<compile_context>
chip_gen: v6e
topology: v6e:2x2x1
jax: 0.10.0
libtpu: 0.0.40
codegen_flags: <defaults>
</compile_context>

<pallas_src>
import functools

import jax
import jax.numpy as jnp
from jax.experimental import pallas as pl
from jax.experimental.pallas import tpu as pltpu

VMEM_SPEC = pl.BlockSpec(memory_space=pltpu.MemorySpace.VMEM)


# ----------------------------------------------------------------------------
# Pallas kernels
# ----------------------------------------------------------------------------
def _conv_mm_kernel(x_ref, w_ref, s_ref, b_ref, o_ref):
    """o = relu((x @ w) * s + b): conv-as-im2col matmul with folded BatchNorm + ReLU."""
    y = jnp.dot(x_ref[...], w_ref[...], preferred_element_type=jnp.float32)
    o_ref[...] = jnp.maximum(y * s_ref[...] + b_ref[...], 0.0)


def conv_matmul_bn_relu(patches, w, scale, shift, *, row_grid=1):
    M, K = patches.shape
    N = w.shape[1]
    patches = patches.astype(jnp.float32)
    w = w.astype(jnp.float32)
    scale = scale.reshape(1, N).astype(jnp.float32)
    shift = shift.reshape(1, N).astype(jnp.float32)
    if row_grid > 1 and M % row_grid == 0 and (M // row_grid) % 8 == 0:
        tm = M // row_grid
        return pl.pallas_call(
            _conv_mm_kernel,
            out_shape=jax.ShapeDtypeStruct((M, N), jnp.float32),
            grid=(row_grid,),
            in_specs=[pl.BlockSpec((tm, K), lambda i: (i, 0)),
                      pl.BlockSpec((K, N), lambda i: (0, 0)),
                      pl.BlockSpec((1, N), lambda i: (0, 0)),
                      pl.BlockSpec((1, N), lambda i: (0, 0))],
            out_specs=pl.BlockSpec((tm, N), lambda i: (i, 0)),
            compiler_params=pltpu.CompilerParams(
                dimension_semantics=("parallel",)),
        )(patches, w, scale, shift)
    return pl.pallas_call(
        _conv_mm_kernel,
        out_shape=jax.ShapeDtypeStruct((M, N), jnp.float32),
        in_specs=[VMEM_SPEC] * 4,
        out_specs=VMEM_SPEC,
    )(patches, w, scale, shift)


def _linear_kernel(x_ref, w_ref, b_ref, o_ref):
    o_ref[...] = jnp.dot(x_ref[...], w_ref[...],
                         preferred_element_type=jnp.float32) + b_ref[...]


def linear(x, w, b):
    M, K = x.shape
    N = w.shape[1]
    return pl.pallas_call(
        _linear_kernel,
        out_shape=jax.ShapeDtypeStruct((M, N), jnp.float32),
        in_specs=[VMEM_SPEC] * 3,
        out_specs=VMEM_SPEC,
    )(x.astype(jnp.float32), w.astype(jnp.float32),
      b.reshape(1, N).astype(jnp.float32))


def _transformer_kernel(x_ref, wqkv_ref, bqkv_ref, wo_ref, bo_ref,
                        g1_ref, be1_ref, w1_ref, b1_ref, w2_ref, b2_ref,
                        g2_ref, be2_ref, out_ref, scores_ref,
                        *, heads, d_k, eps):
    """One batch element per grid step.  QKV, all heads' attention, Wo, residual + LN1,
    the FFN and residual + LN2 all stay resident in VMEM/vregs."""
    x = x_ref[0]                                          # (N, D)
    D = heads * d_k
    scale = 1.0 / float(d_k) ** 0.5

    # Fused QKV projection: one (N, D) @ (D, 3D) matmul.
    qkv = jnp.dot(x, wqkv_ref[...],
                  preferred_element_type=jnp.float32) + bqkv_ref[...]

    # Multi-head attention.  concat(heads) @ Wo == sum_h head_h @ Wo[h*d_k:(h+1)*d_k, :],
    # so the head-concat is folded into per-head partial output projections.
    attn_proj = bo_ref[...]                               # (1, D), broadcasts over rows
    for h in range(heads):
        lo = h * d_k
        q = qkv[:, lo:lo + d_k]                           # (N, d_k) lane slice
        k = qkv[:, D + lo:D + lo + d_k]
        v = qkv[:, 2 * D + lo:2 * D + lo + d_k]
        # q @ k^T via dot_general contracting the last dims (no explicit transpose).
        s = jax.lax.dot_general(q, k, (((1,), (1,)), ((), ())),
                                preferred_element_type=jnp.float32) * scale
        s = s - jnp.max(s, axis=-1, keepdims=True)
        e = jnp.exp(s)
        p = e * pl.reciprocal(jnp.sum(e, axis=-1, keepdims=True), approx=True)
        scores_ref[0, h] = p                              # softmax probs (pre-dropout)
        head_out = jnp.dot(p, v, preferred_element_type=jnp.float32)     # (N, d_k)
        attn_proj = attn_proj + jnp.dot(head_out, wo_ref[lo:lo + d_k, :],
                                        preferred_element_type=jnp.float32)

    # residual + LayerNorm1
    xr = x + attn_proj
    mu = jnp.mean(xr, axis=-1, keepdims=True)
    var = jnp.mean(jnp.square(xr - mu), axis=-1, keepdims=True)
    xr = (xr - mu) * jax.lax.rsqrt(var + eps) * g1_ref[...] + be1_ref[...]

    # FFN (dropout = identity at inference)
    h1 = jnp.dot(xr, w1_ref[...], preferred_element_type=jnp.float32) + b1_ref[...]
    h1 = jnp.maximum(h1, 0.0)
    h1 = jnp.dot(h1, w2_ref[...], preferred_element_type=jnp.float32) + b2_ref[...]

    # residual + LayerNorm2
    xo = xr + h1
    mu2 = jnp.mean(xo, axis=-1, keepdims=True)
    var2 = jnp.mean(jnp.square(xo - mu2), axis=-1, keepdims=True)
    out_ref[0] = (xo - mu2) * jax.lax.rsqrt(var2 + eps) * g2_ref[...] + be2_ref[...]


def transformer_block(xs, p, *, heads, eps=1e-5):
    B, N, D = xs.shape
    d_k = D // heads
    # One concatenated QKV weight -> a single matmul + single DMA.
    wqkv = jnp.concatenate([p["Wq_w"].T, p["Wk_w"].T, p["Wv_w"].T], axis=1)   # (D, 3D)
    bqkv = jnp.concatenate([p["Wq_b"], p["Wk_b"], p["Wv_b"]]).reshape(1, 3 * D)
    args = (xs.astype(jnp.float32),
            wqkv, bqkv,
            p["Wo_w"].T, p["Wo_b"].reshape(1, D),
            p["norm1_g"].reshape(1, D), p["norm1_b"].reshape(1, D),
            p["lin1_w"].T, p["lin1_b"].reshape(1, D),
            p["lin2_w"].T, p["lin2_b"].reshape(1, D),
            p["norm2_g"].reshape(1, D), p["norm2_b"].reshape(1, D))

    def const_spec(a):
        return pl.BlockSpec(a.shape, lambda b: (0,) * a.ndim)

    in_specs = ([pl.BlockSpec((1, N, D), lambda b: (b, 0, 0))]
                + [const_spec(a) for a in args[1:]])

    out, scores = pl.pallas_call(
        functools.partial(_transformer_kernel, heads=heads, d_k=d_k, eps=eps),
        out_shape=(jax.ShapeDtypeStruct((B, N, D), jnp.float32),
                   jax.ShapeDtypeStruct((B, heads, N, N), jnp.float32)),
        grid=(B,),
        in_specs=in_specs,
        out_specs=(pl.BlockSpec((1, N, D), lambda b: (b, 0, 0)),
                   pl.BlockSpec((1, heads, N, N), lambda b: (b, 0, 0, 0))),
        compiler_params=pltpu.CompilerParams(dimension_semantics=("parallel",)),
    )(*args)
    return out, scores


# ----------------------------------------------------------------------------
# Glue (im2col / parameter folding) in plain JAX
# ----------------------------------------------------------------------------
def im2col(x, ksize, stride, pad):
    # x: (B, H, W, C) -> patches (B, Ho, Wo, ksize*ksize*C), patch layout (kh, kw, C).
    B, H, W, C = x.shape
    xp = jnp.pad(x, ((0, 0), (pad, pad), (pad, pad), (0, 0)))
    Ho = (H + 2 * pad - ksize) // stride + 1
    Wo = (W + 2 * pad - ksize) // stride + 1
    cols = []
    for di in range(ksize):
        for dj in range(ksize):
            cols.append(xp[:, di:di + stride * Ho:stride, dj:dj + stride * Wo:stride, :])
    patches = jnp.stack(cols, axis=3)                      # (B, Ho, Wo, k*k, C)
    return patches.reshape(B, Ho, Wo, ksize * ksize * C), Ho, Wo


def conv_weight_to_mat(w):
    # PyTorch conv weight (Cout, Cin, kh, kw) -> (kh*kw*Cin, Cout)
    cout, cin, kh, kw = w.shape
    return jnp.transpose(w, (2, 3, 1, 0)).reshape(kh * kw * cin, cout)


def fold_bn(conv_b, gamma, beta, rmean, rvar, eps=1e-5):
    scale = gamma * jax.lax.rsqrt(rvar + eps)
    shift = (conv_b - rmean) * scale + beta
    return scale, shift


def init_params(seed, dim=64, classes=10):
    key = jax.random.PRNGKey(seed)

    def nxt():
        nonlocal key
        key, sub = jax.random.split(key)
        return sub

    def rnd(shape, s=0.1):
        return (s * jax.random.normal(nxt(), shape)).astype(jnp.float32)

    p = {}
    p["conv1_w"] = rnd((32, 1, 3, 3));   p["conv1_b"] = rnd((32,))
    p["conv2_w"] = rnd((64, 32, 3, 3));  p["conv2_b"] = rnd((64,))
    p["bn1_g"] = 1.0 + rnd((32,));       p["bn1_b"] = rnd((32,))
    p["bn1_rm"] = rnd((32,));            p["bn1_rv"] = 1.0 + jnp.abs(rnd((32,)))
    p["bn2_g"] = 1.0 + rnd((64,));       p["bn2_b"] = rnd((64,))
    p["bn2_rm"] = rnd((64,));            p["bn2_rv"] = 1.0 + jnp.abs(rnd((64,)))
    for name in ("Wq", "Wk", "Wv", "Wo", "lin1", "lin2"):
        p[name + "_w"] = rnd((dim, dim)); p[name + "_b"] = rnd((dim,))
    p["norm1_g"] = 1.0 + rnd((dim,));    p["norm1_b"] = rnd((dim,))
    p["norm2_g"] = 1.0 + rnd((dim,));    p["norm2_b"] = rnd((dim,))
    p["lin3_w"] = rnd((classes, 3136));  p["lin3_b"] = rnd((classes,))
    return p


def mha_forward(x_nchw, params, heads=4):
    B = x_nchw.shape[0]
    dim = 64
    x = jnp.transpose(x_nchw, (0, 2, 3, 1)).astype(jnp.float32)    # NCHW -> NHWC

    # conv1 (3x3, s1, p1) + BN1 + ReLU — im2col matmul with fused BN/ReLU epilogue,
    # row-gridded ("parallel") so v7x's second TensorCore takes half the rows.
    w1 = conv_weight_to_mat(params["conv1_w"])
    s1, b1 = fold_bn(params["conv1_b"], params["bn1_g"], params["bn1_b"],
                     params["bn1_rm"], params["bn1_rv"])
    pat, Ho, Wo = im2col(x, 3, 1, 1)
    y = conv_matmul_bn_relu(pat.reshape(B * Ho * Wo, -1), w1, s1, b1, row_grid=2)
    x = y.reshape(B, Ho, Wo, 32)

    # conv2 (3x3, s2, p1) + BN2 + ReLU
    w2 = conv_weight_to_mat(params["conv2_w"])
    s2, b2 = fold_bn(params["conv2_b"], params["bn2_g"], params["bn2_b"],
                     params["bn2_rm"], params["bn2_rv"])
    pat, Ho, Wo = im2col(x, 3, 2, 1)
    y = conv_matmul_bn_relu(pat.reshape(B * Ho * Wo, -1), w2, s2, b2)
    x = y.reshape(B, Ho, Wo, 64)

    # 2x2 max pool, fully vectorized -> sequence (B, 49, 64)
    x = x.reshape(B, Ho // 2, 2, Wo // 2, 2, 64).max(axis=(2, 4))
    xs = x.reshape(B, (Ho // 2) * (Wo // 2), dim)

    # Fused transformer block: QKV + MHA + Wo + LN1 + FFN + LN2 in ONE pallas_call.
    xr, scores = transformer_block(xs, params, heads=heads)

    # classifier: (B, 49*64=3136) @ (3136, classes) + bias
    logits = linear(xr.reshape(B, -1), params["lin3_w"].T, params["lin3_b"])
    return logits, scores


if __name__ == "__main__":
    B, heads, classes = 2, 4, 10
    key = jax.random.PRNGKey(0)
    x = jax.random.normal(key, (B, 1, 28, 28), dtype=jnp.float32)   # NCHW like PyTorch
    params = init_params(seed=0, dim=64, classes=classes)

    logits, scores = jax.jit(functools.partial(mha_forward, heads=heads))(x, params)
    jax.block_until_ready((logits, scores))

    assert logits.shape == (B, classes)
    assert scores.shape == (B, heads, 49, 49)
    print("KERNEL_OK")
</pallas_src>

<mosaic_0001>
module attributes {stable_mosaic.version = 11 : i64} {
  func.func @_conv_mm_kernel(%arg0: i32, %arg1: memref<784x9xf32, #tpu.memory_space<vmem>>, %arg2: memref<9x32xf32, #tpu.memory_space<vmem>>, %arg3: memref<1x32xf32, #tpu.memory_space<vmem>>, %arg4: memref<1x32xf32, #tpu.memory_space<vmem>>, %arg5: memref<784x32xf32, #tpu.memory_space<vmem>>) attributes {dimension_semantics = [#tpu.dimension_semantics<parallel>], iteration_bounds = array<i64: 2>, scalar_prefetch = 0 : i64, scratch_operands = 0 : i64, tpu.core_type = #tpu.core_type<tc>, window_params = [{transform_indices = @transform_0, window_bounds = array<i64: 784, 9>}, {pipeline_mode = #tpu.pipeline_mode<synchronous>, transform_indices = @transform_1, window_bounds = array<i64: 9, 32>}, {pipeline_mode = #tpu.pipeline_mode<synchronous>, transform_indices = @transform_2, window_bounds = array<i64: 1, 32>}, {pipeline_mode = #tpu.pipeline_mode<synchronous>, transform_indices = @transform_3, window_bounds = array<i64: 1, 32>}, {transform_indices = @transform_4, window_bounds = array<i64: 784, 32>}]} {
    %c0 = arith.constant 0 : index
    %c0_0 = arith.constant 0 : index
    %0 = vector.load %arg1[%c0, %c0_0] : memref<784x9xf32, #tpu.memory_space<vmem>>, vector<784x9xf32>
    %c0_1 = arith.constant 0 : index
    %c0_2 = arith.constant 0 : index
    %1 = vector.load %arg2[%c0_1, %c0_2] : memref<9x32xf32, #tpu.memory_space<vmem>>, vector<9x32xf32>
    %cst = arith.constant dense<0.000000e+00> : vector<784x32xf32>
    %2 = tpu.matmul %0, %1, %cst {dimension_numbers = #tpu.dot_dimension_numbers<[1], [0], [0], [1], [0, 0, 1, 1], [], []>} : vector<784x9xf32>, vector<9x32xf32>, vector<784x32xf32> -> vector<784x32xf32>
    %c0_3 = arith.constant 0 : index
    %c0_4 = arith.constant 0 : index
    %3 = vector.load %arg3[%c0_3, %c0_4] : memref<1x32xf32, #tpu.memory_space<vmem>>, vector<1x32xf32>
    %4 = vector.broadcast %3 : vector<1x32xf32> to vector<784x32xf32>
    %5 = arith.mulf %2, %4 : vector<784x32xf32>
    %c0_5 = arith.constant 0 : index
    %c0_6 = arith.constant 0 : index
    %6 = vector.load %arg4[%c0_5, %c0_6] : memref<1x32xf32, #tpu.memory_space<vmem>>, vector<1x32xf32>
    %7 = vector.broadcast %6 : vector<1x32xf32> to vector<784x32xf32>
    %8 = arith.addf %5, %7 : vector<784x32xf32>
    %cst_7 = arith.constant 0.000000e+00 : f32
    %9 = vector.broadcast %cst_7 : f32 to vector<784x32xf32>
    %10 = arith.maximumf %8, %9 : vector<784x32xf32>
    %c0_8 = arith.constant 0 : index
    %c0_9 = arith.constant 0 : index
    %11 = vector.load %arg5[%c0_8, %c0_9] : memref<784x32xf32, #tpu.memory_space<vmem>>, vector<784x32xf32>
    tpu.vector_store %arg5[%c0_8, %c0_9], %10 {strides = array<i32>} : memref<784x32xf32, #tpu.memory_space<vmem>>, vector<784x32xf32>,
    return
  }
  func.func @transform_0(%arg0: i32) -> (i32, i32) {
    %c0_i32 = arith.constant 0 : i32
    %c0_i32_0 = arith.constant 0 : i32
    return %arg0, %c0_i32 : i32, i32
  }
  func.func @transform_1(%arg0: i32) -> (i32, i32) {
    %c0_i32 = arith.constant 0 : i32
    %c0_i32_0 = arith.constant 0 : i32
    %c0_i32_1 = arith.constant 0 : i32
    return %c0_i32, %c0_i32_0 : i32, i32
  }
  func.func @transform_2(%arg0: i32) -> (i32, i32) {
    %c0_i32 = arith.constant 0 : i32
    %c0_i32_0 = arith.constant 0 : i32
    %c0_i32_1 = arith.constant 0 : i32
    return %c0_i32, %c0_i32_0 : i32, i32
  }
  func.func @transform_3(%arg0: i32) -> (i32, i32) {
    %c0_i32 = arith.constant 0 : i32
    %c0_i32_0 = arith.constant 0 : i32
    %c0_i32_1 = arith.constant 0 : i32
    return %c0_i32, %c0_i32_0 : i32, i32
  }
  func.func @transform_4(%arg0: i32) -> (i32, i32) {
    %c0_i32 = arith.constant 0 : i32
    %c0_i32_0 = arith.constant 0 : i32
    return %arg0, %c0_i32 : i32, i32
  }
}

module attributes {stable_mosaic.version = 11 : i64} {
  func.func @_conv_mm_kernel(%arg0: memref<392x288xf32, #tpu.memory_space<vmem>>, %arg1: memref<288x64xf32, #tpu.memory_space<vmem>>, %arg2: memref<1x64xf32, #tpu.memory_space<vmem>>, %arg3: memref<1x64xf32, #tpu.memory_space<vmem>>, %arg4: memref<392x64xf32, #tpu.memory_space<vmem>>) attributes {dimension_semantics = [], scalar_prefetch = 0 : i64, scratch_operands = 0 : i64, tpu.core_type = #tpu.core_type<tc>} {
    %c0 = arith.constant 0 : index
    %c0_0 = arith.constant 0 : index
    %0 = vector.load %arg0[%c0, %c0_0] : memref<392x288xf32, #tpu.memory_space<vmem>>, vector<392x288xf32>
    %c0_1 = arith.constant 0 : index
    %c0_2 = arith.constant 0 : index
    %1 = vector.load %arg1[%c0_1, %c0_2] : memref<288x64xf32, #tpu.memory_space<vmem>>, vector<288x64xf32>
    %cst = arith.constant dense<0.000000e+00> : vector<392x64xf32>
    %2 = tpu.matmul %0, %1, %cst {dimension_numbers = #tpu.dot_dimension_numbers<[1], [0], [0], [1], [0, 0, 1, 1], [], []>} : vector<392x288xf32>, vector<288x64xf32>, vector<392x64xf32> -> vector<392x64xf32>
    %c0_3 = arith.constant 0 : index
    %c0_4 = arith.constant 0 : index
    %3 = vector.load %arg2[%c0_3, %c0_4] : memref<1x64xf32, #tpu.memory_space<vmem>>, vector<1x64xf32>
    %4 = vector.broadcast %3 : vector<1x64xf32> to vector<392x64xf32>
    %5 = arith.mulf %2, %4 : vector<392x64xf32>
    %c0_5 = arith.constant 0 : index
    %c0_6 = arith.constant 0 : index
    %6 = vector.load %arg3[%c0_5, %c0_6] : memref<1x64xf32, #tpu.memory_space<vmem>>, vector<1x64xf32>
    %7 = vector.broadcast %6 : vector<1x64xf32> to vector<392x64xf32>
    %8 = arith.addf %5, %7 : vector<392x64xf32>
    %cst_7 = arith.constant 0.000000e+00 : f32
    %9 = vector.broadcast %cst_7 : f32 to vector<392x64xf32>
    %10 = arith.maximumf %8, %9 : vector<392x64xf32>
    %c0_8 = arith.constant 0 : index
    %c0_9 = arith.constant 0 : index
    %11 = vector.load %arg4[%c0_8, %c0_9] : memref<392x64xf32, #tpu.memory_space<vmem>>, vector<392x64xf32>
    tpu.vector_store %arg4[%c0_8, %c0_9], %10 {strides = array<i32>} : memref<392x64xf32, #tpu.memory_space<vmem>>, vector<392x64xf32>,
    return
  }
}

module attributes {stable_mosaic.version = 11 : i64} {
  func.func @_linear_kernel(%arg0: memref<2x3136xf32, #tpu.memory_space<vmem>>, %arg1: memref<3136x10xf32, #tpu.memory_space<vmem>>, %arg2: memref<1x10xf32, #tpu.memory_space<vmem>>, %arg3: memref<2x10xf32, #tpu.memory_space<vmem>>) attributes {dimension_semantics = [], scalar_prefetch = 0 : i64, scratch_operands = 0 : i64, tpu.core_type = #tpu.core_type<tc>} {
    %c0 = arith.constant 0 : index
    %c0_0 = arith.constant 0 : index
    %0 = vector.load %arg0[%c0, %c0_0] : memref<2x3136xf32, #tpu.memory_space<vmem>>, vector<2x3136xf32>
    %c0_1 = arith.constant 0 : index
    %c0_2 = arith.constant 0 : index
    %1 = vector.load %arg1[%c0_1, %c0_2] : memref<3136x10xf32, #tpu.memory_space<vmem>>, vector<3136x10xf32>
    %cst = arith.constant dense<0.000000e+00> : vector<2x10xf32>
    %2 = tpu.matmul %0, %1, %cst {dimension_numbers = #tpu.dot_dimension_numbers<[1], [0], [0], [1], [0, 0, 1, 1], [], []>} : vector<2x3136xf32>, vector<3136x10xf32>, vector<2x10xf32> -> vector<2x10xf32>
    %c0_3 = arith.constant 0 : index
    %c0_4 = arith.constant 0 : index
    %3 = vector.load %arg2[%c0_3, %c0_4] : memref<1x10xf32, #tpu.memory_space<vmem>>, vector<1x10xf32>
    %4 = vector.broadcast %3 : vector<1x10xf32> to vector<2x10xf32>
    %5 = arith.addf %2, %4 : vector<2x10xf32>
    %c0_5 = arith.constant 0 : index
    %c0_6 = arith.constant 0 : index
    %6 = vector.load %arg3[%c0_5, %c0_6] : memref<2x10xf32, #tpu.memory_space<vmem>>, vector<2x10xf32>
    tpu.vector_store %arg3[%c0_5, %c0_6], %5 {strides = array<i32>} : memref<2x10xf32, #tpu.memory_space<vmem>>, vector<2x10xf32>,
    return
  }
}

module attributes {stable_mosaic.version = 11 : i64} {
  func.func @_transformer_kernel(%arg0: i32, %arg1: memref<1x49x64xf32, #tpu.memory_space<vmem>>, %arg2: memref<64x192xf32, #tpu.memory_space<vmem>>, %arg3: memref<1x192xf32, #tpu.memory_space<vmem>>, %arg4: memref<64x64xf32, #tpu.memory_space<vmem>>, %arg5: memref<1x64xf32, #tpu.memory_space<vmem>>, %arg6: memref<1x64xf32, #tpu.memory_space<vmem>>, %arg7: memref<1x64xf32, #tpu.memory_space<vmem>>, %arg8: memref<64x64xf32, #tpu.memory_space<vmem>>, %arg9: memref<1x64xf32, #tpu.memory_space<vmem>>, %arg10: memref<64x64xf32, #tpu.memory_space<vmem>>, %arg11: memref<1x64xf32, #tpu.memory_space<vmem>>, %arg12: memref<1x64xf32, #tpu.memory_space<vmem>>, %arg13: memref<1x64xf32, #tpu.memory_space<vmem>>, %arg14: memref<1x49x64xf32, #tpu.memory_space<vmem>>, %arg15: memref<1x4x49x49xf32, #tpu.memory_space<vmem>>) attributes {dimension_semantics = [#tpu.dimension_semantics<parallel>], iteration_bounds = array<i64: 2>, scalar_prefetch = 0 : i64, scratch_operands = 0 : i64, tpu.core_type = #tpu.core_type<tc>, window_params = [{transform_indices = @transform_0, window_bounds = array<i64: 1, 49, 64>}, {pipeline_mode = #tpu.pipeline_mode<synchronous>, transform_indices = @transform_1, window_bounds = array<i64: 64, 192>}, {pipeline_mode = #tpu.pipeline_mode<synchronous>, transform_indices = @transform_2, window_bounds = array<i64: 1, 192>}, {pipeline_mode = #tpu.pipeline_mode<synchronous>, transform_indices = @transform_3, window_bounds = array<i64: 64, 64>}, {pipeline_mode = #tpu.pipeline_mode<synchronous>, transform_indices = @transform_4, window_bounds = array<i64: 1, 64>}, {pipeline_mode = #tpu.pipeline_mode<synchronous>, transform_indices = @transform_5, window_bounds = array<i64: 1, 64>}, {pipeline_mode = #tpu.pipeline_mode<synchronous>, transform_indices = @transform_6, window_bounds = array<i64: 1, 64>}, {pipeline_mode = #tpu.pipeline_mode<synchronous>, transform_indices = @transform_7, window_bounds = array<i64: 64, 64>}, {pipeline_mode = #tpu.pipeline_mode<synchronous>, transform_indices = @transform_8, window_bounds = array<i64: 1, 64>}, {pipeline_mode = #tpu.pipeline_mode<synchronous>, transform_indices = @transform_9, window_bounds = array<i64: 64, 64>}, {pipeline_mode = #tpu.pipeline_mode<synchronous>, transform_indices = @transform_10, window_bounds = array<i64: 1, 64>}, {pipeline_mode = #tpu.pipeline_mode<synchronous>, transform_indices = @transform_11, window_bounds = array<i64: 1, 64>}, {pipeline_mode = #tpu.pipeline_mode<synchronous>, transform_indices = @transform_12, window_bounds = array<i64: 1, 64>}, {transform_indices = @transform_13, window_bounds = array<i64: 1, 49, 64>}, {transform_indices = @transform_14, window_bounds = array<i64: 1, 4, 49, 49>}]} {
    %c0 = arith.constant 0 : index
    %c0_0 = arith.constant 0 : index
    %c0_1 = arith.constant 0 : index
    %0 = vector.load %arg1[%c0, %c0_0, %c0_1] : memref<1x49x64xf32, #tpu.memory_space<vmem>>, vector<1x49x64xf32>
    %1 = vector.shape_cast %0 : vector<1x49x64xf32> to vector<49x64xf32>
    %c0_2 = arith.constant 0 : index
    %c0_3 = arith.constant 0 : index
    %2 = vector.load %arg2[%c0_2, %c0_3] : memref<64x192xf32, #tpu.memory_space<vmem>>, vector<64x192xf32>
    %cst = arith.constant dense<0.000000e+00> : vector<49x192xf32>
    %3 = tpu.matmul %1, %2, %cst {dimension_numbers = #tpu.dot_dimension_numbers<[1], [0], [0], [1], [0, 0, 1, 1], [], []>} : vector<49x64xf32>, vector<64x192xf32>, vector<49x192xf32> -> vector<49x192xf32>
    %c0_4 = arith.constant 0 : index
    %c0_5 = arith.constant 0 : index
    %4 = vector.load %arg3[%c0_4, %c0_5] : memref<1x192xf32, #tpu.memory_space<vmem>>, vector<1x192xf32>
    %5 = vector.broadcast %4 : vector<1x192xf32> to vector<49x192xf32>
    %6 = arith.addf %3, %5 : vector<49x192xf32>
    %c0_6 = arith.constant 0 : index
    %c0_7 = arith.constant 0 : index
    %7 = vector.load %arg5[%c0_6, %c0_7] : memref<1x64xf32, #tpu.memory_space<vmem>>, vector<1x64xf32>
    %8 = vector.extract_strided_slice %6 {offsets = [0, 0], sizes = [49, 16], strides = [1, 1]} : vector<49x192xf32> to vector<49x16xf32>
    %9 = vector.extract_strided_slice %6 {offsets = [0, 64], sizes = [49, 16], strides = [1, 1]} : vector<49x192xf32> to vector<49x16xf32>
    %10 = vector.extract_strided_slice %6 {offsets = [0, 128], sizes = [49, 16], strides = [1, 1]} : vector<49x192xf32> to vector<49x16xf32>
    %cst_8 = arith.constant dense<0.000000e+00> : vector<49x49xf32>
    %11 = tpu.matmul %8, %9, %cst_8 {dimension_numbers = #tpu.dot_dimension_numbers<[1], [1], [0], [0], [0, 0, 1, 0], [], []>} : vector<49x16xf32>, vector<49x16xf32>, vector<49x49xf32> -> vector<49x49xf32>
    %cst_9 = arith.constant 2.500000e-01 : f32
    %12 = vector.broadcast %cst_9 : f32 to vector<49x49xf32>
    %13 = arith.mulf %11, %12 : vector<49x49xf32>
    %cst_10 = arith.constant dense<0xFF800000> : vector<49xf32>
    %14 = vector.multi_reduction <maximumf>, %13, %cst_10 [1] : vector<49x49xf32> to vector<49xf32>
    %15 = vector.shape_cast %14 : vector<49xf32> to vector<49x1xf32>
    %16 = vector.broadcast %15 : vector<49x1xf32> to vector<49x49xf32>
    %17 = arith.subf %13, %16 : vector<49x49xf32>
    %18 = math.exp %17 : vector<49x49xf32>
    %cst_11 = arith.constant dense<0.000000e+00> : vector<49xf32>
    %19 = vector.multi_reduction <add>, %18, %cst_11 [1] : vector<49x49xf32> to vector<49xf32>
    %20 = vector.shape_cast %19 : vector<49xf32> to vector<49x1xf32>
    %21 = tpu.reciprocal %20 {approx = true} : vector<49x1xf32> -> vector<49x1xf32>
    %22 = vector.broadcast %21 : vector<49x1xf32> to vector<49x49xf32>
    %23 = arith.mulf %18, %22 : vector<49x49xf32>
    %c0_12 = arith.constant 0 : index
    %c0_13 = arith.constant 0 : index
    %c0_14 = arith.constant 0 : index
    %c0_15 = arith.constant 0 : index
    %24 = vector.load %arg15[%c0_12, %c0_13, %c0_14, %c0_15] : memref<1x4x49x49xf32, #tpu.memory_space<vmem>>, vector<1x1x49x49xf32>
    %25 = vector.shape_cast %24 : vector<1x1x49x49xf32> to vector<49x49xf32>
    %26 = vector.shape_cast %23 : vector<49x49xf32> to vector<1x1x49x49xf32>
    tpu.vector_store %arg15[%c0_12, %c0_13, %c0_14, %c0_15], %26 {strides = array<i32>} : memref<1x4x49x49xf32, #tpu.memory_space<vmem>>, vector<1x1x49x49xf32>,
    %cst_16 = arith.constant dense<0.000000e+00> : vector<49x16xf32>
    %27 = tpu.matmul %23, %10, %cst_16 {dimension_numbers = #tpu.dot_dimension_numbers<[1], [0], [0], [1], [0, 0, 1, 1], [], []>} : vector<49x49xf32>, vector<49x16xf32>, vector<49x16xf32> -> vector<49x16xf32>
    %c0_17 = arith.constant 0 : index
    %c0_18 = arith.constant 0 : index
    %28 = vector.load %arg4[%c0_17, %c0_18] : memref<64x64xf32, #tpu.memory_space<vmem>>, vector<16x64xf32>
    %cst_19 = arith.constant dense<0.000000e+00> : vector<49x64xf32>
    %29 = tpu.matmul %27, %28, %cst_19 {dimension_numbers = #tpu.dot_dimension_numbers<[1], [0], [0], [1], [0, 0, 1, 1], [], []>} : vector<49x16xf32>, vector<16x64xf32>, vector<49x64xf32> -> vector<49x64xf32>
    %30 = vector.broadcast %7 : vector<1x64xf32> to vector<49x64xf32>
    %31 = arith.addf %30, %29 : vector<49x64xf32>
    %32 = vector.extract_strided_slice %6 {offsets = [0, 16], sizes = [49, 16], strides = [1, 1]} : vector<49x192xf32> to vector<49x16xf32>
    %33 = vector.extract_strided_slice %6 {offsets = [0, 80], sizes = [49, 16], strides = [1, 1]} : vector<49x192xf32> to vector<49x16xf32>
    %34 = vector.extract_strided_slice %6 {offsets = [0, 144], sizes = [49, 16], strides = [1, 1]} : vector<49x192xf32> to vector<49x16xf32>
    %cst_20 = arith.constant dense<0.000000e+00> : vector<49x49xf32>
    %35 = tpu.matmul %32, %33, %cst_20 {dimension_numbers = #tpu.dot_dimension_numbers<[1], [1], [0], [0], [0, 0, 1, 0], [], []>} : vector<49x16xf32>, vector<49x16xf32>, vector<49x49xf32> -> vector<49x49xf32>
    %cst_21 = arith.constant 2.500000e-01 : f32
    %36 = vector.broadcast %cst_21 : f32 to vector<49x49xf32>
    %37 = arith.mulf %35, %36 : vector<49x49xf32>
    %cst_22 = arith.constant dense<0xFF800000> : vector<49xf32>
    %38 = vector.multi_reduction <maximumf>, %37, %cst_22 [1] : vector<49x49xf32> to vector<49xf32>
    %39 = vector.shape_cast %38 : vector<49xf32> to vector<49x1xf32>
    %40 = vector.broadcast %39 : vector<49x1xf32> to vector<49x49xf32>
    %41 = arith.subf %37, %40 : vector<49x49xf32>
    %42 = math.exp %41 : vector<49x49xf32>
    %cst_23 = arith.constant dense<0.000000e+00> : vector<49xf32>
    %43 = vector.multi_reduction <add>, %42, %cst_23 [1] : vector<49x49xf32> to vector<49xf32>
    %44 = vector.shape_cast %43 : vector<49xf32> to vector<49x1xf32>
    %45 = tpu.reciprocal %44 {approx = true} : vector<49x1xf32> -> vector<49x1xf32>
    %46 = vector.broadcast %45 : vector<49x1xf32> to vector<49x49xf32>
    %47 = arith.mulf %42, %46 : vector<49x49xf32>
    %c0_24 = arith.constant 0 : index
    %c1 = arith.constant 1 : index
    %c0_25 = arith.constant 0 : index
    %c0_26 = arith.constant 0 : index
    %48 = vector.load %arg15[%c0_24, %c1, %c0_25, %c0_26] : memref<1x4x49x49xf32, #tpu.memory_space<vmem>>, vector<1x1x49x49xf32>
    %49 = vector.shape_cast %48 : vector<1x1x49x49xf32> to vector<49x49xf32>
    %50 = vector.shape_cast %47 : vector<49x49xf32> to vector<1x1x49x49xf32>
    tpu.vector_store %arg15[%c0_24, %c1, %c0_25, %c0_26], %50 {strides = array<i32>} : memref<1x4x49x49xf32, #tpu.memory_space<vmem>>, vector<1x1x49x49xf32>,
    %cst_27 = arith.constant dense<0.000000e+00> : vector<49x16xf32>
    %51 = tpu.matmul %47, %34, %cst_27 {dimension_numbers = #tpu.dot_dimension_numbers<[1], [0], [0], [1], [0, 0, 1, 1], [], []>} : vector<49x49xf32>, vector<49x16xf32>, vector<49x16xf32> -> vector<49x16xf32>
    %c16 = arith.constant 16 : index
    %c0_28 = arith.constant 0 : index
    %52 = vector.load %arg4[%c16, %c0_28] : memref<64x64xf32, #tpu.memory_space<vmem>>, vector<16x64xf32>
    %cst_29 = arith.constant dense<0.000000e+00> : vector<49x64xf32>
    %53 = tpu.matmul %51, %52, %cst_29 {dimension_numbers = #tpu.dot_dimension_numbers<[1], [0], [0], [1], [0, 0, 1, 1], [], []>} : vector<49x16xf32>, vector<16x64xf32>, vector<49x64xf32> -> vector<49x64xf32>
    %54 = arith.addf %31, %53 : vector<49x64xf32>
    %55 = vector.extract_strided_slice %6 {offsets = [0, 32], sizes = [49, 16], strides = [1, 1]} : vector<49x192xf32> to vector<49x16xf32>
    %56 = vector.extract_strided_slice %6 {offsets = [0, 96], sizes = [49, 16], strides = [1, 1]} : vector<49x192xf32> to vector<49x16xf32>
    %57 = vector.extract_strided_slice %6 {offsets = [0, 160], sizes = [49, 16], strides = [1, 1]} : vector<49x192xf32> to vector<49x16xf32>
    %cst_30 = arith.constant dense<0.000000e+00> : vector<49x49xf32>
    %58 = tpu.matmul %55, %56, %cst_30 {dimension_numbers = #tpu.dot_dimension_numbers<[1], [1], [0], [0], [0, 0, 1, 0], [], []>} : vector<49x16xf32>, vector<49x16xf32>, vector<49x49xf32> -> vector<49x49xf32>
    %cst_31 = arith.constant 2.500000e-01 : f32
    %59 = vector.broadcast %cst_31 : f32 to vector<49x49xf32>
    %60 = arith.mulf %58, %59 : vector<49x49xf32>
    %cst_32 = arith.constant dense<0xFF800000> : vector<49xf32>
    %61 = vector.multi_reduction <maximumf>, %60, %cst_32 [1] : vector<49x49xf32> to vector<49xf32>
    %62 = vector.shape_cast %61 : vector<49xf32> to vector<49x1xf32>
    %63 = vector.broadcast %62 : vector<49x1xf32> to vector<49x49xf32>
    %64 = arith.subf %60, %63 : vector<49x49xf32>
    %65 = math.exp %64 : vector<49x49xf32>
    %cst_33 = arith.constant dense<0.000000e+00> : vector<49xf32>
    %66 = vector.multi_reduction <add>, %65, %cst_33 [1] : vector<49x49xf32> to vector<49xf32>
    %67 = vector.shape_cast %66 : vector<49xf32> to vector<49x1xf32>
    %68 = tpu.reciprocal %67 {approx = true} : vector<49x1xf32> -> vector<49x1xf32>
    %69 = vector.broadcast %68 : vector<49x1xf32> to vector<49x49xf32>
    %70 = arith.mulf %65, %69 : vector<49x49xf32>
    %c0_34 = arith.constant 0 : index
    %c2 = arith.constant 2 : index
    %c0_35 = arith.constant 0 : index
    %c0_36 = arith.constant 0 : index
    %71 = vector.load %arg15[%c0_34, %c2, %c0_35, %c0_36] : memref<1x4x49x49xf32, #tpu.memory_space<vmem>>, vector<1x1x49x49xf32>
    %72 = vector.shape_cast %71 : vector<1x1x49x49xf32> to vector<49x49xf32>
    %73 = vector.shape_cast %70 : vector<49x49xf32> to vector<1x1x49x49xf32>
    tpu.vector_store %arg15[%c0_34, %c2, %c0_35, %c0_36], %73 {strides = array<i32>} : memref<1x4x49x49xf32, #tpu.memory_space<vmem>>, vector<1x1x49x49xf32>,
    %cst_37 = arith.constant dense<0.000000e+00> : vector<49x16xf32>
    %74 = tpu.matmul %70, %57, %cst_37 {dimension_numbers = #tpu.dot_dimension_numbers<[1], [0], [0], [1], [0, 0, 1, 1], [], []>} : vector<49x49xf32>, vector<49x16xf32>, vector<49x16xf32> -> vector<49x16xf32>
    %c32 = arith.constant 32 : index
    %c0_38 = arith.constant 0 : index
    %75 = vector.load %arg4[%c32, %c0_38] : memref<64x64xf32, #tpu.memory_space<vmem>>, vector<16x64xf32>
    %cst_39 = arith.constant dense<0.000000e+00> : vector<49x64xf32>
    %76 = tpu.matmul %74, %75, %cst_39 {dimension_numbers = #tpu.dot_dimension_numbers<[1], [0], [0], [1], [0, 0, 1, 1], [], []>} : vector<49x16xf32>, vector<16x64xf32>, vector<49x64xf32> -> vector<49x64xf32>
    %77 = arith.addf %54, %76 : vector<49x64xf32>
    %78 = vector.extract_strided_slice %6 {offsets = [0, 48], sizes = [49, 16], strides = [1, 1]} : vector<49x192xf32> to vector<49x16xf32>
    %79 = vector.extract_strided_slice %6 {offsets = [0, 112], sizes = [49, 16], strides = [1, 1]} : vector<49x192xf32> to vector<49x16xf32>
    %80 = vector.extract_strided_slice %6 {offsets = [0, 176], sizes = [49, 16], strides = [1, 1]} : vector<49x192xf32> to vector<49x16xf32>
    %cst_40 = arith.constant dense<0.000000e+00> : vector<49x49xf32>
    %81 = tpu.matmul %78, %79, %cst_40 {dimension_numbers = #tpu.dot_dimension_numbers<[1], [1], [0], [0], [0, 0, 1, 0], [], []>} : vector<49x16xf32>, vector<49x16xf32>, vector<49x49xf32> -> vector<49x49xf32>
    %cst_41 = arith.constant 2.500000e-01 : f32
    %82 = vector.broadcast %cst_41 : f32 to vector<49x49xf32>
    %83 = arith.mulf %81, %82 : vector<49x49xf32>
    %cst_42 = arith.constant dense<0xFF800000> : vector<49xf32>
    %84 = vector.multi_reduction <maximumf>, %83, %cst_42 [1] : vector<49x49xf32> to vector<49xf32>
    %85 = vector.shape_cast %84 : vector<49xf32> to vector<49x1xf32>
    %86 = vector.broadcast %85 : vector<49x1xf32> to vector<49x49xf32>
    %87 = arith.subf %83, %86 : vector<49x49xf32>
    %88 = math.exp %87 : vector<49x49xf32>
    %cst_43 = arith.constant dense<0.000000e+00> : vector<49xf32>
    %89 = vector.multi_reduction <add>, %88, %cst_43 [1] : vector<49x49xf32> to vector<49xf32>
    %90 = vector.shape_cast %89 : vector<49xf32> to vector<49x1xf32>
    %91 = tpu.reciprocal %90 {approx = true} : vector<49x1xf32> -> vector<49x1xf32>
    %92 = vector.broadcast %91 : vector<49x1xf32> to vector<49x49xf32>
    %93 = arith.mulf %88, %92 : vector<49x49xf32>
    %c0_44 = arith.constant 0 : index
    %c3 = arith.constant 3 : index
    %c0_45 = arith.constant 0 : index
    %c0_46 = arith.constant 0 : index
    %94 = vector.load %arg15[%c0_44, %c3, %c0_45, %c0_46] : memref<1x4x49x49xf32, #tpu.memory_space<vmem>>, vector<1x1x49x49xf32>
    %95 = vector.shape_cast %94 : vector<1x1x49x49xf32> to vector<49x49xf32>
    %96 = vector.shape_cast %93 : vector<49x49xf32> to vector<1x1x49x49xf32>
    tpu.vector_store %arg15[%c0_44, %c3, %c0_45, %c0_46], %96 {strides = array<i32>} : memref<1x4x49x49xf32, #tpu.memory_space<vmem>>, vector<1x1x49x49xf32>,
    %cst_47 = arith.constant dense<0.000000e+00> : vector<49x16xf32>
    %97 = tpu.matmul %93, %80, %cst_47 {dimension_numbers = #tpu.dot_dimension_numbers<[1], [0], [0], [1], [0, 0, 1, 1], [], []>} : vector<49x49xf32>, vector<49x16xf32>, vector<49x16xf32> -> vector<49x16xf32>
    %c48 = arith.constant 48 : index
    %c0_48 = arith.constant 0 : index
    %98 = vector.load %arg4[%c48, %c0_48] : memref<64x64xf32, #tpu.memory_space<vmem>>, vector<16x64xf32>
    %cst_49 = arith.constant dense<0.000000e+00> : vector<49x64xf32>
    %99 = tpu.matmul %97, %98, %cst_49 {dimension_numbers = #tpu.dot_dimension_numbers<[1], [0], [0], [1], [0, 0, 1, 1], [], []>} : vector<49x16xf32>, vector<16x64xf32>, vector<49x64xf32> -> vector<49x64xf32>
    %100 = arith.addf %77, %99 : vector<49x64xf32>
    %101 = arith.addf %1, %100 : vector<49x64xf32>
    %cst_50 = arith.constant dense<0.000000e+00> : vector<49xf32>
    %102 = vector.multi_reduction <add>, %101, %cst_50 [1] : vector<49x64xf32> to vector<49xf32>
    %103 = vector.shape_cast %102 : vector<49xf32> to vector<49x1xf32>
    %cst_51 = arith.constant 6.400000e+01 : f32
    %104 = vector.broadcast %cst_51 : f32 to vector<49x1xf32>
    %105 = arith.divf %103, %104 : vector<49x1xf32>
    %106 = vector.broadcast %105 : vector<49x1xf32> to vector<49x64xf32>
    %107 = arith.subf %101, %106 : vector<49x64xf32>
    %108 = arith.mulf %107, %107 : vector<49x64xf32>
    %cst_52 = arith.constant dense<0.000000e+00> : vector<49xf32>
    %109 = vector.multi_reduction <add>, %108, %cst_52 [1] : vector<49x64xf32> to vector<49xf32>
    %110 = vector.shape_cast %109 : vector<49xf32> to vector<49x1xf32>
    %cst_53 = arith.constant 6.400000e+01 : f32
    %111 = vector.broadcast %cst_53 : f32 to vector<49x1xf32>
    %112 = arith.divf %110, %111 : vector<49x1xf32>
    %113 = vector.broadcast %105 : vector<49x1xf32> to vector<49x64xf32>
    %114 = arith.subf %101, %113 : vector<49x64xf32>
    %cst_54 = arith.constant 9.99999974E-6 : f32
    %115 = vector.broadcast %cst_54 : f32 to vector<49x1xf32>
    %116 = arith.addf %112, %115 : vector<49x1xf32>
    %117 = math.rsqrt %116 : vector<49x1xf32>
    %118 = vector.broadcast %117 : vector<49x1xf32> to vector<49x64xf32>
    %119 = arith.mulf %114, %118 : vector<49x64xf32>
    %c0_55 = arith.constant 0 : index
    %c0_56 = arith.constant 0 : index
    %120 = vector.load %arg6[%c0_55, %c0_56] : memref<1x64xf32, #tpu.memory_space<vmem>>, vector<1x64xf32>
    %121 = vector.broadcast %120 : vector<1x64xf32> to vector<49x64xf32>
    %122 = arith.mulf %119, %121 : vector<49x64xf32>
    %c0_57 = arith.constant 0 : index
    %c0_58 = arith.constant 0 : index
    %123 = vector.load %arg7[%c0_57, %c0_58] : memref<1x64xf32, #tpu.memory_space<vmem>>, vector<1x64xf32>
    %124 = vector.broadcast %123 : vector<1x64xf32> to vector<49x64xf32>
    %125 = arith.addf %122, %124 : vector<49x64xf32>
    %c0_59 = arith.constant 0 : index
    %c0_60 = arith.constant 0 : index
    %126 = vector.load %arg8[%c0_59, %c0_60] : memref<64x64xf32, #tpu.memory_space<vmem>>, vector<64x64xf32>
    %cst_61 = arith.constant dense<0.000000e+00> : vector<49x64xf32>
    %127 = tpu.matmul %125, %126, %cst_61 {dimension_numbers = #tpu.dot_dimension_numbers<[1], [0], [0], [1], [0, 0, 1, 1], [], []>} : vector<49x64xf32>, vector<64x64xf32>, vector<49x64xf32> -> vector<49x64xf32>
    %c0_62 = arith.constant 0 : index
    %c0_63 = arith.constant 0 : index
    %128 = vector.load %arg9[%c0_62, %c0_63] : memref<1x64xf32, #tpu.memory_space<vmem>>, vector<1x64xf32>
    %129 = vector.broadcast %128 : vector<1x64xf32> to vector<49x64xf32>
    %130 = arith.addf %127, %129 : vector<49x64xf32>
    %cst_64 = arith.constant 0.000000e+00 : f32
    %131 = vector.broadcast %cst_64 : f32 to vector<49x64xf32>
    %132 = arith.maximumf %130, %131 : vector<49x64xf32>
    %c0_65 = arith.constant 0 : index
    %c0_66 = arith.constant 0 : index
    %133 = vector.load %arg10[%c0_65, %c0_66] : memref<64x64xf32, #tpu.memory_space<vmem>>, vector<64x64xf32>
    %cst_67 = arith.constant dense<0.000000e+00> : vector<49x64xf32>
    %134 = tpu.matmul %132, %133, %cst_67 {dimension_numbers = #tpu.dot_dimension_numbers<[1], [0], [0], [1], [0, 0, 1, 1], [], []>} : vector<49x64xf32>, vector<64x64xf32>, vector<49x64xf32> -> vector<49x64xf32>
    %c0_68 = arith.constant 0 : index
    %c0_69 = arith.constant 0 : index
    %135 = vector.load %arg11[%c0_68, %c0_69] : memref<1x64xf32, #tpu.memory_space<vmem>>, vector<1x64xf32>
    %136 = vector.broadcast %135 : vector<1x64xf32> to vector<49x64xf32>
    %137 = arith.addf %134, %136 : vector<49x64xf32>
    %138 = arith.addf %125, %137 : vector<49x64xf32>
    %cst_70 = arith.constant dense<0.000000e+00> : vector<49xf32>
    %139 = vector.multi_reduction <add>, %138, %cst_70 [1] : vector<49x64xf32> to vector<49xf32>
    %140 = vector.shape_cast %139 : vector<49xf32> to vector<49x1xf32>
    %cst_71 = arith.constant 6.400000e+01 : f32
    %141 = vector.broadcast %cst_71 : f32 to vector<49x1xf32>
    %142 = arith.divf %140, %141 : vector<49x1xf32>
    %143 = vector.broadcast %142 : vector<49x1xf32> to vector<49x64xf32>
    %144 = arith.subf %138, %143 : vector<49x64xf32>
    %145 = arith.mulf %144, %144 : vector<49x64xf32>
    %cst_72 = arith.constant dense<0.000000e+00> : vector<49xf32>
    %146 = vector.multi_reduction <add>, %145, %cst_72 [1] : vector<49x64xf32> to vector<49xf32>
    %147 = vector.shape_cast %146 : vector<49xf32> to vector<49x1xf32>
    %cst_73 = arith.constant 6.400000e+01 : f32
    %148 = vector.broadcast %cst_73 : f32 to vector<49x1xf32>
    %149 = arith.divf %147, %148 : vector<49x1xf32>
    %150 = vector.broadcast %142 : vector<49x1xf32> to vector<49x64xf32>
    %151 = arith.subf %138, %150 : vector<49x64xf32>
    %cst_74 = arith.constant 9.99999974E-6 : f32
    %152 = vector.broadcast %cst_74 : f32 to vector<49x1xf32>
    %153 = arith.addf %149, %152 : vector<49x1xf32>
    %154 = math.rsqrt %153 : vector<49x1xf32>
    %155 = vector.broadcast %154 : vector<49x1xf32> to vector<49x64xf32>
    %156 = arith.mulf %151, %155 : vector<49x64xf32>
    %c0_75 = arith.constant 0 : index
    %c0_76 = arith.constant 0 : index
    %157 = vector.load %arg12[%c0_75, %c0_76] : memref<1x64xf32, #tpu.memory_space<vmem>>, vector<1x64xf32>
    %158 = vector.broadcast %157 : vector<1x64xf32> to vector<49x64xf32>
    %159 = arith.mulf %156, %158 : vector<49x64xf32>
    %c0_77 = arith.constant 0 : index
    %c0_78 = arith.constant 0 : index
    %160 = vector.load %arg13[%c0_77, %c0_78] : memref<1x64xf32, #tpu.memory_space<vmem>>, vector<1x64xf32>
    %161 = vector.broadcast %160 : vector<1x64xf32> to vector<49x64xf32>
    %162 = arith.addf %159, %161 : vector<49x64xf32>
    %c0_79 = arith.constant 0 : index
    %c0_80 = arith.constant 0 : index
    %c0_81 = arith.constant 0 : index
    %163 = vector.load %arg14[%c0_79, %c0_80, %c0_81] : memref<1x49x64xf32, #tpu.memory_space<vmem>>, vector<1x49x64xf32>
    %164 = vector.shape_cast %163 : vector<1x49x64xf32> to vector<49x64xf32>
    %165 = vector.shape_cast %162 : vector<49x64xf32> to vector<1x49x64xf32>
    tpu.vector_store %arg14[%c0_79, %c0_80, %c0_81], %165 {strides = array<i32>} : memref<1x49x64xf32, #tpu.memory_space<vmem>>, vector<1x49x64xf32>,
    return
  }
  func.func @transform_0(%arg0: i32) -> (i32, i32, i32) {
    %c0_i32 = arith.constant 0 : i32
    %c0_i32_0 = arith.constant 0 : i32
    %c0_i32_1 = arith.constant 0 : i32
    return %arg0, %c0_i32, %c0_i32_0 : i32, i32, i32
  }
  func.func @transform_1(%arg0: i32) -> (i32, i32) {
    %c0_i32 = arith.constant 0 : i32
    %c0_i32_0 = arith.constant 0 : i32
    %c0_i32_1 = arith.constant 0 : i32
    return %c0_i32, %c0_i32_0 : i32, i32
  }
  func.func @transform_2(%arg0: i32) -> (i32, i32) {
    %c0_i32 = arith.constant 0 : i32
    %c0_i32_0 = arith.constant 0 : i32
    %c0_i32_1 = arith.constant 0 : i32
    return %c0_i32, %c0_i32_0 : i32, i32
  }
  func.func @transform_3(%arg0: i32) -> (i32, i32) {
    %c0_i32 = arith.constant 0 : i32
    %c0_i32_0 = arith.constant 0 : i32
    %c0_i32_1 = arith.constant 0 : i32
    return %c0_i32, %c0_i32_0 : i32, i32
  }
  func.func @transform_4(%arg0: i32) -> (i32, i32) {
    %c0_i32 = arith.constant 0 : i32
    %c0_i32_0 = arith.constant 0 : i32
    %c0_i32_1 = arith.constant 0 : i32
    return %c0_i32, %c0_i32_0 : i32, i32
  }
  func.func @transform_5(%arg0: i32) -> (i32, i32) {
    %c0_i32 = arith.constant 0 : i32
    %c0_i32_0 = arith.constant 0 : i32
    %c0_i32_1 = arith.constant 0 : i32
    return %c0_i32, %c0_i32_0 : i32, i32
  }
  func.func @transform_6(%arg0: i32) -> (i32, i32) {
    %c0_i32 = arith.constant 0 : i32
    %c0_i32_0 = arith.constant 0 : i32
    %c0_i32_1 = arith.constant 0 : i32
    return %c0_i32, %c0_i32_0 : i32, i32
  }
  func.func @transform_7(%arg0: i32) -> (i32, i32) {
    %c0_i32 = arith.constant 0 : i32
    %c0_i32_0 = arith.constant 0 : i32
    %c0_i32_1 = arith.constant 0 : i32
    return %c0_i32, %c0_i32_0 : i32, i32
  }
  func.func @transform_8(%arg0: i32) -> (i32, i32) {
    %c0_i32 = arith.constant 0 : i32
    %c0_i32_0 = arith.constant 0 : i32
    %c0_i32_1 = arith.constant 0 : i32
    return %c0_i32, %c0_i32_0 : i32, i32
  }
  func.func @transform_9(%arg0: i32) -> (i32, i32) {
    %c0_i32 = arith.constant 0 : i32
    %c0_i32_0 = arith.constant 0 : i32
    %c0_i32_1 = arith.constant 0 : i32
    return %c0_i32, %c0_i32_0 : i32, i32
  }
  func.func @transform_10(%arg0: i32) -> (i32, i32) {
    %c0_i32 = arith.constant 0 : i32
    %c0_i32_0 = arith.constant 0 : i32
    %c0_i32_1 = arith.constant 0 : i32
    return %c0_i32, %c0_i32_0 : i32, i32
  }
  func.func @transform_11(%arg0: i32) -> (i32, i32) {
    %c0_i32 = arith.constant 0 : i32
    %c0_i32_0 = arith.constant 0 : i32
    %c0_i32_1 = arith.constant 0 : i32
    return %c0_i32, %c0_i32_0 : i32, i32
  }
  func.func @transform_12(%arg0: i32) -> (i32, i32) {
    %c0_i32 = arith.constant 0 : i32
    %c0_i32_0 = arith.constant 0 : i32
    %c0_i32_1 = arith.constant 0 : i32
    return %c0_i32, %c0_i32_0 : i32, i32
  }
  func.func @transform_13(%arg0: i32) -> (i32, i32, i32) {
    %c0_i32 = arith.constant 0 : i32
    %c0_i32_0 = arith.constant 0 : i32
    %c0_i32_1 = arith.constant 0 : i32
    return %arg0, %c0_i32, %c0_i32_0 : i32, i32, i32
  }
  func.func @transform_14(%arg0: i32) -> (i32, i32, i32, i32) {
    %c0_i32 = arith.constant 0 : i32
    %c0_i32_0 = arith.constant 0 : i32
    %c0_i32_1 = arith.constant 0 : i32
    %c0_i32_2 = arith.constant 0 : i32
    return %arg0, %c0_i32, %c0_i32_0, %c0_i32_1 : i32, i32, i32, i32
  }
}

</mosaic_0001>

<bundles_post_ra>
// kernel: mha_forward.4
= control target key start
LH: loop header
LB: loop body
LE: loop exit
PB: predicated region body
PF: predicated region fallthrough
CT: control target
= control target key end

     0   :  { %s2024_s15 = smov 0   ;;  %s2656_s0 = inlined_call_operand.vmem [shape: f32[1568,9], index: 0, kind: input, shape index: {}]   ;;  %s2657_s1 = inlined_call_operand.vmem [shape: f32[9,32], index: 1, kind: input, shape index: {}]   ;;  %s2658_s2 = inlined_call_operand.vmem [shape: f32[1,32], index: 2, kind: input, shape index: {}]   ;;  %s2659_s3 = inlined_call_operand.vmem [shape: f32[1,32], index: 3, kind: input, shape index: {}]   ;;  %s2660_s4 = inlined_call_operand.vmem [shape: f32[1568,32], index: 4, kind: output, shape index: {}]  }
   0x1 LB: > { %s1618_s16 = sadd.s32 4294967295, %s1997_s15   ;;  %p1622_p0 = scmp.ge.s32.totalorder %s1997_s15, 1  ;;  %s1997_s15 = sphi %s2024_s15, %s14_s15  }
   0x2   : > { %p163_p1 = scmp.lt.s32.totalorder %s1997_s15, 3 }
   0x4   : > { %p164_p2 = pnand %p1622_p0, %p163_p1 }
   0x5   : > { %s189_s21 = smul.u32 (!%p164_p2), 98, %s1618_s16 }
   0x6   : > { %167 = sbr.rel (%p164_p2) target bundleno = 315 (0x13b), region = 36 }
   0x7   : > { %p190_p3 = scmp.lt.s32.totalorder (!%p164_p2), %s189_s21, 195 }
   0xb   : > { %v300_v0 = vld [vmem:[%s2657_s1 + $0x8] sm:$0x1]  ;;  %vm596_vm0 = vcmask 1040384   ;;  %v299_v1 = vld [vmem:[%s2657_s1] sm:$0xff]  ;;  %s2662_s21 = smov (!%p190_p3, %s189_s21), 195  ;;  %vm301_vm1 = vcmask 72704  }
   0xc   : > { %1828 = vmatprep.subr.msk.mxu0 %vm596_vm0, %v300_v0  ;;  %1979 = vmatprep.subr.msk.mxu1 %vm596_vm0, %v300_v0  ;;  %s1623_s22 = sshll.u32 %s2662_s21, 3  ;;  %vm1463_vm2 = vcmask 261120  }
   0xd   : > { %1829 = vmatpush3.msk.msra.mxu0 %vm596_vm0, %v300_v0  ;;  %1981 = vmatpush3.msk.msra.mxu1 %vm596_vm0, %v300_v0  ;;  %s2046_s25 = scalar_lea.vmem %s2656_s0, %s1623_s22  ;;  %s2265_s6 = scalar_lea.vmem %s2660_s4, %s1623_s22 }
   0xe   : > { %1830 = vmatprep.subr.mxu0 %v299_v1  ;;  %1980 = vmatprep.subr.mxu1 %v299_v1  ;;  %v201_v2 = vld [vmem:[%s2046_s25] sm:$0xff]  ;;  %v202_v3 = vld [vmem:[%s2046_s25 + $0x8] sm:$0xff]  ;;  %v251_v4 = vld [vmem:[%s2046_s25 + $0x190] sm:$0xff] }
   0xf   : > { %1831 = vmatpush3.msra.mxu0 %v299_v1  ;;  %1982 = vmatpush3.msra.mxu1 %v299_v1  ;;  %v252_v5 = vld [vmem:[%s2046_s25 + $0x198] sm:$0xff]  ;;  %v203_v6 = vld [vmem:[%s2046_s25 + $0x10] sm:$0xff]  ;;  %v253_v7 = vld [vmem:[%s2046_s25 + $0x1a0] sm:$0xff] }
  0x10   : > { %1832 = vmatprep.mubr.msk.f32.mxu0 %vm301_vm1, %v201_v2  ;;  %1907 = vmatprep.mubr.msk.f32.mxu1 %vm301_vm1, %v251_v4  ;;  %v204_v8 = vld [vmem:[%s2046_s25 + $0x18] sm:$0xff]  ;;  %v254_v9 = vld [vmem:[%s2046_s25 + $0x1a8] sm:$0xff]  ;;  %v205_v10 = vld [vmem:[%s2046_s25 + $0x20] sm:$0xff] }
  0x11   : > { %1833 = vmatmul.mubr.msk.f32.vlgmr.msra.gmra.mxu0 %vm301_vm1, %v202_v3  ;;  %1908 = vmatmul.mubr.msk.f32.vlgmr.msra.gmra.mxu1 %vm301_vm1, %v252_v5  ;;  %v255_v11 = vld [vmem:[%s2046_s25 + $0x1b0] sm:$0xff]  ;;  %v206_v12 = vld [vmem:[%s2046_s25 + $0x28] sm:$0xff]  ;;  %v256_v13 = vld [vmem:[%s2046_s25 + $0x1b8] sm:$0xff] }
  0x12   : > { %1835 = vmatprep.mubr.msk.f32.mxu0 %vm301_vm1, %v203_v6  ;;  %1910 = vmatprep.mubr.msk.f32.mxu1 %vm301_vm1, %v253_v7  ;;  %v207_v14 = vld [vmem:[%s2046_s25 + $0x30] sm:$0xff]  ;;  %v257_v15 = vld [vmem:[%s2046_s25 + $0x1c0] sm:$0xff]  ;;  %v208_v16 = vld [vmem:[%s2046_s25 + $0x38] sm:$0xff] }
  0x13   : > { %v258_v17 = vld [vmem:[%s2046_s25 + $0x1c8] sm:$0xff]  ;;  %v209_v18 = vld [vmem:[%s2046_s25 + $0x40] sm:$0xff]  ;;  %v259_v19 = vld [vmem:[%s2046_s25 + $0x1d0] sm:$0xff] }
  0x14   : > { %v210_v20 = vld [vmem:[%s2046_s25 + $0x48] sm:$0xff]  ;;  %v260_v21 = vld [vmem:[%s2046_s25 + $0x1d8] sm:$0xff]  ;;  %v211_v22 = vld [vmem:[%s2046_s25 + $0x50] sm:$0xff] }
  0x15   : > { %1836 = vmatmul.mubr.msk.f32.gmra.mxu0 %vm301_vm1, %v204_v8  ;;  %1911 = vmatmul.mubr.msk.f32.gmra.mxu1 %vm301_vm1, %v254_v9  ;;  %v261_v23 = vld [vmem:[%s2046_s25 + $0x1e0] sm:$0xff]  ;;  %v212_v24 = vld [vmem:[%s2046_s25 + $0x58] sm:$0xff]  ;;  %v262_v25 = vld [vmem:[%s2046_s25 + $0x1e8] sm:$0xff] }
  0x16   : > { %1838 = vmatprep.mubr.msk.f32.mxu0 %vm301_vm1, %v205_v10  ;;  %1913 = vmatprep.mubr.msk.f32.mxu1 %vm301_vm1, %v255_v11  ;;  %v213_v26 = vld [vmem:[%s2046_s25 + $0x60] sm:$0xff]  ;;  %v263_v27 = vld [vmem:[%s2046_s25 + $0x1f0] sm:$0xff]  ;;  %v214_v28 = vld [vmem:[%s2046_s25 + $0x68] sm:$0xff] }
  0x17   : > { %v264_v29 = vld [vmem:[%s2046_s25 + $0x1f8] sm:$0xff]  ;;  %v215_v30 = vld [vmem:[%s2046_s25 + $0x70] sm:$0xff]  ;;  %v265_v31 = vld [vmem:[%s2046_s25 + $0x200] sm:$0xff] }
  0x18   : > { %v216_v32 = vld [vmem:[%s2046_s25 + $0x78] sm:$0xff]  ;;  %v266_v33 = vld [vmem:[%s2046_s25 + $0x208] sm:$0xff]  ;;  %v217_v34 = vld [vmem:[%s2046_s25 + $0x80] sm:$0xff] }
  0x19   : > { %1839 = vmatmul.mubr.msk.f32.gmra.mxu0 %vm301_vm1, %v206_v12  ;;  %1914 = vmatmul.mubr.msk.f32.gmra.mxu1 %vm301_vm1, %v256_v13  ;;  %v267_v35 = vld [vmem:[%s2046_s25 + $0x210] sm:$0xff]  ;;  %v218_v36 = vld [vmem:[%s2046_s25 + $0x88] sm:$0xff]  ;;  %v268_v37 = vld [vmem:[%s2046_s25 + $0x218] sm:$0xff] }
  0x1a   : > { %1841 = vmatprep.mubr.msk.f32.mxu0 %vm301_vm1, %v207_v14  ;;  %1916 = vmatprep.mubr.msk.f32.mxu1 %vm301_vm1, %v257_v15  ;;  %v219_v38 = vld [vmem:[%s2046_s25 + $0x90] sm:$0xff]  ;;  %v269_v39 = vld [vmem:[%s2046_s25 + $0x220] sm:$0xff]  ;;  %v220_v40 = vld [vmem:[%s2046_s25 + $0x98] sm:$0xff] }
  0x1b   : > { %v270_v41 = vld [vmem:[%s2046_s25 + $0x228] sm:$0xff]  ;;  %v221_v42 = vld [vmem:[%s2046_s25 + $0xa0] sm:$0xff]  ;;  %v271_v43 = vld [vmem:[%s2046_s25 + $0x230] sm:$0xff] }
  0x1c   : > { %v222_v44 = vld [vmem:[%s2046_s25 + $0xa8] sm:$0xff]  ;;  %v272_v45 = vld [vmem:[%s2046_s25 + $0x238] sm:$0xff]  ;;  %v223_v46 = vld [vmem:[%s2046_s25 + $0xb0] sm:$0xff] }
  0x1d   : > { %1842 = vmatmul.mubr.msk.f32.gmra.mxu0 %vm301_vm1, %v208_v16  ;;  %1917 = vmatmul.mubr.msk.f32.gmra.mxu1 %vm301_vm1, %v258_v17  ;;  %v273_v47 = vld [vmem:[%s2046_s25 + $0x240] sm:$0xff]  ;;  %v224_v48 = vld [vmem:[%s2046_s25 + $0xb8] sm:$0xff]  ;;  %v274_v49 = vld [vmem:[%s2046_s25 + $0x248] sm:$0xff] }
  0x1e   : > { %1844 = vmatprep.mubr.msk.f32.mxu0 %vm301_vm1, %v209_v18  ;;  %1919 = vmatprep.mubr.msk.f32.mxu1 %vm301_vm1, %v259_v19  ;;  %v225_v50 = vld [vmem:[%s2046_s25 + $0xc0] sm:$0xff]  ;;  %v275_v51 = vld [vmem:[%s2046_s25 + $0x250] sm:$0xff]  ;;  %v226_v52 = vld [vmem:[%s2046_s25 + $0xc8] sm:$0xff] }
  0x1f   : > { %v276_v53 = vld [vmem:[%s2046_s25 + $0x258] sm:$0xff]  ;;  %v227_v54 = vld [vmem:[%s2046_s25 + $0xd0] sm:$0xff]  ;;  %v277_v55 = vld [vmem:[%s2046_s25 + $0x260] sm:$0xff] }
  0x20   : > { %v228_v56 = vld [vmem:[%s2046_s25 + $0xd8] sm:$0xff]  ;;  %v278_v57 = vld [vmem:[%s2046_s25 + $0x268] sm:$0xff]  ;;  %v229_v58 = vld [vmem:[%s2046_s25 + $0xe0] sm:$0xff] }
  0x21   : > { %1845 = vmatmul.mubr.msk.f32.gmra.mxu0 %vm301_vm1, %v210_v20  ;;  %1920 = vmatmul.mubr.msk.f32.gmra.mxu1 %vm301_vm1, %v260_v21  ;;  %v279_v59 = vld [vmem:[%s2046_s25 + $0x270] sm:$0xff]  ;;  %v230_v60 = vld [vmem:[%s2046_s25 + $0xe8] sm:$0xff]  ;;  %v280_v61 = vld [vmem:[%s2046_s25 + $0x278] sm:$0xff] }
  0x22   : > { %1847 = vmatprep.mubr.msk.f32.mxu0 %vm301_vm1, %v211_v22  ;;  %1922 = vmatprep.mubr.msk.f32.mxu1 %vm301_vm1, %v261_v23  ;;  %v231_v62 = vld [vmem:[%s2046_s25 + $0xf0] sm:$0xff]  ;;  %v281_v63 = vld [vmem:[%s2046_s25 + $0x280] sm:$0xff]  ;;  %v232_v0 = vld [vmem:[%s2046_s25 + $0xf8] sm:$0xff] }
  0x23   : > { %v282_v1 = vld [vmem:[%s2046_s25 + $0x288] sm:$0xff]  ;;  %v233_v2 = vld [vmem:[%s2046_s25 + $0x100] sm:$0xff]  ;;  %v283_v3 = vld [vmem:[%s2046_s25 + $0x290] sm:$0xff] }
  0x24   : > { %v234_v4 = vld [vmem:[%s2046_s25 + $0x108] sm:$0xff]  ;;  %v284_v5 = vld [vmem:[%s2046_s25 + $0x298] sm:$0xff]  ;;  %v235_v6 = vld [vmem:[%s2046_s25 + $0x110] sm:$0xff] }
  0x25   : > { %1848 = vmatmul.mubr.msk.f32.gmra.mxu0 %vm301_vm1, %v212_v24  ;;  %1923 = vmatmul.mubr.msk.f32.gmra.mxu1 %vm301_vm1, %v262_v25  ;;  %v285_v7 = vld [vmem:[%s2046_s25 + $0x2a0] sm:$0xff]  ;;  %v236_v8 = vld [vmem:[%s2046_s25 + $0x118] sm:$0xff]  ;;  %v286_v9 = vld [vmem:[%s2046_s25 + $0x2a8] sm:$0xff] }
  0x26   : > { %1850 = vmatprep.mubr.msk.f32.mxu0 %vm301_vm1, %v213_v26  ;;  %1925 = vmatprep.mubr.msk.f32.mxu1 %vm301_vm1, %v263_v27  ;;  %v237_v10 = vld [vmem:[%s2046_s25 + $0x120] sm:$0xff]  ;;  %v287_v11 = vld [vmem:[%s2046_s25 + $0x2b0] sm:$0xff]  ;;  %v238_v12 = vld [vmem:[%s2046_s25 + $0x128] sm:$0xff] }
  0x27   : > { %v288_v13 = vld [vmem:[%s2046_s25 + $0x2b8] sm:$0xff]  ;;  %v239_v14 = vld [vmem:[%s2046_s25 + $0x130] sm:$0xff]  ;;  %v289_v15 = vld [vmem:[%s2046_s25 + $0x2c0] sm:$0xff] }
  0x28   : > { %v240_v16 = vld [vmem:[%s2046_s25 + $0x138] sm:$0xff]  ;;  %v290_v17 = vld [vmem:[%s2046_s25 + $0x2c8] sm:$0xff]  ;;  %v241_v18 = vld [vmem:[%s2046_s25 + $0x140] sm:$0xff] }
  0x29   : > { %1851 = vmatmul.mubr.msk.f32.gmra.mxu0 %vm301_vm1, %v214_v28  ;;  %1926 = vmatmul.mubr.msk.f32.gmra.mxu1 %vm301_vm1, %v264_v29  ;;  %v291_v19 = vld [vmem:[%s2046_s25 + $0x2d0] sm:$0xff]  ;;  %v242_v20 = vld [vmem:[%s2046_s25 + $0x148] sm:$0xff]  ;;  %v292_v21 = vld [vmem:[%s2046_s25 + $0x2d8] sm:$0xff] }
  0x2a   : > { %1853 = vmatprep.mubr.msk.f32.mxu0 %vm301_vm1, %v215_v30  ;;  %1928 = vmatprep.mubr.msk.f32.mxu1 %vm301_vm1, %v265_v31  ;;  %v243_v22 = vld [vmem:[%s2046_s25 + $0x150] sm:$0xff]  ;;  %v293_v23 = vld [vmem:[%s2046_s25 + $0x2e0] sm:$0xff]  ;;  %v244_v24 = vld [vmem:[%s2046_s25 + $0x158] sm:$0xff] }
  0x2b   : > { %v294_v25 = vld [vmem:[%s2046_s25 + $0x2e8] sm:$0xff]  ;;  %v245_v26 = vld [vmem:[%s2046_s25 + $0x160] sm:$0xff]  ;;  %v295_v27 = vld [vmem:[%s2046_s25 + $0x2f0] sm:$0xff] }
  0x2c   : > { %v246_v28 = vld [vmem:[%s2046_s25 + $0x168] sm:$0xff]  ;;  %v296_v29 = vld [vmem:[%s2046_s25 + $0x2f8] sm:$0xff]  ;;  %v247_v30 = vld [vmem:[%s2046_s25 + $0x170] sm:$0xff] }
  0x2d   : > { %1854 = vmatmul.mubr.msk.f32.gmra.mxu0 %vm301_vm1, %v216_v32  ;;  %1929 = vmatmul.mubr.msk.f32.gmra.mxu1 %vm301_vm1, %v266_v33  ;;  %v297_v31 = vld [vmem:[%s2046_s25 + $0x300] sm:$0xff]  ;;  %v248_v32 = vld [vmem:[%s2046_s25 + $0x178] sm:$0xff]  ;;  %v298_v33 = vld [vmem:[%s2046_s25 + $0x308] sm:$0xff] }
  0x2e   : > { %1856 = vmatprep.mubr.msk.f32.mxu0 %vm301_vm1, %v217_v34  ;;  %1931 = vmatprep.mubr.msk.f32.mxu1 %vm301_vm1, %v267_v35  ;;  %v249_v34 = vld [vmem:[%s2046_s25 + $0x180] sm:$0xff]  ;;  %v250_v35 = vld [vmem:[%s2046_s25 + $0x188] sm:$0xff] }
  0x31   : > { %1857 = vmatmul.mubr.msk.f32.gmra.mxu0 %vm301_vm1, %v218_v36  ;;  %1932 = vmatmul.mubr.msk.f32.gmra.mxu1 %vm301_vm1, %v268_v37  ;;  %v2247_v36 = vld [vmem:[%s2658_s2] ss:$0 sm:$0xff] }
  0x32   : > { %1859 = vmatprep.mubr.msk.f32.mxu0 %vm301_vm1, %v219_v38  ;;  %1934 = vmatprep.mubr.msk.f32.mxu1 %vm301_vm1, %v269_v39  ;;  %v2252_v38 = vld [vmem:[%s2659_s3] ss:$0 sm:$0xff] }
  0x35   : > { %1860 = vmatmul.mubr.msk.f32.gmra.mxu0 %vm301_vm1, %v220_v40  ;;  %1935 = vmatmul.mubr.msk.f32.gmra.mxu1 %vm301_vm1, %v270_v41 }
  0x36   : > { %1862 = vmatprep.mubr.msk.f32.mxu0 %vm301_vm1, %v221_v42  ;;  %1937 = vmatprep.mubr.msk.f32.mxu1 %vm301_vm1, %v271_v43 }
  0x39   : > { %1863 = vmatmul.mubr.msk.f32.gmra.mxu0 %vm301_vm1, %v222_v44  ;;  %1938 = vmatmul.mubr.msk.f32.gmra.mxu1 %vm301_vm1, %v272_v45 }
  0x3a   : > { %1865 = vmatprep.mubr.msk.f32.mxu0 %vm301_vm1, %v223_v46  ;;  %1940 = vmatprep.mubr.msk.f32.mxu1 %vm301_vm1, %v273_v47 }
  0x3d   : > { %1866 = vmatmul.mubr.msk.f32.gmra.mxu0 %vm301_vm1, %v224_v48  ;;  %1941 = vmatmul.mubr.msk.f32.gmra.mxu1 %vm301_vm1, %v274_v49 }
  0x3e   : > { %1868 = vmatprep.mubr.msk.f32.mxu0 %vm301_vm1, %v225_v50  ;;  %1943 = vmatprep.mubr.msk.f32.mxu1 %vm301_vm1, %v275_v51 }
  0x41   : > { %1869 = vmatmul.mubr.msk.f32.gmra.mxu0 %vm301_vm1, %v226_v52  ;;  %1944 = vmatmul.mubr.msk.f32.gmra.mxu1 %vm301_vm1, %v276_v53 }
  0x42   : > { %1871 = vmatprep.mubr.msk.f32.mxu0 %vm301_vm1, %v227_v54  ;;  %1946 = vmatprep.mubr.msk.f32.mxu1 %vm301_vm1, %v277_v55 }
  0x45   : > { %1872 = vmatmul.mubr.msk.f32.gmra.mxu0 %vm301_vm1, %v228_v56  ;;  %1947 = vmatmul.mubr.msk.f32.gmra.mxu1 %vm301_vm1, %v278_v57 }
  0x46   : > { %1874 = vmatprep.mubr.msk.f32.mxu0 %vm301_vm1, %v229_v58  ;;  %1949 = vmatprep.mubr.msk.f32.mxu1 %vm301_vm1, %v279_v59 }
  0x49   : > { %1875 = vmatmul.mubr.msk.f32.gmra.mxu0 %vm301_vm1, %v230_v60  ;;  %1950 = vmatmul.mubr.msk.f32.gmra.mxu1 %vm301_vm1, %v280_v61 }
  0x4a   : > { %1877 = vmatprep.mubr.msk.f32.mxu0 %vm301_vm1, %v231_v62  ;;  %1952 = vmatprep.mubr.msk.f32.mxu1 %vm301_vm1, %v281_v63 }
  0x4d   : > { %1878 = vmatmul.mubr.msk.f32.gmra.mxu0 %vm301_vm1, %v232_v0  ;;  %1953 = vmatmul.mubr.msk.f32.gmra.mxu1 %vm301_vm1, %v282_v1 }
  0x4e   : > { %1880 = vmatprep.mubr.msk.f32.mxu0 %vm301_vm1, %v233_v2  ;;  %1955 = vmatprep.mubr.msk.f32.mxu1 %vm301_vm1, %v283_v3 }
  0x51   : > { %1881 = vmatmul.mubr.msk.f32.gmra.mxu0 %vm301_vm1, %v234_v4  ;;  %1956 = vmatmul.mubr.msk.f32.gmra.mxu1 %vm301_vm1, %v284_v5 }
  0x52   : > { %1883 = vmatprep.mubr.msk.f32.mxu0 %vm301_vm1, %v235_v6  ;;  %1958 = vmatprep.mubr.msk.f32.mxu1 %vm301_vm1, %v285_v7 }
  0x55   : > { %1884 = vmatmul.mubr.msk.f32.gmra.mxu0 %vm301_vm1, %v236_v8  ;;  %1959 = vmatmul.mubr.msk.f32.gmra.mxu1 %vm301_vm1, %v286_v9 }
  0x56   : > { %1886 = vmatprep.mubr.msk.f32.mxu0 %vm301_vm1, %v237_v10  ;;  %1961 = vmatprep.mubr.msk.f32.mxu1 %vm301_vm1, %v287_v11 }
  0x59   : > { %1887 = vmatmul.mubr.msk.f32.gmra.mxu0 %vm301_vm1, %v238_v12  ;;  %1962 = vmatmul.mubr.msk.f32.gmra.mxu1 %vm301_vm1, %v288_v13 }
  0x5a   : > { %1889 = vmatprep.mubr.msk.f32.mxu0 %vm301_vm1, %v239_v14  ;;  %1964 = vmatprep.mubr.msk.f32.mxu1 %vm301_vm1, %v289_v15 }
  0x5d   : > { %1890 = vmatmul.mubr.msk.f32.gmra.mxu0 %vm301_vm1, %v240_v16  ;;  %1965 = vmatmul.mubr.msk.f32.gmra.mxu1 %vm301_vm1, %v290_v17 }
  0x5e   : > { %1892 = vmatprep.mubr.msk.f32.mxu0 %vm301_vm1, %v241_v18  ;;  %1967 = vmatprep.mubr.msk.f32.mxu1 %vm301_vm1, %v291_v19 }
  0x61   : > { %1893 = vmatmul.mubr.msk.f32.gmra.mxu0 %vm301_vm1, %v242_v20  ;;  %1968 = vmatmul.mubr.msk.f32.gmra.mxu1 %vm301_vm1, %v292_v21 }
  0x62   : > { %1895 = vmatprep.mubr.msk.f32.mxu0 %vm301_vm1, %v243_v22  ;;  %1970 = vmatprep.mubr.msk.f32.mxu1 %vm301_vm1, %v293_v23 }
  0x65   : > { %1896 = vmatmul.mubr.msk.f32.gmra.mxu0 %vm301_vm1, %v244_v24  ;;  %1971 = vmatmul.mubr.msk.f32.gmra.mxu1 %vm301_vm1, %v294_v25 }
  0x66   : > { %1898 = vmatprep.mubr.msk.f32.mxu0 %vm301_vm1, %v245_v26  ;;  %1973 = vmatprep.mubr.msk.f32.mxu1 %vm301_vm1, %v295_v27 }
  0x69   : > { %1899 = vmatmul.mubr.msk.f32.gmra.mxu0 %vm301_vm1, %v246_v28  ;;  %1974 = vmatmul.mubr.msk.f32.gmra.mxu1 %vm301_vm1, %v296_v29 }
  0x6a   : > { %1901 = vmatprep.mubr.msk.f32.mxu0 %vm301_vm1, %v247_v30  ;;  %1976 = vmatprep.mubr.msk.f32.mxu1 %vm301_vm1, %v297_v31 }
  0x6d   : > { %1902 = vmatmul.mubr.msk.f32.gmra.mxu0 %vm301_vm1, %v248_v32  ;;  %1977 = vmatmul.mubr.msk.f32.gmra.mxu1 %vm301_vm1, %v298_v33 }
  0x6e   : > { %1904 = vmatprep.mubr.msk.f32.mxu0 %vm301_vm1, %v249_v34 }
  0x71   : > { %1905 = vmatmul.mubr.msk.f32.gmra.mxu0 %vm301_vm1, %v250_v35 }
  0xd1   : > { %v1834_v37 = vpop.f32.mrf.mxu0  ;;  %v1909_v39 = vpop.f32.mrf.mxu1 }
  0xd2   : > { %v1163_v40 = vmul.f32 %v1834_v37, %v2247_v36  ;;  %v1213_v41 = vmul.f32 %v1909_v39, %v2247_v36 }
  0xd3   : > { %v666_v42 = vpop.f32.mrf.mxu0  ;;  %v916_v43 = vpop.f32.mrf.mxu1 }
  0xd4   : > { %v1268_v44 = vadd.f32 %v2252_v38, %v1163_v40  ;;  %v1162_v45 = vmul.f32 %v2247_v36, %v666_v42  ;;  %v1318_v46 = vadd.f32 %v2252_v38, %v1213_v41  ;;  %v1212_v47 = vmul.f32 %v2247_v36, %v916_v43 }
  0xd5   : > { %v1837_v48 = vpop.f32.mrf.mxu0  ;;  %v1912_v49 = vpop.f32.mrf.mxu1 }
  0xd6   : > { %v1366_v50 = vmax.f32 %v1268_v44, 0.0  ;;  %v1267_v51 = vadd.f32 %v2252_v38, %v1162_v45  ;;  %v1416_v52 = vmax.f32 %v1318_v46, 0.0  ;;  %v1165_v53 = vmul.f32 %v1837_v48, %v2247_v36 }
  0xd7   : > { %v1317_v54 = vadd.f32 %v2252_v38, %v1212_v47  ;;  %v676_v55 = vpop.f32.mrf.mxu0  ;;  %v1215_v56 = vmul.f32 %v1912_v49, %v2247_v36  ;;  %v926_v57 = vpop.f32.mrf.mxu1 }
  0xd8   : > { %1465 = vst.msk [vmem:[%s2265_s6 + $0x8] sm:$0xff] %vm1463_vm2, %v1366_v50  ;;  %v1365_v58 = vmax.f32 %v1267_v51, 0.0  ;;  %1515 = vst.msk [vmem:[%s2265_s6 + $0x198] sm:$0xff] %vm1463_vm2, %v1416_v52  ;;  %v1270_v59 = vadd.f32 %v2252_v38, %v1165_v53  ;;  %v1164_v60 = vmul.f32 %v2247_v36, %v676_v55  ;;  %v1214_v61 = vmul.f32 %v2247_v36, %v926_v57 }
  0xd9   : > { %v1415_v62 = vmax.f32 %v1317_v54, 0.0  ;;  %v1320_v63 = vadd.f32 %v2252_v38, %v1215_v56  ;;  %v1840_v0 = vpop.f32.mrf.mxu0  ;;  %v1915_v1 = vpop.f32.mrf.mxu1 }
  0xda   : > { %1464 = vst.msk [vmem:[%s2265_s6] sm:$0xff] %vm1463_vm2, %v1365_v58  ;;  %v1368_v2 = vmax.f32 %v1270_v59, 0.0  ;;  %v1269_v3 = vadd.f32 %v2252_v38, %v1164_v60  ;;  %v1167_v4 = vmul.f32 %v1840_v0, %v2247_v36  ;;  %v1319_v5 = vadd.f32 %v2252_v38, %v1214_v61 }
  0xdb   : > { %1514 = vst.msk [vmem:[%s2265_s6 + $0x190] sm:$0xff] %vm1463_vm2, %v1415_v62  ;;  %v1418_v6 = vmax.f32 %v1320_v63, 0.0  ;;  %v686_v7 = vpop.f32.mrf.mxu0  ;;  %v1217_v8 = vmul.f32 %v1915_v1, %v2247_v36  ;;  %v936_v9 = vpop.f32.mrf.mxu1 }
  0xdc   : > { %1467 = vst.msk [vmem:[%s2265_s6 + $0x18] sm:$0xff] %vm1463_vm2, %v1368_v2  ;;  %v1367_v10 = vmax.f32 %v1269_v3, 0.0  ;;  %v1272_v11 = vadd.f32 %v2252_v38, %v1167_v4  ;;  %v1417_v12 = vmax.f32 %v1319_v5, 0.0  ;;  %v1166_v13 = vmul.f32 %v2247_v36, %v686_v7 }
  0xdd   : > { %1517 = vst.msk [vmem:[%s2265_s6 + $0x1a8] sm:$0xff] %vm1463_vm2, %v1418_v6  ;;  %v1322_v14 = vadd.f32 %v2252_v38, %v1217_v8  ;;  %v1843_v15 = vpop.f32.mrf.mxu0  ;;  %v1216_v16 = vmul.f32 %v2247_v36, %v936_v9  ;;  %v1918_v17 = vpop.f32.mrf.mxu1 }
  0xde   : > { %1466 = vst.msk [vmem:[%s2265_s6 + $0x10] sm:$0xff] %vm1463_vm2, %v1367_v10  ;;  %v1370_v18 = vmax.f32 %v1272_v11, 0.0  ;;  %1516 = vst.msk [vmem:[%s2265_s6 + $0x1a0] sm:$0xff] %vm1463_vm2, %v1417_v12  ;;  %v1271_v19 = vadd.f32 %v2252_v38, %v1166_v13  ;;  %v1169_v20 = vmul.f32 %v1843_v15, %v2247_v36  ;;  %v1219_v21 = vmul.f32 %v1918_v17, %v2247_v36 }
  0xdf   : > { %v1420_v22 = vmax.f32 %v1322_v14, 0.0  ;;  %v1321_v23 = vadd.f32 %v2252_v38, %v1216_v16  ;;  %v696_v24 = vpop.f32.mrf.mxu0  ;;  %v946_v25 = vpop.f32.mrf.mxu1 }
  0xe0   : > { %1469 = vst.msk [vmem:[%s2265_s6 + $0x28] sm:$0xff] %vm1463_vm2, %v1370_v18  ;;  %v1369_v26 = vmax.f32 %v1271_v19, 0.0  ;;  %v1274_v27 = vadd.f32 %v2252_v38, %v1169_v20  ;;  %v1168_v28 = vmul.f32 %v2247_v36, %v696_v24  ;;  %v1324_v29 = vadd.f32 %v2252_v38, %v1219_v21 }
  0xe1   : > { %1519 = vst.msk [vmem:[%s2265_s6 + $0x1b8] sm:$0xff] %vm1463_vm2, %v1420_v22  ;;  %v1419_v30 = vmax.f32 %v1321_v23, 0.0  ;;  %v1846_v31 = vpop.f32.mrf.mxu0  ;;  %v1218_v32 = vmul.f32 %v2247_v36, %v946_v25  ;;  %v1921_v33 = vpop.f32.mrf.mxu1 }
  0xe2   : > { %1468 = vst.msk [vmem:[%s2265_s6 + $0x20] sm:$0xff] %vm1463_vm2, %v1369_v26  ;;  %v1372_v34 = vmax.f32 %v1274_v27, 0.0  ;;  %v1273_v35 = vadd.f32 %v2252_v38, %v1168_v28  ;;  %v1422_v37 = vmax.f32 %v1324_v29, 0.0  ;;  %v1171_v39 = vmul.f32 %v1846_v31, %v2247_v36 }
  0xe3   : > { %1518 = vst.msk [vmem:[%s2265_s6 + $0x1b0] sm:$0xff] %vm1463_vm2, %v1419_v30  ;;  %v1323_v40 = vadd.f32 %v2252_v38, %v1218_v32  ;;  %v706_v41 = vpop.f32.mrf.mxu0  ;;  %v1221_v42 = vmul.f32 %v1921_v33, %v2247_v36  ;;  %v956_v43 = vpop.f32.mrf.mxu1 }
  0xe4   : > { %1471 = vst.msk [vmem:[%s2265_s6 + $0x38] sm:$0xff] %vm1463_vm2, %v1372_v34  ;;  %v1371_v44 = vmax.f32 %v1273_v35, 0.0  ;;  %1521 = vst.msk [vmem:[%s2265_s6 + $0x1c8] sm:$0xff] %vm1463_vm2, %v1422_v37  ;;  %v1276_v45 = vadd.f32 %v2252_v38, %v1171_v39  ;;  %v1170_v46 = vmul.f32 %v2247_v36, %v706_v41  ;;  %v1220_v47 = vmul.f32 %v2247_v36, %v956_v43 }
  0xe5   : > { %v1421_v48 = vmax.f32 %v1323_v40, 0.0  ;;  %v1326_v49 = vadd.f32 %v2252_v38, %v1221_v42  ;;  %v1849_v50 = vpop.f32.mrf.mxu0  ;;  %v1924_v51 = vpop.f32.mrf.mxu1 }
  0xe6   : > { %1470 = vst.msk [vmem:[%s2265_s6 + $0x30] sm:$0xff] %vm1463_vm2, %v1371_v44  ;;  %v1374_v52 = vmax.f32 %v1276_v45, 0.0  ;;  %v1275_v53 = vadd.f32 %v2252_v38, %v1170_v46  ;;  %v1173_v54 = vmul.f32 %v1849_v50, %v2247_v36  ;;  %v1325_v55 = vadd.f32 %v2252_v38, %v1220_v47 }
  0xe7   : > { %1520 = vst.msk [vmem:[%s2265_s6 + $0x1c0] sm:$0xff] %vm1463_vm2, %v1421_v48  ;;  %v1424_v56 = vmax.f32 %v1326_v49, 0.0  ;;  %v716_v57 = vpop.f32.mrf.mxu0  ;;  %v1223_v58 = vmul.f32 %v1924_v51, %v2247_v36  ;;  %v966_v59 = vpop.f32.mrf.mxu1 }
  0xe8   : > { %1473 = vst.msk [vmem:[%s2265_s6 + $0x48] sm:$0xff] %vm1463_vm2, %v1374_v52  ;;  %v1373_v60 = vmax.f32 %v1275_v53, 0.0  ;;  %v1278_v61 = vadd.f32 %v2252_v38, %v1173_v54  ;;  %v1423_v62 = vmax.f32 %v1325_v55, 0.0  ;;  %v1172_v63 = vmul.f32 %v2247_v36, %v716_v57 }
  0xe9   : > { %1523 = vst.msk [vmem:[%s2265_s6 + $0x1d8] sm:$0xff] %vm1463_vm2, %v1424_v56  ;;  %v1328_v0 = vadd.f32 %v2252_v38, %v1223_v58  ;;  %v1852_v1 = vpop.f32.mrf.mxu0  ;;  %v1222_v2 = vmul.f32 %v2247_v36, %v966_v59  ;;  %v1927_v3 = vpop.f32.mrf.mxu1 }
  0xea   : > { %1472 = vst.msk [vmem:[%s2265_s6 + $0x40] sm:$0xff] %vm1463_vm2, %v1373_v60  ;;  %v1376_v4 = vmax.f32 %v1278_v61, 0.0  ;;  %1522 = vst.msk [vmem:[%s2265_s6 + $0x1d0] sm:$0xff] %vm1463_vm2, %v1423_v62  ;;  %v1277_v5 = vadd.f32 %v2252_v38, %v1172_v63  ;;  %v1175_v6 = vmul.f32 %v1852_v1, %v2247_v36  ;;  %v1225_v7 = vmul.f32 %v1927_v3, %v2247_v36 }
  0xeb   : > { %v1426_v8 = vmax.f32 %v1328_v0, 0.0  ;;  %v1327_v9 = vadd.f32 %v2252_v38, %v1222_v2  ;;  %v726_v10 = vpop.f32.mrf.mxu0  ;;  %v976_v11 = vpop.f32.mrf.mxu1 }
  0xec   : > { %1475 = vst.msk [vmem:[%s2265_s6 + $0x58] sm:$0xff] %vm1463_vm2, %v1376_v4  ;;  %v1375_v12 = vmax.f32 %v1277_v5, 0.0  ;;  %v1280_v13 = vadd.f32 %v2252_v38, %v1175_v6  ;;  %v1174_v14 = vmul.f32 %v2247_v36, %v726_v10  ;;  %v1330_v15 = vadd.f32 %v2252_v38, %v1225_v7 }
  0xed   : > { %1525 = vst.msk [vmem:[%s2265_s6 + $0x1e8] sm:$0xff] %vm1463_vm2, %v1426_v8  ;;  %v1425_v16 = vmax.f32 %v1327_v9, 0.0  ;;  %v1855_v17 = vpop.f32.mrf.mxu0  ;;  %v1224_v18 = vmul.f32 %v2247_v36, %v976_v11  ;;  %v1930_v19 = vpop.f32.mrf.mxu1 }
  0xee   : > { %1474 = vst.msk [vmem:[%s2265_s6 + $0x50] sm:$0xff] %vm1463_vm2, %v1375_v12  ;;  %v1378_v20 = vmax.f32 %v1280_v13, 0.0  ;;  %v1279_v21 = vadd.f32 %v2252_v38, %v1174_v14  ;;  %v1428_v22 = vmax.f32 %v1330_v15, 0.0  ;;  %v1177_v23 = vmul.f32 %v1855_v17, %v2247_v36 }
  0xef   : > { %1524 = vst.msk [vmem:[%s2265_s6 + $0x1e0] sm:$0xff] %vm1463_vm2, %v1425_v16  ;;  %v1329_v24 = vadd.f32 %v2252_v38, %v1224_v18  ;;  %v736_v25 = vpop.f32.mrf.mxu0  ;;  %v1227_v26 = vmul.f32 %v1930_v19, %v2247_v36  ;;  %v986_v27 = vpop.f32.mrf.mxu1 }
  0xf0   : > { %1477 = vst.msk [vmem:[%s2265_s6 + $0x68] sm:$0xff] %vm1463_vm2, %v1378_v20  ;;  %v1377_v28 = vmax.f32 %v1279_v21, 0.0  ;;  %1527 = vst.msk [vmem:[%s2265_s6 + $0x1f8] sm:$0xff] %vm1463_vm2, %v1428_v22  ;;  %v1282_v29 = vadd.f32 %v2252_v38, %v1177_v23  ;;  %v1176_v30 = vmul.f32 %v2247_v36, %v736_v25  ;;  %v1226_v31 = vmul.f32 %v2247_v36, %v986_v27 }
  0xf1   : > { %v1427_v32 = vmax.f32 %v1329_v24, 0.0  ;;  %v1332_v33 = vadd.f32 %v2252_v38, %v1227_v26  ;;  %v1858_v34 = vpop.f32.mrf.mxu0  ;;  %v1933_v35 = vpop.f32.mrf.mxu1 }
  0xf2   : > { %1476 = vst.msk [vmem:[%s2265_s6 + $0x60] sm:$0xff] %vm1463_vm2, %v1377_v28  ;;  %v1380_v37 = vmax.f32 %v1282_v29, 0.0  ;;  %v1281_v39 = vadd.f32 %v2252_v38, %v1176_v30  ;;  %v1179_v40 = vmul.f32 %v1858_v34, %v2247_v36  ;;  %v1331_v41 = vadd.f32 %v2252_v38, %v1226_v31 }
  0xf3   : > { %1526 = vst.msk [vmem:[%s2265_s6 + $0x1f0] sm:$0xff] %vm1463_vm2, %v1427_v32  ;;  %v1430_v42 = vmax.f32 %v1332_v33, 0.0  ;;  %v746_v43 = vpop.f32.mrf.mxu0  ;;  %v1229_v44 = vmul.f32 %v1933_v35, %v2247_v36  ;;  %v996_v45 = vpop.f32.mrf.mxu1 }
  0xf4   : > { %1479 = vst.msk [vmem:[%s2265_s6 + $0x78] sm:$0xff] %vm1463_vm2, %v1380_v37  ;;  %v1379_v46 = vmax.f32 %v1281_v39, 0.0  ;;  %v1284_v47 = vadd.f32 %v2252_v38, %v1179_v40  ;;  %v1429_v48 = vmax.f32 %v1331_v41, 0.0  ;;  %v1178_v49 = vmul.f32 %v2247_v36, %v746_v43 }
  0xf5   : > { %1529 = vst.msk [vmem:[%s2265_s6 + $0x208] sm:$0xff] %vm1463_vm2, %v1430_v42  ;;  %v1334_v50 = vadd.f32 %v2252_v38, %v1229_v44  ;;  %v1861_v51 = vpop.f32.mrf.mxu0  ;;  %v1228_v52 = vmul.f32 %v2247_v36, %v996_v45  ;;  %v1936_v53 = vpop.f32.mrf.mxu1 }
  0xf6   : > { %1478 = vst.msk [vmem:[%s2265_s6 + $0x70] sm:$0xff] %vm1463_vm2, %v1379_v46  ;;  %v1382_v54 = vmax.f32 %v1284_v47, 0.0  ;;  %1528 = vst.msk [vmem:[%s2265_s6 + $0x200] sm:$0xff] %vm1463_vm2, %v1429_v48  ;;  %v1283_v55 = vadd.f32 %v2252_v38, %v1178_v49  ;;  %v1181_v56 = vmul.f32 %v1861_v51, %v2247_v36  ;;  %v1231_v57 = vmul.f32 %v1936_v53, %v2247_v36 }
  0xf7   : > { %v1432_v58 = vmax.f32 %v1334_v50, 0.0  ;;  %v1333_v59 = vadd.f32 %v2252_v38, %v1228_v52  ;;  %v756_v60 = vpop.f32.mrf.mxu0  ;;  %v1006_v61 = vpop.f32.mrf.mxu1 }
  0xf8   : > { %1481 = vst.msk [vmem:[%s2265_s6 + $0x88] sm:$0xff] %vm1463_vm2, %v1382_v54  ;;  %v1381_v62 = vmax.f32 %v1283_v55, 0.0  ;;  %v1286_v63 = vadd.f32 %v2252_v38, %v1181_v56  ;;  %v1180_v0 = vmul.f32 %v2247_v36, %v756_v60  ;;  %v1336_v1 = vadd.f32 %v2252_v38, %v1231_v57 }
  0xf9   : > { %1531 = vst.msk [vmem:[%s2265_s6 + $0x218] sm:$0xff] %vm1463_vm2, %v1432_v58  ;;  %v1431_v2 = vmax.f32 %v1333_v59, 0.0  ;;  %v1864_v3 = vpop.f32.mrf.mxu0  ;;  %v1230_v4 = vmul.f32 %v2247_v36, %v1006_v61  ;;  %v1939_v5 = vpop.f32.mrf.mxu1 }
  0xfa   : > { %1480 = vst.msk [vmem:[%s2265_s6 + $0x80] sm:$0xff] %vm1463_vm2, %v1381_v62  ;;  %v1384_v6 = vmax.f32 %v1286_v63, 0.0  ;;  %v1285_v7 = vadd.f32 %v2252_v38, %v1180_v0  ;;  %v1434_v8 = vmax.f32 %v1336_v1, 0.0  ;;  %v1183_v9 = vmul.f32 %v1864_v3, %v2247_v36 }
  0xfb   : > { %1530 = vst.msk [vmem:[%s2265_s6 + $0x210] sm:$0xff] %vm1463_vm2, %v1431_v2  ;;  %v1335_v10 = vadd.f32 %v2252_v38, %v1230_v4  ;;  %v766_v11 = vpop.f32.mrf.mxu0  ;;  %v1233_v12 = vmul.f32 %v1939_v5, %v2247_v36  ;;  %v1016_v13 = vpop.f32.mrf.mxu1 }
  0xfc   : > { %1483 = vst.msk [vmem:[%s2265_s6 + $0x98] sm:$0xff] %vm1463_vm2, %v1384_v6  ;;  %v1383_v14 = vmax.f32 %v1285_v7, 0.0  ;;  %1533 = vst.msk [vmem:[%s2265_s6 + $0x228] sm:$0xff] %vm1463_vm2, %v1434_v8  ;;  %v1288_v15 = vadd.f32 %v2252_v38, %v1183_v9  ;;  %v1182_v16 = vmul.f32 %v2247_v36, %v766_v11  ;;  %v1232_v17 = vmul.f32 %v2247_v36, %v1016_v13 }
  0xfd   : > { %v1433_v18 = vmax.f32 %v1335_v10, 0.0  ;;  %v1338_v19 = vadd.f32 %v2252_v38, %v1233_v12  ;;  %v1867_v20 = vpop.f32.mrf.mxu0  ;;  %v1942_v21 = vpop.f32.mrf.mxu1 }
  0xfe   : > { %1482 = vst.msk [vmem:[%s2265_s6 + $0x90] sm:$0xff] %vm1463_vm2, %v1383_v14  ;;  %v1386_v22 = vmax.f32 %v1288_v15, 0.0  ;;  %v1287_v23 = vadd.f32 %v2252_v38, %v1182_v16  ;;  %v1185_v24 = vmul.f32 %v1867_v20, %v2247_v36  ;;  %v1337_v25 = vadd.f32 %v2252_v38, %v1232_v17 }
  0xff   : > { %1532 = vst.msk [vmem:[%s2265_s6 + $0x220] sm:$0xff] %vm1463_vm2, %v1433_v18  ;;  %v1436_v26 = vmax.f32 %v1338_v19, 0.0  ;;  %v776_v27 = vpop.f32.mrf.mxu0  ;;  %v1235_v28 = vmul.f32 %v1942_v21, %v2247_v36  ;;  %v1026_v29 = vpop.f32.mrf.mxu1 }
 0x100   : > { %1485 = vst.msk [vmem:[%s2265_s6 + $0xa8] sm:$0xff] %vm1463_vm2, %v1386_v22  ;;  %v1385_v30 = vmax.f32 %v1287_v23, 0.0  ;;  %v1290_v31 = vadd.f32 %v2252_v38, %v1185_v24  ;;  %v1435_v32 = vmax.f32 %v1337_v25, 0.0  ;;  %v1184_v33 = vmul.f32 %v2247_v36, %v776_v27 }
 0x101   : > { %1535 = vst.msk [vmem:[%s2265_s6 + $0x238] sm:$0xff] %vm1463_vm2, %v1436_v26  ;;  %v1340_v34 = vadd.f32 %v2252_v38, %v1235_v28  ;;  %v1870_v35 = vpop.f32.mrf.mxu0  ;;  %v1234_v37 = vmul.f32 %v2247_v36, %v1026_v29  ;;  %v1945_v39 = vpop.f32.mrf.mxu1 }
 0x102   : > { %1484 = vst.msk [vmem:[%s2265_s6 + $0xa0] sm:$0xff] %vm1463_vm2, %v1385_v30  ;;  %v1388_v40 = vmax.f32 %v1290_v31, 0.0  ;;  %1534 = vst.msk [vmem:[%s2265_s6 + $0x230] sm:$0xff] %vm1463_vm2, %v1435_v32  ;;  %v1289_v41 = vadd.f32 %v2252_v38, %v1184_v33  ;;  %v1187_v42 = vmul.f32 %v1870_v35, %v2247_v36  ;;  %v1237_v43 = vmul.f32 %v1945_v39, %v2247_v36 }
 0x103   : > { %v1438_v44 = vmax.f32 %v1340_v34, 0.0  ;;  %v1339_v45 = vadd.f32 %v2252_v38, %v1234_v37  ;;  %v786_v46 = vpop.f32.mrf.mxu0  ;;  %v1036_v47 = vpop.f32.mrf.mxu1 }
 0x104   : > { %1487 = vst.msk [vmem:[%s2265_s6 + $0xb8] sm:$0xff] %vm1463_vm2, %v1388_v40  ;;  %v1387_v48 = vmax.f32 %v1289_v41, 0.0  ;;  %v1292_v49 = vadd.f32 %v2252_v38, %v1187_v42  ;;  %v1186_v50 = vmul.f32 %v2247_v36, %v786_v46  ;;  %v1342_v51 = vadd.f32 %v2252_v38, %v1237_v43 }
 0x105   : > { %1537 = vst.msk [vmem:[%s2265_s6 + $0x248] sm:$0xff] %vm1463_vm2, %v1438_v44  ;;  %v1437_v52 = vmax.f32 %v1339_v45, 0.0  ;;  %v1873_v53 = vpop.f32.mrf.mxu0  ;;  %v1236_v54 = vmul.f32 %v2247_v36, %v1036_v47  ;;  %v1948_v55 = vpop.f32.mrf.mxu1 }
 0x106   : > { %1486 = vst.msk [vmem:[%s2265_s6 + $0xb0] sm:$0xff] %vm1463_vm2, %v1387_v48  ;;  %v1390_v56 = vmax.f32 %v1292_v49, 0.0  ;;  %v1291_v57 = vadd.f32 %v2252_v38, %v1186_v50  ;;  %v1440_v58 = vmax.f32 %v1342_v51, 0.0  ;;  %v1189_v59 = vmul.f32 %v1873_v53, %v2247_v36 }
 0x107   : > { %1536 = vst.msk [vmem:[%s2265_s6 + $0x240] sm:$0xff] %vm1463_vm2, %v1437_v52  ;;  %v1341_v60 = vadd.f32 %v2252_v38, %v1236_v54  ;;  %v796_v61 = vpop.f32.mrf.mxu0  ;;  %v1239_v62 = vmul.f32 %v1948_v55, %v2247_v36  ;;  %v1046_v63 = vpop.f32.mrf.mxu1 }
 0x108   : > { %1489 = vst.msk [vmem:[%s2265_s6 + $0xc8] sm:$0xff] %vm1463_vm2, %v1390_v56  ;;  %v1389_v0 = vmax.f32 %v1291_v57, 0.0  ;;  %1539 = vst.msk [vmem:[%s2265_s6 + $0x258] sm:$0xff] %vm1463_vm2, %v1440_v58  ;;  %v1294_v1 = vadd.f32 %v2252_v38, %v1189_v59  ;;  %v1188_v2 = vmul.f32 %v2247_v36, %v796_v61  ;;  %v1238_v3 = vmul.f32 %v2247_v36, %v1046_v63 }
 0x109   : > { %v1439_v4 = vmax.f32 %v1341_v60, 0.0  ;;  %v1344_v5 = vadd.f32 %v2252_v38, %v1239_v62  ;;  %v1876_v6 = vpop.f32.mrf.mxu0  ;;  %v1951_v7 = vpop.f32.mrf.mxu1 }
 0x10a   : > { %1488 = vst.msk [vmem:[%s2265_s6 + $0xc0] sm:$0xff] %vm1463_vm2, %v1389_v0  ;;  %v1392_v8 = vmax.f32 %v1294_v1, 0.0  ;;  %v1293_v9 = vadd.f32 %v2252_v38, %v1188_v2  ;;  %v1191_v10 = vmul.f32 %v1876_v6, %v2247_v36  ;;  %v1343_v11 = vadd.f32 %v2252_v38, %v1238_v3 }
 0x10b   : > { %1538 = vst.msk [vmem:[%s2265_s6 + $0x250] sm:$0xff] %vm1463_vm2, %v1439_v4  ;;  %v1442_v12 = vmax.f32 %v1344_v5, 0.0  ;;  %v806_v13 = vpop.f32.mrf.mxu0  ;;  %v1241_v14 = vmul.f32 %v1951_v7, %v2247_v36  ;;  %v1056_v15 = vpop.f32.mrf.mxu1 }
 0x10c   : > { %1491 = vst.msk [vmem:[%s2265_s6 + $0xd8] sm:$0xff] %vm1463_vm2, %v1392_v8  ;;  %v1391_v16 = vmax.f32 %v1293_v9, 0.0  ;;  %v1296_v17 = vadd.f32 %v2252_v38, %v1191_v10  ;;  %v1441_v18 = vmax.f32 %v1343_v11, 0.0  ;;  %v1190_v19 = vmul.f32 %v2247_v36, %v806_v13 }
 0x10d   : > { %1541 = vst.msk [vmem:[%s2265_s6 + $0x268] sm:$0xff] %vm1463_vm2, %v1442_v12  ;;  %v1346_v20 = vadd.f32 %v2252_v38, %v1241_v14  ;;  %v1879_v21 = vpop.f32.mrf.mxu0  ;;  %v1240_v22 = vmul.f32 %v2247_v36, %v1056_v15  ;;  %v1954_v23 = vpop.f32.mrf.mxu1 }
 0x10e   : > { %1490 = vst.msk [vmem:[%s2265_s6 + $0xd0] sm:$0xff] %vm1463_vm2, %v1391_v16  ;;  %v1394_v24 = vmax.f32 %v1296_v17, 0.0  ;;  %1540 = vst.msk [vmem:[%s2265_s6 + $0x260] sm:$0xff] %vm1463_vm2, %v1441_v18  ;;  %v1295_v25 = vadd.f32 %v2252_v38, %v1190_v19  ;;  %v1193_v26 = vmul.f32 %v1879_v21, %v2247_v36  ;;  %v1243_v27 = vmul.f32 %v1954_v23, %v2247_v36 }
 0x10f   : > { %v1444_v28 = vmax.f32 %v1346_v20, 0.0  ;;  %v1345_v29 = vadd.f32 %v2252_v38, %v1240_v22  ;;  %v816_v30 = vpop.f32.mrf.mxu0  ;;  %v1066_v31 = vpop.f32.mrf.mxu1 }
 0x110   : > { %1493 = vst.msk [vmem:[%s2265_s6 + $0xe8] sm:$0xff] %vm1463_vm2, %v1394_v24  ;;  %v1393_v32 = vmax.f32 %v1295_v25, 0.0  ;;  %v1298_v33 = vadd.f32 %v2252_v38, %v1193_v26  ;;  %v1192_v34 = vmul.f32 %v2247_v36, %v816_v30  ;;  %v1348_v35 = vadd.f32 %v2252_v38, %v1243_v27 }
 0x111   : > { %1543 = vst.msk [vmem:[%s2265_s6 + $0x278] sm:$0xff] %vm1463_vm2, %v1444_v28  ;;  %v1443_v37 = vmax.f32 %v1345_v29, 0.0  ;;  %v1882_v39 = vpop.f32.mrf.mxu0  ;;  %v1242_v40 = vmul.f32 %v2247_v36, %v1066_v31  ;;  %v1957_v41 = vpop.f32.mrf.mxu1 }
 0x112   : > { %1492 = vst.msk [vmem:[%s2265_s6 + $0xe0] sm:$0xff] %vm1463_vm2, %v1393_v32  ;;  %v1396_v42 = vmax.f32 %v1298_v33, 0.0  ;;  %v1297_v43 = vadd.f32 %v2252_v38, %v1192_v34  ;;  %v1446_v44 = vmax.f32 %v1348_v35, 0.0  ;;  %v1195_v45 = vmul.f32 %v1882_v39, %v2247_v36 }
 0x113   : > { %1542 = vst.msk [vmem:[%s2265_s6 + $0x270] sm:$0xff] %vm1463_vm2, %v1443_v37  ;;  %v1347_v46 = vadd.f32 %v2252_v38, %v1242_v40  ;;  %v826_v47 = vpop.f32.mrf.mxu0  ;;  %v1245_v48 = vmul.f32 %v1957_v41, %v2247_v36  ;;  %v1076_v49 = vpop.f32.mrf.mxu1 }
 0x114   : > { %1495 = vst.msk [vmem:[%s2265_s6 + $0xf8] sm:$0xff] %vm1463_vm2, %v1396_v42  ;;  %v1395_v50 = vmax.f32 %v1297_v43, 0.0  ;;  %1545 = vst.msk [vmem:[%s2265_s6 + $0x288] sm:$0xff] %vm1463_vm2, %v1446_v44  ;;  %v1300_v51 = vadd.f32 %v2252_v38, %v1195_v45  ;;  %v1194_v52 = vmul.f32 %v2247_v36, %v826_v47  ;;  %v1244_v53 = vmul.f32 %v2247_v36, %v1076_v49 }
 0x115   : > { %v1445_v54 = vmax.f32 %v1347_v46, 0.0  ;;  %v1350_v55 = vadd.f32 %v2252_v38, %v1245_v48  ;;  %v1885_v56 = vpop.f32.mrf.mxu0  ;;  %v1960_v57 = vpop.f32.mrf.mxu1 }
 0x116   : > { %1494 = vst.msk [vmem:[%s2265_s6 + $0xf0] sm:$0xff] %vm1463_vm2, %v1395_v50  ;;  %v1398_v58 = vmax.f32 %v1300_v51, 0.0  ;;  %v1299_v59 = vadd.f32 %v2252_v38, %v1194_v52  ;;  %v1197_v60 = vmul.f32 %v1885_v56, %v2247_v36  ;;  %v1349_v61 = vadd.f32 %v2252_v38, %v1244_v53 }
 0x117   : > { %1544 = vst.msk [vmem:[%s2265_s6 + $0x280] sm:$0xff] %vm1463_vm2, %v1445_v54  ;;  %v1448_v62 = vmax.f32 %v1350_v55, 0.0  ;;  %v836_v63 = vpop.f32.mrf.mxu0  ;;  %v1247_v0 = vmul.f32 %v1960_v57, %v2247_v36  ;;  %v1086_v1 = vpop.f32.mrf.mxu1 }
 0x118   : > { %1497 = vst.msk [vmem:[%s2265_s6 + $0x108] sm:$0xff] %vm1463_vm2, %v1398_v58  ;;  %v1397_v2 = vmax.f32 %v1299_v59, 0.0  ;;  %v1302_v3 = vadd.f32 %v2252_v38, %v1197_v60  ;;  %v1447_v4 = vmax.f32 %v1349_v61, 0.0  ;;  %v1196_v5 = vmul.f32 %v2247_v36, %v836_v63 }
 0x119   : > { %1547 = vst.msk [vmem:[%s2265_s6 + $0x298] sm:$0xff] %vm1463_vm2, %v1448_v62  ;;  %v1352_v6 = vadd.f32 %v2252_v38, %v1247_v0  ;;  %v1888_v7 = vpop.f32.mrf.mxu0  ;;  %v1246_v8 = vmul.f32 %v2247_v36, %v1086_v1  ;;  %v1963_v9 = vpop.f32.mrf.mxu1 }
 0x11a   : > { %1496 = vst.msk [vmem:[%s2265_s6 + $0x100] sm:$0xff] %vm1463_vm2, %v1397_v2  ;;  %v1400_v10 = vmax.f32 %v1302_v3, 0.0  ;;  %1546 = vst.msk [vmem:[%s2265_s6 + $0x290] sm:$0xff] %vm1463_vm2, %v1447_v4  ;;  %v1301_v11 = vadd.f32 %v2252_v38, %v1196_v5  ;;  %v1199_v12 = vmul.f32 %v1888_v7, %v2247_v36  ;;  %v1249_v13 = vmul.f32 %v1963_v9, %v2247_v36 }
 0x11b   : > { %v1450_v14 = vmax.f32 %v1352_v6, 0.0  ;;  %v1351_v15 = vadd.f32 %v2252_v38, %v1246_v8  ;;  %v846_v16 = vpop.f32.mrf.mxu0  ;;  %v1096_v17 = vpop.f32.mrf.mxu1 }
 0x11c   : > { %1499 = vst.msk [vmem:[%s2265_s6 + $0x118] sm:$0xff] %vm1463_vm2, %v1400_v10  ;;  %v1399_v18 = vmax.f32 %v1301_v11, 0.0  ;;  %v1304_v19 = vadd.f32 %v2252_v38, %v1199_v12  ;;  %v1198_v20 = vmul.f32 %v2247_v36, %v846_v16  ;;  %v1354_v21 = vadd.f32 %v2252_v38, %v1249_v13 }
 0x11d   : > { %1549 = vst.msk [vmem:[%s2265_s6 + $0x2a8] sm:$0xff] %vm1463_vm2, %v1450_v14  ;;  %v1449_v22 = vmax.f32 %v1351_v15, 0.0  ;;  %v1891_v23 = vpop.f32.mrf.mxu0  ;;  %v1248_v24 = vmul.f32 %v2247_v36, %v1096_v17  ;;  %v1966_v25 = vpop.f32.mrf.mxu1 }
 0x11e   : > { %1498 = vst.msk [vmem:[%s2265_s6 + $0x110] sm:$0xff] %vm1463_vm2, %v1399_v18  ;;  %v1402_v26 = vmax.f32 %v1304_v19, 0.0  ;;  %v1303_v27 = vadd.f32 %v2252_v38, %v1198_v20  ;;  %v1452_v28 = vmax.f32 %v1354_v21, 0.0  ;;  %v1201_v29 = vmul.f32 %v1891_v23, %v2247_v36 }
 0x11f   : > { %1548 = vst.msk [vmem:[%s2265_s6 + $0x2a0] sm:$0xff] %vm1463_vm2, %v1449_v22  ;;  %v1353_v30 = vadd.f32 %v2252_v38, %v1248_v24  ;;  %v856_v31 = vpop.f32.mrf.mxu0  ;;  %v1251_v32 = vmul.f32 %v1966_v25, %v2247_v36  ;;  %v1106_v33 = vpop.f32.mrf.mxu1 }
 0x120   : > { %1501 = vst.msk [vmem:[%s2265_s6 + $0x128] sm:$0xff] %vm1463_vm2, %v1402_v26  ;;  %v1401_v34 = vmax.f32 %v1303_v27, 0.0  ;;  %1551 = vst.msk [vmem:[%s2265_s6 + $0x2b8] sm:$0xff] %vm1463_vm2, %v1452_v28  ;;  %v1306_v35 = vadd.f32 %v2252_v38, %v1201_v29  ;;  %v1200_v37 = vmul.f32 %v2247_v36, %v856_v31  ;;  %v1250_v39 = vmul.f32 %v2247_v36, %v1106_v33 }
 0x121   : > { %v1451_v40 = vmax.f32 %v1353_v30, 0.0  ;;  %v1356_v41 = vadd.f32 %v2252_v38, %v1251_v32  ;;  %v1894_v42 = vpop.f32.mrf.mxu0  ;;  %v1969_v43 = vpop.f32.mrf.mxu1 }
 0x122   : > { %1500 = vst.msk [vmem:[%s2265_s6 + $0x120] sm:$0xff] %vm1463_vm2, %v1401_v34  ;;  %v1404_v44 = vmax.f32 %v1306_v35, 0.0  ;;  %v1305_v45 = vadd.f32 %v2252_v38, %v1200_v37  ;;  %v1203_v46 = vmul.f32 %v1894_v42, %v2247_v36  ;;  %v1355_v47 = vadd.f32 %v2252_v38, %v1250_v39 }
 0x123   : > { %1550 = vst.msk [vmem:[%s2265_s6 + $0x2b0] sm:$0xff] %vm1463_vm2, %v1451_v40  ;;  %v1454_v48 = vmax.f32 %v1356_v41, 0.0  ;;  %v866_v49 = vpop.f32.mrf.mxu0  ;;  %v1253_v50 = vmul.f32 %v1969_v43, %v2247_v36  ;;  %v1116_v51 = vpop.f32.mrf.mxu1 }
 0x124   : > { %1503 = vst.msk [vmem:[%s2265_s6 + $0x138] sm:$0xff] %vm1463_vm2, %v1404_v44  ;;  %v1403_v52 = vmax.f32 %v1305_v45, 0.0  ;;  %v1308_v53 = vadd.f32 %v2252_v38, %v1203_v46  ;;  %v1453_v54 = vmax.f32 %v1355_v47, 0.0  ;;  %v1202_v55 = vmul.f32 %v2247_v36, %v866_v49 }
 0x125   : > { %1553 = vst.msk [vmem:[%s2265_s6 + $0x2c8] sm:$0xff] %vm1463_vm2, %v1454_v48  ;;  %v1358_v56 = vadd.f32 %v2252_v38, %v1253_v50  ;;  %v1897_v57 = vpop.f32.mrf.mxu0  ;;  %v1252_v58 = vmul.f32 %v2247_v36, %v1116_v51  ;;  %v1972_v59 = vpop.f32.mrf.mxu1 }
 0x126   : > { %1502 = vst.msk [vmem:[%s2265_s6 + $0x130] sm:$0xff] %vm1463_vm2, %v1403_v52  ;;  %v1406_v60 = vmax.f32 %v1308_v53, 0.0  ;;  %1552 = vst.msk [vmem:[%s2265_s6 + $0x2c0] sm:$0xff] %vm1463_vm2, %v1453_v54  ;;  %v1307_v61 = vadd.f32 %v2252_v38, %v1202_v55  ;;  %v1205_v62 = vmul.f32 %v1897_v57, %v2247_v36  ;;  %v1255_v63 = vmul.f32 %v1972_v59, %v2247_v36 }
 0x127   : > { %v1456_v0 = vmax.f32 %v1358_v56, 0.0  ;;  %v1357_v1 = vadd.f32 %v2252_v38, %v1252_v58  ;;  %v876_v2 = vpop.f32.mrf.mxu0  ;;  %v1126_v3 = vpop.f32.mrf.mxu1 }
 0x128   : > { %1505 = vst.msk [vmem:[%s2265_s6 + $0x148] sm:$0xff] %vm1463_vm2, %v1406_v60  ;;  %v1405_v4 = vmax.f32 %v1307_v61, 0.0  ;;  %v1310_v5 = vadd.f32 %v2252_v38, %v1205_v62  ;;  %v1204_v6 = vmul.f32 %v2247_v36, %v876_v2  ;;  %v1360_v7 = vadd.f32 %v2252_v38, %v1255_v63 }
 0x129   : > { %1555 = vst.msk [vmem:[%s2265_s6 + $0x2d8] sm:$0xff] %vm1463_vm2, %v1456_v0  ;;  %v1455_v8 = vmax.f32 %v1357_v1, 0.0  ;;  %v1900_v9 = vpop.f32.mrf.mxu0  ;;  %v1254_v10 = vmul.f32 %v2247_v36, %v1126_v3  ;;  %v1975_v11 = vpop.f32.mrf.mxu1 }
 0x12a   : > { %1504 = vst.msk [vmem:[%s2265_s6 + $0x140] sm:$0xff] %vm1463_vm2, %v1405_v4  ;;  %v1408_v12 = vmax.f32 %v1310_v5, 0.0  ;;  %v1309_v13 = vadd.f32 %v2252_v38, %v1204_v6  ;;  %v1458_v14 = vmax.f32 %v1360_v7, 0.0  ;;  %v1207_v15 = vmul.f32 %v1900_v9, %v2247_v36 }
 0x12b   : > { %1554 = vst.msk [vmem:[%s2265_s6 + $0x2d0] sm:$0xff] %vm1463_vm2, %v1455_v8  ;;  %v1359_v16 = vadd.f32 %v2252_v38, %v1254_v10  ;;  %v886_v17 = vpop.f32.mrf.mxu0  ;;  %v1257_v18 = vmul.f32 %v1975_v11, %v2247_v36  ;;  %v1136_v19 = vpop.f32.mrf.mxu1 }
 0x12c   : > { %1507 = vst.msk [vmem:[%s2265_s6 + $0x158] sm:$0xff] %vm1463_vm2, %v1408_v12  ;;  %v1407_v20 = vmax.f32 %v1309_v13, 0.0  ;;  %1557 = vst.msk [vmem:[%s2265_s6 + $0x2e8] sm:$0xff] %vm1463_vm2, %v1458_v14  ;;  %v1312_v21 = vadd.f32 %v2252_v38, %v1207_v15  ;;  %v1206_v22 = vmul.f32 %v2247_v36, %v886_v17  ;;  %v1256_v23 = vmul.f32 %v2247_v36, %v1136_v19 }
 0x12d   : > { %v1457_v24 = vmax.f32 %v1359_v16, 0.0  ;;  %v1362_v25 = vadd.f32 %v2252_v38, %v1257_v18  ;;  %v1903_v26 = vpop.f32.mrf.mxu0  ;;  %v1978_v27 = vpop.f32.mrf.mxu1 }
 0x12e   : > { %1506 = vst.msk [vmem:[%s2265_s6 + $0x150] sm:$0xff] %vm1463_vm2, %v1407_v20  ;;  %v1410_v28 = vmax.f32 %v1312_v21, 0.0  ;;  %v1311_v29 = vadd.f32 %v2252_v38, %v1206_v22  ;;  %v1209_v30 = vmul.f32 %v1903_v26, %v2247_v36  ;;  %v1361_v31 = vadd.f32 %v2252_v38, %v1256_v23 }
 0x12f   : > { %1556 = vst.msk [vmem:[%s2265_s6 + $0x2e0] sm:$0xff] %vm1463_vm2, %v1457_v24  ;;  %v1460_v32 = vmax.f32 %v1362_v25, 0.0  ;;  %v896_v33 = vpop.f32.mrf.mxu0  ;;  %v1259_v34 = vmul.f32 %v1978_v27, %v2247_v36  ;;  %v1146_v35 = vpop.f32.mrf.mxu1 }
 0x130   : > { %1509 = vst.msk [vmem:[%s2265_s6 + $0x168] sm:$0xff] %vm1463_vm2, %v1410_v28  ;;  %v1409_v37 = vmax.f32 %v1311_v29, 0.0  ;;  %v1314_v39 = vadd.f32 %v2252_v38, %v1209_v30  ;;  %v1459_v40 = vmax.f32 %v1361_v31, 0.0  ;;  %v1208_v41 = vmul.f32 %v2247_v36, %v896_v33 }
 0x131   : > { %1559 = vst.msk [vmem:[%s2265_s6 + $0x2f8] sm:$0xff] %vm1463_vm2, %v1460_v32  ;;  %v1364_v42 = vadd.f32 %v2252_v38, %v1259_v34  ;;  %v1906_v43 = vpop.f32.mrf.mxu0  ;;  %v1258_v44 = vmul.f32 %v2247_v36, %v1146_v35 }
 0x132   : > { %1508 = vst.msk [vmem:[%s2265_s6 + $0x160] sm:$0xff] %vm1463_vm2, %v1409_v37  ;;  %v1412_v45 = vmax.f32 %v1314_v39, 0.0  ;;  %1558 = vst.msk [vmem:[%s2265_s6 + $0x2f0] sm:$0xff] %vm1463_vm2, %v1459_v40  ;;  %v1313_v46 = vadd.f32 %v2252_v38, %v1208_v41  ;;  %v1211_v47 = vmul.f32 %v1906_v43, %v2247_v36 }
 0x133   : > { %v1462_v48 = vmax.f32 %v1364_v42, 0.0  ;;  %v1363_v49 = vadd.f32 %v2252_v38, %v1258_v44  ;;  %v906_v50 = vpop.f32.mrf.mxu0 }
 0x134   : > { %1511 = vst.msk [vmem:[%s2265_s6 + $0x178] sm:$0xff] %vm1463_vm2, %v1412_v45  ;;  %v1411_v51 = vmax.f32 %v1313_v46, 0.0  ;;  %v1316_v52 = vadd.f32 %v2252_v38, %v1211_v47  ;;  %v1210_v53 = vmul.f32 %v2247_v36, %v906_v50 }
 0x135   : > { %1561 = vst.msk [vmem:[%s2265_s6 + $0x308] sm:$0xff] %vm1463_vm2, %v1462_v48  ;;  %v1461_v54 = vmax.f32 %v1363_v49, 0.0 }
 0x136   : > { %1510 = vst.msk [vmem:[%s2265_s6 + $0x170] sm:$0xff] %vm1463_vm2, %v1411_v51  ;;  %v1414_v55 = vmax.f32 %v1316_v52, 0.0  ;;  %v1315_v56 = vadd.f32 %v2252_v38, %v1210_v53 }
 0x137   : > { %1560 = vst.msk [vmem:[%s2265_s6 + $0x300] sm:$0xff] %vm1463_vm2, %v1461_v54 }
 0x138   : > { %1513 = vst.msk [vmem:[%s2265_s6 + $0x188] sm:$0xff] %vm1463_vm2, %v1414_v55  ;;  %v1413_v57 = vmax.f32 %v1315_v56, 0.0 }
 0x13a   : > { %1512 = vst.msk [vmem:[%s2265_s6 + $0x180] sm:$0xff] %vm1463_vm2, %v1413_v57 }
 0x13b PF: > { %s14_s15 = sadd.s32 1, %s1997_s15  }
 0x13c   : > { %p11_p4 = scmp.ge.s32.totalorder %s14_s15, 4  }
 0x13e   :  { %13 = sbr.rel (!%p11_p4) target bundleno = 1 (0x1), region = 66 }

// kernel: mha_forward.5
= control target key start
LH: loop header
LB: loop body
LE: loop exit
PB: predicated region body
PF: predicated region fallthrough
CT: control target
= control target key end

     0   :  { %v1444_v0 = vmov 0.0   ;;  %vm1445_vm0 = vmmov 0   ;;  %vm200_vm1 = vcmask 261120   ;;  %vm1129_vm2 = vcmask 523264   ;;  %s2654_s1 = inlined_call_operand.vmem [shape: f32[288,64], index: 1, kind: input, shape index: {}]   ;;  %s2655_s0 = inlined_call_operand.vmem [shape: f32[392,288], index: 0, kind: input, shape index: {}]   ;;  %s2656_s2 = inlined_call_operand.vmem [shape: f32[1,64], index: 2, kind: input, shape index: {}]   ;;  %s2657_s3 = inlined_call_operand.vmem [shape: f32[1,64], index: 3, kind: input, shape index: {}]   ;;  %s2658_s4 = inlined_call_operand.vmem [shape: f32[392,64], index: 4, kind: output, shape index: {}]  }
   0x1   :  { %348 = vmatprep.subr.mxu0 %v1444_v0  ;;  %v179_v1 = vld [vmem:[%s2654_s1 + $0x78] sm:$0xff]  ;;  %v178_v2 = vld [vmem:[%s2654_s1 + $0x70] sm:$0xff]  ;;  %1287 = vmatprep.subr.mxu1 %v1444_v0  ;;  %v177_v3 = vld [vmem:[%s2654_s1 + $0x68] sm:$0xff] }
   0x2   :  { %349 = vmatpush1.msra.mxu0 %v179_v1  ;;  %1295 = vmatprep.mubr.msk.f32.mxu1 %vm1445_vm0, %v1444_v0  ;;  %v176_v4 = vld [vmem:[%s2654_s1 + $0x60] sm:$0xff]  ;;  %v175_v5 = vld [vmem:[%s2654_s1 + $0x58] sm:$0xff]  ;;  %v174_v6 = vld [vmem:[%s2654_s1 + $0x50] sm:$0xff] }
   0x3   :  { %350 = vmatprep.subr.mxu0 %v1444_v0  ;;  %v199_v7 = vld [vmem:[%s2654_s1 + $0x118] sm:$0xff]  ;;  %v173_v8 = vld [vmem:[%s2654_s1 + $0x48] sm:$0xff]  ;;  %v198_v9 = vld [vmem:[%s2654_s1 + $0x110] sm:$0xff] }
   0x4   :  { %351 = vmatpush1.msra.mxu0 %v178_v2  ;;  %1288 = vmatpush3.msra.mxu1 %v199_v7  ;;  %v197_v10 = vld [vmem:[%s2654_s1 + $0x108] sm:$0xff]  ;;  %v172_v11 = vld [vmem:[%s2654_s1 + $0x40] sm:$0xff]  ;;  %v171_v13 = vld [vmem:[%s2654_s1 + $0x38] sm:$0xff] }
   0x5   :  { %352 = vmatprep.subr.mxu0 %v1444_v0  ;;  %1289 = vmatprep.subr.mxu1 %v1444_v0  ;;  %v196_v12 = vld [vmem:[%s2654_s1 + $0x100] sm:$0xff]  ;;  %v19_v14 = vld [vmem:[%s2655_s0 + $0x10] sm:$0xff]  ;;  %v18_v15 = vld [vmem:[%s2655_s0 + $0x8] sm:$0xff] }
   0x6   :  { %353 = vmatpush1.msra.mxu0 %v177_v3  ;;  %1290 = vmatpush3.msra.mxu1 %v198_v9  ;;  %v170_v16 = vld [vmem:[%s2654_s1 + $0x30] sm:$0xff]  ;;  %v169_v17 = vld [vmem:[%s2654_s1 + $0x28] sm:$0xff]  ;;  %v168_v19 = vld [vmem:[%s2654_s1 + $0x20] sm:$0xff] }
   0x7   :  { %354 = vmatprep.subr.mxu0 %v1444_v0  ;;  %1291 = vmatprep.subr.mxu1 %v1444_v0  ;;  %v22_v18 = vld [vmem:[%s2655_s0 + $0x28] sm:$0xff]  ;;  %v167_v20 = vld [vmem:[%s2654_s1 + $0x18] sm:$0xff]  ;;  %v25_v21 = vld [vmem:[%s2655_s0 + $0x40] sm:$0xff] }
   0x8   :  { %355 = vmatpush1.msra.mxu0 %v176_v4  ;;  %1292 = vmatpush3.msra.mxu1 %v197_v10  ;;  %v166_v22 = vld [vmem:[%s2654_s1 + $0x10] sm:$0xff]  ;;  %v165_v23 = vld [vmem:[%s2654_s1 + $0x8] sm:$0xff]  ;;  %v28_v24 = vld [vmem:[%s2655_s0 + $0x58] sm:$0xff] }
   0x9   :  { %356 = vmatprep.subr.mxu0 %v1444_v0  ;;  %1293 = vmatprep.subr.mxu1 %v1444_v0  ;;  %v164_v25 = vld [vmem:[%s2654_s1] sm:$0xff]  ;;  %v195_v26 = vld [vmem:[%s2654_s1 + $0xf8] sm:$0xff]  ;;  %v31_v27 = vld [vmem:[%s2655_s0 + $0x70] sm:$0xff] }
   0xa   :  { %357 = vmatpush1.msra.mxu0 %v175_v5  ;;  %1294 = vmatpush3.msra.mxu1 %v196_v12  ;;  %v194_v28 = vld [vmem:[%s2654_s1 + $0xf0] sm:$0xff]  ;;  %v193_v29 = vld [vmem:[%s2654_s1 + $0xe8] sm:$0xff]  ;;  %v192_v31 = vld [vmem:[%s2654_s1 + $0xe0] sm:$0xff] }
   0xb   :  { %358 = vmatprep.subr.mxu0 %v1444_v0  ;;  %1296 = vmatmul.mubr.msk.f32.vlgmr.msra.gmra.mxu1 %vm200_vm1, %v19_v14  ;;  %v34_v30 = vld [vmem:[%s2655_s0 + $0x88] sm:$0xff]  ;;  %v191_v32 = vld [vmem:[%s2654_s1 + $0xd8] sm:$0xff]  ;;  %v37_v33 = vld [vmem:[%s2655_s0 + $0xa0] sm:$0xff] }
   0xc   :  { %359 = vmatpush1.msra.mxu0 %v174_v6  ;;  %412 = vmatprep.mubr.f32.mxu0 %v18_v15  ;;  %v190_v34 = vld [vmem:[%s2654_s1 + $0xd0] sm:$0xff]  ;;  %v189_v35 = vld [vmem:[%s2654_s1 + $0xc8] sm:$0xff]  ;;  %v40_v36 = vld [vmem:[%s2655_s0 + $0xb8] sm:$0xff] }
   0xd   :  { %360 = vmatprep.subr.mxu0 %v1444_v0  ;;  %1298 = vmatprep.mubr.msk.f32.mxu1 %vm1445_vm0, %v1444_v0  ;;  %v188_v37 = vld [vmem:[%s2654_s1 + $0xc0] sm:$0xff]  ;;  %v187_v38 = vld [vmem:[%s2654_s1 + $0xb8] sm:$0xff]  ;;  %v43_v39 = vld [vmem:[%s2655_s0 + $0xd0] sm:$0xff] }
   0xe   :  { %361 = vmatpush1.msra.mxu0 %v173_v8  ;;  %v186_v40 = vld [vmem:[%s2654_s1 + $0xb0] sm:$0xff]  ;;  %v185_v41 = vld [vmem:[%s2654_s1 + $0xa8] sm:$0xff]  ;;  %v184_v43 = vld [vmem:[%s2654_s1 + $0xa0] sm:$0xff] }
   0xf   :  { %362 = vmatprep.subr.mxu0 %v1444_v0  ;;  %1299 = vmatmul.mubr.msk.f32.gmra.mxu1 %vm200_vm1, %v22_v18  ;;  %v46_v42 = vld [vmem:[%s2655_s0 + $0xe8] sm:$0xff]  ;;  %v183_v44 = vld [vmem:[%s2654_s1 + $0x98] sm:$0xff]  ;;  %v49_v45 = vld [vmem:[%s2655_s0 + $0x100] sm:$0xff] }
  0x10   :  { %363 = vmatpush1.msra.mxu0 %v172_v11  ;;  %1301 = vmatprep.mubr.msk.f32.mxu1 %vm1445_vm0, %v1444_v0  ;;  %v182_v46 = vld [vmem:[%s2654_s1 + $0x90] sm:$0xff]  ;;  %v181_v47 = vld [vmem:[%s2654_s1 + $0x88] sm:$0xff]  ;;  %v52_v48 = vld [vmem:[%s2655_s0 + $0x118] sm:$0xff] }
  0x11   :  { %364 = vmatprep.subr.mxu0 %v1444_v0  ;;  %v180_v49 = vld [vmem:[%s2654_s1 + $0x80] sm:$0xff]  ;;  %v55_v52 = vld [vmem:[%s2655_s0 + $0x130] sm:$0xff]  ;;  %v20_v53 = vld [vmem:[%s2655_s0 + $0x18] sm:$0xff] }
  0x12   :  { %365 = vmatpush1.msra.mxu0 %v171_v13  ;;  %v17_v50 = vld [vmem:[%s2655_s0] sm:$0xff]  ;;  %v24_v54 = vld [vmem:[%s2655_s0 + $0x38] sm:$0xff]  ;;  %v58_v55 = vld [vmem:[%s2655_s0 + $0x148] sm:$0xff] }
  0x13   :  { %366 = vmatprep.subr.mxu0 %v1444_v0  ;;  %1302 = vmatmul.mubr.msk.f32.gmra.mxu1 %vm200_vm1, %v25_v21  ;;  %v21_v51 = vld [vmem:[%s2655_s0 + $0x20] sm:$0xff]  ;;  %v23_v56 = vld [vmem:[%s2655_s0 + $0x30] sm:$0xff]  ;;  %v26_v59 = vld [vmem:[%s2655_s0 + $0x48] sm:$0xff] }
  0x14   :  { %367 = vmatpush1.msra.mxu0 %v170_v16  ;;  %1304 = vmatprep.mubr.msk.f32.mxu1 %vm1445_vm0, %v1444_v0  ;;  %v27_v57 = vld [vmem:[%s2655_s0 + $0x50] sm:$0xff]  ;;  %v61_v58 = vld [vmem:[%s2655_s0 + $0x160] sm:$0xff]  ;;  %v30_v60 = vld [vmem:[%s2655_s0 + $0x68] sm:$0xff] }
  0x15   :  { %368 = vmatprep.subr.mxu0 %v1444_v0  ;;  %v64_v61 = vld [vmem:[%s2655_s0 + $0x178] sm:$0xff]  ;;  %v29_v62 = vld [vmem:[%s2655_s0 + $0x60] sm:$0xff]  ;;  %v67_v1 = vld [vmem:[%s2655_s0 + $0x190] sm:$0xff] }
  0x16   :  { %369 = vmatpush1.msra.mxu0 %v169_v17  ;;  %v33_v63 = vld [vmem:[%s2655_s0 + $0x80] sm:$0xff]  ;;  %v32_v2 = vld [vmem:[%s2655_s0 + $0x78] sm:$0xff]  ;;  %v70_v4 = vld [vmem:[%s2655_s0 + $0x1a8] sm:$0xff] }
  0x17   :  { %370 = vmatprep.subr.mxu0 %v1444_v0  ;;  %1305 = vmatmul.mubr.msk.f32.gmra.mxu1 %vm200_vm1, %v28_v24  ;;  %v36_v3 = vld [vmem:[%s2655_s0 + $0x98] sm:$0xff]  ;;  %v35_v5 = vld [vmem:[%s2655_s0 + $0x90] sm:$0xff]  ;;  %v73_v7 = vld [vmem:[%s2655_s0 + $0x1c0] sm:$0xff] }
  0x18   :  { %371 = vmatpush1.msra.mxu0 %v168_v19  ;;  %1307 = vmatprep.mubr.msk.f32.mxu1 %vm1445_vm0, %v1444_v0  ;;  %v39_v6 = vld [vmem:[%s2655_s0 + $0xb0] sm:$0xff]  ;;  %v38_v8 = vld [vmem:[%s2655_s0 + $0xa8] sm:$0xff]  ;;  %v76_v10 = vld [vmem:[%s2655_s0 + $0x1d8] sm:$0xff] }
  0x19   :  { %372 = vmatprep.subr.mxu0 %v1444_v0  ;;  %v42_v9 = vld [vmem:[%s2655_s0 + $0xc8] sm:$0xff]  ;;  %v41_v11 = vld [vmem:[%s2655_s0 + $0xc0] sm:$0xff]  ;;  %v79_v13 = vld [vmem:[%s2655_s0 + $0x1f0] sm:$0xff] }
  0x1a   :  { %373 = vmatpush1.msra.mxu0 %v167_v20  ;;  %v45_v12 = vld [vmem:[%s2655_s0 + $0xe0] sm:$0xff]  ;;  %v44_v14 = vld [vmem:[%s2655_s0 + $0xd8] sm:$0xff]  ;;  %v82_v16 = vld [vmem:[%s2655_s0 + $0x208] sm:$0xff] }
  0x1b   :  { %374 = vmatprep.subr.mxu0 %v1444_v0  ;;  %1308 = vmatmul.mubr.msk.f32.gmra.mxu1 %vm200_vm1, %v31_v27  ;;  %v48_v15 = vld [vmem:[%s2655_s0 + $0xf8] sm:$0xff]  ;;  %v47_v17 = vld [vmem:[%s2655_s0 + $0xf0] sm:$0xff]  ;;  %v85_v19 = vld [vmem:[%s2655_s0 + $0x220] sm:$0xff] }
  0x1c   :  { %375 = vmatpush1.msra.mxu0 %v166_v22  ;;  %1310 = vmatprep.mubr.msk.f32.mxu1 %vm1445_vm0, %v1444_v0  ;;  %v51_v18 = vld [vmem:[%s2655_s0 + $0x110] sm:$0xff]  ;;  %v50_v20 = vld [vmem:[%s2655_s0 + $0x108] sm:$0xff]  ;;  %v88_v22 = vld [vmem:[%s2655_s0 + $0x238] sm:$0xff] }
  0x1d   :  { %376 = vmatprep.subr.mxu0 %v1444_v0  ;;  %v54_v21 = vld [vmem:[%s2655_s0 + $0x128] sm:$0xff]  ;;  %v57_v24 = vld [vmem:[%s2655_s0 + $0x140] sm:$0xff]  ;;  %v60_v27 = vld [vmem:[%s2655_s0 + $0x158] sm:$0xff] }
  0x1e   :  { %377 = vmatpush1.msra.mxu0 %v165_v23  ;;  %v53_v23 = vld [vmem:[%s2655_s0 + $0x120] sm:$0xff] }
  0x1f   :  { %378 = vmatprep.subr.mxu0 %v1444_v0  ;;  %1311 = vmatmul.mubr.msk.f32.gmra.mxu1 %vm200_vm1, %v34_v30  ;;  %v63_v30 = vld [vmem:[%s2655_s0 + $0x170] sm:$0xff] }
  0x20   :  { %379 = vmatpush1.msra.mxu0 %v164_v25  ;;  %1313 = vmatprep.mubr.msk.f32.mxu1 %vm1445_vm0, %v1444_v0  ;;  %v91_v25 = vld [vmem:[%s2655_s0 + $0x250] sm:$0xff] }
  0x21   :  { %380 = vmatprep.subr.mxu0 %v1444_v0 }
  0x22   :  { %381 = vmatpush2.msra.mxu0 %v195_v26  ;;  %v56_v26 = vld [vmem:[%s2655_s0 + $0x138] sm:$0xff] }
  0x23   :  { %382 = vmatprep.subr.mxu0 %v1444_v0  ;;  %1314 = vmatmul.mubr.msk.f32.gmra.mxu1 %vm200_vm1, %v37_v33  ;;  %v66_v33 = vld [vmem:[%s2655_s0 + $0x188] sm:$0xff] }
  0x24   :  { %383 = vmatpush2.msra.mxu0 %v194_v28  ;;  %1316 = vmatprep.mubr.msk.f32.mxu1 %vm1445_vm0, %v1444_v0  ;;  %v94_v28 = vld [vmem:[%s2655_s0 + $0x268] sm:$0xff] }
  0x25   :  { %384 = vmatprep.subr.mxu0 %v1444_v0 }
  0x26   :  { %385 = vmatpush2.msra.mxu0 %v193_v29  ;;  %v59_v29 = vld [vmem:[%s2655_s0 + $0x150] sm:$0xff] }
  0x27   :  { %386 = vmatprep.subr.mxu0 %v1444_v0  ;;  %1317 = vmatmul.mubr.msk.f32.gmra.mxu1 %vm200_vm1, %v40_v36  ;;  %v69_v36 = vld [vmem:[%s2655_s0 + $0x1a0] sm:$0xff] }
  0x28   :  { %387 = vmatpush2.msra.mxu0 %v192_v31  ;;  %1319 = vmatprep.mubr.msk.f32.mxu1 %vm1445_vm0, %v1444_v0  ;;  %v97_v31 = vld [vmem:[%s2655_s0 + $0x280] sm:$0xff] }
  0x29   :  { %388 = vmatprep.subr.mxu0 %v1444_v0 }
  0x2a   :  { %389 = vmatpush2.msra.mxu0 %v191_v32  ;;  %v62_v32 = vld [vmem:[%s2655_s0 + $0x168] sm:$0xff] }
  0x2b   :  { %390 = vmatprep.subr.mxu0 %v1444_v0  ;;  %1320 = vmatmul.mubr.msk.f32.gmra.mxu1 %vm200_vm1, %v43_v39  ;;  %v72_v39 = vld [vmem:[%s2655_s0 + $0x1b8] sm:$0xff] }
  0x2c   :  { %391 = vmatpush2.msra.mxu0 %v190_v34  ;;  %1322 = vmatprep.mubr.msk.f32.mxu1 %vm1445_vm0, %v1444_v0  ;;  %v100_v34 = vld [vmem:[%s2655_s0 + $0x298] sm:$0xff] }
  0x2d   :  { %392 = vmatprep.subr.mxu0 %v1444_v0 }
  0x2e   :  { %393 = vmatpush2.msra.mxu0 %v189_v35  ;;  %v65_v35 = vld [vmem:[%s2655_s0 + $0x180] sm:$0xff] }
  0x2f   :  { %394 = vmatprep.subr.mxu0 %v1444_v0  ;;  %1323 = vmatmul.mubr.msk.f32.gmra.mxu1 %vm200_vm1, %v46_v42  ;;  %v75_v42 = vld [vmem:[%s2655_s0 + $0x1d0] sm:$0xff] }
  0x30   :  { %395 = vmatpush2.msra.mxu0 %v188_v37  ;;  %1325 = vmatprep.mubr.msk.f32.mxu1 %vm1445_vm0, %v1444_v0  ;;  %v103_v37 = vld [vmem:[%s2655_s0 + $0x2b0] sm:$0xff] }
  0x31   :  { %396 = vmatprep.subr.mxu0 %v1444_v0 }
  0x32   :  { %397 = vmatpush2.msra.mxu0 %v187_v38  ;;  %v68_v38 = vld [vmem:[%s2655_s0 + $0x198] sm:$0xff] }
  0x33   :  { %398 = vmatprep.subr.mxu0 %v1444_v0  ;;  %1326 = vmatmul.mubr.msk.f32.gmra.mxu1 %vm200_vm1, %v49_v45  ;;  %v78_v45 = vld [vmem:[%s2655_s0 + $0x1e8] sm:$0xff] }
  0x34   :  { %399 = vmatpush2.msra.mxu0 %v186_v40  ;;  %1328 = vmatprep.mubr.msk.f32.mxu1 %vm1445_vm0, %v1444_v0  ;;  %v106_v40 = vld [vmem:[%s2655_s0 + $0x2c8] sm:$0xff] }
  0x35   :  { %400 = vmatprep.subr.mxu0 %v1444_v0 }
  0x36   :  { %401 = vmatpush2.msra.mxu0 %v185_v41  ;;  %v71_v41 = vld [vmem:[%s2655_s0 + $0x1b0] sm:$0xff] }
  0x37   :  { %402 = vmatprep.subr.mxu0 %v1444_v0  ;;  %1329 = vmatmul.mubr.msk.f32.gmra.mxu1 %vm200_vm1, %v52_v48  ;;  %v81_v48 = vld [vmem:[%s2655_s0 + $0x200] sm:$0xff] }
  0x38   :  { %403 = vmatpush2.msra.mxu0 %v184_v43  ;;  %1331 = vmatprep.mubr.msk.f32.mxu1 %vm1445_vm0, %v1444_v0  ;;  %v109_v43 = vld [vmem:[%s2655_s0 + $0x2e0] sm:$0xff] }
  0x39   :  { %404 = vmatprep.subr.mxu0 %v1444_v0 }
  0x3a   :  { %405 = vmatpush2.msra.mxu0 %v183_v44  ;;  %v74_v44 = vld [vmem:[%s2655_s0 + $0x1c8] sm:$0xff] }
  0x3b   :  { %406 = vmatprep.subr.mxu0 %v1444_v0  ;;  %1332 = vmatmul.mubr.msk.f32.gmra.mxu1 %vm200_vm1, %v55_v52  ;;  %v118_v52 = vld [vmem:[%s2655_s0 + $0x328] sm:$0xff] }
  0x3c   :  { %407 = vmatpush2.msra.mxu0 %v182_v46  ;;  %1334 = vmatprep.mubr.msk.f32.mxu1 %vm1445_vm0, %v1444_v0  ;;  %v112_v46 = vld [vmem:[%s2655_s0 + $0x2f8] sm:$0xff] }
  0x3d   :  { %408 = vmatprep.subr.mxu0 %v1444_v0 }
  0x3e   :  { %409 = vmatpush2.msra.mxu0 %v181_v47  ;;  %v77_v47 = vld [vmem:[%s2655_s0 + $0x1e0] sm:$0xff] }
  0x3f   :  { %410 = vmatprep.subr.mxu0 %v1444_v0  ;;  %1335 = vmatmul.mubr.msk.f32.gmra.mxu1 %vm200_vm1, %v58_v55  ;;  %v121_v55 = vld [vmem:[%s2655_s0 + $0x340] sm:$0xff] }
  0x40   :  { %411 = vmatpush2.msra.mxu0 %v180_v49  ;;  %1337 = vmatprep.mubr.msk.f32.mxu1 %vm1445_vm0, %v1444_v0  ;;  %v115_v49 = vld [vmem:[%s2655_s0 + $0x310] sm:$0xff] }
  0x41   :  { %413 = vmatmul.mubr.f32.vlgmr.msra.gmra.mxu0 %v17_v50  ;;  %v80_v50 = vld [vmem:[%s2655_s0 + $0x1f8] sm:$0xff] }
  0x42   :  { %417 = vmatprep.mubr.f32.mxu0 %v21_v51  ;;  %v84_v51 = vld [vmem:[%s2655_s0 + $0x218] sm:$0xff] }
  0x43   :  { %1338 = vmatmul.mubr.msk.f32.gmra.mxu1 %vm200_vm1, %v61_v58  ;;  %v124_v58 = vld [vmem:[%s2655_s0 + $0x358] sm:$0xff] }
  0x44   :  { %1340 = vmatprep.mubr.msk.f32.mxu1 %vm1445_vm0, %v1444_v0 }
  0x45   :  { %418 = vmatmul.mubr.f32.gmra.mxu0 %v20_v53  ;;  %v83_v53 = vld [vmem:[%s2655_s0 + $0x210] sm:$0xff] }
  0x46   :  { %422 = vmatprep.mubr.f32.mxu0 %v24_v54  ;;  %v87_v54 = vld [vmem:[%s2655_s0 + $0x230] sm:$0xff] }
  0x47   :  { %1341 = vmatmul.mubr.msk.f32.gmra.mxu1 %vm200_vm1, %v64_v61  ;;  %v127_v61 = vld [vmem:[%s2655_s0 + $0x370] sm:$0xff] }
  0x48   :  { %1343 = vmatprep.mubr.msk.f32.mxu1 %vm1445_vm0, %v1444_v0 }
  0x49   :  { %423 = vmatmul.mubr.f32.gmra.mxu0 %v23_v56  ;;  %v86_v56 = vld [vmem:[%s2655_s0 + $0x228] sm:$0xff] }
  0x4a   :  { %427 = vmatprep.mubr.f32.mxu0 %v27_v57  ;;  %v90_v57 = vld [vmem:[%s2655_s0 + $0x248] sm:$0xff] }
  0x4b   :  { %1344 = vmatmul.mubr.msk.f32.gmra.mxu1 %vm200_vm1, %v67_v1  ;;  %v130_v1 = vld [vmem:[%s2655_s0 + $0x388] sm:$0xff] }
  0x4c   :  { %1346 = vmatprep.mubr.msk.f32.mxu1 %vm1445_vm0, %v1444_v0 }
  0x4d   :  { %428 = vmatmul.mubr.f32.gmra.mxu0 %v26_v59  ;;  %v89_v59 = vld [vmem:[%s2655_s0 + $0x240] sm:$0xff] }
  0x4e   :  { %432 = vmatprep.mubr.f32.mxu0 %v30_v60  ;;  %v93_v60 = vld [vmem:[%s2655_s0 + $0x260] sm:$0xff] }
  0x4f   :  { %1347 = vmatmul.mubr.msk.f32.gmra.mxu1 %vm200_vm1, %v70_v4  ;;  %v133_v4 = vld [vmem:[%s2655_s0 + $0x3a0] sm:$0xff] }
  0x50   :  { %1349 = vmatprep.mubr.msk.f32.mxu1 %vm1445_vm0, %v1444_v0 }
  0x51   :  { %433 = vmatmul.mubr.f32.gmra.mxu0 %v29_v62  ;;  %v92_v62 = vld [vmem:[%s2655_s0 + $0x258] sm:$0xff] }
  0x52   :  { %437 = vmatprep.mubr.f32.mxu0 %v33_v63  ;;  %v96_v63 = vld [vmem:[%s2655_s0 + $0x278] sm:$0xff] }
  0x53   :  { %1350 = vmatmul.mubr.msk.f32.gmra.mxu1 %vm200_vm1, %v73_v7  ;;  %v136_v7 = vld [vmem:[%s2655_s0 + $0x3b8] sm:$0xff] }
  0x54   :  { %1352 = vmatprep.mubr.msk.f32.mxu1 %vm1445_vm0, %v1444_v0 }
  0x55   :  { %438 = vmatmul.mubr.f32.gmra.mxu0 %v32_v2  ;;  %v95_v2 = vld [vmem:[%s2655_s0 + $0x270] sm:$0xff] }
  0x56   :  { %442 = vmatprep.mubr.f32.mxu0 %v36_v3  ;;  %v99_v3 = vld [vmem:[%s2655_s0 + $0x290] sm:$0xff] }
  0x57   :  { %1353 = vmatmul.mubr.msk.f32.gmra.mxu1 %vm200_vm1, %v76_v10  ;;  %v139_v10 = vld [vmem:[%s2655_s0 + $0x3d0] sm:$0xff] }
  0x58   :  { %1355 = vmatprep.mubr.msk.f32.mxu1 %vm1445_vm0, %v1444_v0 }
  0x59   :  { %443 = vmatmul.mubr.f32.gmra.mxu0 %v35_v5  ;;  %v98_v5 = vld [vmem:[%s2655_s0 + $0x288] sm:$0xff] }
  0x5a   :  { %447 = vmatprep.mubr.f32.mxu0 %v39_v6  ;;  %v102_v6 = vld [vmem:[%s2655_s0 + $0x2a8] sm:$0xff] }
  0x5b   :  { %1356 = vmatmul.mubr.msk.f32.gmra.mxu1 %vm200_vm1, %v79_v13  ;;  %v142_v13 = vld [vmem:[%s2655_s0 + $0x3e8] sm:$0xff] }
  0x5c   :  { %1358 = vmatprep.mubr.msk.f32.mxu1 %vm1445_vm0, %v1444_v0 }
  0x5d   :  { %448 = vmatmul.mubr.f32.gmra.mxu0 %v38_v8  ;;  %v101_v8 = vld [vmem:[%s2655_s0 + $0x2a0] sm:$0xff] }
  0x5e   :  { %452 = vmatprep.mubr.f32.mxu0 %v42_v9  ;;  %v105_v9 = vld [vmem:[%s2655_s0 + $0x2c0] sm:$0xff] }
  0x5f   :  { %1359 = vmatmul.mubr.msk.f32.gmra.mxu1 %vm200_vm1, %v82_v16  ;;  %v145_v16 = vld [vmem:[%s2655_s0 + $0x400] sm:$0xff] }
  0x60   :  { %1361 = vmatprep.mubr.msk.f32.mxu1 %vm1445_vm0, %v1444_v0 }
  0x61   :  { %453 = vmatmul.mubr.f32.gmra.mxu0 %v41_v11  ;;  %v104_v11 = vld [vmem:[%s2655_s0 + $0x2b8] sm:$0xff] }
  0x62   :  { %457 = vmatprep.mubr.f32.mxu0 %v45_v12  ;;  %v108_v12 = vld [vmem:[%s2655_s0 + $0x2d8] sm:$0xff] }
  0x63   :  { %1362 = vmatmul.mubr.msk.f32.gmra.mxu1 %vm200_vm1, %v85_v19  ;;  %v148_v19 = vld [vmem:[%s2655_s0 + $0x418] sm:$0xff] }
  0x64   :  { %1364 = vmatprep.mubr.msk.f32.mxu1 %vm1445_vm0, %v1444_v0 }
  0x65   :  { %458 = vmatmul.mubr.f32.gmra.mxu0 %v44_v14  ;;  %v107_v14 = vld [vmem:[%s2655_s0 + $0x2d0] sm:$0xff] }
  0x66   :  { %462 = vmatprep.mubr.f32.mxu0 %v48_v15  ;;  %v111_v15 = vld [vmem:[%s2655_s0 + $0x2f0] sm:$0xff] }
  0x67   :  { %1365 = vmatmul.mubr.msk.f32.gmra.mxu1 %vm200_vm1, %v88_v22  ;;  %v151_v22 = vld [vmem:[%s2655_s0 + $0x430] sm:$0xff] }
  0x68   :  { %1367 = vmatprep.mubr.msk.f32.mxu1 %vm1445_vm0, %v1444_v0 }
  0x69   :  { %463 = vmatmul.mubr.f32.gmra.mxu0 %v47_v17  ;;  %v110_v17 = vld [vmem:[%s2655_s0 + $0x2e8] sm:$0xff] }
  0x6a   :  { %467 = vmatprep.mubr.f32.mxu0 %v51_v18  ;;  %v114_v18 = vld [vmem:[%s2655_s0 + $0x308] sm:$0xff] }
  0x6b   :  { %1368 = vmatmul.mubr.msk.f32.gmra.mxu1 %vm200_vm1, %v91_v25  ;;  %v154_v25 = vld [vmem:[%s2655_s0 + $0x448] sm:$0xff] }
  0x6c   :  { %1370 = vmatprep.mubr.msk.f32.mxu1 %vm1445_vm0, %v1444_v0 }
  0x6d   :  { %468 = vmatmul.mubr.f32.gmra.mxu0 %v50_v20  ;;  %v113_v20 = vld [vmem:[%s2655_s0 + $0x300] sm:$0xff] }
  0x6e   :  { %472 = vmatprep.mubr.f32.mxu0 %v54_v21  ;;  %v117_v21 = vld [vmem:[%s2655_s0 + $0x320] sm:$0xff] }
  0x6f   :  { %1371 = vmatmul.mubr.msk.f32.gmra.mxu1 %vm200_vm1, %v94_v28  ;;  %v157_v28 = vld [vmem:[%s2655_s0 + $0x460] sm:$0xff] }
  0x70   :  { %1373 = vmatprep.mubr.msk.f32.mxu1 %vm1445_vm0, %v1444_v0 }
  0x71   :  { %473 = vmatmul.mubr.f32.gmra.mxu0 %v53_v23  ;;  %v116_v23 = vld [vmem:[%s2655_s0 + $0x318] sm:$0xff] }
  0x72   :  { %477 = vmatprep.mubr.f32.mxu0 %v57_v24  ;;  %v120_v24 = vld [vmem:[%s2655_s0 + $0x338] sm:$0xff] }
  0x73   :  { %1374 = vmatmul.mubr.msk.f32.gmra.mxu1 %vm200_vm1, %v97_v31  ;;  %v160_v31 = vld [vmem:[%s2655_s0 + $0x478] sm:$0xff] }
  0x74   :  { %1376 = vmatprep.mubr.msk.f32.mxu1 %vm1445_vm0, %v1444_v0 }
  0x75   :  { %478 = vmatmul.mubr.f32.gmra.mxu0 %v56_v26  ;;  %v119_v26 = vld [vmem:[%s2655_s0 + $0x330] sm:$0xff] }
  0x76   :  { %482 = vmatprep.mubr.f32.mxu0 %v60_v27  ;;  %v123_v27 = vld [vmem:[%s2655_s0 + $0x350] sm:$0xff] }
  0x77   :  { %1377 = vmatmul.mubr.msk.f32.gmra.mxu1 %vm200_vm1, %v100_v34  ;;  %v163_v34 = vld [vmem:[%s2655_s0 + $0x490] sm:$0xff] }
  0x78   :  { %1379 = vmatprep.mubr.msk.f32.mxu1 %vm1445_vm0, %v1444_v0 }
  0x79   :  { %483 = vmatmul.mubr.f32.gmra.mxu0 %v59_v29  ;;  %v122_v29 = vld [vmem:[%s2655_s0 + $0x348] sm:$0xff] }
  0x7a   :  { %487 = vmatprep.mubr.f32.mxu0 %v63_v30  ;;  %v126_v30 = vld [vmem:[%s2655_s0 + $0x368] sm:$0xff] }
  0x7b   :  { %1380 = vmatmul.mubr.msk.f32.gmra.mxu1 %vm200_vm1, %v103_v37  ;;  %v132_v37 = vld [vmem:[%s2655_s0 + $0x398] sm:$0xff] }
  0x7c   :  { %1382 = vmatprep.mubr.msk.f32.mxu1 %vm1445_vm0, %v1444_v0 }
  0x7d   :  { %488 = vmatmul.mubr.f32.gmra.mxu0 %v62_v32  ;;  %v125_v32 = vld [vmem:[%s2655_s0 + $0x360] sm:$0xff] }
  0x7e   :  { %492 = vmatprep.mubr.f32.mxu0 %v66_v33  ;;  %v129_v33 = vld [vmem:[%s2655_s0 + $0x380] sm:$0xff] }
  0x7f   :  { %1383 = vmatmul.mubr.msk.f32.gmra.mxu1 %vm200_vm1, %v106_v40  ;;  %v135_v40 = vld [vmem:[%s2655_s0 + $0x3b0] sm:$0xff] }
  0x80   :  { %1385 = vmatprep.mubr.msk.f32.mxu1 %vm1445_vm0, %v1444_v0 }
  0x81   :  { %493 = vmatmul.mubr.f32.gmra.mxu0 %v65_v35  ;;  %v128_v35 = vld [vmem:[%s2655_s0 + $0x378] sm:$0xff] }
  0x82   :  { %497 = vmatprep.mubr.f32.mxu0 %v69_v36 }
  0x83   :  { %1386 = vmatmul.mubr.msk.f32.gmra.mxu1 %vm200_vm1, %v109_v43 }
  0x84   :  { %1388 = vmatprep.mubr.msk.f32.mxu1 %vm1445_vm0, %v1444_v0 }
  0x85   :  { %498 = vmatmul.mubr.f32.gmra.mxu0 %v68_v38 }
  0x86   :  { %502 = vmatprep.mubr.f32.mxu0 %v72_v39 }
  0x87   :  { %1389 = vmatmul.mubr.msk.f32.gmra.mxu1 %vm200_vm1, %v112_v46  ;;  %v137_v46 = vld [vmem:[%s2655_s0 + $0x3c0] sm:$0xff] }
  0x88   :  { %1391 = vmatprep.mubr.msk.f32.mxu1 %vm1445_vm0, %v1444_v0 }
  0x89   :  { %503 = vmatmul.mubr.f32.gmra.mxu0 %v71_v41 }
  0x8a   :  { %507 = vmatprep.mubr.f32.mxu0 %v75_v42  ;;  %v134_v42 = vld [vmem:[%s2655_s0 + $0x3a8] sm:$0xff] }
  0x8b   :  { %1392 = vmatmul.mubr.msk.f32.gmra.mxu1 %vm200_vm1, %v115_v49 }
  0x8c   :  { %1394 = vmatprep.mubr.msk.f32.mxu1 %vm1445_vm0, %v1444_v0 }
  0x8d   :  { %508 = vmatmul.mubr.f32.gmra.mxu0 %v74_v44  ;;  %v138_v44 = vld [vmem:[%s2655_s0 + $0x3c8] sm:$0xff] }
  0x8e   :  { %512 = vmatprep.mubr.f32.mxu0 %v78_v45 }
  0x8f   :  { %1395 = vmatmul.mubr.msk.f32.gmra.mxu1 %vm200_vm1, %v118_v52  ;;  %v144_v52 = vld [vmem:[%s2655_s0 + $0x3f8] sm:$0xff] }
  0x90   :  { %1397 = vmatprep.mubr.msk.f32.mxu1 %vm1445_vm0, %v1444_v0 }
  0x91   :  { %513 = vmatmul.mubr.f32.gmra.mxu0 %v77_v47 }
  0x92   :  { %517 = vmatprep.mubr.f32.mxu0 %v81_v48  ;;  %v141_v48 = vld [vmem:[%s2655_s0 + $0x3e0] sm:$0xff] }
  0x93   :  { %1398 = vmatmul.mubr.msk.f32.gmra.mxu1 %vm200_vm1, %v121_v55 }
  0x94   :  { %1400 = vmatprep.mubr.msk.f32.mxu1 %vm1445_vm0, %v1444_v0 }
  0x95   :  { %518 = vmatmul.mubr.f32.gmra.mxu0 %v80_v50  ;;  %v140_v50 = vld [vmem:[%s2655_s0 + $0x3d8] sm:$0xff] }
  0x96   :  { %522 = vmatprep.mubr.f32.mxu0 %v84_v51 }
  0x97   :  { %1401 = vmatmul.mubr.msk.f32.gmra.mxu1 %vm200_vm1, %v124_v58  ;;  %v146_v58 = vld [vmem:[%s2655_s0 + $0x408] sm:$0xff] }
  0x98   :  { %1403 = vmatprep.mubr.msk.f32.mxu1 %vm1445_vm0, %v1444_v0 }
  0x99   :  { %523 = vmatmul.mubr.f32.gmra.mxu0 %v83_v53 }
  0x9a   :  { %527 = vmatprep.mubr.f32.mxu0 %v87_v54  ;;  %v143_v54 = vld [vmem:[%s2655_s0 + $0x3f0] sm:$0xff] }
  0x9b   :  { %1404 = vmatmul.mubr.msk.f32.gmra.mxu1 %vm200_vm1, %v127_v61 }
  0x9c   :  { %1406 = vmatprep.mubr.msk.f32.mxu1 %vm1445_vm0, %v1444_v0 }
  0x9d   :  { %528 = vmatmul.mubr.f32.gmra.mxu0 %v86_v56  ;;  %v147_v56 = vld [vmem:[%s2655_s0 + $0x410] sm:$0xff] }
  0x9e   :  { %532 = vmatprep.mubr.f32.mxu0 %v90_v57 }
  0x9f   :  { %1407 = vmatmul.mubr.msk.f32.gmra.mxu1 %vm200_vm1, %v130_v1  ;;  %v153_v1 = vld [vmem:[%s2655_s0 + $0x440] sm:$0xff] }
  0xa0   :  { %1409 = vmatprep.mubr.msk.f32.mxu1 %vm1445_vm0, %v1444_v0 }
  0xa1   :  { %533 = vmatmul.mubr.f32.gmra.mxu0 %v89_v59 }
  0xa2   :  { %537 = vmatprep.mubr.f32.mxu0 %v93_v60  ;;  %v150_v60 = vld [vmem:[%s2655_s0 + $0x428] sm:$0xff] }
  0xa3   :  { %1410 = vmatmul.mubr.msk.f32.gmra.mxu1 %vm200_vm1, %v133_v4 }
  0xa4   :  { %1412 = vmatprep.mubr.msk.f32.mxu1 %vm1445_vm0, %v1444_v0 }
  0xa5   :  { %538 = vmatmul.mubr.f32.gmra.mxu0 %v92_v62  ;;  %v149_v62 = vld [vmem:[%s2655_s0 + $0x420] sm:$0xff] }
  0xa6   :  { %542 = vmatprep.mubr.f32.mxu0 %v96_v63 }
  0xa7   :  { %1413 = vmatmul.mubr.msk.f32.gmra.mxu1 %vm200_vm1, %v136_v7  ;;  %v155_v7 = vld [vmem:[%s2655_s0 + $0x450] sm:$0xff] }
  0xa8   :  { %1415 = vmatprep.mubr.msk.f32.mxu1 %vm1445_vm0, %v1444_v0 }
  0xa9   :  { %543 = vmatmul.mubr.f32.gmra.mxu0 %v95_v2 }
  0xaa   :  { %547 = vmatprep.mubr.f32.mxu0 %v99_v3  ;;  %v152_v3 = vld [vmem:[%s2655_s0 + $0x438] sm:$0xff] }
  0xab   :  { %1416 = vmatmul.mubr.msk.f32.gmra.mxu1 %vm200_vm1, %v139_v10 }
  0xac   :  { %1418 = vmatprep.mubr.msk.f32.mxu1 %vm1445_vm0, %v1444_v0 }
  0xad   :  { %548 = vmatmul.mubr.f32.gmra.mxu0 %v98_v5  ;;  %v156_v5 = vld [vmem:[%s2655_s0 + $0x458] sm:$0xff] }
  0xae   :  { %552 = vmatprep.mubr.f32.mxu0 %v102_v6 }
  0xaf   :  { %1419 = vmatmul.mubr.msk.f32.gmra.mxu1 %vm200_vm1, %v142_v13  ;;  %v162_v13 = vld [vmem:[%s2655_s0 + $0x488] sm:$0xff] }
  0xb0   :  { %1421 = vmatprep.mubr.msk.f32.mxu1 %vm1445_vm0, %v1444_v0 }
  0xb1   :  { %553 = vmatmul.mubr.f32.gmra.mxu0 %v101_v8 }
  0xb2   :  { %557 = vmatprep.mubr.f32.mxu0 %v105_v9  ;;  %v159_v9 = vld [vmem:[%s2655_s0 + $0x470] sm:$0xff] }
  0xb3   :  { %1422 = vmatmul.mubr.msk.f32.gmra.mxu1 %vm200_vm1, %v145_v16 }
  0xb4   :  { %1424 = vmatprep.mubr.msk.f32.mxu1 %vm1445_vm0, %v1444_v0 }
  0xb5   :  { %558 = vmatmul.mubr.f32.gmra.mxu0 %v104_v11  ;;  %v158_v11 = vld [vmem:[%s2655_s0 + $0x468] sm:$0xff] }
  0xb6   :  { %562 = vmatprep.mubr.f32.mxu0 %v108_v12 }
  0xb7   :  { %1425 = vmatmul.mubr.msk.f32.gmra.mxu1 %vm200_vm1, %v148_v19  ;;  %v2230_v19 = vld [vmem:[%s2656_s2] ss:$0 sm:$0xff] }
  0xb8   :  { %1427 = vmatprep.mubr.msk.f32.mxu1 %vm1445_vm0, %v1444_v0 }
  0xb9   :  { %563 = vmatmul.mubr.f32.gmra.mxu0 %v107_v14 }
  0xba   :  { %567 = vmatprep.mubr.f32.mxu0 %v111_v15  ;;  %v161_v15 = vld [vmem:[%s2655_s0 + $0x480] sm:$0xff] }
  0xbb   :  { %1428 = vmatmul.mubr.msk.f32.gmra.mxu1 %vm200_vm1, %v151_v22  ;;  %v2238_v22 = vld [vmem:[%s2657_s3] ss:$0 sm:$0xff] }
  0xbc   :  { %1430 = vmatprep.mubr.msk.f32.mxu1 %vm1445_vm0, %v1444_v0 }
  0xbd   :  { %568 = vmatmul.mubr.f32.gmra.mxu0 %v110_v17 }
  0xbe   :  { %572 = vmatprep.mubr.f32.mxu0 %v114_v18 }
  0xbf   :  { %1431 = vmatmul.mubr.msk.f32.gmra.mxu1 %vm200_vm1, %v154_v25 }
  0xc0   :  { %1433 = vmatprep.mubr.msk.f32.mxu1 %vm1445_vm0, %v1444_v0 }
  0xc1   :  { %573 = vmatmul.mubr.f32.gmra.mxu0 %v113_v20 }
  0xc2   :  { %577 = vmatprep.mubr.f32.mxu0 %v117_v21 }
  0xc3   :  { %1434 = vmatmul.mubr.msk.f32.gmra.mxu1 %vm200_vm1, %v157_v28 }
  0xc4   :  { %1436 = vmatprep.mubr.msk.f32.mxu1 %vm1445_vm0, %v1444_v0 }
  0xc5   :  { %578 = vmatmul.mubr.f32.gmra.mxu0 %v116_v23 }
  0xc6   :  { %582 = vmatprep.mubr.f32.mxu0 %v120_v24 }
  0xc7   :  { %1437 = vmatmul.mubr.msk.f32.gmra.mxu1 %vm200_vm1, %v160_v31 }
  0xc8   :  { %1439 = vmatprep.mubr.msk.f32.mxu1 %vm1445_vm0, %v1444_v0  ;;  %v131_v0 = vld [vmem:[%s2655_s0 + $0x390] sm:$0xff] }
  0xc9   :  { %583 = vmatmul.mubr.f32.gmra.mxu0 %v119_v26 }
  0xca   :  { %587 = vmatprep.mubr.f32.mxu0 %v123_v27 }
  0xcb   :  { %v2136_v36 = vpop.f32.mrf.mxu1  ;;  %1440 = vmatmul.mubr.msk.f32.gmra.mxu1 %vm200_vm1, %v163_v34 }
  0xcd   :  { %588 = vmatmul.mubr.f32.gmra.mxu0 %v122_v29  ;;  %v1297_v38 = vpop.f32.mrf.mxu1 }
  0xce   :  { %592 = vmatprep.mubr.f32.mxu0 %v126_v30 }
  0xcf   :  { %v2145_v39 = vpop.f32.mrf.mxu1 }
  0xd1   :  { %593 = vmatmul.mubr.f32.gmra.mxu0 %v125_v32  ;;  %v1300_v41 = vpop.f32.mrf.mxu1 }
  0xd2   :  { %597 = vmatprep.mubr.f32.mxu0 %v129_v33 }
  0xd3   :  { %v2153_v43 = vpop.f32.mrf.mxu1 }
  0xd5   :  { %598 = vmatmul.mubr.f32.gmra.mxu0 %v128_v35  ;;  %v1303_v45 = vpop.f32.mrf.mxu1 }
  0xd6   :  { %602 = vmatprep.mubr.f32.mxu0 %v132_v37 }
  0xd7   :  { %v2161_v47 = vpop.f32.mrf.mxu1 }
  0xd9   :  { %603 = vmatmul.mubr.f32.gmra.mxu0 %v131_v0  ;;  %v1306_v49 = vpop.f32.mrf.mxu1 }
  0xda   :  { %607 = vmatprep.mubr.f32.mxu0 %v135_v40 }
  0xdb   :  { %v2169_v51 = vpop.f32.mrf.mxu1 }
  0xdd   :  { %608 = vmatmul.mubr.f32.gmra.mxu0 %v134_v42  ;;  %v1309_v53 = vpop.f32.mrf.mxu1 }
  0xde   :  { %612 = vmatprep.mubr.f32.mxu0 %v138_v44 }
  0xdf   :  { %v2177_v55 = vpop.f32.mrf.mxu1 }
  0xe1   :  { %613 = vmatmul.mubr.f32.gmra.mxu0 %v137_v46  ;;  %v1312_v57 = vpop.f32.mrf.mxu1 }
  0xe2   :  { %617 = vmatprep.mubr.f32.mxu0 %v141_v48 }
  0xe3   :  { %v2185_v59 = vpop.f32.mrf.mxu1 }
  0xe5   :  { %618 = vmatmul.mubr.f32.gmra.mxu0 %v140_v50  ;;  %v1315_v61 = vpop.f32.mrf.mxu1 }
  0xe6   :  { %622 = vmatprep.mubr.f32.mxu0 %v144_v52 }
  0xe7   :  { %v2193_v63 = vpop.f32.mrf.mxu1 }
  0xe9   :  { %623 = vmatmul.mubr.f32.gmra.mxu0 %v143_v54  ;;  %v1318_v2 = vpop.f32.mrf.mxu1 }
  0xea   :  { %627 = vmatprep.mubr.f32.mxu0 %v147_v56 }
  0xeb   :  { %v2201_v4 = vpop.f32.mrf.mxu1 }
  0xed   :  { %628 = vmatmul.mubr.f32.gmra.mxu0 %v146_v58  ;;  %v1321_v6 = vpop.f32.mrf.mxu1 }
  0xee   :  { %632 = vmatprep.mubr.f32.mxu0 %v150_v60 }
  0xef   :  { %v2209_v8 = vpop.f32.mrf.mxu1 }
  0xf1   :  { %633 = vmatmul.mubr.f32.gmra.mxu0 %v149_v62  ;;  %v1324_v10 = vpop.f32.mrf.mxu1 }
  0xf2   :  { %637 = vmatprep.mubr.f32.mxu0 %v153_v1 }
  0xf3   :  { %v2217_v12 = vpop.f32.mrf.mxu1 }
  0xf5   :  { %638 = vmatmul.mubr.f32.gmra.mxu0 %v152_v3  ;;  %v1327_v14 = vpop.f32.mrf.mxu1 }
  0xf6   :  { %642 = vmatprep.mubr.f32.mxu0 %v156_v5 }
  0xf7   :  { %v2225_v16 = vpop.f32.mrf.mxu1 }
  0xf9   :  { %643 = vmatmul.mubr.f32.gmra.mxu0 %v155_v7  ;;  %v1330_v17 = vpop.f32.mrf.mxu1 }
  0xfa   :  { %647 = vmatprep.mubr.f32.mxu0 %v159_v9 }
  0xfb   :  { %v2233_v21 = vpop.f32.mrf.mxu1 }
  0xfd   :  { %648 = vmatmul.mubr.f32.gmra.mxu0 %v158_v11  ;;  %v1333_v25 = vpop.f32.mrf.mxu1 }
  0xfe   :  { %652 = vmatprep.mubr.f32.mxu0 %v162_v13 }
  0xff   :  { %v2243_v29 = vpop.f32.mrf.mxu1 }
 0x101   :  { %v414_v18 = vpop.f32.mrf.mxu0  ;;  %653 = vmatmul.mubr.f32.gmra.mxu0 %v161_v15  ;;  %v1336_v33 = vpop.f32.mrf.mxu1 }
 0x102   :  { %v725_v20 = vadd.f32 %v2136_v36, %v414_v18 }
 0x103   :  { %v416_v23 = vpop.f32.mrf.mxu0  ;;  %v2252_v37 = vpop.f32.mrf.mxu1 }
 0x104   :  { %v975_v24 = vmul.f32 %v2230_v19, %v725_v20 }
 0x105   :  { %v419_v26 = vpop.f32.mrf.mxu0  ;;  %v1339_v40 = vpop.f32.mrf.mxu1 }
 0x106   :  { %v1031_v27 = vadd.f32 %v2238_v22, %v975_v24  ;;  %v730_v28 = vadd.f32 %v2145_v39, %v419_v26 }
 0x107   :  { %v421_v30 = vpop.f32.mrf.mxu0  ;;  %v2261_v45 = vpop.f32.mrf.mxu1 }
 0x108   :  { %v1080_v31 = vmax.f32 %v1031_v27, 0.0  ;;  %v976_v32 = vmul.f32 %v2230_v19, %v730_v28 }
 0x109   :  { %v424_v34 = vpop.f32.mrf.mxu0  ;;  %v1342_v49 = vpop.f32.mrf.mxu1 }
 0x10a   :  { %1130 = vst.msk [vmem:[%s2658_s4] sm:$0xff] %vm1129_vm2, %v1080_v31  ;;  %v1032_v35 = vadd.f32 %v2238_v22, %v976_v32  ;;  %v735_v36 = vadd.f32 %v2153_v43, %v424_v34 }
 0x10b   :  { %v426_v38 = vpop.f32.mrf.mxu0  ;;  %v2270_v54 = vpop.f32.mrf.mxu1 }
 0x10c   :  { %v1081_v0 = vmax.f32 %v1032_v35, 0.0  ;;  %v977_v39 = vmul.f32 %v2230_v19, %v735_v36 }
 0x10d   :  { %v429_v41 = vpop.f32.mrf.mxu0  ;;  %v1345_v58 = vpop.f32.mrf.mxu1 }
 0x10e   :  { %1131 = vst.msk [vmem:[%s2658_s4 + $0x8] sm:$0xff] %vm1129_vm2, %v1081_v0  ;;  %v1033_v42 = vadd.f32 %v2238_v22, %v977_v39  ;;  %v740_v44 = vadd.f32 %v2161_v47, %v429_v41 }
 0x10f   :  { %v431_v43 = vpop.f32.mrf.mxu0  ;;  %v2279_v1 = vpop.f32.mrf.mxu1 }
 0x110   :  { %v1082_v46 = vmax.f32 %v1033_v42, 0.0  ;;  %v978_v48 = vmul.f32 %v2230_v19, %v740_v44 }
 0x111   :  { %v434_v50 = vpop.f32.mrf.mxu0  ;;  %v1348_v5 = vpop.f32.mrf.mxu1 }
 0x112   :  { %1132 = vst.msk [vmem:[%s2658_s4 + $0x10] sm:$0xff] %vm1129_vm2, %v1082_v46  ;;  %v1034_v52 = vadd.f32 %v2238_v22, %v978_v48  ;;  %v745_v53 = vadd.f32 %v2169_v51, %v434_v50 }
 0x113   :  { %v436_v47 = vpop.f32.mrf.mxu0  ;;  %v2288_v10 = vpop.f32.mrf.mxu1 }
 0x114   :  { %v1083_v56 = vmax.f32 %v1034_v52, 0.0  ;;  %v979_v57 = vmul.f32 %v2230_v19, %v745_v53 }
 0x115   :  { %v439_v60 = vpop.f32.mrf.mxu0  ;;  %v1351_v14 = vpop.f32.mrf.mxu1 }
 0x116   :  { %1133 = vst.msk [vmem:[%s2658_s4 + $0x18] sm:$0xff] %vm1129_vm2, %v1083_v56  ;;  %v1035_v61 = vadd.f32 %v2238_v22, %v979_v57  ;;  %v750_v62 = vadd.f32 %v2177_v55, %v439_v60 }
 0x117   :  { %v441_v51 = vpop.f32.mrf.mxu0  ;;  %v2297_v20 = vpop.f32.mrf.mxu1 }
 0x118   :  { %v1084_v2 = vmax.f32 %v1035_v61, 0.0  ;;  %v980_v3 = vmul.f32 %v2230_v19, %v750_v62 }
 0x119   :  { %v444_v6 = vpop.f32.mrf.mxu0  ;;  %v1354_v25 = vpop.f32.mrf.mxu1 }
 0x11a   :  { %1134 = vst.msk [vmem:[%s2658_s4 + $0x20] sm:$0xff] %vm1129_vm2, %v1084_v2  ;;  %v1036_v7 = vadd.f32 %v2238_v22, %v980_v3  ;;  %v755_v9 = vadd.f32 %v2185_v59, %v444_v6 }
 0x11b   :  { %v446_v55 = vpop.f32.mrf.mxu0  ;;  %v2306_v30 = vpop.f32.mrf.mxu1 }
 0x11c   :  { %v1085_v11 = vmax.f32 %v1036_v7, 0.0  ;;  %v981_v13 = vmul.f32 %v2230_v19, %v755_v9 }
 0x11d   :  { %v449_v15 = vpop.f32.mrf.mxu0  ;;  %v1357_v33 = vpop.f32.mrf.mxu1 }
 0x11e   :  { %1135 = vst.msk [vmem:[%s2658_s4 + $0x28] sm:$0xff] %vm1129_vm2, %v1085_v11  ;;  %v1037_v17 = vadd.f32 %v2238_v22, %v981_v13  ;;  %v760_v18 = vadd.f32 %v2193_v63, %v449_v15 }
 0x11f   :  { %v451_v59 = vpop.f32.mrf.mxu0  ;;  %v2315_v38 = vpop.f32.mrf.mxu1 }
 0x120   :  { %v1086_v23 = vmax.f32 %v1037_v17, 0.0  ;;  %v982_v24 = vmul.f32 %v2230_v19, %v760_v18 }
 0x121   :  { %v454_v26 = vpop.f32.mrf.mxu0  ;;  %v1360_v40 = vpop.f32.mrf.mxu1 }
 0x122   :  { %1136 = vst.msk [vmem:[%s2658_s4 + $0x30] sm:$0xff] %vm1129_vm2, %v1086_v23  ;;  %v1038_v27 = vadd.f32 %v2238_v22, %v982_v24  ;;  %v765_v28 = vadd.f32 %v2201_v4, %v454_v26 }
 0x123   :  { %v456_v63 = vpop.f32.mrf.mxu0  ;;  %v2324_v43 = vpop.f32.mrf.mxu1 }
 0x124   :  { %v1087_v31 = vmax.f32 %v1038_v27, 0.0  ;;  %v983_v32 = vmul.f32 %v2230_v19, %v765_v28 }
 0x125   :  { %v459_v34 = vpop.f32.mrf.mxu0  ;;  %v1363_v49 = vpop.f32.mrf.mxu1 }
 0x126   :  { %1137 = vst.msk [vmem:[%s2658_s4 + $0x38] sm:$0xff] %vm1129_vm2, %v1087_v31  ;;  %v1039_v35 = vadd.f32 %v2238_v22, %v983_v32  ;;  %v770_v36 = vadd.f32 %v2209_v8, %v459_v34 }
 0x127   :  { %v461_v4 = vpop.f32.mrf.mxu0  ;;  %v2333_v47 = vpop.f32.mrf.mxu1 }
 0x128   :  { %v1088_v0 = vmax.f32 %v1039_v35, 0.0  ;;  %v984_v39 = vmul.f32 %v2230_v19, %v770_v36 }
 0x129   :  { %v464_v41 = vpop.f32.mrf.mxu0  ;;  %v1366_v58 = vpop.f32.mrf.mxu1 }
 0x12a   :  { %1138 = vst.msk [vmem:[%s2658_s4 + $0x40] sm:$0xff] %vm1129_vm2, %v1088_v0  ;;  %v1040_v42 = vadd.f32 %v2238_v22, %v984_v39  ;;  %v775_v44 = vadd.f32 %v2217_v12, %v464_v41 }
 0x12b   :  { %v466_v8 = vpop.f32.mrf.mxu0  ;;  %v2342_v51 = vpop.f32.mrf.mxu1 }
 0x12c   :  { %v1089_v46 = vmax.f32 %v1040_v42, 0.0  ;;  %v985_v48 = vmul.f32 %v2230_v19, %v775_v44 }
 0x12d   :  { %v469_v50 = vpop.f32.mrf.mxu0  ;;  %v1369_v5 = vpop.f32.mrf.mxu1 }
 0x12e   :  { %1139 = vst.msk [vmem:[%s2658_s4 + $0x48] sm:$0xff] %vm1129_vm2, %v1089_v46  ;;  %v1041_v52 = vadd.f32 %v2238_v22, %v985_v48  ;;  %v780_v53 = vadd.f32 %v2225_v16, %v469_v50 }
 0x12f   :  { %v471_v12 = vpop.f32.mrf.mxu0  ;;  %v2351_v55 = vpop.f32.mrf.mxu1 }
 0x130   :  { %v1090_v56 = vmax.f32 %v1041_v52, 0.0  ;;  %v986_v57 = vmul.f32 %v2230_v19, %v780_v53 }
 0x131   :  { %v474_v60 = vpop.f32.mrf.mxu0  ;;  %v1372_v14 = vpop.f32.mrf.mxu1 }
 0x132   :  { %1140 = vst.msk [vmem:[%s2658_s4 + $0x50] sm:$0xff] %vm1129_vm2, %v1090_v56  ;;  %v1042_v61 = vadd.f32 %v2238_v22, %v986_v57  ;;  %v785_v62 = vadd.f32 %v2233_v21, %v474_v60 }
 0x133   :  { %v476_v16 = vpop.f32.mrf.mxu0  ;;  %v2360_v59 = vpop.f32.mrf.mxu1 }
 0x134   :  { %v1091_v2 = vmax.f32 %v1042_v61, 0.0  ;;  %v987_v3 = vmul.f32 %v2230_v19, %v785_v62 }
 0x135   :  { %v479_v6 = vpop.f32.mrf.mxu0  ;;  %v1375_v25 = vpop.f32.mrf.mxu1 }
 0x136   :  { %1141 = vst.msk [vmem:[%s2658_s4 + $0x58] sm:$0xff] %vm1129_vm2, %v1091_v2  ;;  %v1043_v7 = vadd.f32 %v2238_v22, %v987_v3  ;;  %v790_v9 = vadd.f32 %v2243_v29, %v479_v6 }
 0x137   :  { %v481_v21 = vpop.f32.mrf.mxu0  ;;  %v2369_v63 = vpop.f32.mrf.mxu1 }
 0x138   :  { %v1092_v11 = vmax.f32 %v1043_v7, 0.0  ;;  %v988_v13 = vmul.f32 %v2230_v19, %v790_v9 }
 0x139   :  { %v484_v15 = vpop.f32.mrf.mxu0  ;;  %v1378_v33 = vpop.f32.mrf.mxu1 }
 0x13a   :  { %1142 = vst.msk [vmem:[%s2658_s4 + $0x60] sm:$0xff] %vm1129_vm2, %v1092_v11  ;;  %v1044_v17 = vadd.f32 %v2238_v22, %v988_v13  ;;  %v795_v18 = vadd.f32 %v2252_v37, %v484_v15 }
 0x13b   :  { %v486_v29 = vpop.f32.mrf.mxu0  ;;  %v2378_v4 = vpop.f32.mrf.mxu1 }
 0x13c   :  { %v1093_v23 = vmax.f32 %v1044_v17, 0.0  ;;  %v989_v24 = vmul.f32 %v2230_v19, %v795_v18 }
 0x13d   :  { %v489_v26 = vpop.f32.mrf.mxu0  ;;  %v1381_v40 = vpop.f32.mrf.mxu1 }
 0x13e   :  { %1143 = vst.msk [vmem:[%s2658_s4 + $0x68] sm:$0xff] %vm1129_vm2, %v1093_v23  ;;  %v1045_v27 = vadd.f32 %v2238_v22, %v989_v24  ;;  %v800_v28 = vadd.f32 %v2261_v45, %v489_v26 }
 0x13f   :  { %v491_v37 = vpop.f32.mrf.mxu0  ;;  %v2387_v8 = vpop.f32.mrf.mxu1 }
 0x140   :  { %v1094_v31 = vmax.f32 %v1045_v27, 0.0  ;;  %v990_v32 = vmul.f32 %v2230_v19, %v800_v28 }
 0x141   :  { %v494_v34 = vpop.f32.mrf.mxu0  ;;  %v1384_v49 = vpop.f32.mrf.mxu1 }
 0x142   :  { %1144 = vst.msk [vmem:[%s2658_s4 + $0x70] sm:$0xff] %vm1129_vm2, %v1094_v31  ;;  %v1046_v35 = vadd.f32 %v2238_v22, %v990_v32  ;;  %v805_v36 = vadd.f32 %v2270_v54, %v494_v34 }
 0x143   :  { %v496_v45 = vpop.f32.mrf.mxu0  ;;  %v2396_v12 = vpop.f32.mrf.mxu1 }
 0x144   :  { %v1095_v0 = vmax.f32 %v1046_v35, 0.0  ;;  %v991_v39 = vmul.f32 %v2230_v19, %v805_v36 }
 0x145   :  { %v499_v41 = vpop.f32.mrf.mxu0  ;;  %v1387_v58 = vpop.f32.mrf.mxu1 }
 0x146   :  { %1145 = vst.msk [vmem:[%s2658_s4 + $0x78] sm:$0xff] %vm1129_vm2, %v1095_v0  ;;  %v1047_v42 = vadd.f32 %v2238_v22, %v991_v39  ;;  %v810_v44 = vadd.f32 %v2279_v1, %v499_v41 }
 0x147   :  { %v501_v54 = vpop.f32.mrf.mxu0  ;;  %v2405_v16 = vpop.f32.mrf.mxu1 }
 0x148   :  { %v1096_v46 = vmax.f32 %v1047_v42, 0.0  ;;  %v992_v48 = vmul.f32 %v2230_v19, %v810_v44 }
 0x149   :  { %v504_v50 = vpop.f32.mrf.mxu0  ;;  %v1390_v5 = vpop.f32.mrf.mxu1 }
 0x14a   :  { %1146 = vst.msk [vmem:[%s2658_s4 + $0x80] sm:$0xff] %vm1129_vm2, %v1096_v46  ;;  %v1048_v52 = vadd.f32 %v2238_v22, %v992_v48  ;;  %v815_v53 = vadd.f32 %v2288_v10, %v504_v50 }
 0x14b   :  { %v506_v1 = vpop.f32.mrf.mxu0  ;;  %v2414_v21 = vpop.f32.mrf.mxu1 }
 0x14c   :  { %v1097_v56 = vmax.f32 %v1048_v52, 0.0  ;;  %v993_v57 = vmul.f32 %v2230_v19, %v815_v53 }
 0x14d   :  { %v509_v60 = vpop.f32.mrf.mxu0  ;;  %v1393_v14 = vpop.f32.mrf.mxu1 }
 0x14e   :  { %1147 = vst.msk [vmem:[%s2658_s4 + $0x88] sm:$0xff] %vm1129_vm2, %v1097_v56  ;;  %v1049_v61 = vadd.f32 %v2238_v22, %v993_v57  ;;  %v820_v62 = vadd.f32 %v2297_v20, %v509_v60 }
 0x14f   :  { %v511_v10 = vpop.f32.mrf.mxu0  ;;  %v2423_v29 = vpop.f32.mrf.mxu1 }
 0x150   :  { %v1098_v2 = vmax.f32 %v1049_v61, 0.0  ;;  %v994_v3 = vmul.f32 %v2230_v19, %v820_v62 }
 0x151   :  { %v514_v6 = vpop.f32.mrf.mxu0  ;;  %v1396_v25 = vpop.f32.mrf.mxu1 }
 0x152   :  { %1148 = vst.msk [vmem:[%s2658_s4 + $0x90] sm:$0xff] %vm1129_vm2, %v1098_v2  ;;  %v1050_v7 = vadd.f32 %v2238_v22, %v994_v3  ;;  %v825_v9 = vadd.f32 %v2306_v30, %v514_v6 }
 0x153   :  { %v516_v20 = vpop.f32.mrf.mxu0  ;;  %v2432_v37 = vpop.f32.mrf.mxu1 }
 0x154   :  { %v1099_v11 = vmax.f32 %v1050_v7, 0.0  ;;  %v995_v13 = vmul.f32 %v2230_v19, %v825_v9 }
 0x155   :  { %v519_v15 = vpop.f32.mrf.mxu0  ;;  %v1399_v33 = vpop.f32.mrf.mxu1 }
 0x156   :  { %1149 = vst.msk [vmem:[%s2658_s4 + $0x98] sm:$0xff] %vm1129_vm2, %v1099_v11  ;;  %v1051_v17 = vadd.f32 %v2238_v22, %v995_v13  ;;  %v830_v18 = vadd.f32 %v2315_v38, %v519_v15 }
 0x157   :  { %v521_v30 = vpop.f32.mrf.mxu0  ;;  %v2441_v45 = vpop.f32.mrf.mxu1 }
 0x158   :  { %v1100_v23 = vmax.f32 %v1051_v17, 0.0  ;;  %v996_v24 = vmul.f32 %v2230_v19, %v830_v18 }
 0x159   :  { %v524_v26 = vpop.f32.mrf.mxu0  ;;  %v1402_v40 = vpop.f32.mrf.mxu1 }
 0x15a   :  { %1150 = vst.msk [vmem:[%s2658_s4 + $0xa0] sm:$0xff] %vm1129_vm2, %v1100_v23  ;;  %v1052_v27 = vadd.f32 %v2238_v22, %v996_v24  ;;  %v835_v28 = vadd.f32 %v2324_v43, %v524_v26 }
 0x15b   :  { %v526_v38 = vpop.f32.mrf.mxu0  ;;  %v2450_v54 = vpop.f32.mrf.mxu1 }
 0x15c   :  { %v1101_v31 = vmax.f32 %v1052_v27, 0.0  ;;  %v997_v32 = vmul.f32 %v2230_v19, %v835_v28 }
 0x15d   :  { %v529_v34 = vpop.f32.mrf.mxu0  ;;  %v1405_v49 = vpop.f32.mrf.mxu1 }
 0x15e   :  { %1151 = vst.msk [vmem:[%s2658_s4 + $0xa8] sm:$0xff] %vm1129_vm2, %v1101_v31  ;;  %v1053_v35 = vadd.f32 %v2238_v22, %v997_v32  ;;  %v840_v36 = vadd.f32 %v2333_v47, %v529_v34 }
 0x15f   :  { %v531_v43 = vpop.f32.mrf.mxu0  ;;  %v2459_v1 = vpop.f32.mrf.mxu1 }
 0x160   :  { %v1102_v0 = vmax.f32 %v1053_v35, 0.0  ;;  %v998_v39 = vmul.f32 %v2230_v19, %v840_v36 }
 0x161   :  { %v534_v41 = vpop.f32.mrf.mxu0  ;;  %v1408_v58 = vpop.f32.mrf.mxu1 }
 0x162   :  { %1152 = vst.msk [vmem:[%s2658_s4 + $0xb0] sm:$0xff] %vm1129_vm2, %v1102_v0  ;;  %v1054_v42 = vadd.f32 %v2238_v22, %v998_v39  ;;  %v845_v44 = vadd.f32 %v2342_v51, %v534_v41 }
 0x163   :  { %v536_v47 = vpop.f32.mrf.mxu0  ;;  %v2468_v10 = vpop.f32.mrf.mxu1 }
 0x164   :  { %v1103_v46 = vmax.f32 %v1054_v42, 0.0  ;;  %v999_v48 = vmul.f32 %v2230_v19, %v845_v44 }
 0x165   :  { %v539_v50 = vpop.f32.mrf.mxu0  ;;  %v1411_v5 = vpop.f32.mrf.mxu1 }
 0x166   :  { %1153 = vst.msk [vmem:[%s2658_s4 + $0xb8] sm:$0xff] %vm1129_vm2, %v1103_v46  ;;  %v1055_v52 = vadd.f32 %v2238_v22, %v999_v48  ;;  %v850_v53 = vadd.f32 %v2351_v55, %v539_v50 }
 0x167   :  { %v541_v51 = vpop.f32.mrf.mxu0  ;;  %v2477_v20 = vpop.f32.mrf.mxu1 }
 0x168   :  { %v1104_v56 = vmax.f32 %v1055_v52, 0.0  ;;  %v1000_v57 = vmul.f32 %v2230_v19, %v850_v53 }
 0x169   :  { %v544_v60 = vpop.f32.mrf.mxu0  ;;  %v1414_v14 = vpop.f32.mrf.mxu1 }
 0x16a   :  { %1154 = vst.msk [vmem:[%s2658_s4 + $0xc0] sm:$0xff] %vm1129_vm2, %v1104_v56  ;;  %v1056_v61 = vadd.f32 %v2238_v22, %v1000_v57  ;;  %v855_v62 = vadd.f32 %v2360_v59, %v544_v60 }
 0x16b   :  { %v546_v55 = vpop.f32.mrf.mxu0  ;;  %v2486_v30 = vpop.f32.mrf.mxu1 }
 0x16c   :  { %v1105_v2 = vmax.f32 %v1056_v61, 0.0  ;;  %v1001_v3 = vmul.f32 %v2230_v19, %v855_v62 }
 0x16d   :  { %v549_v6 = vpop.f32.mrf.mxu0  ;;  %v1417_v25 = vpop.f32.mrf.mxu1 }
 0x16e   :  { %1155 = vst.msk [vmem:[%s2658_s4 + $0xc8] sm:$0xff] %vm1129_vm2, %v1105_v2  ;;  %v1057_v7 = vadd.f32 %v2238_v22, %v1001_v3  ;;  %v860_v9 = vadd.f32 %v2369_v63, %v549_v6 }
 0x16f   :  { %v551_v59 = vpop.f32.mrf.mxu0  ;;  %v2495_v38 = vpop.f32.mrf.mxu1 }
 0x170   :  { %v1106_v11 = vmax.f32 %v1057_v7, 0.0  ;;  %v1002_v13 = vmul.f32 %v2230_v19, %v860_v9 }
 0x171   :  { %v554_v15 = vpop.f32.mrf.mxu0  ;;  %v1420_v33 = vpop.f32.mrf.mxu1 }
 0x172   :  { %1156 = vst.msk [vmem:[%s2658_s4 + $0xd0] sm:$0xff] %vm1129_vm2, %v1106_v11  ;;  %v1058_v17 = vadd.f32 %v2238_v22, %v1002_v13  ;;  %v865_v18 = vadd.f32 %v2378_v4, %v554_v15 }
 0x173   :  { %v556_v63 = vpop.f32.mrf.mxu0  ;;  %v2504_v43 = vpop.f32.mrf.mxu1 }
 0x174   :  { %v1107_v23 = vmax.f32 %v1058_v17, 0.0  ;;  %v1003_v24 = vmul.f32 %v2230_v19, %v865_v18 }
 0x175   :  { %v559_v26 = vpop.f32.mrf.mxu0  ;;  %v1423_v40 = vpop.f32.mrf.mxu1 }
 0x176   :  { %1157 = vst.msk [vmem:[%s2658_s4 + $0xd8] sm:$0xff] %vm1129_vm2, %v1107_v23  ;;  %v1059_v27 = vadd.f32 %v2238_v22, %v1003_v24  ;;  %v870_v28 = vadd.f32 %v2387_v8, %v559_v26 }
 0x177   :  { %v561_v4 = vpop.f32.mrf.mxu0  ;;  %v2513_v47 = vpop.f32.mrf.mxu1 }
 0x178   :  { %v1108_v31 = vmax.f32 %v1059_v27, 0.0  ;;  %v1004_v32 = vmul.f32 %v2230_v19, %v870_v28 }
 0x179   :  { %v564_v34 = vpop.f32.mrf.mxu0  ;;  %v1426_v49 = vpop.f32.mrf.mxu1 }
 0x17a   :  { %1158 = vst.msk [vmem:[%s2658_s4 + $0xe0] sm:$0xff] %vm1129_vm2, %v1108_v31  ;;  %v1060_v35 = vadd.f32 %v2238_v22, %v1004_v32  ;;  %v875_v36 = vadd.f32 %v2396_v12, %v564_v34 }
 0x17b   :  { %v566_v8 = vpop.f32.mrf.mxu0  ;;  %v2522_v51 = vpop.f32.mrf.mxu1 }
 0x17c   :  { %v1109_v0 = vmax.f32 %v1060_v35, 0.0  ;;  %v1005_v39 = vmul.f32 %v2230_v19, %v875_v36 }
 0x17d   :  { %v569_v41 = vpop.f32.mrf.mxu0  ;;  %v1429_v58 = vpop.f32.mrf.mxu1 }
 0x17e   :  { %1159 = vst.msk [vmem:[%s2658_s4 + $0xe8] sm:$0xff] %vm1129_vm2, %v1109_v0  ;;  %v1061_v42 = vadd.f32 %v2238_v22, %v1005_v39  ;;  %v880_v44 = vadd.f32 %v2405_v16, %v569_v41 }
 0x17f   :  { %v571_v12 = vpop.f32.mrf.mxu0  ;;  %v2531_v55 = vpop.f32.mrf.mxu1 }
 0x180   :  { %v1110_v46 = vmax.f32 %v1061_v42, 0.0  ;;  %v1006_v48 = vmul.f32 %v2230_v19, %v880_v44 }
 0x181   :  { %v574_v50 = vpop.f32.mrf.mxu0  ;;  %v1432_v5 = vpop.f32.mrf.mxu1 }
 0x182   :  { %1160 = vst.msk [vmem:[%s2658_s4 + $0xf0] sm:$0xff] %vm1129_vm2, %v1110_v46  ;;  %v1062_v52 = vadd.f32 %v2238_v22, %v1006_v48  ;;  %v885_v53 = vadd.f32 %v2414_v21, %v574_v50 }
 0x183   :  { %v576_v16 = vpop.f32.mrf.mxu0  ;;  %v2540_v59 = vpop.f32.mrf.mxu1 }
 0x184   :  { %v1111_v56 = vmax.f32 %v1062_v52, 0.0  ;;  %v1007_v57 = vmul.f32 %v2230_v19, %v885_v53 }
 0x185   :  { %v579_v60 = vpop.f32.mrf.mxu0  ;;  %v1435_v14 = vpop.f32.mrf.mxu1 }
 0x186   :  { %1161 = vst.msk [vmem:[%s2658_s4 + $0xf8] sm:$0xff] %vm1129_vm2, %v1111_v56  ;;  %v1063_v61 = vadd.f32 %v2238_v22, %v1007_v57  ;;  %v890_v62 = vadd.f32 %v2423_v29, %v579_v60 }
 0x187   :  { %v581_v21 = vpop.f32.mrf.mxu0  ;;  %v2549_v63 = vpop.f32.mrf.mxu1 }
 0x188   :  { %v1112_v2 = vmax.f32 %v1063_v61, 0.0  ;;  %v1008_v3 = vmul.f32 %v2230_v19, %v890_v62 }
 0x189   :  { %v584_v6 = vpop.f32.mrf.mxu0  ;;  %v1438_v25 = vpop.f32.mrf.mxu1 }
 0x18a   :  { %1162 = vst.msk [vmem:[%s2658_s4 + $0x100] sm:$0xff] %vm1129_vm2, %v1112_v2  ;;  %v1064_v7 = vadd.f32 %v2238_v22, %v1008_v3  ;;  %v895_v9 = vadd.f32 %v2432_v37, %v584_v6 }
 0x18b   :  { %v586_v29 = vpop.f32.mrf.mxu0  ;;  %v2558_v4 = vpop.f32.mrf.mxu1 }
 0x18c   :  { %v1113_v11 = vmax.f32 %v1064_v7, 0.0  ;;  %v1009_v13 = vmul.f32 %v2230_v19, %v895_v9 }
 0x18d   :  { %v589_v15 = vpop.f32.mrf.mxu0  ;;  %v1441_v33 = vpop.f32.mrf.mxu1 }
 0x18e   :  { %1163 = vst.msk [vmem:[%s2658_s4 + $0x108] sm:$0xff] %vm1129_vm2, %v1113_v11  ;;  %v1065_v17 = vadd.f32 %v2238_v22, %v1009_v13  ;;  %v900_v18 = vadd.f32 %v2441_v45, %v589_v15 }
 0x18f   :  { %v591_v37 = vpop.f32.mrf.mxu0 }
 0x190   :  { %v1114_v23 = vmax.f32 %v1065_v17, 0.0  ;;  %v1010_v24 = vmul.f32 %v2230_v19, %v900_v18 }
 0x191   :  { %v594_v26 = vpop.f32.mrf.mxu0 }
 0x192   :  { %1164 = vst.msk [vmem:[%s2658_s4 + $0x110] sm:$0xff] %vm1129_vm2, %v1114_v23  ;;  %v1066_v27 = vadd.f32 %v2238_v22, %v1010_v24  ;;  %v905_v28 = vadd.f32 %v2450_v54, %v594_v26 }
 0x193   :  { %v596_v45 = vpop.f32.mrf.mxu0 }
 0x194   :  { %v1115_v31 = vmax.f32 %v1066_v27, 0.0  ;;  %v1011_v32 = vmul.f32 %v2230_v19, %v905_v28 }
 0x195   :  { %v599_v34 = vpop.f32.mrf.mxu0 }
 0x196   :  { %1165 = vst.msk [vmem:[%s2658_s4 + $0x118] sm:$0xff] %vm1129_vm2, %v1115_v31  ;;  %v1067_v35 = vadd.f32 %v2238_v22, %v1011_v32  ;;  %v910_v36 = vadd.f32 %v2459_v1, %v599_v34 }
 0x197   :  { %v601_v8 = vpop.f32.mrf.mxu0 }
 0x198   :  { %v1116_v0 = vmax.f32 %v1067_v35, 0.0  ;;  %v1012_v54 = vmul.f32 %v2230_v19, %v910_v36 }
 0x199   :  { %v604_v39 = vpop.f32.mrf.mxu0 }
 0x19a   :  { %1166 = vst.msk [vmem:[%s2658_s4 + $0x120] sm:$0xff] %vm1129_vm2, %v1116_v0  ;;  %v1068_v40 = vadd.f32 %v2238_v22, %v1012_v54  ;;  %v915_v41 = vadd.f32 %v2468_v10, %v604_v39 }
 0x19b   :  { %v606_v42 = vpop.f32.mrf.mxu0 }
 0x19c   :  { %v1117_v44 = vmax.f32 %v1068_v40, 0.0  ;;  %v1013_v12 = vmul.f32 %v2230_v19, %v915_v41 }
 0x19d   :  { %v609_v46 = vpop.f32.mrf.mxu0 }
 0x19e   :  { %1167 = vst.msk [vmem:[%s2658_s4 + $0x128] sm:$0xff] %vm1129_vm2, %v1117_v44  ;;  %v1069_v1 = vadd.f32 %v2238_v22, %v1013_v12  ;;  %v920_v48 = vadd.f32 %v2477_v20, %v609_v46 }
 0x19f   :  { %v611_v49 = vpop.f32.mrf.mxu0 }
 0x1a0   :  { %v1118_v50 = vmax.f32 %v1069_v1, 0.0  ;;  %v1014_v52 = vmul.f32 %v2230_v19, %v920_v48 }
 0x1a1   :  { %v614_v53 = vpop.f32.mrf.mxu0 }
 0x1a2   :  { %1168 = vst.msk [vmem:[%s2658_s4 + $0x130] sm:$0xff] %vm1129_vm2, %v1118_v50  ;;  %v1070_v10 = vadd.f32 %v2238_v22, %v1014_v52  ;;  %v925_v16 = vadd.f32 %v2486_v30, %v614_v53 }
 0x1a3   :  { %v616_v56 = vpop.f32.mrf.mxu0 }
 0x1a4   :  { %v1119_v57 = vmax.f32 %v1070_v10, 0.0  ;;  %v1015_v58 = vmul.f32 %v2230_v19, %v925_v16 }
 0x1a5   :  { %v619_v60 = vpop.f32.mrf.mxu0 }
 0x1a6   :  { %1169 = vst.msk [vmem:[%s2658_s4 + $0x138] sm:$0xff] %vm1129_vm2, %v1119_v57  ;;  %v1071_v20 = vadd.f32 %v2238_v22, %v1015_v58  ;;  %v930_v61 = vadd.f32 %v2495_v38, %v619_v60 }
 0x1a7   :  { %v621_v62 = vpop.f32.mrf.mxu0 }
 0x1a8   :  { %v1120_v21 = vmax.f32 %v1071_v20, 0.0  ;;  %v1016_v2 = vmul.f32 %v2230_v19, %v930_v61 }
 0x1a9   :  { %v624_v3 = vpop.f32.mrf.mxu0 }
 0x1aa   :  { %1170 = vst.msk [vmem:[%s2658_s4 + $0x140] sm:$0xff] %vm1129_vm2, %v1120_v21  ;;  %v1072_v30 = vadd.f32 %v2238_v22, %v1016_v2  ;;  %v935_v5 = vadd.f32 %v2504_v43, %v624_v3 }
 0x1ab   :  { %v626_v6 = vpop.f32.mrf.mxu0 }
 0x1ac   :  { %v1121_v7 = vmax.f32 %v1072_v30, 0.0  ;;  %v1017_v9 = vmul.f32 %v2230_v19, %v935_v5 }
 0x1ad   :  { %v629_v29 = vpop.f32.mrf.mxu0 }
 0x1ae   :  { %1171 = vst.msk [vmem:[%s2658_s4 + $0x148] sm:$0xff] %vm1129_vm2, %v1121_v7  ;;  %v1073_v38 = vadd.f32 %v2238_v22, %v1017_v9  ;;  %v940_v11 = vadd.f32 %v2513_v47, %v629_v29 }
 0x1af   :  { %v631_v13 = vpop.f32.mrf.mxu0 }
 0x1b0   :  { %v1122_v14 = vmax.f32 %v1073_v38, 0.0  ;;  %v1018_v15 = vmul.f32 %v2230_v19, %v940_v11 }
 0x1b1   :  { %v634_v17 = vpop.f32.mrf.mxu0 }
 0x1b2   :  { %1172 = vst.msk [vmem:[%s2658_s4 + $0x150] sm:$0xff] %vm1129_vm2, %v1122_v14  ;;  %v1074_v43 = vadd.f32 %v2238_v22, %v1018_v15  ;;  %v945_v18 = vadd.f32 %v2522_v51, %v634_v17 }
 0x1b3   :  { %v636_v37 = vpop.f32.mrf.mxu0 }
 0x1b4   :  { %v1123_v23 = vmax.f32 %v1074_v43, 0.0  ;;  %v1019_v24 = vmul.f32 %v2230_v19, %v945_v18 }
 0x1b5   :  { %v639_v25 = vpop.f32.mrf.mxu0 }
 0x1b6   :  { %1173 = vst.msk [vmem:[%s2658_s4 + $0x158] sm:$0xff] %vm1129_vm2, %v1123_v23  ;;  %v1075_v47 = vadd.f32 %v2238_v22, %v1019_v24  ;;  %v950_v26 = vadd.f32 %v2531_v55, %v639_v25 }
 0x1b7   :  { %v641_v27 = vpop.f32.mrf.mxu0 }
 0x1b8   :  { %v1124_v28 = vmax.f32 %v1075_v47, 0.0  ;;  %v1020_v45 = vmul.f32 %v2230_v19, %v950_v26 }
 0x1b9   :  { %v644_v31 = vpop.f32.mrf.mxu0 }
 0x1ba   :  { %1174 = vst.msk [vmem:[%s2658_s4 + $0x160] sm:$0xff] %vm1129_vm2, %v1124_v28  ;;  %v1076_v51 = vadd.f32 %v2238_v22, %v1020_v45  ;;  %v955_v32 = vadd.f32 %v2540_v59, %v644_v31 }
 0x1bb   :  { %v646_v33 = vpop.f32.mrf.mxu0 }
 0x1bc   :  { %v1125_v34 = vmax.f32 %v1076_v51, 0.0  ;;  %v1021_v35 = vmul.f32 %v2230_v19, %v955_v32 }
 0x1bd   :  { %v649_v36 = vpop.f32.mrf.mxu0 }
 0x1be   :  { %1175 = vst.msk [vmem:[%s2658_s4 + $0x168] sm:$0xff] %vm1129_vm2, %v1125_v34  ;;  %v1077_v55 = vadd.f32 %v2238_v22, %v1021_v35  ;;  %v960_v8 = vadd.f32 %v2549_v63, %v649_v36 }
 0x1bf   :  { %v651_v0 = vpop.f32.mrf.mxu0 }
 0x1c0   :  { %v1126_v54 = vmax.f32 %v1077_v55, 0.0  ;;  %v1022_v39 = vmul.f32 %v2230_v19, %v960_v8 }
 0x1c1   :  { %v654_v40 = vpop.f32.mrf.mxu0 }
 0x1c2   :  { %1176 = vst.msk [vmem:[%s2658_s4 + $0x170] sm:$0xff] %vm1129_vm2, %v1126_v54  ;;  %v1078_v59 = vadd.f32 %v2238_v22, %v1022_v39  ;;  %v965_v41 = vadd.f32 %v2558_v4, %v654_v40 }
 0x1c3   :  { %v656_v42 = vpop.f32.mrf.mxu0 }
 0x1c4   :  { %v1127_v44 = vmax.f32 %v1078_v59, 0.0  ;;  %v1023_v12 = vmul.f32 %v2230_v19, %v965_v41 }
 0x1c6   :  { %1177 = vst.msk [vmem:[%s2658_s4 + $0x178] sm:$0xff] %vm1129_vm2, %v1127_v44  ;;  %v1079_v63 = vadd.f32 %v2238_v22, %v1023_v12 }
 0x1c8   :  { %v1128_v46 = vmax.f32 %v1079_v63, 0.0 }
 0x1ca   :  { %1178 = vst.msk [vmem:[%s2658_s4 + $0x180] sm:$0xff] %vm1129_vm2, %v1128_v46 }

// kernel: mha_forward.7
= control target key start
LH: loop header
LB: loop body
LE: loop exit
PB: predicated region body
PF: predicated region fallthrough
CT: control target
= control target key end

     0   :  { %v1973_v27 = vmov 1983009808   ;;  %v432_v29 = vlaneseq  ;;  %s3214_s0 = inlined_call_operand.vmem [shape: f32[2,3136], index: 0, kind: input, shape index: {}]   ;;  %s3215_s1 = inlined_call_operand.vmem [shape: f32[3136,10], index: 1, kind: input, shape index: {}]   ;;  %s3216_s2 = inlined_call_operand.vmem [shape: f32[1,10], index: 2, kind: input, shape index: {}]   ;;  %s3217_s3 = inlined_call_operand.hbm [shape: f32[2,10], index: 3, kind: output, shape index: {}]  }
   0x1   :  { %v53_v0 = vld [vmem:[%s3215_s1 + $0xf8] sm:$0xff]  ;;  %v52_v2 = vld [vmem:[%s3215_s1 + $0xf0] sm:$0xff]  ;;  %v51_v6 = vld [vmem:[%s3215_s1 + $0xe8] sm:$0xff]  ;;  %v430_v28 = vunpack.c.l.s4 %v1973_v27 }
   0x2   :  { %v37_v1 = vld [vmem:[%s3215_s1 + $0x78] sm:$0xff]  ;;  %1493 = vmatprep.subr.mxu0 %v53_v0  ;;  %v36_v4 = vld [vmem:[%s3215_s1 + $0x70] sm:$0xff]  ;;  %v35_v8 = vld [vmem:[%s3215_s1 + $0x68] sm:$0xff]  ;;  %v433_v39 = vshrl.u32 %v432_v29, 7 }
   0x3   :  { %v85_v3 = vld [vmem:[%s3215_s1 + $0x1f8] sm:$0xff]  ;;  %1494 = vmatpush3.msra.mxu0 %v37_v1  ;;  %v84_v7 = vld [vmem:[%s3215_s1 + $0x1f0] sm:$0xff]  ;;  %v83_v10 = vld [vmem:[%s3215_s1 + $0x1e8] sm:$0xff]  ;;  %v431_v38 = vunpack.c.0.s8 %v430_v28 }
   0x4   :  { %v69_v5 = vld [vmem:[%s3215_s1 + $0x178] sm:$0xff]  ;;  %1528 = vmatprep.subr.mxu1 %v85_v3  ;;  %1495 = vmatprep.subr.mxu0 %v52_v2  ;;  %v68_v9 = vld [vmem:[%s3215_s1 + $0x170] sm:$0xff]  ;;  %v50_v11 = vld [vmem:[%s3215_s1 + $0xe0] sm:$0xff] }
   0x5   :  { %1529 = vmatpush3.msra.mxu1 %v69_v5  ;;  %1496 = vmatpush3.msra.mxu0 %v36_v4  ;;  %v67_v12 = vld [vmem:[%s3215_s1 + $0x168] sm:$0xff]  ;;  %v34_v13 = vld [vmem:[%s3215_s1 + $0x60] sm:$0xff]  ;;  %v49_v15 = vld [vmem:[%s3215_s1 + $0xd8] sm:$0xff]  ;;  %v2126_v48 = vsub.s32 %v431_v38, %v433_v39 }
   0x6   :  { %1530 = vmatprep.subr.mxu1 %v84_v7  ;;  %1497 = vmatprep.subr.mxu0 %v51_v6  ;;  %v82_v14 = vld [vmem:[%s3215_s1 + $0x1e0] sm:$0xff]  ;;  %v33_v17 = vld [vmem:[%s3215_s1 + $0x58] sm:$0xff]  ;;  %v48_v19 = vld [vmem:[%s3215_s1 + $0xd0] sm:$0xff] }
   0x7   :  { %1531 = vmatpush3.msra.mxu1 %v68_v9  ;;  %1498 = vmatpush3.msra.mxu0 %v35_v8  ;;  %v66_v16 = vld [vmem:[%s3215_s1 + $0x160] sm:$0xff]  ;;  %v81_v18 = vld [vmem:[%s3215_s1 + $0x1d8] sm:$0xff]  ;;  %v32_v21 = vld [vmem:[%s3215_s1 + $0x50] sm:$0xff] }
   0x8   :  { %1532 = vmatprep.subr.mxu1 %v83_v10  ;;  %1499 = vmatprep.subr.mxu0 %v50_v11  ;;  %v65_v20 = vld [vmem:[%s3215_s1 + $0x158] sm:$0xff]  ;;  %v80_v22 = vld [vmem:[%s3215_s1 + $0x1d0] sm:$0xff]  ;;  %v47_v23 = vld [vmem:[%s3215_s1 + $0xc8] sm:$0xff] }
   0x9   :  { %1533 = vmatpush3.msra.mxu1 %v67_v12  ;;  %1500 = vmatpush3.msra.mxu0 %v34_v13  ;;  %v64_v24 = vld [vmem:[%s3215_s1 + $0x150] sm:$0xff]  ;;  %v31_v25 = vld [vmem:[%s3215_s1 + $0x48] sm:$0xff]  ;;  %v46_v30 = vld [vmem:[%s3215_s1 + $0xc0] sm:$0xff] }
   0xa   :  { %1534 = vmatprep.subr.mxu1 %v82_v14  ;;  %1501 = vmatprep.subr.mxu0 %v49_v15  ;;  %v79_v26 = vld [vmem:[%s3215_s1 + $0x1c8] sm:$0xff]  ;;  %v30_v32 = vld [vmem:[%s3215_s1 + $0x40] sm:$0xff]  ;;  %v45_v34 = vld [vmem:[%s3215_s1 + $0xb8] sm:$0xff] }
   0xb   :  { %1535 = vmatpush3.msra.mxu1 %v66_v16  ;;  %1502 = vmatpush3.msra.mxu0 %v33_v17  ;;  %v63_v31 = vld [vmem:[%s3215_s1 + $0x148] sm:$0xff]  ;;  %v78_v33 = vld [vmem:[%s3215_s1 + $0x1c0] sm:$0xff]  ;;  %v29_v36 = vld [vmem:[%s3215_s1 + $0x38] sm:$0xff] }
   0xc   :  { %1536 = vmatprep.subr.mxu1 %v81_v18  ;;  %1503 = vmatprep.subr.mxu0 %v48_v19  ;;  %v62_v35 = vld [vmem:[%s3215_s1 + $0x140] sm:$0xff]  ;;  %v77_v37 = vld [vmem:[%s3215_s1 + $0x1b8] sm:$0xff]  ;;  %v44_v40 = vld [vmem:[%s3215_s1 + $0xb0] sm:$0xff] }
   0xd   :  { %1537 = vmatpush3.msra.mxu1 %v65_v20  ;;  %1504 = vmatpush3.msra.mxu0 %v32_v21  ;;  %v61_v41 = vld [vmem:[%s3215_s1 + $0x138] sm:$0xff]  ;;  %v28_v42 = vld [vmem:[%s3215_s1 + $0x30] sm:$0xff]  ;;  %v43_v44 = vld [vmem:[%s3215_s1 + $0xa8] sm:$0xff] }
   0xe   :  { %1538 = vmatprep.subr.mxu1 %v80_v22  ;;  %1505 = vmatprep.subr.mxu0 %v47_v23  ;;  %v76_v43 = vld [vmem:[%s3215_s1 + $0x1b0] sm:$0xff]  ;;  %v27_v46 = vld [vmem:[%s3215_s1 + $0x28] sm:$0xff]  ;;  %v42_v49 = vld [vmem:[%s3215_s1 + $0xa0] sm:$0xff] }
   0xf   :  { %1539 = vmatpush3.msra.mxu1 %v64_v24  ;;  %1506 = vmatpush3.msra.mxu0 %v31_v25  ;;  %v60_v45 = vld [vmem:[%s3215_s1 + $0x130] sm:$0xff]  ;;  %v75_v47 = vld [vmem:[%s3215_s1 + $0x1a8] sm:$0xff]  ;;  %v15_v51 = vld [vmem:[%s3214_s0] sm:$0xff] }
  0x10   :  { %1540 = vmatprep.subr.mxu1 %v79_v26  ;;  %1507 = vmatprep.subr.mxu0 %v46_v30  ;;  %v59_v50 = vld [vmem:[%s3215_s1 + $0x128] sm:$0xff]  ;;  %v26_v52 = vld [vmem:[%s3215_s1 + $0x20] sm:$0xff]  ;;  %v41_v54 = vld [vmem:[%s3215_s1 + $0x98] sm:$0xff]  ;;  %v435_v58 = vrot.slane %v15_v51, %v2126_v48  ;;  %v428_v59 = vcombine.high %v15_v51, %v15_v51 }
  0x11   :  { %1541 = vmatpush3.msra.mxu1 %v63_v31  ;;  %1508 = vmatpush3.msra.mxu0 %v30_v32  ;;  %v74_v53 = vld [vmem:[%s3215_s1 + $0x1a0] sm:$0xff]  ;;  %v25_v56 = vld [vmem:[%s3215_s1 + $0x18] sm:$0xff]  ;;  %v40_v60 = vld [vmem:[%s3215_s1 + $0x90] sm:$0xff] }
  0x12   :  { %1542 = vmatprep.subr.mxu1 %v78_v33  ;;  %1509 = vmatprep.subr.mxu0 %v45_v34  ;;  %v58_v55 = vld [vmem:[%s3215_s1 + $0x120] sm:$0xff]  ;;  %v73_v57 = vld [vmem:[%s3215_s1 + $0x198] sm:$0xff]  ;;  %v24_v62 = vld [vmem:[%s3215_s1 + $0x10] sm:$0xff]  ;;  %v443_v4 = vcombine.high %v435_v58, %v435_v58  ;;  %v442_v5 = vrot.slane %v428_v59, %v2126_v48 }
  0x13   :  { %1543 = vmatpush3.msra.mxu1 %v62_v35  ;;  %1510 = vmatpush3.msra.mxu0 %v29_v36  ;;  %v57_v61 = vld [vmem:[%s3215_s1 + $0x118] sm:$0xff]  ;;  %v72_v63 = vld [vmem:[%s3215_s1 + $0x190] sm:$0xff]  ;;  %v39_v0 = vld [vmem:[%s3215_s1 + $0x88] sm:$0xff] }
  0x14   :  { %1544 = vmatprep.subr.mxu1 %v77_v37  ;;  %1511 = vmatprep.subr.mxu0 %v44_v40  ;;  %v56_v1 = vld [vmem:[%s3215_s1 + $0x110] sm:$0xff]  ;;  %v23_v2 = vld [vmem:[%s3215_s1 + $0x8] sm:$0xff]  ;;  %v38_v6 = vld [vmem:[%s3215_s1 + $0x80] sm:$0xff]  ;;  %v444_v12 = vcombine.high %v442_v5, %v442_v5 }
  0x15   :  { %1545 = vmatpush3.msra.mxu1 %v61_v41  ;;  %1512 = vmatpush3.msra.mxu0 %v28_v42  ;;  %v71_v3 = vld [vmem:[%s3215_s1 + $0x188] sm:$0xff]  ;;  %v22_v7 = vld [vmem:[%s3215_s1] sm:$0xff]  ;;  %v117_v10 = vld [vmem:[%s3215_s1 + $0x2f8] sm:$0xff] }
  0x16   :  { %1546 = vmatprep.subr.mxu1 %v76_v43  ;;  %1513 = vmatprep.subr.mxu0 %v43_v44  ;;  %v55_v8 = vld [vmem:[%s3215_s1 + $0x108] sm:$0xff]  ;;  %v70_v9 = vld [vmem:[%s3215_s1 + $0x180] sm:$0xff]  ;;  %v101_v13 = vld [vmem:[%s3215_s1 + $0x278] sm:$0xff] }
  0x17   :  { %1547 = vmatpush3.msra.mxu1 %v60_v45  ;;  %1514 = vmatpush3.msra.mxu0 %v27_v46  ;;  %v54_v11 = vld [vmem:[%s3215_s1 + $0x100] sm:$0xff]  ;;  %v116_v14 = vld [vmem:[%s3215_s1 + $0x2f0] sm:$0xff]  ;;  %v149_v15 = vld [vmem:[%s3215_s1 + $0x3f8] sm:$0xff] }
  0x18   :  { %1548 = vmatprep.subr.mxu1 %v75_v47  ;;  %1515 = vmatprep.subr.mxu0 %v42_v49  ;;  %v100_v16 = vld [vmem:[%s3215_s1 + $0x270] sm:$0xff]  ;;  %v133_v17 = vld [vmem:[%s3215_s1 + $0x378] sm:$0xff]  ;;  %v115_v18 = vld [vmem:[%s3215_s1 + $0x2e8] sm:$0xff] }
  0x19   :  { %1549 = vmatpush3.msra.mxu1 %v59_v50  ;;  %1516 = vmatpush3.msra.mxu0 %v26_v52  ;;  %v148_v19 = vld [vmem:[%s3215_s1 + $0x3f0] sm:$0xff]  ;;  %v99_v20 = vld [vmem:[%s3215_s1 + $0x268] sm:$0xff]  ;;  %v114_v22 = vld [vmem:[%s3215_s1 + $0x2e0] sm:$0xff] }
  0x1a   :  { %1550 = vmatprep.subr.mxu1 %v74_v53  ;;  %1517 = vmatprep.subr.mxu0 %v41_v54  ;;  %v132_v21 = vld [vmem:[%s3215_s1 + $0x370] sm:$0xff]  ;;  %v147_v23 = vld [vmem:[%s3215_s1 + $0x3e8] sm:$0xff]  ;;  %v98_v24 = vld [vmem:[%s3215_s1 + $0x260] sm:$0xff] }
  0x1b   :  { %1551 = vmatpush3.msra.mxu1 %v58_v55  ;;  %1518 = vmatpush3.msra.mxu0 %v25_v56  ;;  %v131_v25 = vld [vmem:[%s3215_s1 + $0x368] sm:$0xff]  ;;  %v113_v26 = vld [vmem:[%s3215_s1 + $0x2d8] sm:$0xff]  ;;  %v146_v27 = vld [vmem:[%s3215_s1 + $0x3e0] sm:$0xff] }
  0x1c   :  { %1552 = vmatprep.subr.mxu1 %v73_v57  ;;  %1519 = vmatprep.subr.mxu0 %v40_v60  ;;  %v97_v28 = vld [vmem:[%s3215_s1 + $0x258] sm:$0xff]  ;;  %v130_v29 = vld [vmem:[%s3215_s1 + $0x360] sm:$0xff]  ;;  %v112_v30 = vld [vmem:[%s3215_s1 + $0x2d0] sm:$0xff] }
  0x1d   :  { %1553 = vmatpush3.msra.mxu1 %v57_v61  ;;  %1520 = vmatpush3.msra.mxu0 %v24_v62  ;;  %v145_v31 = vld [vmem:[%s3215_s1 + $0x3d8] sm:$0xff]  ;;  %v96_v32 = vld [vmem:[%s3215_s1 + $0x250] sm:$0xff]  ;;  %v111_v34 = vld [vmem:[%s3215_s1 + $0x2c8] sm:$0xff] }
  0x1e   :  { %1554 = vmatprep.subr.mxu1 %v72_v63  ;;  %1521 = vmatprep.subr.mxu0 %v39_v0  ;;  %v129_v33 = vld [vmem:[%s3215_s1 + $0x358] sm:$0xff]  ;;  %v144_v35 = vld [vmem:[%s3215_s1 + $0x3d0] sm:$0xff]  ;;  %v95_v36 = vld [vmem:[%s3215_s1 + $0x248] sm:$0xff] }
  0x1f   :  { %1555 = vmatpush3.msra.mxu1 %v56_v1  ;;  %1522 = vmatpush3.msra.mxu0 %v23_v2  ;;  %v128_v37 = vld [vmem:[%s3215_s1 + $0x350] sm:$0xff]  ;;  %v110_v38 = vld [vmem:[%s3215_s1 + $0x2c0] sm:$0xff]  ;;  %v143_v39 = vld [vmem:[%s3215_s1 + $0x3c8] sm:$0xff] }
  0x20   :  { %1556 = vmatprep.subr.mxu1 %v71_v3  ;;  %1523 = vmatprep.subr.mxu0 %v38_v6  ;;  %v94_v40 = vld [vmem:[%s3215_s1 + $0x240] sm:$0xff]  ;;  %v127_v41 = vld [vmem:[%s3215_s1 + $0x348] sm:$0xff]  ;;  %v109_v42 = vld [vmem:[%s3215_s1 + $0x2b8] sm:$0xff] }
  0x21   :  { %628 = vmatprep.mubr.f32.mxu0 %v443_v4  ;;  %1524 = vmatpush3.msra.mxu0 %v22_v7  ;;  %v142_v43 = vld [vmem:[%s3215_s1 + $0x3c0] sm:$0xff]  ;;  %v93_v44 = vld [vmem:[%s3215_s1 + $0x238] sm:$0xff]  ;;  %v108_v46 = vld [vmem:[%s3215_s1 + $0x2b0] sm:$0xff] }
  0x22   :  { %1557 = vmatpush3.msra.mxu1 %v55_v8  ;;  %629 = vmatmul.mubr.f32.vlgmr.msra.gmra.mxu0 %v435_v58  ;;  %v126_v45 = vld [vmem:[%s3215_s1 + $0x340] sm:$0xff]  ;;  %v141_v47 = vld [vmem:[%s3215_s1 + $0x3b8] sm:$0xff]  ;;  %v92_v49 = vld [vmem:[%s3215_s1 + $0x230] sm:$0xff] }
  0x23   :  { %1558 = vmatprep.subr.mxu1 %v70_v9  ;;  %1563 = vmatprep.subr.mxu0 %v117_v10  ;;  %v125_v50 = vld [vmem:[%s3215_s1 + $0x338] sm:$0xff]  ;;  %v107_v51 = vld [vmem:[%s3215_s1 + $0x2a8] sm:$0xff]  ;;  %v140_v52 = vld [vmem:[%s3215_s1 + $0x3b0] sm:$0xff] }
  0x24   :  { %1559 = vmatpush3.msra.mxu1 %v54_v11  ;;  %698 = vmatprep.mubr.f32.mxu1 %v444_v12  ;;  %v91_v53 = vld [vmem:[%s3215_s1 + $0x228] sm:$0xff]  ;;  %v124_v54 = vld [vmem:[%s3215_s1 + $0x330] sm:$0xff]  ;;  %v106_v55 = vld [vmem:[%s3215_s1 + $0x2a0] sm:$0xff] }
  0x25   :  { %1564 = vmatpush3.msra.mxu0 %v101_v13  ;;  %699 = vmatmul.mubr.f32.vlgmr.msra.gmra.mxu1 %v442_v5  ;;  %v139_v56 = vld [vmem:[%s3215_s1 + $0x3a8] sm:$0xff]  ;;  %v90_v57 = vld [vmem:[%s3215_s1 + $0x220] sm:$0xff]  ;;  %v105_v60 = vld [vmem:[%s3215_s1 + $0x298] sm:$0xff] }
  0x26   :  { %1565 = vmatprep.subr.mxu0 %v116_v14  ;;  %1598 = vmatprep.subr.mxu1 %v149_v15  ;;  %v16_v58 = vld [vmem:[%s3214_s0 + $0x8] sm:$0xff]  ;;  %v138_v61 = vld [vmem:[%s3215_s1 + $0x3a0] sm:$0xff]  ;;  %v89_v62 = vld [vmem:[%s3215_s1 + $0x218] sm:$0xff] }
  0x27   :  { %1566 = vmatpush3.msra.mxu0 %v100_v16  ;;  %1599 = vmatpush3.msra.mxu1 %v133_v17  ;;  %v123_v59 = vld [vmem:[%s3215_s1 + $0x328] sm:$0xff]  ;;  %v122_v63 = vld [vmem:[%s3215_s1 + $0x320] sm:$0xff]  ;;  %v104_v0 = vld [vmem:[%s3215_s1 + $0x290] sm:$0xff]  ;;  %v445_v1 = vcombine.high %v16_v58, %v16_v58  ;;  %v452_v4 = vrot.slane %v16_v58, %v2126_v48 }
  0x28   :  { %1567 = vmatprep.subr.mxu0 %v115_v18  ;;  %1600 = vmatprep.subr.mxu1 %v148_v19  ;;  %v137_v2 = vld [vmem:[%s3215_s1 + $0x398] sm:$0xff]  ;;  %v88_v3 = vld [vmem:[%s3215_s1 + $0x210] sm:$0xff]  ;;  %v103_v6 = vld [vmem:[%s3215_s1 + $0x288] sm:$0xff] }
  0x29   :  { %1568 = vmatpush3.msra.mxu0 %v99_v20  ;;  %1601 = vmatpush3.msra.mxu1 %v132_v21  ;;  %v121_v5 = vld [vmem:[%s3215_s1 + $0x318] sm:$0xff]  ;;  %v136_v7 = vld [vmem:[%s3215_s1 + $0x390] sm:$0xff]  ;;  %v87_v8 = vld [vmem:[%s3215_s1 + $0x208] sm:$0xff]  ;;  %v459_v11 = vrot.slane %v445_v1, %v2126_v48  ;;  %v460_v14 = vcombine.high %v452_v4, %v452_v4 }
  0x2a   :  { %1569 = vmatprep.subr.mxu0 %v114_v22  ;;  %1602 = vmatprep.subr.mxu1 %v147_v23  ;;  %v120_v9 = vld [vmem:[%s3215_s1 + $0x310] sm:$0xff]  ;;  %v102_v10 = vld [vmem:[%s3215_s1 + $0x280] sm:$0xff]  ;;  %v135_v12 = vld [vmem:[%s3215_s1 + $0x388] sm:$0xff] }
  0x2b   :  { %1570 = vmatpush3.msra.mxu0 %v98_v24  ;;  %1603 = vmatpush3.msra.mxu1 %v131_v25  ;;  %v86_v13 = vld [vmem:[%s3215_s1 + $0x200] sm:$0xff]  ;;  %v119_v15 = vld [vmem:[%s3215_s1 + $0x308] sm:$0xff]  ;;  %v181_v17 = vld [vmem:[%s3215_s1 + $0x4f8] sm:$0xff]  ;;  %v461_v19 = vcombine.high %v459_v11, %v459_v11 }
  0x2c   :  { %1571 = vmatprep.subr.mxu0 %v113_v26  ;;  %1604 = vmatprep.subr.mxu1 %v146_v27  ;;  %v134_v16 = vld [vmem:[%s3215_s1 + $0x380] sm:$0xff]  ;;  %v165_v20 = vld [vmem:[%s3215_s1 + $0x478] sm:$0xff]  ;;  %v180_v21 = vld [vmem:[%s3215_s1 + $0x4f0] sm:$0xff] }
  0x2d   :  { %1572 = vmatpush3.msra.mxu0 %v97_v28  ;;  %1605 = vmatpush3.msra.mxu1 %v130_v29  ;;  %v118_v18 = vld [vmem:[%s3215_s1 + $0x300] sm:$0xff]  ;;  %v213_v22 = vld [vmem:[%s3215_s1 + $0x5f8] sm:$0xff]  ;;  %v164_v23 = vld [vmem:[%s3215_s1 + $0x470] sm:$0xff] }
  0x2e   :  { %1573 = vmatprep.subr.mxu0 %v112_v30  ;;  %1606 = vmatprep.subr.mxu1 %v145_v31  ;;  %v197_v24 = vld [vmem:[%s3215_s1 + $0x578] sm:$0xff]  ;;  %v179_v25 = vld [vmem:[%s3215_s1 + $0x4e8] sm:$0xff]  ;;  %v212_v26 = vld [vmem:[%s3215_s1 + $0x5f0] sm:$0xff] }
  0x2f   :  { %1574 = vmatpush3.msra.mxu0 %v96_v32  ;;  %1607 = vmatpush3.msra.mxu1 %v129_v33  ;;  %v163_v27 = vld [vmem:[%s3215_s1 + $0x468] sm:$0xff]  ;;  %v196_v28 = vld [vmem:[%s3215_s1 + $0x570] sm:$0xff]  ;;  %v178_v29 = vld [vmem:[%s3215_s1 + $0x4e0] sm:$0xff] }
  0x30   :  { %1575 = vmatprep.subr.mxu0 %v111_v34  ;;  %1608 = vmatprep.subr.mxu1 %v144_v35  ;;  %v211_v30 = vld [vmem:[%s3215_s1 + $0x5e8] sm:$0xff]  ;;  %v162_v31 = vld [vmem:[%s3215_s1 + $0x460] sm:$0xff]  ;;  %v177_v33 = vld [vmem:[%s3215_s1 + $0x4d8] sm:$0xff] }
  0x31   :  { %1576 = vmatpush3.msra.mxu0 %v95_v36  ;;  %1609 = vmatpush3.msra.mxu1 %v128_v37  ;;  %v195_v32 = vld [vmem:[%s3215_s1 + $0x568] sm:$0xff]  ;;  %v210_v34 = vld [vmem:[%s3215_s1 + $0x5e0] sm:$0xff]  ;;  %v161_v35 = vld [vmem:[%s3215_s1 + $0x458] sm:$0xff] }
  0x32   :  { %1577 = vmatprep.subr.mxu0 %v110_v38  ;;  %1610 = vmatprep.subr.mxu1 %v143_v39  ;;  %v194_v36 = vld [vmem:[%s3215_s1 + $0x560] sm:$0xff]  ;;  %v176_v37 = vld [vmem:[%s3215_s1 + $0x4d0] sm:$0xff]  ;;  %v209_v38 = vld [vmem:[%s3215_s1 + $0x5d8] sm:$0xff] }
  0x33   :  { %1578 = vmatpush3.msra.mxu0 %v94_v40  ;;  %1611 = vmatpush3.msra.mxu1 %v127_v41  ;;  %v160_v39 = vld [vmem:[%s3215_s1 + $0x450] sm:$0xff]  ;;  %v193_v40 = vld [vmem:[%s3215_s1 + $0x558] sm:$0xff]  ;;  %v175_v41 = vld [vmem:[%s3215_s1 + $0x4c8] sm:$0xff] }
  0x34   :  { %1579 = vmatprep.subr.mxu0 %v109_v42  ;;  %1612 = vmatprep.subr.mxu1 %v142_v43  ;;  %v208_v42 = vld [vmem:[%s3215_s1 + $0x5d0] sm:$0xff]  ;;  %v159_v43 = vld [vmem:[%s3215_s1 + $0x448] sm:$0xff] }
  0x35   :  { %1580 = vmatpush3.msra.mxu0 %v93_v44  ;;  %1613 = vmatpush3.msra.mxu1 %v126_v45  ;;  %v192_v44 = vld [vmem:[%s3215_s1 + $0x550] sm:$0xff]  ;;  %v174_v45 = vld [vmem:[%s3215_s1 + $0x4c0] sm:$0xff]  ;;  %v171_v58 = vld [vmem:[%s3215_s1 + $0x4a8] sm:$0xff] }
  0x36   :  { %1581 = vmatprep.subr.mxu0 %v108_v46  ;;  %1614 = vmatprep.subr.mxu1 %v141_v47  ;;  %v207_v46 = vld [vmem:[%s3215_s1 + $0x5c8] sm:$0xff]  ;;  %v158_v47 = vld [vmem:[%s3215_s1 + $0x440] sm:$0xff]  ;;  %v17_v1 = vld [vmem:[%s3214_s0 + $0x10] sm:$0xff] }
  0x37   :  { %1582 = vmatpush3.msra.mxu0 %v92_v49  ;;  %1615 = vmatpush3.msra.mxu1 %v125_v50  ;;  %v191_v49 = vld [vmem:[%s3215_s1 + $0x548] sm:$0xff]  ;;  %v173_v50 = vld [vmem:[%s3215_s1 + $0x4b8] sm:$0xff] }
  0x38   :  { %1583 = vmatprep.subr.mxu0 %v107_v51  ;;  %1616 = vmatprep.subr.mxu1 %v140_v52  ;;  %v206_v51 = vld [vmem:[%s3215_s1 + $0x5c0] sm:$0xff]  ;;  %v157_v52 = vld [vmem:[%s3215_s1 + $0x438] sm:$0xff] }
  0x39   :  { %1584 = vmatpush3.msra.mxu0 %v91_v53  ;;  %1617 = vmatpush3.msra.mxu1 %v124_v54  ;;  %v190_v53 = vld [vmem:[%s3215_s1 + $0x540] sm:$0xff]  ;;  %v172_v54 = vld [vmem:[%s3215_s1 + $0x4b0] sm:$0xff] }
  0x3a   :  { %1585 = vmatprep.subr.mxu0 %v106_v55  ;;  %1618 = vmatprep.subr.mxu1 %v139_v56  ;;  %v205_v55 = vld [vmem:[%s3215_s1 + $0x5b8] sm:$0xff]  ;;  %v156_v56 = vld [vmem:[%s3215_s1 + $0x430] sm:$0xff] }
  0x3b   :  { %1586 = vmatpush3.msra.mxu0 %v90_v57  ;;  %1619 = vmatpush3.msra.mxu1 %v123_v59  ;;  %v189_v57 = vld [vmem:[%s3215_s1 + $0x538] sm:$0xff]  ;;  %v204_v59 = vld [vmem:[%s3215_s1 + $0x5b0] sm:$0xff] }
  0x3c   :  { %1587 = vmatprep.subr.mxu0 %v105_v60  ;;  %1620 = vmatprep.subr.mxu1 %v138_v61  ;;  %v155_v60 = vld [vmem:[%s3215_s1 + $0x428] sm:$0xff]  ;;  %v188_v61 = vld [vmem:[%s3215_s1 + $0x530] sm:$0xff] }
  0x3d   :  { %1588 = vmatpush3.msra.mxu0 %v89_v62  ;;  %1621 = vmatpush3.msra.mxu1 %v122_v63  ;;  %v170_v62 = vld [vmem:[%s3215_s1 + $0x4a0] sm:$0xff]  ;;  %v203_v63 = vld [vmem:[%s3215_s1 + $0x5a8] sm:$0xff] }
  0x3e   :  { %1589 = vmatprep.subr.mxu0 %v104_v0  ;;  %1622 = vmatprep.subr.mxu1 %v137_v2  ;;  %v154_v0 = vld [vmem:[%s3215_s1 + $0x420] sm:$0xff]  ;;  %v187_v2 = vld [vmem:[%s3215_s1 + $0x528] sm:$0xff] }
  0x3f   :  { %1590 = vmatpush3.msra.mxu0 %v88_v3  ;;  %1623 = vmatpush3.msra.mxu1 %v121_v5  ;;  %v169_v3 = vld [vmem:[%s3215_s1 + $0x498] sm:$0xff] }
  0x40   :  { %1591 = vmatprep.subr.mxu0 %v103_v6  ;;  %1624 = vmatprep.subr.mxu1 %v136_v7  ;;  %v153_v5 = vld [vmem:[%s3215_s1 + $0x418] sm:$0xff]  ;;  %v186_v6 = vld [vmem:[%s3215_s1 + $0x520] sm:$0xff]  ;;  %v168_v7 = vld [vmem:[%s3215_s1 + $0x490] sm:$0xff] }
  0x41   :  { %1592 = vmatpush3.msra.mxu0 %v87_v8  ;;  %1625 = vmatpush3.msra.mxu1 %v120_v9  ;;  %v462_v8 = vcombine.high %v17_v1, %v17_v1  ;;  %v201_v9 = vld [vmem:[%s3215_s1 + $0x598] sm:$0xff] }
  0x42   :  { %1593 = vmatprep.subr.mxu0 %v102_v10  ;;  %1626 = vmatprep.subr.mxu1 %v135_v12  ;;  %v152_v10 = vld [vmem:[%s3215_s1 + $0x410] sm:$0xff]  ;;  %v185_v12 = vld [vmem:[%s3215_s1 + $0x518] sm:$0xff] }
  0x43   :  { %1594 = vmatpush3.msra.mxu0 %v86_v13  ;;  %768 = vmatprep.mubr.f32.mxu0 %v460_v14  ;;  %v167_v13 = vld [vmem:[%s3215_s1 + $0x488] sm:$0xff]  ;;  %v200_v14 = vld [vmem:[%s3215_s1 + $0x590] sm:$0xff] }
  0x44   :  { %1627 = vmatpush3.msra.mxu1 %v119_v15  ;;  %769 = vmatmul.mubr.f32.vlgmr.msra.gmra.mxu0 %v452_v4  ;;  %v202_v4 = vld [vmem:[%s3215_s1 + $0x5a0] sm:$0xff]  ;;  %v151_v15 = vld [vmem:[%s3215_s1 + $0x408] sm:$0xff] }
  0x45   :  { %1628 = vmatprep.subr.mxu1 %v134_v16  ;;  %1633 = vmatprep.subr.mxu0 %v181_v17  ;;  %v184_v16 = vld [vmem:[%s3215_s1 + $0x510] sm:$0xff]  ;;  %v166_v17 = vld [vmem:[%s3215_s1 + $0x480] sm:$0xff] }
  0x46   :  { %1629 = vmatpush3.msra.mxu1 %v118_v18  ;;  %838 = vmatprep.mubr.f32.mxu1 %v461_v19  ;;  %v476_v18 = vrot.slane %v462_v8, %v2126_v48  ;;  %v199_v19 = vld [vmem:[%s3215_s1 + $0x588] sm:$0xff]  ;;  %v18_v8 = vld [vmem:[%s3214_s0 + $0x18] sm:$0xff] }
  0x47   :  { %1634 = vmatpush3.msra.mxu0 %v165_v20  ;;  %839 = vmatmul.mubr.f32.vlgmr.msra.gmra.mxu1 %v459_v11  ;;  %v469_v11 = vrot.slane %v17_v1, %v2126_v48  ;;  %v150_v20 = vld [vmem:[%s3215_s1 + $0x400] sm:$0xff]  ;;  %v235_v1 = vld [vmem:[%s3215_s1 + $0x6a8] sm:$0xff] }
  0x48   :  { %1635 = vmatprep.subr.mxu0 %v180_v21  ;;  %1668 = vmatprep.subr.mxu1 %v213_v22  ;;  %v183_v22 = vld [vmem:[%s3215_s1 + $0x508] sm:$0xff] }
  0x49   :  { %1636 = vmatpush3.msra.mxu0 %v164_v23  ;;  %1669 = vmatpush3.msra.mxu1 %v197_v24  ;;  %v477_v21 = vcombine.high %v469_v11, %v469_v11  ;;  %v198_v23 = vld [vmem:[%s3215_s1 + $0x580] sm:$0xff]  ;;  %v245_v24 = vld [vmem:[%s3215_s1 + $0x6f8] sm:$0xff] }
  0x4a   :  { %1637 = vmatprep.subr.mxu0 %v179_v25  ;;  %1670 = vmatprep.subr.mxu1 %v212_v26  ;;  %v182_v25 = vld [vmem:[%s3215_s1 + $0x500] sm:$0xff]  ;;  %v478_v26 = vcombine.high %v476_v18, %v476_v18 }
  0x4b   :  { %1638 = vmatpush3.msra.mxu0 %v163_v27  ;;  %1671 = vmatpush3.msra.mxu1 %v196_v28  ;;  %v229_v27 = vld [vmem:[%s3215_s1 + $0x678] sm:$0xff]  ;;  %v244_v28 = vld [vmem:[%s3215_s1 + $0x6f0] sm:$0xff] }
  0x4c   :  { %1639 = vmatprep.subr.mxu0 %v178_v29  ;;  %1672 = vmatprep.subr.mxu1 %v211_v30  ;;  %v277_v29 = vld [vmem:[%s3215_s1 + $0x7f8] sm:$0xff]  ;;  %v228_v30 = vld [vmem:[%s3215_s1 + $0x670] sm:$0xff] }
  0x4d   :  { %1640 = vmatpush3.msra.mxu0 %v162_v31  ;;  %1673 = vmatpush3.msra.mxu1 %v195_v32  ;;  %v261_v31 = vld [vmem:[%s3215_s1 + $0x778] sm:$0xff]  ;;  %v243_v32 = vld [vmem:[%s3215_s1 + $0x6e8] sm:$0xff] }
  0x4e   :  { %1641 = vmatprep.subr.mxu0 %v177_v33  ;;  %1674 = vmatprep.subr.mxu1 %v210_v34  ;;  %v276_v33 = vld [vmem:[%s3215_s1 + $0x7f0] sm:$0xff]  ;;  %v227_v34 = vld [vmem:[%s3215_s1 + $0x668] sm:$0xff] }
  0x4f   :  { %1642 = vmatpush3.msra.mxu0 %v161_v35  ;;  %1675 = vmatpush3.msra.mxu1 %v194_v36  ;;  %v260_v35 = vld [vmem:[%s3215_s1 + $0x770] sm:$0xff]  ;;  %v242_v36 = vld [vmem:[%s3215_s1 + $0x6e0] sm:$0xff] }
  0x50   :  { %1643 = vmatprep.subr.mxu0 %v176_v37  ;;  %1676 = vmatprep.subr.mxu1 %v209_v38  ;;  %v275_v37 = vld [vmem:[%s3215_s1 + $0x7e8] sm:$0xff]  ;;  %v226_v38 = vld [vmem:[%s3215_s1 + $0x660] sm:$0xff] }
  0x51   :  { %1644 = vmatpush3.msra.mxu0 %v160_v39  ;;  %1677 = vmatpush3.msra.mxu1 %v193_v40  ;;  %v259_v39 = vld [vmem:[%s3215_s1 + $0x768] sm:$0xff]  ;;  %v241_v40 = vld [vmem:[%s3215_s1 + $0x6d8] sm:$0xff] }
  0x52   :  { %1645 = vmatprep.subr.mxu0 %v175_v41  ;;  %1678 = vmatprep.subr.mxu1 %v208_v42  ;;  %v274_v41 = vld [vmem:[%s3215_s1 + $0x7e0] sm:$0xff]  ;;  %v225_v42 = vld [vmem:[%s3215_s1 + $0x658] sm:$0xff] }
  0x53   :  { %1646 = vmatpush3.msra.mxu0 %v159_v43  ;;  %1679 = vmatpush3.msra.mxu1 %v192_v44  ;;  %v258_v43 = vld [vmem:[%s3215_s1 + $0x760] sm:$0xff]  ;;  %v240_v44 = vld [vmem:[%s3215_s1 + $0x6d0] sm:$0xff] }
  0x54   :  { %1647 = vmatprep.subr.mxu0 %v174_v45  ;;  %1680 = vmatprep.subr.mxu1 %v207_v46  ;;  %v273_v45 = vld [vmem:[%s3215_s1 + $0x7d8] sm:$0xff]  ;;  %v224_v46 = vld [vmem:[%s3215_s1 + $0x650] sm:$0xff] }
  0x55   :  { %1648 = vmatpush3.msra.mxu0 %v158_v47  ;;  %1681 = vmatpush3.msra.mxu1 %v191_v49  ;;  %v257_v47 = vld [vmem:[%s3215_s1 + $0x758] sm:$0xff]  ;;  %v239_v49 = vld [vmem:[%s3215_s1 + $0x6c8] sm:$0xff] }
  0x56   :  { %1649 = vmatprep.subr.mxu0 %v173_v50  ;;  %1682 = vmatprep.subr.mxu1 %v206_v51  ;;  %v272_v50 = vld [vmem:[%s3215_s1 + $0x7d0] sm:$0xff]  ;;  %v223_v51 = vld [vmem:[%s3215_s1 + $0x648] sm:$0xff] }
  0x57   :  { %1650 = vmatpush3.msra.mxu0 %v157_v52  ;;  %1683 = vmatpush3.msra.mxu1 %v190_v53  ;;  %v256_v52 = vld [vmem:[%s3215_s1 + $0x750] sm:$0xff]  ;;  %v238_v53 = vld [vmem:[%s3215_s1 + $0x6c0] sm:$0xff] }
  0x58   :  { %1651 = vmatprep.subr.mxu0 %v172_v54  ;;  %1684 = vmatprep.subr.mxu1 %v205_v55  ;;  %v271_v54 = vld [vmem:[%s3215_s1 + $0x7c8] sm:$0xff]  ;;  %v222_v55 = vld [vmem:[%s3215_s1 + $0x640] sm:$0xff] }
  0x59   :  { %1652 = vmatpush3.msra.mxu0 %v156_v56  ;;  %1685 = vmatpush3.msra.mxu1 %v189_v57  ;;  %v255_v56 = vld [vmem:[%s3215_s1 + $0x748] sm:$0xff]  ;;  %v237_v57 = vld [vmem:[%s3215_s1 + $0x6b8] sm:$0xff] }
  0x5a   :  { %1653 = vmatprep.subr.mxu0 %v171_v58  ;;  %1686 = vmatprep.subr.mxu1 %v204_v59  ;;  %v270_v58 = vld [vmem:[%s3215_s1 + $0x7c0] sm:$0xff]  ;;  %v221_v59 = vld [vmem:[%s3215_s1 + $0x638] sm:$0xff] }
  0x5b   :  { %1654 = vmatpush3.msra.mxu0 %v155_v60  ;;  %1687 = vmatpush3.msra.mxu1 %v188_v61  ;;  %v254_v60 = vld [vmem:[%s3215_s1 + $0x740] sm:$0xff]  ;;  %v236_v61 = vld [vmem:[%s3215_s1 + $0x6b0] sm:$0xff] }
  0x5c   :  { %1655 = vmatprep.subr.mxu0 %v170_v62  ;;  %1688 = vmatprep.subr.mxu1 %v203_v63  ;;  %v269_v62 = vld [vmem:[%s3215_s1 + $0x7b8] sm:$0xff]  ;;  %v220_v63 = vld [vmem:[%s3215_s1 + $0x630] sm:$0xff] }
  0x5d   :  { %1656 = vmatpush3.msra.mxu0 %v154_v0  ;;  %1689 = vmatpush3.msra.mxu1 %v187_v2  ;;  %v253_v0 = vld [vmem:[%s3215_s1 + $0x738] sm:$0xff]  ;;  %v268_v2 = vld [vmem:[%s3215_s1 + $0x7b0] sm:$0xff] }
  0x5e   :  { %1657 = vmatprep.subr.mxu0 %v169_v3  ;;  %1690 = vmatprep.subr.mxu1 %v202_v4  ;;  %v219_v3 = vld [vmem:[%s3215_s1 + $0x628] sm:$0xff]  ;;  %v252_v4 = vld [vmem:[%s3215_s1 + $0x730] sm:$0xff] }
  0x5f   :  { %1658 = vmatpush3.msra.mxu0 %v153_v5  ;;  %1691 = vmatpush3.msra.mxu1 %v186_v6  ;;  %v234_v5 = vld [vmem:[%s3215_s1 + $0x6a0] sm:$0xff]  ;;  %v267_v6 = vld [vmem:[%s3215_s1 + $0x7a8] sm:$0xff] }
  0x60   :  { %1659 = vmatprep.subr.mxu0 %v168_v7  ;;  %1692 = vmatprep.subr.mxu1 %v201_v9  ;;  %v218_v7 = vld [vmem:[%s3215_s1 + $0x620] sm:$0xff]  ;;  %v251_v9 = vld [vmem:[%s3215_s1 + $0x728] sm:$0xff] }
  0x61   :  { %1660 = vmatpush3.msra.mxu0 %v152_v10  ;;  %1693 = vmatpush3.msra.mxu1 %v185_v12  ;;  %v233_v10 = vld [vmem:[%s3215_s1 + $0x698] sm:$0xff] }
  0x62   :  { %1661 = vmatprep.subr.mxu0 %v167_v13  ;;  %1694 = vmatprep.subr.mxu1 %v200_v14  ;;  %v217_v12 = vld [vmem:[%s3215_s1 + $0x618] sm:$0xff]  ;;  %v250_v13 = vld [vmem:[%s3215_s1 + $0x720] sm:$0xff]  ;;  %v232_v14 = vld [vmem:[%s3215_s1 + $0x690] sm:$0xff] }
  0x63   :  { %1662 = vmatpush3.msra.mxu0 %v151_v15  ;;  %1695 = vmatpush3.msra.mxu1 %v184_v16  ;;  %v479_v15 = vcombine.high %v18_v8, %v18_v8  ;;  %v265_v16 = vld [vmem:[%s3215_s1 + $0x798] sm:$0xff] }
  0x64   :  { %1663 = vmatprep.subr.mxu0 %v166_v17  ;;  %1696 = vmatprep.subr.mxu1 %v199_v19  ;;  %v216_v17 = vld [vmem:[%s3215_s1 + $0x610] sm:$0xff]  ;;  %v249_v19 = vld [vmem:[%s3215_s1 + $0x718] sm:$0xff] }
  0x65   :  { %1664 = vmatpush3.msra.mxu0 %v150_v20  ;;  %908 = vmatprep.mubr.f32.mxu0 %v477_v21  ;;  %v231_v20 = vld [vmem:[%s3215_s1 + $0x688] sm:$0xff]  ;;  %v264_v21 = vld [vmem:[%s3215_s1 + $0x790] sm:$0xff] }
  0x66   :  { %1697 = vmatpush3.msra.mxu1 %v183_v22  ;;  %909 = vmatmul.mubr.f32.vlgmr.msra.gmra.mxu0 %v469_v11  ;;  %v266_v11 = vld [vmem:[%s3215_s1 + $0x7a0] sm:$0xff]  ;;  %v215_v22 = vld [vmem:[%s3215_s1 + $0x608] sm:$0xff] }
  0x67   :  { %1698 = vmatprep.subr.mxu1 %v198_v23  ;;  %1703 = vmatprep.subr.mxu0 %v245_v24  ;;  %v248_v23 = vld [vmem:[%s3215_s1 + $0x710] sm:$0xff]  ;;  %v230_v24 = vld [vmem:[%s3215_s1 + $0x680] sm:$0xff] }
  0x68   :  { %1699 = vmatpush3.msra.mxu1 %v182_v25  ;;  %978 = vmatprep.mubr.f32.mxu1 %v478_v26  ;;  %v493_v25 = vrot.slane %v479_v15, %v2126_v48  ;;  %v263_v26 = vld [vmem:[%s3215_s1 + $0x788] sm:$0xff] }
  0x69   :  { %1704 = vmatpush3.msra.mxu0 %v229_v27  ;;  %979 = vmatmul.mubr.f32.vlgmr.msra.gmra.mxu1 %v476_v18  ;;  %v486_v18 = vrot.slane %v18_v8, %v2126_v48  ;;  %v214_v27 = vld [vmem:[%s3215_s1 + $0x600] sm:$0xff] }
  0x6a   :  { %1705 = vmatprep.subr.mxu0 %v244_v28  ;;  %1738 = vmatprep.subr.mxu1 %v277_v29  ;;  %v247_v29 = vld [vmem:[%s3215_s1 + $0x708] sm:$0xff] }
  0x6b   :  { %1706 = vmatpush3.msra.mxu0 %v228_v30  ;;  %1739 = vmatpush3.msra.mxu1 %v261_v31  ;;  %v494_v28 = vcombine.high %v486_v18, %v486_v18  ;;  %v262_v30 = vld [vmem:[%s3215_s1 + $0x780] sm:$0xff]  ;;  %v309_v31 = vld [vmem:[%s3215_s1 + $0x8f8] sm:$0xff] }
  0x6c   :  { %1707 = vmatprep.subr.mxu0 %v243_v32  ;;  %1740 = vmatprep.subr.mxu1 %v276_v33  ;;  %v246_v32 = vld [vmem:[%s3215_s1 + $0x700] sm:$0xff]  ;;  %v495_v33 = vcombine.high %v493_v25, %v493_v25 }
  0x6d   :  { %1708 = vmatpush3.msra.mxu0 %v227_v34  ;;  %1741 = vmatpush3.msra.mxu1 %v260_v35 }
  0x6e   :  { %1709 = vmatprep.subr.mxu0 %v242_v36  ;;  %1742 = vmatprep.subr.mxu1 %v275_v37 }
  0x6f   :  { %1710 = vmatpush3.msra.mxu0 %v226_v38  ;;  %1743 = vmatpush3.msra.mxu1 %v259_v39 }
  0x70   :  { %1711 = vmatprep.subr.mxu0 %v241_v40  ;;  %1744 = vmatprep.subr.mxu1 %v274_v41 }
  0x71   :  { %1712 = vmatpush3.msra.mxu0 %v225_v42  ;;  %1745 = vmatpush3.msra.mxu1 %v258_v43 }
  0x72   :  { %1713 = vmatprep.subr.mxu0 %v240_v44  ;;  %1746 = vmatprep.subr.mxu1 %v273_v45 }
  0x73   :  { %1714 = vmatpush3.msra.mxu0 %v224_v46  ;;  %1747 = vmatpush3.msra.mxu1 %v257_v47 }
  0x74   :  { %1715 = vmatprep.subr.mxu0 %v239_v49  ;;  %1748 = vmatprep.subr.mxu1 %v272_v50 }
  0x75   :  { %1716 = vmatpush3.msra.mxu0 %v223_v51  ;;  %1749 = vmatpush3.msra.mxu1 %v256_v52 }
  0x76   :  { %1717 = vmatprep.subr.mxu0 %v238_v53  ;;  %1750 = vmatprep.subr.mxu1 %v271_v54 }
  0x77   :  { %1718 = vmatpush3.msra.mxu0 %v222_v55  ;;  %1751 = vmatpush3.msra.mxu1 %v255_v56 }
  0x78   :  { %1719 = vmatprep.subr.mxu0 %v237_v57  ;;  %1752 = vmatprep.subr.mxu1 %v270_v58 }
  0x79   :  { %1720 = vmatpush3.msra.mxu0 %v221_v59  ;;  %1753 = vmatpush3.msra.mxu1 %v254_v60 }
  0x7a   :  { %1721 = vmatprep.subr.mxu0 %v236_v61  ;;  %1754 = vmatprep.subr.mxu1 %v269_v62 }
  0x7b   :  { %1722 = vmatpush3.msra.mxu0 %v220_v63  ;;  %1755 = vmatpush3.msra.mxu1 %v253_v0 }
  0x7c   :  { %1723 = vmatprep.subr.mxu0 %v235_v1  ;;  %1756 = vmatprep.subr.mxu1 %v268_v2 }
  0x7d   :  { %1724 = vmatpush3.msra.mxu0 %v219_v3  ;;  %1757 = vmatpush3.msra.mxu1 %v252_v4 }
  0x7e   :  { %1725 = vmatprep.subr.mxu0 %v234_v5  ;;  %1758 = vmatprep.subr.mxu1 %v267_v6 }
  0x7f   :  { %1726 = vmatpush3.msra.mxu0 %v218_v7  ;;  %1759 = vmatpush3.msra.mxu1 %v251_v9 }
  0x80   :  { %1727 = vmatprep.subr.mxu0 %v233_v10  ;;  %1760 = vmatprep.subr.mxu1 %v266_v11 }
  0x81   :  { %1728 = vmatpush3.msra.mxu0 %v217_v12  ;;  %1761 = vmatpush3.msra.mxu1 %v250_v13 }
  0x82   :  { %1729 = vmatprep.subr.mxu0 %v232_v14  ;;  %1762 = vmatprep.subr.mxu1 %v265_v16 }
  0x83   :  { %1730 = vmatpush3.msra.mxu0 %v216_v17  ;;  %1763 = vmatpush3.msra.mxu1 %v249_v19 }
  0x84   :  { %1731 = vmatprep.subr.mxu0 %v231_v20  ;;  %1764 = vmatprep.subr.mxu1 %v264_v21 }
  0x85   :  { %1732 = vmatpush3.msra.mxu0 %v215_v22  ;;  %1765 = vmatpush3.msra.mxu1 %v248_v23 }
  0x86   :  { %1733 = vmatprep.subr.mxu0 %v230_v24  ;;  %1766 = vmatprep.subr.mxu1 %v263_v26 }
  0x87   :  { %1734 = vmatpush3.msra.mxu0 %v214_v27 }
  0x88   :  { %8 = vsyncpa [#allocation3], 0  ;;  %1048 = vmatprep.mubr.f32.mxu0 %v494_v28  ;;  %1767 = vmatpush3.msra.mxu1 %v247_v29  ;;  %v293_v34 = vld [vmem:[%s3215_s1 + $0x878] sm:$0xff]  ;;  %v308_v35 = vld [vmem:[%s3215_s1 + $0x8f0] sm:$0xff]  ;;  %vm1975_vm0 = vmmov 0   ;;  %vm561_vm1 = vcmask 523264  }
  0x89   :  { %1049 = vmatmul.mubr.f32.vlgmr.msra.gmra.mxu0 %v486_v18  ;;  %1768 = vmatprep.subr.mxu1 %v262_v30  ;;  %v341_v36 = vld [vmem:[%s3215_s1 + $0x9f8] sm:$0xff]  ;;  %v292_v37 = vld [vmem:[%s3215_s1 + $0x870] sm:$0xff]  ;;  %v307_v39 = vld [vmem:[%s3215_s1 + $0x8e8] sm:$0xff]  ;;  %vm1474_vm2 = vcmask 74752  }
  0x8a   :  { %1773 = vmatprep.subr.mxu0 %v309_v31  ;;  %1769 = vmatpush3.msra.mxu1 %v246_v32  ;;  %v325_v38 = vld [vmem:[%s3215_s1 + $0x978] sm:$0xff]  ;;  %v340_v40 = vld [vmem:[%s3215_s1 + $0x9f0] sm:$0xff]  ;;  %v291_v41 = vld [vmem:[%s3215_s1 + $0x868] sm:$0xff] }
  0x8b   :  { %1118 = vmatprep.mubr.f32.mxu1 %v495_v33  ;;  %1774 = vmatpush3.msra.mxu0 %v293_v34  ;;  %v324_v42 = vld [vmem:[%s3215_s1 + $0x970] sm:$0xff]  ;;  %v306_v43 = vld [vmem:[%s3215_s1 + $0x8e0] sm:$0xff]  ;;  %v339_v44 = vld [vmem:[%s3215_s1 + $0x9e8] sm:$0xff] }
  0x8c   :  { %1119 = vmatmul.mubr.f32.vlgmr.msra.gmra.mxu1 %v493_v25  ;;  %1775 = vmatprep.subr.mxu0 %v308_v35  ;;  %v290_v45 = vld [vmem:[%s3215_s1 + $0x860] sm:$0xff]  ;;  %v323_v46 = vld [vmem:[%s3215_s1 + $0x968] sm:$0xff]  ;;  %v305_v47 = vld [vmem:[%s3215_s1 + $0x8d8] sm:$0xff] }
  0x8d   :  { %1808 = vmatprep.subr.mxu1 %v341_v36  ;;  %1776 = vmatpush3.msra.mxu0 %v292_v37  ;;  %v338_v49 = vld [vmem:[%s3215_s1 + $0x9e0] sm:$0xff]  ;;  %v289_v50 = vld [vmem:[%s3215_s1 + $0x858] sm:$0xff]  ;;  %v304_v52 = vld [vmem:[%s3215_s1 + $0x8d0] sm:$0xff] }
  0x8e   :  { %1809 = vmatpush3.msra.mxu1 %v325_v38  ;;  %1777 = vmatprep.subr.mxu0 %v307_v39  ;;  %v322_v51 = vld [vmem:[%s3215_s1 + $0x960] sm:$0xff]  ;;  %v337_v53 = vld [vmem:[%s3215_s1 + $0x9d8] sm:$0xff]  ;;  %v288_v54 = vld [vmem:[%s3215_s1 + $0x850] sm:$0xff] }
  0x8f   :  { %1810 = vmatprep.subr.mxu1 %v340_v40  ;;  %1778 = vmatpush3.msra.mxu0 %v291_v41  ;;  %v321_v55 = vld [vmem:[%s3215_s1 + $0x958] sm:$0xff]  ;;  %v303_v56 = vld [vmem:[%s3215_s1 + $0x8c8] sm:$0xff]  ;;  %v336_v57 = vld [vmem:[%s3215_s1 + $0x9d0] sm:$0xff] }
  0x90   :  { %1811 = vmatpush3.msra.mxu1 %v324_v42  ;;  %1779 = vmatprep.subr.mxu0 %v306_v43  ;;  %v287_v58 = vld [vmem:[%s3215_s1 + $0x848] sm:$0xff]  ;;  %v320_v59 = vld [vmem:[%s3215_s1 + $0x950] sm:$0xff]  ;;  %v302_v60 = vld [vmem:[%s3215_s1 + $0x8c0] sm:$0xff] }
  0x91   :  { %1812 = vmatprep.subr.mxu1 %v339_v44  ;;  %1780 = vmatpush3.msra.mxu0 %v290_v45  ;;  %v335_v61 = vld [vmem:[%s3215_s1 + $0x9c8] sm:$0xff]  ;;  %v286_v62 = vld [vmem:[%s3215_s1 + $0x840] sm:$0xff]  ;;  %v301_v0 = vld [vmem:[%s3215_s1 + $0x8b8] sm:$0xff] }
  0x92   :  { %1813 = vmatpush3.msra.mxu1 %v323_v46  ;;  %1781 = vmatprep.subr.mxu0 %v305_v47  ;;  %v319_v63 = vld [vmem:[%s3215_s1 + $0x948] sm:$0xff]  ;;  %v334_v1 = vld [vmem:[%s3215_s1 + $0x9c0] sm:$0xff]  ;;  %v285_v2 = vld [vmem:[%s3215_s1 + $0x838] sm:$0xff] }
  0x93   :  { %1814 = vmatprep.subr.mxu1 %v338_v49  ;;  %1782 = vmatpush3.msra.mxu0 %v289_v50  ;;  %v318_v3 = vld [vmem:[%s3215_s1 + $0x940] sm:$0xff]  ;;  %v300_v4 = vld [vmem:[%s3215_s1 + $0x8b0] sm:$0xff]  ;;  %v333_v5 = vld [vmem:[%s3215_s1 + $0x9b8] sm:$0xff] }
  0x94   :  { %1815 = vmatpush3.msra.mxu1 %v322_v51  ;;  %1783 = vmatprep.subr.mxu0 %v304_v52  ;;  %v284_v6 = vld [vmem:[%s3215_s1 + $0x830] sm:$0xff]  ;;  %v317_v7 = vld [vmem:[%s3215_s1 + $0x938] sm:$0xff]  ;;  %v299_v8 = vld [vmem:[%s3215_s1 + $0x8a8] sm:$0xff] }
  0x95   :  { %1816 = vmatprep.subr.mxu1 %v337_v53  ;;  %1784 = vmatpush3.msra.mxu0 %v288_v54  ;;  %v332_v9 = vld [vmem:[%s3215_s1 + $0x9b0] sm:$0xff]  ;;  %v283_v10 = vld [vmem:[%s3215_s1 + $0x828] sm:$0xff]  ;;  %v298_v12 = vld [vmem:[%s3215_s1 + $0x8a0] sm:$0xff] }
  0x96   :  { %1817 = vmatpush3.msra.mxu1 %v321_v55  ;;  %1785 = vmatprep.subr.mxu0 %v303_v56  ;;  %v316_v11 = vld [vmem:[%s3215_s1 + $0x930] sm:$0xff]  ;;  %v331_v13 = vld [vmem:[%s3215_s1 + $0x9a8] sm:$0xff]  ;;  %v282_v14 = vld [vmem:[%s3215_s1 + $0x820] sm:$0xff] }
  0x97   :  { %1818 = vmatprep.subr.mxu1 %v336_v57  ;;  %1786 = vmatpush3.msra.mxu0 %v287_v58  ;;  %v19_v15 = vld [vmem:[%s3214_s0 + $0x20] sm:$0xff]  ;;  %v315_v16 = vld [vmem:[%s3215_s1 + $0x928] sm:$0xff]  ;;  %v297_v17 = vld [vmem:[%s3215_s1 + $0x898] sm:$0xff] }
  0x98   :  { %1819 = vmatpush3.msra.mxu1 %v320_v59  ;;  %1787 = vmatprep.subr.mxu0 %v302_v60  ;;  %v330_v18 = vld [vmem:[%s3215_s1 + $0x9a0] sm:$0xff]  ;;  %v281_v19 = vld [vmem:[%s3215_s1 + $0x818] sm:$0xff]  ;;  %v296_v21 = vld [vmem:[%s3215_s1 + $0x890] sm:$0xff]  ;;  %v496_v22 = vcombine.high %v19_v15, %v19_v15  ;;  %v503_v25 = vrot.slane %v19_v15, %v2126_v48 }
  0x99   :  { %1820 = vmatprep.subr.mxu1 %v335_v61  ;;  %1788 = vmatpush3.msra.mxu0 %v286_v62  ;;  %v314_v20 = vld [vmem:[%s3215_s1 + $0x920] sm:$0xff]  ;;  %v329_v23 = vld [vmem:[%s3215_s1 + $0x998] sm:$0xff]  ;;  %v280_v24 = vld [vmem:[%s3215_s1 + $0x810] sm:$0xff] }
  0x9a   :  { %1821 = vmatpush3.msra.mxu1 %v319_v63  ;;  %1789 = vmatprep.subr.mxu0 %v301_v0  ;;  %v313_v26 = vld [vmem:[%s3215_s1 + $0x918] sm:$0xff]  ;;  %v295_v27 = vld [vmem:[%s3215_s1 + $0x888] sm:$0xff]  ;;  %v328_v28 = vld [vmem:[%s3215_s1 + $0x990] sm:$0xff]  ;;  %v510_v32 = vrot.slane %v496_v22, %v2126_v48  ;;  %v511_v35 = vcombine.high %v503_v25, %v503_v25 }
  0x9b   :  { %1822 = vmatprep.subr.mxu1 %v334_v1  ;;  %1790 = vmatpush3.msra.mxu0 %v285_v2  ;;  %v279_v29 = vld [vmem:[%s3215_s1 + $0x808] sm:$0xff]  ;;  %v312_v30 = vld [vmem:[%s3215_s1 + $0x910] sm:$0xff]  ;;  %v294_v31 = vld [vmem:[%s3215_s1 + $0x880] sm:$0xff] }
  0x9c   :  { %1823 = vmatpush3.msra.mxu1 %v318_v3  ;;  %1791 = vmatprep.subr.mxu0 %v300_v4  ;;  %v327_v33 = vld [vmem:[%s3215_s1 + $0x988] sm:$0xff]  ;;  %v278_v34 = vld [vmem:[%s3215_s1 + $0x800] sm:$0xff]  ;;  %v373_v38 = vld [vmem:[%s3215_s1 + $0xaf8] sm:$0xff]  ;;  %v512_v40 = vcombine.high %v510_v32, %v510_v32 }
  0x9d   :  { %1824 = vmatprep.subr.mxu1 %v333_v5  ;;  %1792 = vmatpush3.msra.mxu0 %v284_v6  ;;  %v311_v36 = vld [vmem:[%s3215_s1 + $0x908] sm:$0xff]  ;;  %v326_v37 = vld [vmem:[%s3215_s1 + $0x980] sm:$0xff]  ;;  %v357_v41 = vld [vmem:[%s3215_s1 + $0xa78] sm:$0xff] }
  0x9e   :  { %1825 = vmatpush3.msra.mxu1 %v317_v7  ;;  %1793 = vmatprep.subr.mxu0 %v299_v8  ;;  %v310_v39 = vld [vmem:[%s3215_s1 + $0x900] sm:$0xff]  ;;  %v372_v42 = vld [vmem:[%s3215_s1 + $0xaf0] sm:$0xff]  ;;  %v405_v43 = vld [vmem:[%s3215_s1 + $0xbf8] sm:$0xff] }
  0x9f   :  { %1826 = vmatprep.subr.mxu1 %v332_v9  ;;  %1794 = vmatpush3.msra.mxu0 %v283_v10  ;;  %v356_v44 = vld [vmem:[%s3215_s1 + $0xa70] sm:$0xff]  ;;  %v389_v45 = vld [vmem:[%s3215_s1 + $0xb78] sm:$0xff]  ;;  %v371_v46 = vld [vmem:[%s3215_s1 + $0xae8] sm:$0xff] }
  0xa0   :  { %1827 = vmatpush3.msra.mxu1 %v316_v11  ;;  %1795 = vmatprep.subr.mxu0 %v298_v12  ;;  %v404_v47 = vld [vmem:[%s3215_s1 + $0xbf0] sm:$0xff]  ;;  %v355_v49 = vld [vmem:[%s3215_s1 + $0xa68] sm:$0xff]  ;;  %v370_v51 = vld [vmem:[%s3215_s1 + $0xae0] sm:$0xff] }
  0xa1   :  { %1828 = vmatprep.subr.mxu1 %v331_v13  ;;  %1796 = vmatpush3.msra.mxu0 %v282_v14  ;;  %v388_v50 = vld [vmem:[%s3215_s1 + $0xb70] sm:$0xff]  ;;  %v403_v52 = vld [vmem:[%s3215_s1 + $0xbe8] sm:$0xff]  ;;  %v354_v53 = vld [vmem:[%s3215_s1 + $0xa60] sm:$0xff] }
  0xa2   :  { %1829 = vmatpush3.msra.mxu1 %v315_v16  ;;  %1797 = vmatprep.subr.mxu0 %v297_v17  ;;  %v387_v54 = vld [vmem:[%s3215_s1 + $0xb68] sm:$0xff]  ;;  %v369_v55 = vld [vmem:[%s3215_s1 + $0xad8] sm:$0xff]  ;;  %v402_v56 = vld [vmem:[%s3215_s1 + $0xbe0] sm:$0xff] }
  0xa3   :  { %1830 = vmatprep.subr.mxu1 %v330_v18  ;;  %1798 = vmatpush3.msra.mxu0 %v281_v19  ;;  %v353_v57 = vld [vmem:[%s3215_s1 + $0xa58] sm:$0xff]  ;;  %v386_v58 = vld [vmem:[%s3215_s1 + $0xb60] sm:$0xff]  ;;  %v368_v59 = vld [vmem:[%s3215_s1 + $0xad0] sm:$0xff] }
  0xa4   :  { %1831 = vmatpush3.msra.mxu1 %v314_v20  ;;  %1799 = vmatprep.subr.mxu0 %v296_v21  ;;  %v401_v60 = vld [vmem:[%s3215_s1 + $0xbd8] sm:$0xff]  ;;  %v352_v61 = vld [vmem:[%s3215_s1 + $0xa50] sm:$0xff]  ;;  %v367_v63 = vld [vmem:[%s3215_s1 + $0xac8] sm:$0xff] }
  0xa5   :  { %1832 = vmatprep.subr.mxu1 %v329_v23  ;;  %1800 = vmatpush3.msra.mxu0 %v280_v24  ;;  %v385_v62 = vld [vmem:[%s3215_s1 + $0xb58] sm:$0xff]  ;;  %v400_v0 = vld [vmem:[%s3215_s1 + $0xbd0] sm:$0xff]  ;;  %v351_v1 = vld [vmem:[%s3215_s1 + $0xa48] sm:$0xff] }
  0xa6   :  { %1833 = vmatpush3.msra.mxu1 %v313_v26  ;;  %1801 = vmatprep.subr.mxu0 %v295_v27  ;;  %v384_v2 = vld [vmem:[%s3215_s1 + $0xb50] sm:$0xff]  ;;  %v366_v3 = vld [vmem:[%s3215_s1 + $0xac0] sm:$0xff]  ;;  %v399_v4 = vld [vmem:[%s3215_s1 + $0xbc8] sm:$0xff] }
  0xa7   :  { %1834 = vmatprep.subr.mxu1 %v328_v28  ;;  %1802 = vmatpush3.msra.mxu0 %v279_v29  ;;  %v350_v5 = vld [vmem:[%s3215_s1 + $0xa40] sm:$0xff]  ;;  %v383_v6 = vld [vmem:[%s3215_s1 + $0xb48] sm:$0xff]  ;;  %v365_v7 = vld [vmem:[%s3215_s1 + $0xab8] sm:$0xff] }
  0xa8   :  { %1835 = vmatpush3.msra.mxu1 %v312_v30  ;;  %1803 = vmatprep.subr.mxu0 %v294_v31  ;;  %v398_v8 = vld [vmem:[%s3215_s1 + $0xbc0] sm:$0xff]  ;;  %v349_v9 = vld [vmem:[%s3215_s1 + $0xa38] sm:$0xff]  ;;  %v364_v11 = vld [vmem:[%s3215_s1 + $0xab0] sm:$0xff] }
  0xa9   :  { %1836 = vmatprep.subr.mxu1 %v327_v33  ;;  %1804 = vmatpush3.msra.mxu0 %v278_v34  ;;  %v382_v10 = vld [vmem:[%s3215_s1 + $0xb40] sm:$0xff]  ;;  %v397_v12 = vld [vmem:[%s3215_s1 + $0xbb8] sm:$0xff]  ;;  %v348_v13 = vld [vmem:[%s3215_s1 + $0xa30] sm:$0xff] }
  0xaa   :  { %1188 = vmatprep.mubr.f32.mxu0 %v511_v35  ;;  %1837 = vmatpush3.msra.mxu1 %v311_v36  ;;  %v381_v14 = vld [vmem:[%s3215_s1 + $0xb38] sm:$0xff]  ;;  %v363_v15 = vld [vmem:[%s3215_s1 + $0xaa8] sm:$0xff]  ;;  %v396_v16 = vld [vmem:[%s3215_s1 + $0xbb0] sm:$0xff] }
  0xab   :  { %1189 = vmatmul.mubr.f32.vlgmr.msra.gmra.mxu0 %v503_v25  ;;  %1838 = vmatprep.subr.mxu1 %v326_v37  ;;  %v347_v17 = vld [vmem:[%s3215_s1 + $0xa28] sm:$0xff]  ;;  %v380_v18 = vld [vmem:[%s3215_s1 + $0xb30] sm:$0xff]  ;;  %v362_v19 = vld [vmem:[%s3215_s1 + $0xaa0] sm:$0xff] }
  0xac   :  { %1843 = vmatprep.subr.mxu0 %v373_v38  ;;  %1839 = vmatpush3.msra.mxu1 %v310_v39  ;;  %v395_v20 = vld [vmem:[%s3215_s1 + $0xba8] sm:$0xff]  ;;  %v346_v21 = vld [vmem:[%s3215_s1 + $0xa20] sm:$0xff]  ;;  %v361_v24 = vld [vmem:[%s3215_s1 + $0xa98] sm:$0xff] }
  0xad   :  { %1258 = vmatprep.mubr.f32.mxu1 %v512_v40  ;;  %1844 = vmatpush3.msra.mxu0 %v357_v41  ;;  %v20_v22 = vld [vmem:[%s3214_s0 + $0x28] sm:$0xff]  ;;  %v394_v25 = vld [vmem:[%s3215_s1 + $0xba0] sm:$0xff]  ;;  %v345_v26 = vld [vmem:[%s3215_s1 + $0xa18] sm:$0xff] }
  0xae   :  { %1259 = vmatmul.mubr.f32.vlgmr.msra.gmra.mxu1 %v510_v32  ;;  %1845 = vmatprep.subr.mxu0 %v372_v42  ;;  %v379_v23 = vld [vmem:[%s3215_s1 + $0xb28] sm:$0xff]  ;;  %v378_v27 = vld [vmem:[%s3215_s1 + $0xb20] sm:$0xff]  ;;  %v360_v28 = vld [vmem:[%s3215_s1 + $0xa90] sm:$0xff]  ;;  %v513_v29 = vcombine.high %v20_v22, %v20_v22  ;;  %v520_v32 = vrot.slane %v20_v22, %v2126_v48 }
  0xaf   :  { %1878 = vmatprep.subr.mxu1 %v405_v43  ;;  %1846 = vmatpush3.msra.mxu0 %v356_v44  ;;  %v393_v30 = vld [vmem:[%s3215_s1 + $0xb98] sm:$0xff]  ;;  %v344_v31 = vld [vmem:[%s3215_s1 + $0xa10] sm:$0xff]  ;;  %v359_v34 = vld [vmem:[%s3215_s1 + $0xa88] sm:$0xff] }
  0xb0   :  { %1879 = vmatpush3.msra.mxu1 %v389_v45  ;;  %1847 = vmatprep.subr.mxu0 %v371_v46  ;;  %v377_v33 = vld [vmem:[%s3215_s1 + $0xb18] sm:$0xff]  ;;  %v392_v35 = vld [vmem:[%s3215_s1 + $0xb90] sm:$0xff]  ;;  %v343_v36 = vld [vmem:[%s3215_s1 + $0xa08] sm:$0xff]  ;;  %v527_v39 = vrot.slane %v513_v29, %v2126_v48  ;;  %v528_v42 = vcombine.high %v520_v32, %v520_v32 }
  0xb1   :  { %1880 = vmatprep.subr.mxu1 %v404_v47  ;;  %1848 = vmatpush3.msra.mxu0 %v355_v49  ;;  %v376_v37 = vld [vmem:[%s3215_s1 + $0xb10] sm:$0xff]  ;;  %v358_v38 = vld [vmem:[%s3215_s1 + $0xa80] sm:$0xff]  ;;  %v391_v40 = vld [vmem:[%s3215_s1 + $0xb88] sm:$0xff]  ;;  %v1974_v47 = vmov 0.0  }
  0xb2   :  { %1881 = vmatpush3.msra.mxu1 %v388_v50  ;;  %1849 = vmatprep.subr.mxu0 %v370_v51  ;;  %v342_v41 = vld [vmem:[%s3215_s1 + $0xa00] sm:$0xff]  ;;  %v375_v43 = vld [vmem:[%s3215_s1 + $0xb08] sm:$0xff]  ;;  %v529_v45 = vcombine.high %v527_v39, %v527_v39  ;;  %v413_v46 = vld [vmem:[%s3215_s1 + $0xc38] sm:$0xff] }
  0xb3   :  { %1882 = vmatprep.subr.mxu1 %v403_v52  ;;  %1850 = vmatpush3.msra.mxu0 %v354_v53  ;;  %v390_v48 = vld [vmem:[%s3215_s1 + $0xb80] sm:$0xff]  ;;  %v412_v49 = vld [vmem:[%s3215_s1 + $0xc30] sm:$0xff]  ;;  %v411_v50 = vld [vmem:[%s3215_s1 + $0xc28] sm:$0xff] }
  0xb4   :  { %1883 = vmatpush3.msra.mxu1 %v387_v54  ;;  %1851 = vmatprep.subr.mxu0 %v369_v55  ;;  %v374_v44 = vld [vmem:[%s3215_s1 + $0xb00] sm:$0xff]  ;;  %v409_v52 = vld [vmem:[%s3215_s1 + $0xc18] sm:$0xff]  ;;  %v408_v53 = vld [vmem:[%s3215_s1 + $0xc10] sm:$0xff] }
  0xb5   :  { %1884 = vmatprep.subr.mxu1 %v402_v56  ;;  %1852 = vmatpush3.msra.mxu0 %v353_v57  ;;  %v410_v51 = vld [vmem:[%s3215_s1 + $0xc20] sm:$0xff]  ;;  %v407_v54 = vld [vmem:[%s3215_s1 + $0xc08] sm:$0xff]  ;;  %v1491_v56 = vld.sshfl [vmem:[%s3214_s0 + $0x30] sm:$0x3 pattern:$0x76325410] }
  0xb6   :  { %1885 = vmatpush3.msra.mxu1 %v386_v58  ;;  %1853 = vmatprep.subr.mxu0 %v368_v59  ;;  %v406_v55 = vld [vmem:[%s3215_s1 + $0xc00] sm:$0xff]  ;;  %s1976_s0 = smov [#allocation2]  }
  0xb7   :  { %1886 = vmatprep.subr.mxu1 %v401_v60  ;;  %1854 = vmatpush3.msra.mxu0 %v352_v61  ;;  %s1482_s1 = sshll.u32 %s1976_s0, 4  ;;  %s1483_s1 = int_to_ptr.vmem [resolvable:$true] %s1482_s1 }
  0xb8   :  { %1887 = vmatpush3.msra.mxu1 %v385_v62  ;;  %1855 = vmatprep.subr.mxu0 %v367_v63  ;;  %v1490_v62 = vld [vmem:[%s3216_s2] ss:$0 sm:$0xff]  ;;  %s1951_s2 = scalar_lea.vmem %s1483_s1, 32  ;;  %p1956_p1 = scmp.lt.s32.totalorder %s1483_s1, %s1483_s1 }
  0xb9   :  { %1888 = vmatprep.subr.mxu1 %v400_v0  ;;  %1856 = vmatpush3.msra.mxu0 %v351_v1  ;;  %p1952_p0 = scmp.ne.s32.totalorder %s1483_s1, %s1951_s2  ;;  %p1957_p2 = scmp.lt.s32.totalorder %s1951_s2, %s1951_s2 }
  0xba   :  { %1889 = vmatpush3.msra.mxu1 %v384_v2  ;;  %1857 = vmatprep.subr.mxu0 %v366_v3 }
  0xbb   :  { %1890 = vmatprep.subr.mxu1 %v399_v4  ;;  %1858 = vmatpush3.msra.mxu0 %v350_v5  ;;  %p1958_p3 = por %p1957_p2, %p1956_p1 }
  0xbc   :  { %1891 = vmatpush3.msra.mxu1 %v383_v6  ;;  %1859 = vmatprep.subr.mxu0 %v365_v7 }
  0xbd   :  { %1892 = vmatprep.subr.mxu1 %v398_v8  ;;  %1860 = vmatpush3.msra.mxu0 %v349_v9  ;;  %p1959_p4 = pnand %p1958_p3, %p1952_p0 }
  0xbe   :  { %1893 = vmatpush3.msra.mxu1 %v382_v10  ;;  %1861 = vmatprep.subr.mxu0 %v364_v11 }
  0xbf   :  { %1894 = vmatprep.subr.mxu1 %v397_v12  ;;  %1862 = vmatpush3.msra.mxu0 %v348_v13 }
  0xc0   :  { %1895 = vmatpush3.msra.mxu1 %v381_v14  ;;  %1863 = vmatprep.subr.mxu0 %v363_v15 }
  0xc1   :  { %1896 = vmatprep.subr.mxu1 %v396_v16  ;;  %1864 = vmatpush3.msra.mxu0 %v347_v17 }
  0xc2   :  { %1897 = vmatpush3.msra.mxu1 %v380_v18  ;;  %1865 = vmatprep.subr.mxu0 %v362_v19 }
  0xc3   :  { %1898 = vmatprep.subr.mxu1 %v395_v20  ;;  %1866 = vmatpush3.msra.mxu0 %v346_v21 }
  0xc4   :  { %1899 = vmatpush3.msra.mxu1 %v379_v23  ;;  %1867 = vmatprep.subr.mxu0 %v361_v24 }
  0xc5   :  { %1900 = vmatprep.subr.mxu1 %v394_v25  ;;  %1868 = vmatpush3.msra.mxu0 %v345_v26 }
  0xc6   :  { %1901 = vmatpush3.msra.mxu1 %v378_v27  ;;  %1869 = vmatprep.subr.mxu0 %v360_v28 }
  0xc7   :  { %1902 = vmatprep.subr.mxu1 %v393_v30  ;;  %1870 = vmatpush3.msra.mxu0 %v344_v31 }
  0xc8   :  { %1903 = vmatpush3.msra.mxu1 %v377_v33  ;;  %1871 = vmatprep.subr.mxu0 %v359_v34 }
  0xc9   :  { %1904 = vmatprep.subr.mxu1 %v392_v35  ;;  %1872 = vmatpush3.msra.mxu0 %v343_v36 }
  0xca   :  { %1905 = vmatpush3.msra.mxu1 %v376_v37  ;;  %1873 = vmatprep.subr.mxu0 %v358_v38 }
  0xcb   :  { %1906 = vmatprep.subr.mxu1 %v391_v40  ;;  %1874 = vmatpush3.msra.mxu0 %v342_v41 }
  0xcc   :  { %1328 = vmatprep.mubr.f32.mxu0 %v528_v42  ;;  %1907 = vmatpush3.msra.mxu1 %v375_v43 }
  0xcd   :  { %1329 = vmatmul.mubr.f32.vlgmr.msra.gmra.mxu0 %v520_v32  ;;  %1908 = vmatprep.subr.mxu1 %v390_v48 }
  0xce   :  { %1922 = vmatprep.subr.mxu0 %v1974_v47  ;;  %1909 = vmatpush3.msra.mxu1 %v374_v44 }
  0xcf   :  { %1398 = vmatprep.mubr.f32.mxu1 %v529_v45  ;;  %1923 = vmatpush3.msra.mxu0 %v413_v46 }
  0xd0   :  { %1399 = vmatmul.mubr.f32.vlgmr.msra.gmra.mxu1 %v527_v39  ;;  %1924 = vmatprep.subr.mxu0 %v1974_v47 }
  0xd1   :  { %1925 = vmatpush3.msra.mxu0 %v412_v49  ;;  %1938 = vmatprep.mubr.msk.f32.mxu0 %vm1975_vm0, %v1974_v47 }
  0xd2   :  { %1926 = vmatprep.subr.mxu0 %v1974_v47 }
  0xd3   :  { %1927 = vmatpush3.msra.mxu0 %v411_v50 }
  0xd4   :  { %1928 = vmatprep.subr.mxu0 %v1974_v47 }
  0xd5   :  { %1929 = vmatpush3.msra.mxu0 %v410_v51 }
  0xd6   :  { %1930 = vmatprep.subr.mxu0 %v1974_v47 }
  0xd7   :  { %1931 = vmatpush3.msra.mxu0 %v409_v52 }
  0xd8   :  { %1932 = vmatprep.subr.mxu0 %v1974_v47 }
  0xd9   :  { %1933 = vmatpush3.msra.mxu0 %v408_v53 }
  0xda   :  { %1934 = vmatprep.subr.mxu0 %v1974_v47 }
  0xdb   :  { %1935 = vmatpush3.msra.mxu0 %v407_v54 }
  0xdc   :  { %1936 = vmatprep.subr.mxu0 %v1974_v47 }
  0xdd   :  { %1937 = vmatpush3.msra.mxu0 %v406_v55 }
  0xde   :  { %1939 = vmatmul.mubr.msk.f32.vlgmr.msra.gmra.mxu0 %vm561_vm1, %v1491_v56 }
  0xe2   :  { %v1525_v57 = vpop.f32.mrf.mxu0 }
  0xe4   :  { %v1526_v58 = vpop.f32.mrf.mxu0 }
  0xe5   :  { %v1560_v59 = vpop.f32.mrf.mxu1  ;;  %v1527_v61 = vadd.f32 %v1526_v58, %v1525_v57 }
  0xe7   :  { %v1561_v63 = vpop.f32.mrf.mxu1  ;;  %v631_v2 = vadd.f32 %v1527_v61, %v1490_v62 }
  0xe8   :  { %v1562_v3 = vadd.f32 %v1561_v63, %v1560_v59 }
  0xea   :  { %v701_v7 = vadd.f32 %v1562_v3, %v631_v2 }
 0x104   :  { %v1595_v60 = vpop.f32.mrf.mxu0 }
 0x106   :  { %v1596_v0 = vpop.f32.mrf.mxu0 }
 0x107   :  { %v1630_v1 = vpop.f32.mrf.mxu1  ;;  %v1597_v5 = vadd.f32 %v1596_v0, %v1595_v60 }
 0x109   :  { %v1631_v6 = vpop.f32.mrf.mxu1  ;;  %v771_v10 = vadd.f32 %v1597_v5, %v701_v7 }
 0x10a   :  { %v1632_v11 = vadd.f32 %v1631_v6, %v1630_v1 }
 0x10c   :  { %v841_v15 = vadd.f32 %v1632_v11, %v771_v10 }
 0x126   :  { %v1665_v4 = vpop.f32.mrf.mxu0 }
 0x128   :  { %v1666_v8 = vpop.f32.mrf.mxu0 }
 0x129   :  { %v1700_v9 = vpop.f32.mrf.mxu1  ;;  %v1667_v13 = vadd.f32 %v1666_v8, %v1665_v4 }
 0x12b   :  { %v1701_v14 = vpop.f32.mrf.mxu1  ;;  %v911_v18 = vadd.f32 %v1667_v13, %v841_v15 }
 0x12c   :  { %v1702_v19 = vadd.f32 %v1701_v14, %v1700_v9 }
 0x12e   :  { %v981_v23 = vadd.f32 %v1702_v19, %v911_v18 }
 0x149   :  { %v1735_v12 = vpop.f32.mrf.mxu0 }
 0x14b   :  { %v1736_v16 = vpop.f32.mrf.mxu0 }
 0x14c   :  { %v1770_v17 = vpop.f32.mrf.mxu1  ;;  %v1737_v21 = vadd.f32 %v1736_v16, %v1735_v12 }
 0x14e   :  { %v1771_v22 = vpop.f32.mrf.mxu1  ;;  %v1051_v26 = vadd.f32 %v1737_v21, %v981_v23 }
 0x14f   :  { %v1772_v27 = vadd.f32 %v1771_v22, %v1770_v17 }
 0x151   :  { %v1121_v31 = vadd.f32 %v1772_v27, %v1051_v26 }
 0x16b   :  { %v1805_v20 = vpop.f32.mrf.mxu0 }
 0x16d   :  { %v1806_v24 = vpop.f32.mrf.mxu0 }
 0x16e   :  { %v1840_v25 = vpop.f32.mrf.mxu1  ;;  %v1807_v29 = vadd.f32 %v1806_v24, %v1805_v20 }
 0x170   :  { %v1841_v30 = vpop.f32.mrf.mxu1  ;;  %v1191_v34 = vadd.f32 %v1807_v29, %v1121_v31 }
 0x171   :  { %v1842_v35 = vadd.f32 %v1841_v30, %v1840_v25 }
 0x173   :  { %v1261_v38 = vadd.f32 %v1842_v35, %v1191_v34 }
 0x18d   :  { %v1875_v28 = vpop.f32.mrf.mxu0 }
 0x18f   :  { %v1876_v32 = vpop.f32.mrf.mxu0 }
 0x190   :  { %v1910_v33 = vpop.f32.mrf.mxu1  ;;  %v1877_v36 = vadd.f32 %v1876_v32, %v1875_v28 }
 0x192   :  { %v1911_v37 = vpop.f32.mrf.mxu1  ;;  %v1331_v39 = vadd.f32 %v1877_v36, %v1261_v38 }
 0x193   :  { %v1912_v40 = vadd.f32 %v1911_v37, %v1910_v33 }
 0x195   :  { %v1401_v41 = vadd.f32 %v1912_v40, %v1331_v39 }
 0x19e   :  { %v1470_v42 = vpop.f32.mrf.mxu0 }
 0x19f   :  { %v1471_v43 = vadd.f32 %v1470_v42, %v1401_v41 }
 0x1a0   :  { %v1940_v48 = vpop.f32.mrf.mxu0 }
 0x1a1   :  { %1475 = vst.msk [vmem:[#allocation2] sm:$0x3] %vm1474_vm2, %v1471_v43 }
 0x1a2   :  { %1962 = shalt.err (!%p1959_p4)
}
 0x1a3   :  { %1485 = dma.vmem_to_hbm [thread:$0]  %s1483_s1, 32, %s3217_s3, [#allocation3]  }
 0x1a4   :  { %1971 = dma.done.wait [#allocation3], 32  }
 0x1a5   :  { %1972 = vsyncadd [#allocation3], 4294967264 }
 0x1a6   :  { %1489 = vsyncpa [#allocation3], 1 }

// kernel: mha_forward.6
= control target key start
LH: loop header
LB: loop body
LE: loop exit
PB: predicated region body
PF: predicated region fallthrough
CT: control target
= control target key end

     0   :  { %s4428_s29 = smov 0   ;;  %s5680_s0 = inlined_call_operand.vmem [shape: f32[2,49,64], index: 0, kind: input, shape index: {}]   ;;  %s5681_s1 = inlined_call_operand.vmem [shape: f32[64,192], index: 1, kind: input, shape index: {}]   ;;  %s5682_s2 = inlined_call_operand.vmem [shape: f32[1,192], index: 2, kind: input, shape index: {}]   ;;  %s5683_s3 = inlined_call_operand.vmem [shape: f32[64,64], index: 3, kind: input, shape index: {}]   ;;  %s5684_s4 = inlined_call_operand.vmem [shape: f32[1,64], index: 4, kind: input, shape index: {}]   ;;  %s5685_s5 = inlined_call_operand.vmem [shape: f32[1,64], index: 5, kind: input, shape index: {}]   ;;  %s5686_s6 = inlined_call_operand.vmem [shape: f32[1,64], index: 6, kind: input, shape index: {}]   ;;  %s5687_s7 = inlined_call_operand.vmem [shape: f32[64,64], index: 7, kind: input, shape index: {}]   ;;  %s5688_s8 = inlined_call_operand.vmem [shape: f32[1,64], index: 8, kind: input, shape index: {}]   ;;  %s5689_s9 = inlined_call_operand.vmem [shape: f32[64,64], index: 9, kind: input, shape index: {}]   ;;  %s5690_s10 = inlined_call_operand.vmem [shape: f32[1,64], index: 10, kind: input, shape index: {}]   ;;  %s5691_s11 = inlined_call_operand.vmem [shape: f32[1,64], index: 11, kind: input, shape index: {}]   ;;  %s5692_s12 = inlined_call_operand.vmem [shape: f32[1,64], index: 12, kind: input, shape index: {}]   ;;  %s5693_s13 = inlined_call_operand.vmem [shape: f32[2,49,64], index: 13, kind: output, shape index: {0}]   ;;  %s5694_s14 = inlined_call_operand.vmem [shape: f32[2,4,49,49], index: 14, kind: output, shape index: {1}]  }
   0x1 LB: > { %s3347_s30 = sadd.s32 4294967295, %s4342_s29   ;;  %p3351_p0 = scmp.ge.s32.totalorder %s4342_s29, 1  ;;  %s4342_s29 = sphi %s4428_s29, %s25_s29  }
   0x2   : > { %p415_p1 = scmp.lt.s32.totalorder %s4342_s29, 3 }
   0x4   : > { %p416_p2 = pnand %p3351_p0, %p415_p1 }
   0x5   : > { %p466_p3 = scmp.lt.s32.totalorder (!%p416_p2), %s3347_s30, 1  ;;  %s4345_s26 = smov (!%p416_p2), 64  }
   0x6   : > { %419 = sbr.rel (%p416_p2) target bundleno = 4213 (0x1075), region = 72  ;;  %s4347_s27 = smov (!%p416_p2), 48  }
   0x7   : > { %s4348_s28 = smov (!%p416_p2), 112   ;;  %s4349_s25 = smov (!%p416_p2), 32  }
   0x8   : > { %s4351_s17 = smov (!%p416_p2), 16   ;;  %s4352_s23 = smov (!%p416_p2), 80  }
   0xb   : > { %v503_v0 = vld [vmem:[%s5681_s1 + $0x78] sm:$0xff]  ;;  %v502_v1 = vld [vmem:[%s5681_s1 + $0x70] sm:$0xff]  ;;  %v501_v2 = vld [vmem:[%s5681_s1 + $0x68] sm:$0xff]  ;;  %v4344_v4 = vmov 0.0   ;;  %s5696_s30 = smov (!%p466_p3, %s3347_s30), 1  ;;  %vm516_vm0 = vcmask 523264   ;;  %v506_v26 = vlaneseq }
   0xc   : > { %554 = vmatprep.subr.mxu0 %v503_v0  ;;  %v500_v3 = vld [vmem:[%s5681_s1 + $0x60] sm:$0xff]  ;;  %602 = vmatprep.mubr.f32.mxu0 %v4344_v4  ;;  %v499_v5 = vld [vmem:[%s5681_s1 + $0x58] sm:$0xff]  ;;  %v498_v6 = vld [vmem:[%s5681_s1 + $0x50] sm:$0xff]  ;;  %s4170_s21 = smul.u32 56, %s5696_s30  ;;  %vm910_vm1 = vcmask 1040384   ;;  %vm4346_vm2 = vmmov 0  }
   0xd   : > { %555 = vmatpush1.msra.mxu0 %v502_v1  ;;  %3700 = vmatprep.subr.mxu1 %v4344_v4  ;;  %v497_v7 = vld [vmem:[%s5681_s1 + $0x48] sm:$0xff]  ;;  %v496_v8 = vld [vmem:[%s5681_s1 + $0x40] sm:$0xff]  ;;  %v495_v9 = vld [vmem:[%s5681_s1 + $0x38] sm:$0xff]  ;;  %v507_v29 = vshrl.u32 %v506_v26, 7  ;;  %vm667_vm3 = vcmask 130048   ;;  %vm803_vm4 = vcmask 400384  }
   0xe   : > { %556 = vmatprep.subr.mxu0 %v501_v2  ;;  %v494_v10 = vld [vmem:[%s5681_s1 + $0x30] sm:$0xff]  ;;  %v493_v11 = vld [vmem:[%s5681_s1 + $0x28] sm:$0xff]  ;;  %v492_v12 = vld [vmem:[%s5681_s1 + $0x20] sm:$0xff]  ;;  %s4488_s18 = scalar_lea.vmem %s5680_s0, %s4170_s21  ;;  %3714 = vmatprep.mubr.msk.f32.mxu1 %vm4346_vm2, %v4344_v4  ;;  %vm822_vm5 = vcmask 393216   ;;  %s4171_s15 = smul.u32 224, %s5696_s30  ;;  %vm2744_vm6 = vcmask 516096  }
   0xf   : > { %557 = vmatpush1.msra.mxu0 %v500_v3  ;;  %v491_v13 = vld [vmem:[%s5681_s1 + $0x18] sm:$0xff]  ;;  %v490_v14 = vld [vmem:[%s5681_s1 + $0x10] sm:$0xff]  ;;  %v489_v15 = vld [vmem:[%s5681_s1 + $0x8] sm:$0xff]  ;;  %v508_v32 = vsub.s32 0, %v507_v29  ;;  %v512_v41 = vsub.s32 1, %v507_v29 }
  0x10   : > { %558 = vmatprep.subr.mxu0 %v499_v5  ;;  %v488_v16 = vld [vmem:[%s5681_s1] sm:$0xff]  ;;  %v482_v18 = vld [vmem:[%s4488_s18 + $0x8] sm:$0xff]  ;;  %v483_v19 = vld [vmem:[%s4488_s18 + $0x10] sm:$0xff]  ;;  %s4700_s19 = scalar_lea.vmem %s5694_s14, %s4171_s15 }
  0x11   : > { %559 = vmatpush1.msra.mxu0 %v498_v6  ;;  %v481_v17 = vld [vmem:[%s4488_s18] sm:$0xff]  ;;  %v484_v20 = vld [vmem:[%s4488_s18 + $0x18] sm:$0xff]  ;;  %v486_v22 = vld [vmem:[%s4488_s18 + $0x28] sm:$0xff] }
  0x12   : > { %560 = vmatprep.subr.mxu0 %v497_v7  ;;  %v485_v21 = vld [vmem:[%s4488_s18 + $0x20] sm:$0xff]  ;;  %v487_v23 = vld [vmem:[%s4488_s18 + $0x30] sm:$0x1] }
  0x13   : > { %561 = vmatpush1.msra.mxu0 %v496_v8  ;;  %v504_v33 = vld [vmem:[%s5682_s2] sm:$0x3] }
  0x14   : > { %562 = vmatprep.subr.mxu0 %v495_v9  ;;  %v509_v36 = vrot.slane %v504_v33, %v508_v32  ;;  %v513_v45 = vrot.slane %v504_v33, %v512_v41 }
  0x15   : > { %563 = vmatpush1.msra.mxu0 %v494_v10 }
  0x16   : > { %564 = vmatprep.subr.mxu0 %v493_v11 }
  0x17   : > { %565 = vmatpush1.msra.mxu0 %v492_v12 }
  0x18   : > { %566 = vmatprep.subr.mxu0 %v491_v13 }
  0x19   : > { %567 = vmatpush1.msra.mxu0 %v490_v14 }
  0x1a   : > { %568 = vmatprep.subr.mxu0 %v489_v15 }
  0x1b   : > { %569 = vmatpush1.msra.mxu0 %v488_v16 }
  0x1c   : > { %3355 = vmatmul.mubr.msk.f32.vlgmr.msra.gmra.mxu0 %vm516_vm0, %v481_v17  ;;  %3735 = vmatprep.subr.mxu0 %v4344_v4 }
  0x1d   : > { %608 = vmatprep.mubr.f32.mxu0 %v4344_v4 }
  0x20   : > { %3356 = vmatmul.mubr.msk.f32.gmra.mxu0 %vm516_vm0, %v482_v18 }
  0x21   : > { %614 = vmatprep.mubr.f32.mxu0 %v4344_v4 }
  0x24   : > { %3357 = vmatmul.mubr.msk.f32.gmra.mxu0 %vm516_vm0, %v483_v19 }
  0x25   : > { %620 = vmatprep.mubr.f32.mxu0 %v4344_v4 }
  0x28   : > { %3358 = vmatmul.mubr.msk.f32.gmra.mxu0 %vm516_vm0, %v484_v20 }
  0x29   : > { %626 = vmatprep.mubr.f32.mxu0 %v4344_v4 }
  0x2c   : > { %3359 = vmatmul.mubr.msk.f32.gmra.mxu0 %vm516_vm0, %v485_v21 }
  0x2d   : > { %632 = vmatprep.mubr.f32.mxu0 %v4344_v4 }
  0x30   : > { %3360 = vmatmul.mubr.msk.f32.gmra.mxu0 %vm516_vm0, %v486_v22 }
  0x31   : > { %638 = vmatprep.mubr.f32.mxu0 %v4344_v4 }
  0x34   : > { %3361 = vmatmul.mubr.msk.f32.gmra.mxu0 %vm516_vm0, %v487_v23 }
  0x35   : > { %3749 = vmatprep.mubr.msk.f32.mxu0 %vm4346_vm2, %v4344_v4 }
  0xdc   : > { %v604_v24 = vpop.f32.mrf.mxu0 }
  0xdd   : > { %v4563_v56 = vadd.f32 %v604_v24, %v509_v36 }
  0xde   : > { %v606_v25 = vpop.f32.mrf.mxu0 }
  0xdf   : > { %v4569_v58 = vadd.f32 %v606_v25, %v513_v45 }
  0xe0   : > { %v610_v27 = vpop.f32.mrf.mxu0 }
  0xe1   : > { %v4528_v46 = vadd.f32 %v610_v27, %v509_v36 }
  0xe2   : > { %v612_v28 = vpop.f32.mrf.mxu0 }
  0xe3   : > { %v4565_v57 = vadd.f32 %v612_v28, %v513_v45 }
  0xe4   : > { %v616_v30 = vpop.f32.mrf.mxu0 }
  0xe5   : > { %v4551_v53 = vadd.f32 %v616_v30, %v509_v36 }
  0xe6   : > { %v618_v31 = vpop.f32.mrf.mxu0 }
  0xe7   : > { %v4557_v55 = vadd.f32 %v618_v31, %v513_v45 }
  0xe8   : > { %v622_v34 = vpop.f32.mrf.mxu0 }
  0xe9   : > { %v4524_v42 = vadd.f32 %v622_v34, %v509_v36 }
  0xea   : > { %v624_v35 = vpop.f32.mrf.mxu0 }
  0xeb   : > { %v4553_v54 = vadd.f32 %v624_v35, %v513_v45 }
  0xec   : > { %v628_v37 = vpop.f32.mrf.mxu0 }
  0xed   : > { %v4520_v38 = vadd.f32 %v628_v37, %v509_v36 }
  0xee   : > { %v630_v39 = vpop.f32.mrf.mxu0 }
  0xef   : > { %661 = vrot.lane.b32.xlu1 %v4520_v38, %s4345_s26  ;;  %v4545_v52 = vadd.f32 %v630_v39, %v513_v45 }
  0xf0   : > { %v634_v40 = vpop.f32.mrf.mxu0 }
  0xf1   : > { %v4538_v50 = vadd.f32 %v634_v40, %v509_v36 }
  0xf2   : > { %v636_v43 = vpop.f32.mrf.mxu0 }
  0xf3   : > { %659 = vrot.lane.b32.xlu1 %v4524_v42, %s4345_s26  ;;  %v4540_v51 = vadd.f32 %v636_v43, %v513_v45 }
  0xf4   : > { %v640_v44 = vpop.f32.mrf.mxu0 }
  0xf5   : > { %v4530_v47 = vadd.f32 %v640_v44, %v509_v36 }
  0xf6   : > { %v642_v48 = vpop.f32.mrf.mxu0 }
  0xf7   : > { %v4532_v49 = vadd.f32 %v642_v48, %v513_v45  ;;  %665 = vrot.lane.b32.xlu0 %v4530_v47, %s4345_s26  ;;  %655 = vrot.lane.b32.xlu1 %v4528_v46, %s4345_s26 }
  0xf9   : > { %3736 = vmatpush3.msk.msra.mxu0 %vm910_vm1, %v4532_v49 }
  0xfa   : > { %3737 = vmatprep.subr.mxu0 %v4344_v4 }
  0xfb   : > { %3738 = vmatpush3.msra.mxu0 %v4540_v51  ;;  %663 = vrot.lane.b32.xlu0 %v4538_v50, %s4345_s26 }
  0xfc   : > { %3739 = vmatprep.subr.mxu0 %v4344_v4 }
  0xfd   : > { %3740 = vmatpush3.msra.mxu0 %v4545_v52 }
  0xfe   : > { %3741 = vmatprep.subr.mxu0 %v4344_v4 }
  0xff   : > { %3742 = vmatpush3.msra.mxu0 %v4553_v54  ;;  %657 = vrot.lane.b32.xlu0 %v4551_v53, %s4345_s26 }
 0x100   : > { %3743 = vmatprep.subr.mxu0 %v4344_v4 }
 0x101   : > { %3744 = vmatpush3.msra.mxu0 %v4557_v55 }
 0x102   : > { %3745 = vmatprep.subr.mxu0 %v4344_v4 }
 0x103   : > { %3746 = vmatpush3.msra.mxu0 %v4565_v57  ;;  %653 = vrot.lane.b32.xlu0 %v4563_v56, %s4345_s26  ;;  %s4350_s26 = smov 96  }
 0x104   : > { %3747 = vmatprep.subr.mxu0 %v4344_v4 }
 0x105   : > { %3748 = vmatpush3.msra.mxu0 %v4569_v58 }
 0x106   : > { %3795 = vmatprep.subr.mxu0 %v4344_v4 }
 0x161   : > { %v662_v61 = vpop.permute.xlu1 %661 }
 0x165   : > { %v660_v62 = vpop.permute.xlu1 %659 }
 0x169   : > { %v666_v59 = vpop.permute.xlu0 %665  ;;  %v656_v0 = vpop.permute.xlu1 %655 }
 0x16a   : > { %3701 = vmatpush3.xpose.msk.msra.mxu1 %vm667_vm3, %v666_v59 }
 0x16b   : > { %3702 = vmatprep.subr.mxu1 %v4344_v4 }
 0x16d   : > { %v664_v60 = vpop.permute.xlu0 %663 }
 0x16e   : > { %3703 = vmatpush3.xpose.msk.msra.mxu1 %vm667_vm3, %v664_v60 }
 0x16f   : > { %3704 = vmatprep.subr.mxu1 %v4344_v4 }
 0x171   : > { %v658_v63 = vpop.permute.xlu0 %657 }
 0x172   : > { %3705 = vmatpush3.xpose.msk.msra.mxu1 %vm667_vm3, %v662_v61 }
 0x173   : > { %3706 = vmatprep.subr.mxu1 %v4344_v4 }
 0x175   : > { %v654_v1 = vpop.permute.xlu0 %653 }
 0x176   : > { %3707 = vmatpush3.xpose.msk.msra.mxu1 %vm667_vm3, %v660_v62 }
 0x177   : > { %3708 = vmatprep.subr.mxu1 %v4344_v4 }
 0x17a   : > { %3709 = vmatpush3.xpose.msk.msra.mxu1 %vm667_vm3, %v658_v63 }
 0x17b   : > { %3710 = vmatprep.subr.mxu1 %v4344_v4 }
 0x17e   : > { %3711 = vmatpush3.xpose.msk.msra.mxu1 %vm667_vm3, %v656_v0 }
 0x17f   : > { %3712 = vmatprep.subr.mxu1 %v4344_v4 }
 0x182   : > { %3713 = vmatpush3.xpose.msk.msra.mxu1 %vm667_vm3, %v654_v1 }
 0x183   : > { %3770 = vmatprep.subr.mxu1 %v4344_v4 }
 0x185   : > { %3715 = vmatmul.mubr.msk.f32.vlgmr.msra.gmra.mxu1 %vm667_vm3, %v4563_v56 }
 0x186   : > { %3717 = vmatprep.mubr.msk.f32.mxu1 %vm4346_vm2, %v4344_v4 }
 0x189   : > { %3718 = vmatmul.mubr.msk.f32.gmra.mxu1 %vm667_vm3, %v4528_v46 }
 0x18a   : > { %3720 = vmatprep.mubr.msk.f32.mxu1 %vm4346_vm2, %v4344_v4 }
 0x18d   : > { %3721 = vmatmul.mubr.msk.f32.gmra.mxu1 %vm667_vm3, %v4551_v53 }
 0x18e   : > { %3723 = vmatprep.mubr.msk.f32.mxu1 %vm4346_vm2, %v4344_v4 }
 0x191   : > { %3724 = vmatmul.mubr.msk.f32.gmra.mxu1 %vm667_vm3, %v4524_v42 }
 0x192   : > { %3726 = vmatprep.mubr.msk.f32.mxu1 %vm4346_vm2, %v4344_v4 }
 0x195   : > { %3727 = vmatmul.mubr.msk.f32.gmra.mxu1 %vm667_vm3, %v4520_v38 }
 0x196   : > { %3729 = vmatprep.mubr.msk.f32.mxu1 %vm4346_vm2, %v4344_v4 }
 0x199   : > { %3730 = vmatmul.mubr.msk.f32.gmra.mxu1 %vm667_vm3, %v4538_v50 }
 0x19a   : > { %3732 = vmatprep.mubr.msk.f32.mxu1 %vm4346_vm2, %v4344_v4 }
 0x19d   : > { %3733 = vmatmul.mubr.msk.f32.gmra.mxu1 %vm667_vm3, %v4530_v47 }
 0x19e   : > { %3774 = vmatprep.mubr.msk.f32.mxu1 %vm4346_vm2, %v4344_v4 }
 0x245   : > { %v762_v2 = vpop.f32.mrf.mxu1 }
 0x246   : > { %v796_v3 = vmul.f32 0.25, %v762_v2 }
 0x247   : > { %v3716_v5 = vpop.f32.mrf.mxu1 }
 0x248   : > { %v804_v6 = vsel %vm803_vm4, %v796_v3, -inf }
 0x249   : > { %805 = vmax.xlane.f32.xlu1 %v804_v6  ;;  %v767_v7 = vpop.f32.mrf.mxu1 }
 0x24a   : > { %v797_v8 = vmul.f32 0.25, %v767_v7 }
 0x24b   : > { %v3719_v9 = vpop.f32.mrf.mxu1 }
 0x24c   : > { %v807_v10 = vsel %vm803_vm4, %v797_v8, -inf }
 0x24d   : > { %808 = vmax.xlane.f32.xlu0 %v807_v10  ;;  %v772_v11 = vpop.f32.mrf.mxu1 }
 0x24e   : > { %v798_v12 = vmul.f32 0.25, %v772_v11 }
 0x24f   : > { %v3722_v13 = vpop.f32.mrf.mxu1 }
 0x250   : > { %v810_v14 = vsel %vm803_vm4, %v798_v12, -inf }
 0x251   : > { %811 = vmax.xlane.f32.xlu0 %v810_v14  ;;  %v777_v15 = vpop.f32.mrf.mxu1 }
 0x252   : > { %v799_v16 = vmul.f32 0.25, %v777_v15 }
 0x253   : > { %v3725_v17 = vpop.f32.mrf.mxu1 }
 0x254   : > { %v813_v18 = vsel %vm803_vm4, %v799_v16, -inf }
 0x255   : > { %814 = vmax.xlane.f32.xlu1 %v813_v18  ;;  %v782_v19 = vpop.f32.mrf.mxu1 }
 0x256   : > { %v800_v20 = vmul.f32 0.25, %v782_v19 }
 0x257   : > { %v3728_v21 = vpop.f32.mrf.mxu1 }
 0x258   : > { %v816_v22 = vsel %vm803_vm4, %v800_v20, -inf }
 0x259   : > { %817 = vmax.xlane.f32.xlu0 %v816_v22  ;;  %v787_v23 = vpop.f32.mrf.mxu1 }
 0x25a   : > { %v801_v24 = vmul.f32 0.25, %v787_v23 }
 0x25b   : > { %v3731_v25 = vpop.f32.mrf.mxu1 }
 0x25c   : > { %v819_v26 = vsel %vm803_vm4, %v801_v24, -inf }
 0x25d   : > { %820 = vmax.xlane.f32.xlu1 %v819_v26  ;;  %v792_v27 = vpop.f32.mrf.mxu1 }
 0x25e   : > { %v802_v28 = vmul.f32 0.25, %v792_v27 }
 0x25f   : > { %v3734_v29 = vpop.f32.mrf.mxu1 }
 0x260   : > { %v823_v30 = vsel %vm822_vm5, %v802_v28, -inf }
 0x261   : > { %824 = vmax.xlane.f32.xlu0 %v823_v30 }
 0x26e   : > { %1174 = vrot.lane.b32.xlu1 %v4538_v50, %s4347_s27 }
 0x272   : > { %1172 = vrot.lane.b32.xlu1 %v4520_v38, %s4347_s27 }
 0x277   : > { %1176 = vrot.lane.b32.xlu0 %v4530_v47, %s4347_s27 }
 0x2d2   : > { %v806_v31 = vpop.xlane.xlu1 %805 }
 0x2d3   : > { %v826_v32 = vsub.f32 %v796_v3, %v806_v31 }
 0x2d5   : > { %v833_v33 = vmul.f32 1.442695, %v826_v32 }
 0x2d6   : > { %v809_v34 = vpop.xlane.xlu0 %808 }
 0x2d7   : > { %4189 = vpow2.f32 %v833_v33  ;;  %v827_v35 = vsub.f32 %v797_v8, %v809_v34  ;;  %v1015_v33 = vld [vmem:[%s5683_s3 + $0x8] sm:$0xff]  ;;  %v1014_v34 = vld [vmem:[%s5683_s3] sm:$0xff] }
 0x2d8   : > { %3771 = vmatpush3.msra.mxu1 %v1015_v33 }
 0x2d9   : > { %v835_v36 = vmul.f32 1.442695, %v827_v35  ;;  %3772 = vmatprep.subr.mxu1 %v4344_v4 }
 0x2da   : > { %v812_v37 = vpop.xlane.xlu0 %811  ;;  %3773 = vmatpush3.msra.mxu1 %v1014_v34 }
 0x2db   : > { %4191 = vpow2.f32 %v835_v36  ;;  %v828_v39 = vsub.f32 %v798_v12, %v812_v37  ;;  %3830 = vmatprep.subr.mxu1 %v4344_v4 }
 0x2dd   : > { %v837_v40 = vmul.f32 1.442695, %v828_v39 }
 0x2de   : > { %v815_v41 = vpop.xlane.xlu1 %814 }
 0x2df   : > { %4193 = vpow2.f32 %v837_v40  ;;  %v829_v43 = vsub.f32 %v799_v16, %v815_v41 }
 0x2e1   : > { %v839_v44 = vmul.f32 1.442695, %v829_v43 }
 0x2e2   : > { %v818_v1 = vpop.xlane.xlu0 %817 }
 0x2e3   : > { %4195 = vpow2.f32 %v839_v44  ;;  %v830_v2 = vsub.f32 %v800_v20, %v818_v1 }
 0x2e4   : > { %v4636_v45 = vpop.eup %4189 }
 0x2e5   : > { %v847_v48 = vsel %vm803_vm4, %v4636_v45, 0.0  ;;  %v841_v5 = vmul.f32 1.442695, %v830_v2 }
 0x2e6   : > { %848 = vadd.xlane.f32.xlu1 %v847_v48  ;;  %v821_v3 = vpop.xlane.xlu1 %820 }
 0x2e7   : > { %v831_v6 = vsub.f32 %v801_v24, %v821_v3  ;;  %4197 = vpow2.f32 %v841_v5 }
 0x2e8   : > { %v4640_v59 = vpop.eup %4191 }
 0x2e9   : > { %v850_v60 = vsel %vm803_vm4, %v4640_v59, 0.0  ;;  %v843_v7 = vmul.f32 1.442695, %v831_v6 }
 0x2ea   : > { %851 = vadd.xlane.f32.xlu0 %v850_v60  ;;  %v825_v12 = vpop.xlane.xlu0 %824  ;;  %v1175_v17 = vpop.permute.xlu1 %1174 }
 0x2eb   : > { %4199 = vpow2.f32 %v843_v7  ;;  %v832_v13 = vsub.f32 %v802_v28, %v825_v12 }
 0x2ec   : > { %v4644_v61 = vpop.eup %4193 }
 0x2ed   : > { %v853_v62 = vsel %vm803_vm4, %v4644_v61, 0.0  ;;  %v845_v14 = vmul.f32 1.442695, %v832_v13 }
 0x2ee   : > { %854 = vadd.xlane.f32.xlu1 %v853_v62  ;;  %v1173_v18 = vpop.permute.xlu1 %1172  ;;  %v1177_v19 = vpop.permute.xlu0 %1176 }
 0x2ef   : > { %4201 = vpow2.f32 %v845_v14 }
 0x2f0   : > { %v4648_v63 = vpop.eup %4195 }
 0x2f1   : > { %v856_v0 = vsel %vm803_vm4, %v4648_v63, 0.0 }
 0x2f2   : > { %857 = vadd.xlane.f32.xlu0 %v856_v0 }
 0x2f4   : > { %v4656_v8 = vpop.eup %4197 }
 0x2f5   : > { %v859_v9 = vsel %vm803_vm4, %v4656_v8, 0.0 }
 0x2f8   : > { %v4660_v10 = vpop.eup %4199 }
 0x2f9   : > { %v862_v11 = vsel %vm803_vm4, %v4660_v10, 0.0 }
 0x2fc   : > { %v4678_v15 = vpop.eup %4201 }
 0x2fd   : > { %v865_v16 = vsel %vm822_vm5, %v4678_v15, 0.0 }
 0x2ff   : > { %1168 = vrot.lane.b32.xlu1 %v4551_v53, %s4347_s27 }
 0x308   : > { %1170 = vrot.lane.b32.xlu0 %v4524_v42, %s4347_s27 }
 0x323   : > { %860 = vadd.xlane.f32.xlu1 %v859_v9 }
 0x327   : > { %863 = vadd.xlane.f32.xlu0 %v862_v11 }
 0x334   : > { %1164 = vrot.lane.b32.xlu1 %v4563_v56, %s4347_s27 }
 0x33d   : > { %1166 = vrot.lane.b32.xlu0 %v4528_v46, %s4347_s27 }
 0x341   : > { %1150 = vrot.lane.b32.xlu0 %v4563_v56, %s4348_s28 }
 0x345   : > { %1154 = vrot.lane.b32.xlu0 %v4551_v53, %s4348_s28 }
 0x349   : > { %1158 = vrot.lane.b32.xlu0 %v4520_v38, %s4348_s28 }
 0x34d   : > { %1162 = vrot.lane.b32.xlu0 %v4530_v47, %s4348_s28 }
 0x351   : > { %1414 = vrot.lane.b32.xlu0 %v4540_v51, %s4348_s28 }
 0x355   : > { %1410 = vrot.lane.b32.xlu0 %v4553_v54, %s4348_s28 }
 0x358   : > { %866 = vadd.xlane.f32.xlu1 %v865_v16 }
 0x359   : > { %1408 = vrot.lane.b32.xlu0 %v4557_v55, %s4348_s28 }
 0x369   : > { %1152 = vrot.lane.b32.xlu1 %v4528_v46, %s4348_s28 }
 0x36d   : > { %1156 = vrot.lane.b32.xlu1 %v4524_v42, %s4348_s28 }
 0x36f   : > { %v849_v20 = vpop.xlane.xlu1 %848 }
 0x370   : > { %4203 = vrcp.f32 %v849_v20 }
 0x371   : > { %1160 = vrot.lane.b32.xlu1 %v4538_v50, %s4348_s28 }
 0x373   : > { %v852_v21 = vpop.xlane.xlu0 %851 }
 0x374   : > { %4205 = vrcp.f32 %v852_v21 }
 0x375   : > { %1416 = vrot.lane.b32.xlu1 %v4532_v49, %s4348_s28 }
 0x377   : > { %v855_v22 = vpop.xlane.xlu1 %854 }
 0x378   : > { %4207 = vrcp.f32 %v855_v22 }
 0x379   : > { %1412 = vrot.lane.b32.xlu1 %v4545_v52, %s4348_s28 }
 0x37b   : > { %v858_v23 = vpop.xlane.xlu0 %857  ;;  %v1169_v35 = vpop.permute.xlu1 %1168 }
 0x37c   : > { %4209 = vrcp.f32 %v858_v23 }
 0x37d   : > { %v4204_v24 = vpop.eup %4203  ;;  %1406 = vrot.lane.b32.xlu1 %v4565_v57, %s4348_s28 }
 0x37e   : > { %v875_v25 = vmul.f32 %v4204_v24, %v4636_v45 }
 0x37f   : > { %v1171_v32 = vpop.permute.xlu0 %1170 }
 0x380   : > { %882 = vst.msk [vmem:[%s4700_s19] sm:$0xff] %vm803_vm4, %v875_v25  ;;  %3750 = vmatmul.mubr.msk.f32.vlgmr.msra.gmra.mxu0 %vm803_vm4, %v875_v25 }
 0x381   : > { %v4206_v26 = vpop.eup %4205  ;;  %3796 = vmatpush3.xpose.msk.msra.mxu0 %vm667_vm3, %v1177_v19  ;;  %3752 = vmatprep.mubr.msk.f32.mxu0 %vm4346_vm2, %v4344_v4 }
 0x382   : > { %3797 = vmatprep.subr.mxu0 %v4344_v4  ;;  %v876_v27 = vmul.f32 %v4206_v26, %v4640_v59 }
 0x384   : > { %883 = vst.msk [vmem:[%s4700_s19 + $0x8] sm:$0xff] %vm803_vm4, %v876_v27  ;;  %3753 = vmatmul.mubr.msk.f32.gmra.mxu0 %vm803_vm4, %v876_v27 }
 0x385   : > { %v4208_v28 = vpop.eup %4207  ;;  %3798 = vmatpush3.xpose.msk.msra.mxu0 %vm667_vm3, %v1175_v17  ;;  %3755 = vmatprep.mubr.msk.f32.mxu0 %vm4346_vm2, %v4344_v4 }
 0x386   : > { %3799 = vmatprep.subr.mxu0 %v4344_v4  ;;  %v877_v29 = vmul.f32 %v4208_v28, %v4644_v61 }
 0x388   : > { %884 = vst.msk [vmem:[%s4700_s19 + $0x10] sm:$0xff] %vm803_vm4, %v877_v29  ;;  %3756 = vmatmul.mubr.msk.f32.gmra.mxu0 %vm803_vm4, %v877_v29 }
 0x389   : > { %v4210_v30 = vpop.eup %4209  ;;  %3800 = vmatpush3.xpose.msk.msra.mxu0 %vm667_vm3, %v1173_v18  ;;  %3758 = vmatprep.mubr.msk.f32.mxu0 %vm4346_vm2, %v4344_v4 }
 0x38a   : > { %3801 = vmatprep.subr.mxu0 %v4344_v4  ;;  %v878_v31 = vmul.f32 %v4210_v30, %v4648_v63 }
 0x38c   : > { %885 = vst.msk [vmem:[%s4700_s19 + $0x18] sm:$0xff] %vm803_vm4, %v878_v31  ;;  %3759 = vmatmul.mubr.msk.f32.gmra.mxu0 %vm803_vm4, %v878_v31 }
 0x38d   : > { %3802 = vmatpush3.xpose.msk.msra.mxu0 %vm667_vm3, %v1171_v32  ;;  %3761 = vmatprep.mubr.msk.f32.mxu0 %vm4346_vm2, %v4344_v4 }
 0x38e   : > { %3803 = vmatprep.subr.mxu0 %v4344_v4 }
 0x391   : > { %3804 = vmatpush3.xpose.msk.msra.mxu0 %vm667_vm3, %v1169_v35 }
 0x392   : > { %3805 = vmatprep.subr.mxu0 %v4344_v4 }
 0x3ac   : > { %v861_v36 = vpop.xlane.xlu1 %860 }
 0x3ad   : > { %4211 = vrcp.f32 %v861_v36 }
 0x3b0   : > { %v864_v37 = vpop.xlane.xlu0 %863  ;;  %v1165_v40 = vpop.permute.xlu1 %1164 }
 0x3b1   : > { %4213 = vrcp.f32 %v864_v37 }
 0x3b4   : > { %v1167_v39 = vpop.permute.xlu0 %1166 }
 0x3b5   : > { %3806 = vmatpush3.xpose.msk.msra.mxu0 %vm667_vm3, %v1167_v39 }
 0x3b6   : > { %3807 = vmatprep.subr.mxu0 %v4344_v4 }
 0x3b8   : > { %v1151_v61 = vpop.permute.xlu0 %1150 }
 0x3b9   : > { %3808 = vmatpush3.xpose.msk.msra.mxu0 %vm667_vm3, %v1165_v40 }
 0x3ba   : > { %v4212_v41 = vpop.eup %4211  ;;  %3865 = vmatprep.subr.mxu0 %v4344_v4 }
 0x3bb   : > { %v879_v43 = vmul.f32 %v4212_v41, %v4656_v8 }
 0x3bc   : > { %v1155_v63 = vpop.permute.xlu0 %1154 }
 0x3bd   : > { %886 = vst.msk [vmem:[%s4700_s19 + $0x20] sm:$0xff] %vm803_vm4, %v879_v43  ;;  %3762 = vmatmul.mubr.msk.f32.gmra.mxu0 %vm803_vm4, %v879_v43 }
 0x3be   : > { %v4214_v44 = vpop.eup %4213  ;;  %3764 = vmatprep.mubr.msk.f32.mxu0 %vm4346_vm2, %v4344_v4 }
 0x3bf   : > { %v880_v45 = vmul.f32 %v4214_v44, %v4660_v10 }
 0x3c0   : > { %v1159_v1 = vpop.permute.xlu0 %1158 }
 0x3c1   : > { %887 = vst.msk [vmem:[%s4700_s19 + $0x28] sm:$0xff] %vm803_vm4, %v880_v45  ;;  %3765 = vmatmul.mubr.msk.f32.gmra.mxu0 %vm803_vm4, %v880_v45 }
 0x3c2   : > { %3767 = vmatprep.mubr.msk.f32.mxu0 %vm4346_vm2, %v4344_v4 }
 0x3c4   : > { %v1163_v3 = vpop.permute.xlu0 %1162 }
 0x3c8   : > { %v1415_v5 = vpop.permute.xlu0 %1414 }
 0x3cc   : > { %v1411_v9 = vpop.permute.xlu0 %1410 }
 0x3d0   : > { %v1409_v14 = vpop.permute.xlu0 %1408 }
 0x3e1   : > { %v867_v48 = vpop.xlane.xlu1 %866 }
 0x3e2   : > { %4215 = vrcp.f32 %v867_v48 }
 0x3e5   : > { %v1153_v62 = vpop.permute.xlu1 %1152 }
 0x3e9   : > { %v1157_v0 = vpop.permute.xlu1 %1156 }
 0x3ed   : > { %v1161_v2 = vpop.permute.xlu1 %1160 }
 0x3ef   : > { %v4216_v59 = vpop.eup %4215 }
 0x3f0   : > { %v881_v60 = vmul.f32 %v4216_v59, %v4678_v15 }
 0x3f1   : > { %v1417_v6 = vpop.permute.xlu1 %1416 }
 0x3f2   : > { %888 = vst.msk [vmem:[%s4700_s19 + $0x30] sm:$0x1] %vm822_vm5, %v881_v60  ;;  %3768 = vmatmul.mubr.msk.f32.gmra.mxu0 %vm803_vm4, %v881_v60 }
 0x3f3   : > { %3809 = vmatprep.mubr.msk.f32.mxu0 %vm4346_vm2, %v4344_v4 }
 0x3f5   : > { %v1413_v11 = vpop.permute.xlu1 %1412 }
 0x3f6   : > { %3810 = vmatmul.mubr.msk.f32.vlgmr.msra.gmra.mxu0 %vm667_vm3, %v1151_v61 }
 0x3f7   : > { %3812 = vmatprep.mubr.msk.f32.mxu0 %vm4346_vm2, %v4344_v4 }
 0x3f9   : > { %v1407_v16 = vpop.permute.xlu1 %1406 }
 0x3fa   : > { %3813 = vmatmul.mubr.msk.f32.gmra.mxu0 %vm667_vm3, %v1153_v62 }
 0x3fb   : > { %3815 = vmatprep.mubr.msk.f32.mxu0 %vm4346_vm2, %v4344_v4 }
 0x3fe   : > { %3816 = vmatmul.mubr.msk.f32.gmra.mxu0 %vm667_vm3, %v1155_v63 }
 0x3ff   : > { %3818 = vmatprep.mubr.msk.f32.mxu0 %vm4346_vm2, %v4344_v4 }
 0x402   : > { %3819 = vmatmul.mubr.msk.f32.gmra.mxu0 %vm667_vm3, %v1157_v0 }
 0x403   : > { %3821 = vmatprep.mubr.msk.f32.mxu0 %vm4346_vm2, %v4344_v4 }
 0x406   : > { %3822 = vmatmul.mubr.msk.f32.gmra.mxu0 %vm667_vm3, %v1159_v1 }
 0x407   : > { %3824 = vmatprep.mubr.msk.f32.mxu0 %vm4346_vm2, %v4344_v4 }
 0x40a   : > { %3825 = vmatmul.mubr.msk.f32.gmra.mxu0 %vm667_vm3, %v1161_v2 }
 0x40b   : > { %3827 = vmatprep.mubr.msk.f32.mxu0 %vm4346_vm2, %v4344_v4 }
 0x40e   : > { %3828 = vmatmul.mubr.msk.f32.gmra.mxu0 %vm667_vm3, %v1163_v3 }
 0x40f   : > { %3869 = vmatprep.mubr.msk.f32.mxu0 %vm4346_vm2, %v4344_v4 }
 0x440   : > { %v980_v7 = vpop.f32.mrf.mxu0 }
 0x441   : > { %3775 = vmatmul.mubr.msk.f32.vlgmr.msra.gmra.mxu1 %vm667_vm3, %v980_v7 }
 0x442   : > { %3831 = vmatpush3.msk.msra.mxu1 %vm910_vm1, %v1417_v6  ;;  %v3751_v8 = vpop.f32.mrf.mxu0  ;;  %3777 = vmatprep.mubr.msk.f32.mxu1 %vm4346_vm2, %v4344_v4 }
 0x443   : > { %3832 = vmatprep.subr.mxu1 %v4344_v4 }
 0x444   : > { %3833 = vmatpush3.msra.mxu1 %v1415_v5  ;;  %v985_v10 = vpop.f32.mrf.mxu0 }
 0x445   : > { %3834 = vmatprep.subr.mxu1 %v4344_v4  ;;  %3778 = vmatmul.mubr.msk.f32.gmra.mxu1 %vm667_vm3, %v985_v10 }
 0x446   : > { %3835 = vmatpush3.msra.mxu1 %v1413_v11  ;;  %v3754_v12 = vpop.f32.mrf.mxu0  ;;  %3780 = vmatprep.mubr.msk.f32.mxu1 %vm4346_vm2, %v4344_v4 }
 0x447   : > { %3836 = vmatprep.subr.mxu1 %v4344_v4 }
 0x448   : > { %3837 = vmatpush3.msra.mxu1 %v1411_v9  ;;  %v990_v13 = vpop.f32.mrf.mxu0 }
 0x449   : > { %3838 = vmatprep.subr.mxu1 %v4344_v4  ;;  %3781 = vmatmul.mubr.msk.f32.gmra.mxu1 %vm667_vm3, %v990_v13 }
 0x44a   : > { %3839 = vmatpush3.msra.mxu1 %v1409_v14  ;;  %v3757_v15 = vpop.f32.mrf.mxu0  ;;  %3783 = vmatprep.mubr.msk.f32.mxu1 %vm4346_vm2, %v4344_v4 }
 0x44b   : > { %3840 = vmatprep.subr.mxu1 %v4344_v4 }
 0x44c   : > { %3841 = vmatpush3.msra.mxu1 %v1407_v16  ;;  %v995_v17 = vpop.f32.mrf.mxu0 }
 0x44d   : > { %3784 = vmatmul.mubr.msk.f32.gmra.mxu1 %vm667_vm3, %v995_v17  ;;  %3842 = vmatprep.subr.mxu1 %v4344_v4 }
 0x44e   : > { %v3760_v18 = vpop.f32.mrf.mxu0  ;;  %3786 = vmatprep.mubr.msk.f32.mxu1 %vm4346_vm2, %v4344_v4 }
 0x47d   : > { %v1000_v19 = vpop.f32.mrf.mxu0 }
 0x47e   : > { %3787 = vmatmul.mubr.msk.f32.gmra.mxu1 %vm667_vm3, %v1000_v19 }
 0x47f   : > { %v3763_v20 = vpop.f32.mrf.mxu0  ;;  %3789 = vmatprep.mubr.msk.f32.mxu1 %vm4346_vm2, %v4344_v4 }
 0x481   : > { %v1005_v21 = vpop.f32.mrf.mxu0 }
 0x482   : > { %3790 = vmatmul.mubr.msk.f32.gmra.mxu1 %vm667_vm3, %v1005_v21 }
 0x483   : > { %v3766_v22 = vpop.f32.mrf.mxu0  ;;  %3792 = vmatprep.mubr.msk.f32.mxu1 %vm4346_vm2, %v4344_v4 }
 0x4b2   : > { %v1010_v23 = vpop.f32.mrf.mxu0 }
 0x4b3   : > { %3793 = vmatmul.mubr.msk.f32.gmra.mxu1 %vm667_vm3, %v1010_v23 }
 0x4b4   : > { %v3769_v24 = vpop.f32.mrf.mxu0  ;;  %3844 = vmatprep.mubr.msk.f32.mxu1 %vm4346_vm2, %v4344_v4 }
 0x4b6   : > { %v1272_v25 = vpop.f32.mrf.mxu0 }
 0x4b7   : > { %v1306_v26 = vmul.f32 0.25, %v1272_v25 }
 0x4b8   : > { %v3811_v27 = vpop.f32.mrf.mxu0 }
 0x4b9   : > { %v1313_v28 = vsel %vm803_vm4, %v1306_v26, -inf }
 0x4ba   : > { %1314 = vmax.xlane.f32.xlu1 %v1313_v28  ;;  %v1277_v29 = vpop.f32.mrf.mxu0 }
 0x4bb   : > { %v1307_v30 = vmul.f32 0.25, %v1277_v29 }
 0x4bc   : > { %v3814_v31 = vpop.f32.mrf.mxu0 }
 0x4bd   : > { %v1316_v32 = vsel %vm803_vm4, %v1307_v30, -inf }
 0x4be   : > { %1317 = vmax.xlane.f32.xlu0 %v1316_v32  ;;  %v1282_v33 = vpop.f32.mrf.mxu0 }
 0x4bf   : > { %v1308_v34 = vmul.f32 0.25, %v1282_v33 }
 0x4c0   : > { %v3817_v35 = vpop.f32.mrf.mxu0 }
 0x4c1   : > { %v1319_v36 = vsel %vm803_vm4, %v1308_v34, -inf }
 0x4c2   : > { %1320 = vmax.xlane.f32.xlu0 %v1319_v36  ;;  %v1287_v37 = vpop.f32.mrf.mxu0 }
 0x4c3   : > { %v1309_v39 = vmul.f32 0.25, %v1287_v37 }
 0x4c4   : > { %v3820_v40 = vpop.f32.mrf.mxu0 }
 0x4c5   : > { %v1322_v41 = vsel %vm803_vm4, %v1309_v39, -inf }
 0x4c6   : > { %1323 = vmax.xlane.f32.xlu1 %v1322_v41  ;;  %v1292_v43 = vpop.f32.mrf.mxu0 }
 0x4c7   : > { %v1310_v44 = vmul.f32 0.25, %v1292_v43 }
 0x4c8   : > { %v3823_v45 = vpop.f32.mrf.mxu0 }
 0x4c9   : > { %v1325_v48 = vsel %vm803_vm4, %v1310_v44, -inf }
 0x4ca   : > { %1326 = vmax.xlane.f32.xlu0 %v1325_v48  ;;  %v1297_v59 = vpop.f32.mrf.mxu0 }
 0x4cb   : > { %v4822_v60 = vmul.f32 0.25, %v1297_v59 }
 0x4cc   : > { %v3826_v61 = vpop.f32.mrf.mxu0 }
 0x4cd   : > { %v1328_v62 = vsel %vm803_vm4, %v4822_v60, -inf }
 0x4ce   : > { %1329 = vmax.xlane.f32.xlu1 %v1328_v62  ;;  %v1302_v63 = vpop.f32.mrf.mxu0 }
 0x4cf   : > { %v4826_v0 = vmul.f32 0.25, %v1302_v63 }
 0x4d0   : > { %v3829_v1 = vpop.f32.mrf.mxu0 }
 0x4d1   : > { %v1331_v2 = vsel %vm822_vm5, %v4826_v0, -inf }
 0x4d2   : > { %1332 = vmax.xlane.f32.xlu0 %v1331_v2 }
 0x4df   : > { %1703 = vrot.lane.b32.xlu1 %v4530_v47, %s4349_s25 }
 0x4e3   : > { %1701 = vrot.lane.b32.xlu1 %v4538_v50, %s4349_s25 }
 0x4e7   : > { %1699 = vrot.lane.b32.xlu1 %v4520_v38, %s4349_s25 }
 0x4e8   : > { %1404 = vrot.lane.b32.xlu0 %v4569_v58, %s4348_s28 }
 0x4eb   : > { %1697 = vrot.lane.b32.xlu1 %v4524_v42, %s4349_s25 }
 0x501   : > { %v4840_v3 = vpop.f32.mrf.mxu1 }
 0x503   : > { %v3776_v5 = vpop.f32.mrf.mxu1 }
 0x505   : > { %v4842_v6 = vpop.f32.mrf.mxu1 }
 0x507   : > { %v3779_v7 = vpop.f32.mrf.mxu1 }
 0x509   : > { %v4844_v8 = vpop.f32.mrf.mxu1 }
 0x50b   : > { %v3782_v9 = vpop.f32.mrf.mxu1 }
 0x50d   : > { %v4846_v10 = vpop.f32.mrf.mxu1 }
 0x50f   : > { %v3785_v11 = vpop.f32.mrf.mxu1 }
 0x510   : > { %v1548_v11 = vld [vmem:[%s5683_s3 + $0x18] sm:$0xff] }
 0x511   : > { %3866 = vmatpush3.msra.mxu0 %v1548_v11 }
 0x512   : > { %3867 = vmatprep.subr.mxu0 %v4344_v4 }
 0x53e   : > { %v4848_v12 = vpop.f32.mrf.mxu1 }
 0x540   : > { %v3788_v13 = vpop.f32.mrf.mxu1 }
 0x541   : > { %v1547_v13 = vld [vmem:[%s5683_s3 + $0x10] sm:$0xff] }
 0x542   : > { %v4850_v14 = vpop.f32.mrf.mxu1  ;;  %3868 = vmatpush3.msra.mxu0 %v1547_v13 }
 0x543   : > { %v1315_v15 = vpop.xlane.xlu1 %1314  ;;  %3925 = vmatprep.subr.mxu0 %v4344_v4 }
 0x544   : > { %v1334_v16 = vsub.f32 %v1306_v26, %v1315_v15  ;;  %v3791_v17 = vpop.f32.mrf.mxu1 }
 0x546   : > { %v1341_v18 = vmul.f32 1.442695, %v1334_v16 }
 0x547   : > { %v1318_v19 = vpop.xlane.xlu0 %1317 }
 0x548   : > { %4217 = vpow2.f32 %v1341_v18  ;;  %v1335_v20 = vsub.f32 %v1307_v30, %v1318_v19 }
 0x54a   : > { %v1343_v21 = vmul.f32 1.442695, %v1335_v20 }
 0x54b   : > { %v1321_v22 = vpop.xlane.xlu0 %1320 }
 0x54c   : > { %4219 = vpow2.f32 %v1343_v21  ;;  %v1336_v23 = vsub.f32 %v1308_v34, %v1321_v22 }
 0x54e   : > { %v1345_v24 = vmul.f32 1.442695, %v1336_v23 }
 0x54f   : > { %v1324_v25 = vpop.xlane.xlu1 %1323 }
 0x550   : > { %4221 = vpow2.f32 %v1345_v24  ;;  %v1337_v27 = vsub.f32 %v1309_v39, %v1324_v25 }
 0x552   : > { %v1347_v28 = vmul.f32 1.442695, %v1337_v27 }
 0x553   : > { %v1327_v29 = vpop.xlane.xlu0 %1326 }
 0x554   : > { %4223 = vpow2.f32 %v1347_v28  ;;  %v1338_v31 = vsub.f32 %v1310_v44, %v1327_v29 }
 0x555   : > { %v4852_v32 = vpop.eup %4217 }
 0x556   : > { %v1349_v26 = vmul.f32 1.442695, %v1338_v31  ;;  %v1355_v33 = vsel %vm803_vm4, %v4852_v32, 0.0 }
 0x557   : > { %1356 = vadd.xlane.f32.xlu1 %v1355_v33  ;;  %v1330_v59 = vpop.xlane.xlu1 %1329 }
 0x558   : > { %4225 = vpow2.f32 %v1349_v26  ;;  %v1339_v61 = vsub.f32 %v4822_v60, %v1330_v59 }
 0x559   : > { %v4856_v30 = vpop.eup %4219 }
 0x55a   : > { %v1358_v34 = vsel %vm803_vm4, %v4856_v30, 0.0  ;;  %v1351_v62 = vmul.f32 1.442695, %v1339_v61 }
 0x55b   : > { %1359 = vadd.xlane.f32.xlu0 %v1358_v34  ;;  %v1333_v35 = vpop.xlane.xlu0 %1332 }
 0x55c   : > { %4227 = vpow2.f32 %v1351_v62  ;;  %v1340_v63 = vsub.f32 %v4826_v0, %v1333_v35  ;;  %v1704_v0 = vpop.permute.xlu1 %1703 }
 0x55d   : > { %v4860_v36 = vpop.eup %4221 }
 0x55e   : > { %v1361_v37 = vsel %vm803_vm4, %v4860_v36, 0.0  ;;  %v1353_v1 = vmul.f32 1.442695, %v1340_v63 }
 0x55f   : > { %1362 = vadd.xlane.f32.xlu1 %v1361_v37  ;;  %v1405_v39 = vpop.permute.xlu0 %1404 }
 0x560   : > { %3843 = vmatpush3.msra.mxu1 %v1405_v39  ;;  %4229 = vpow2.f32 %v1353_v1  ;;  %v1702_v9 = vpop.permute.xlu1 %1701 }
 0x561   : > { %v4864_v40 = vpop.eup %4223  ;;  %3890 = vmatprep.subr.mxu1 %v4344_v4 }
 0x562   : > { %v1364_v41 = vsel %vm803_vm4, %v4864_v40, 0.0 }
 0x563   : > { %1365 = vadd.xlane.f32.xlu0 %v1364_v41 }
 0x564   : > { %v1700_v15 = vpop.permute.xlu1 %1699 }
 0x565   : > { %v4869_v43 = vpop.eup %4225 }
 0x566   : > { %v1367_v44 = vsel %vm803_vm4, %v4869_v43, 0.0 }
 0x567   : > { %1368 = vadd.xlane.f32.xlu0 %v1367_v44 }
 0x568   : > { %v1698_v16 = vpop.permute.xlu1 %1697 }
 0x569   : > { %v4881_v2 = vpop.eup %4227 }
 0x56a   : > { %v1370_v5 = vsel %vm803_vm4, %v4881_v2, 0.0 }
 0x56d   : > { %v4885_v7 = vpop.eup %4229 }
 0x56e   : > { %v1373_v60 = vsel %vm822_vm5, %v4885_v7, 0.0 }
 0x570   : > { %1693 = vrot.lane.b32.xlu1 %v4528_v46, %s4349_s25 }
 0x573   : > { %v4875_v45 = vpop.f32.mrf.mxu1 }
 0x575   : > { %v3794_v48 = vpop.f32.mrf.mxu1 }
 0x57d   : > { %1695 = vrot.lane.b32.xlu0 %v4551_v53, %s4349_s25 }
 0x594   : > { %1371 = vadd.xlane.f32.xlu1 %v1370_v5 }
 0x59c   : > { %1374 = vadd.xlane.f32.xlu0 %v1373_v60 }
 0x5a5   : > { %1677 = vrot.lane.b32.xlu1 %v4563_v56, %s4350_s26 }
 0x5a9   : > { %1681 = vrot.lane.b32.xlu1 %v4551_v53, %s4350_s26 }
 0x5ad   : > { %1685 = vrot.lane.b32.xlu1 %v4520_v38, %s4350_s26 }
 0x5b1   : > { %1689 = vrot.lane.b32.xlu1 %v4530_v47, %s4350_s26 }
 0x5b2   : > { %1691 = vrot.lane.b32.xlu0 %v4563_v56, %s4349_s25 }
 0x5b5   : > { %1935 = vrot.lane.b32.xlu1 %v4540_v51, %s4350_s26 }
 0x5b6   : > { %1679 = vrot.lane.b32.xlu0 %v4528_v46, %s4350_s26 }
 0x5b9   : > { %1927 = vrot.lane.b32.xlu1 %v4565_v57, %s4350_s26 }
 0x5ba   : > { %1683 = vrot.lane.b32.xlu0 %v4524_v42, %s4350_s26 }
 0x5be   : > { %1687 = vrot.lane.b32.xlu0 %v4538_v50, %s4350_s26 }
 0x5c2   : > { %1937 = vrot.lane.b32.xlu0 %v4532_v49, %s4350_s26 }
 0x5c6   : > { %1933 = vrot.lane.b32.xlu0 %v4545_v52, %s4350_s26 }
 0x5ca   : > { %1931 = vrot.lane.b32.xlu0 %v4553_v54, %s4350_s26 }
 0x5ce   : > { %1929 = vrot.lane.b32.xlu0 %v4557_v55, %s4350_s26 }
 0x5e0   : > { %v1357_v17 = vpop.xlane.xlu1 %1356 }
 0x5e1   : > { %4231 = vrcp.f32 %v1357_v17 }
 0x5e4   : > { %v1360_v18 = vpop.xlane.xlu0 %1359 }
 0x5e5   : > { %4233 = vrcp.f32 %v1360_v18 }
 0x5e8   : > { %v1363_v19 = vpop.xlane.xlu1 %1362 }
 0x5e9   : > { %4235 = vrcp.f32 %v1363_v19 }
 0x5ec   : > { %v1366_v20 = vpop.xlane.xlu0 %1365 }
 0x5ed   : > { %4237 = vrcp.f32 %v1366_v20 }
 0x5ee   : > { %v4232_v21 = vpop.eup %4231 }
 0x5ef   : > { %v1383_v22 = vmul.f32 %v4232_v21, %v4852_v32 }
 0x5f0   : > { %v1369_v23 = vpop.xlane.xlu0 %1368 }
 0x5f1   : > { %3406 = vst.msk [vmem:[%s4700_s19 + $0x38] sm:$0xff] %vm803_vm4, %v1383_v22  ;;  %4239 = vrcp.f32 %v1369_v23  ;;  %3845 = vmatmul.mubr.msk.f32.vlgmr.msra.gmra.mxu1 %vm803_vm4, %v1383_v22 }
 0x5f2   : > { %v4234_v24 = vpop.eup %4233  ;;  %3891 = vmatpush3.xpose.msk.msra.mxu1 %vm667_vm3, %v1704_v0  ;;  %3847 = vmatprep.mubr.msk.f32.mxu1 %vm4346_vm2, %v4344_v4 }
 0x5f3   : > { %3892 = vmatprep.subr.mxu1 %v4344_v4  ;;  %v1384_v25 = vmul.f32 %v4234_v24, %v4856_v30  ;;  %v1694_v30 = vpop.permute.xlu1 %1693 }
 0x5f4   : > { %v1696_v33 = vpop.permute.xlu0 %1695 }
 0x5f5   : > { %3407 = vst.msk [vmem:[%s4700_s19 + $0x40] sm:$0xff] %vm803_vm4, %v1384_v25  ;;  %3848 = vmatmul.mubr.msk.f32.gmra.mxu1 %vm803_vm4, %v1384_v25 }
 0x5f6   : > { %v4236_v27 = vpop.eup %4235  ;;  %3893 = vmatpush3.xpose.msk.msra.mxu1 %vm667_vm3, %v1702_v9  ;;  %3850 = vmatprep.mubr.msk.f32.mxu1 %vm4346_vm2, %v4344_v4 }
 0x5f7   : > { %3894 = vmatprep.subr.mxu1 %v4344_v4  ;;  %v1385_v28 = vmul.f32 %v4236_v27, %v4860_v36 }
 0x5f9   : > { %3408 = vst.msk [vmem:[%s4700_s19 + $0x48] sm:$0xff] %vm803_vm4, %v1385_v28  ;;  %3851 = vmatmul.mubr.msk.f32.gmra.mxu1 %vm803_vm4, %v1385_v28 }
 0x5fa   : > { %v4238_v29 = vpop.eup %4237  ;;  %3895 = vmatpush3.xpose.msk.msra.mxu1 %vm667_vm3, %v1700_v15  ;;  %3853 = vmatprep.mubr.msk.f32.mxu1 %vm4346_vm2, %v4344_v4 }
 0x5fb   : > { %3896 = vmatprep.subr.mxu1 %v4344_v4  ;;  %v1386_v31 = vmul.f32 %v4238_v29, %v4864_v40 }
 0x5fd   : > { %3409 = vst.msk [vmem:[%s4700_s19 + $0x50] sm:$0xff] %vm803_vm4, %v1386_v31  ;;  %3854 = vmatmul.mubr.msk.f32.gmra.mxu1 %vm803_vm4, %v1386_v31 }
 0x5fe   : > { %v4240_v32 = vpop.eup %4239  ;;  %3897 = vmatpush3.xpose.msk.msra.mxu1 %vm667_vm3, %v1698_v16  ;;  %3856 = vmatprep.mubr.msk.f32.mxu1 %vm4346_vm2, %v4344_v4 }
 0x5ff   : > { %3898 = vmatprep.subr.mxu1 %v4344_v4  ;;  %v1387_v26 = vmul.f32 %v4240_v32, %v4869_v43 }
 0x601   : > { %3410 = vst.msk [vmem:[%s4700_s19 + $0x58] sm:$0xff] %vm803_vm4, %v1387_v26  ;;  %3857 = vmatmul.mubr.msk.f32.gmra.mxu1 %vm803_vm4, %v1387_v26 }
 0x602   : > { %3899 = vmatpush3.xpose.msk.msra.mxu1 %vm667_vm3, %v1696_v33  ;;  %3859 = vmatprep.mubr.msk.f32.mxu1 %vm4346_vm2, %v4344_v4 }
 0x603   : > { %3900 = vmatprep.subr.mxu1 %v4344_v4 }
 0x606   : > { %3901 = vmatpush3.xpose.msk.msra.mxu1 %vm667_vm3, %v1694_v30 }
 0x607   : > { %3902 = vmatprep.subr.mxu1 %v4344_v4 }
 0x61d   : > { %v1372_v34 = vpop.xlane.xlu1 %1371 }
 0x61e   : > { %4241 = vrcp.f32 %v1372_v34 }
 0x621   : > { %v1678_v43 = vpop.permute.xlu1 %1677 }
 0x625   : > { %v1375_v35 = vpop.xlane.xlu0 %1374  ;;  %v1682_v48 = vpop.permute.xlu1 %1681 }
 0x626   : > { %4243 = vrcp.f32 %v1375_v35 }
 0x629   : > { %v1692_v36 = vpop.permute.xlu0 %1691  ;;  %v1686_v61 = vpop.permute.xlu1 %1685 }
 0x62a   : > { %3903 = vmatpush3.xpose.msk.msra.mxu1 %vm667_vm3, %v1692_v36 }
 0x62b   : > { %v4242_v37 = vpop.eup %4241  ;;  %3960 = vmatprep.subr.mxu1 %v4344_v4 }
 0x62c   : > { %v1388_v39 = vmul.f32 %v4242_v37, %v4881_v2 }
 0x62d   : > { %v1680_v44 = vpop.permute.xlu0 %1679  ;;  %v1690_v63 = vpop.permute.xlu1 %1689 }
 0x62e   : > { %3411 = vst.msk [vmem:[%s4700_s19 + $0x60] sm:$0xff] %vm803_vm4, %v1388_v39  ;;  %3860 = vmatmul.mubr.msk.f32.gmra.mxu1 %vm803_vm4, %v1388_v39 }
 0x62f   : > { %3862 = vmatprep.mubr.msk.f32.mxu1 %vm4346_vm2, %v4344_v4 }
 0x631   : > { %v1684_v59 = vpop.permute.xlu0 %1683  ;;  %v1936_v60 = vpop.permute.xlu1 %1935 }
 0x633   : > { %v4244_v40 = vpop.eup %4243 }
 0x634   : > { %v1389_v41 = vmul.f32 %v4244_v40, %v4885_v7 }
 0x635   : > { %v1688_v62 = vpop.permute.xlu0 %1687  ;;  %v1928_v17 = vpop.permute.xlu1 %1927 }
 0x636   : > { %3412 = vst.msk [vmem:[%s4700_s19 + $0x68] sm:$0x1] %vm822_vm5, %v1389_v41  ;;  %3863 = vmatmul.mubr.msk.f32.gmra.mxu1 %vm803_vm4, %v1389_v41 }
 0x637   : > { %3904 = vmatprep.mubr.msk.f32.mxu1 %vm4346_vm2, %v4344_v4 }
 0x639   : > { %v1938_v1 = vpop.permute.xlu0 %1937 }
 0x63a   : > { %3905 = vmatmul.mubr.msk.f32.vlgmr.msra.gmra.mxu1 %vm667_vm3, %v1678_v43 }
 0x63b   : > { %3907 = vmatprep.mubr.msk.f32.mxu1 %vm4346_vm2, %v4344_v4 }
 0x63d   : > { %v1934_v2 = vpop.permute.xlu0 %1933 }
 0x63e   : > { %3908 = vmatmul.mubr.msk.f32.gmra.mxu1 %vm667_vm3, %v1680_v44 }
 0x63f   : > { %3910 = vmatprep.mubr.msk.f32.mxu1 %vm4346_vm2, %v4344_v4 }
 0x641   : > { %v1932_v0 = vpop.permute.xlu0 %1931 }
 0x642   : > { %3911 = vmatmul.mubr.msk.f32.gmra.mxu1 %vm667_vm3, %v1682_v48 }
 0x643   : > { %3913 = vmatprep.mubr.msk.f32.mxu1 %vm4346_vm2, %v4344_v4 }
 0x645   : > { %v1930_v15 = vpop.permute.xlu0 %1929 }
 0x646   : > { %3914 = vmatmul.mubr.msk.f32.gmra.mxu1 %vm667_vm3, %v1684_v59 }
 0x647   : > { %3916 = vmatprep.mubr.msk.f32.mxu1 %vm4346_vm2, %v4344_v4 }
 0x64a   : > { %3917 = vmatmul.mubr.msk.f32.gmra.mxu1 %vm667_vm3, %v1686_v61 }
 0x64b   : > { %3919 = vmatprep.mubr.msk.f32.mxu1 %vm4346_vm2, %v4344_v4 }
 0x64e   : > { %3920 = vmatmul.mubr.msk.f32.gmra.mxu1 %vm667_vm3, %v1688_v62 }
 0x64f   : > { %3922 = vmatprep.mubr.msk.f32.mxu1 %vm4346_vm2, %v4344_v4 }
 0x652   : > { %3923 = vmatmul.mubr.msk.f32.gmra.mxu1 %vm667_vm3, %v1690_v63 }
 0x653   : > { %3964 = vmatprep.mubr.msk.f32.mxu1 %vm4346_vm2, %v4344_v4 }
 0x6b1   : > { %v1513_v5 = vpop.f32.mrf.mxu1 }
 0x6b2   : > { %3870 = vmatmul.mubr.msk.f32.vlgmr.msra.gmra.mxu0 %vm667_vm3, %v1513_v5 }
 0x6b3   : > { %3926 = vmatpush3.msk.msra.mxu0 %vm910_vm1, %v1938_v1  ;;  %v3846_v7 = vpop.f32.mrf.mxu1  ;;  %3872 = vmatprep.mubr.msk.f32.mxu0 %vm4346_vm2, %v4344_v4 }
 0x6b4   : > { %3927 = vmatprep.subr.mxu0 %v4344_v4 }
 0x6b5   : > { %3928 = vmatpush3.msra.mxu0 %v1936_v60  ;;  %v1518_v9 = vpop.f32.mrf.mxu1 }
 0x6b6   : > { %3929 = vmatprep.subr.mxu0 %v4344_v4  ;;  %3873 = vmatmul.mubr.msk.f32.gmra.mxu0 %vm667_vm3, %v1518_v9  ;;  %v3391_v9 = vld [vmem:[%s5684_s4] ss:$0 sm:$0xff] }
 0x6b7   : > { %3930 = vmatpush3.msra.mxu0 %v1934_v2  ;;  %v3849_v11 = vpop.f32.mrf.mxu1  ;;  %3875 = vmatprep.mubr.msk.f32.mxu0 %vm4346_vm2, %v4344_v4 }
 0x6b8   : > { %3931 = vmatprep.subr.mxu0 %v4344_v4  ;;  %v1143_v11 = vadd.f32 %v3391_v9, %v4840_v3 }
 0x6b9   : > { %3932 = vmatpush3.msra.mxu0 %v1932_v0  ;;  %v1523_v13 = vpop.f32.mrf.mxu1 }
 0x6ba   : > { %3933 = vmatprep.subr.mxu0 %v4344_v4  ;;  %3876 = vmatmul.mubr.msk.f32.gmra.mxu0 %vm667_vm3, %v1523_v13 }
 0x6bb   : > { %3934 = vmatpush3.msra.mxu0 %v1930_v15  ;;  %v3852_v16 = vpop.f32.mrf.mxu1  ;;  %3878 = vmatprep.mubr.msk.f32.mxu0 %vm4346_vm2, %v4344_v4 }
 0x6bc   : > { %3935 = vmatprep.subr.mxu0 %v4344_v4 }
 0x6bd   : > { %3936 = vmatpush3.msra.mxu0 %v1928_v17  ;;  %v1528_v18 = vpop.f32.mrf.mxu1  ;;  %v1144_v17 = vadd.f32 %v3391_v9, %v4842_v6 }
 0x6be   : > { %3879 = vmatmul.mubr.msk.f32.gmra.mxu0 %vm667_vm3, %v1528_v18  ;;  %3937 = vmatprep.subr.mxu0 %v4344_v4 }
 0x6bf   : > { %v3855_v19 = vpop.f32.mrf.mxu1  ;;  %3881 = vmatprep.mubr.msk.f32.mxu0 %vm4346_vm2, %v4344_v4 }
 0x6c1   : > { %v1533_v20 = vpop.f32.mrf.mxu1 }
 0x6c2   : > { %3882 = vmatmul.mubr.msk.f32.gmra.mxu0 %vm667_vm3, %v1533_v20 }
 0x6c3   : > { %v3858_v21 = vpop.f32.mrf.mxu1  ;;  %3884 = vmatprep.mubr.msk.f32.mxu0 %vm4346_vm2, %v4344_v4 }
 0x6c4   : > { %v1145_v21 = vadd.f32 %v3391_v9, %v4844_v8 }
 0x6ee   : > { %v1538_v22 = vpop.f32.mrf.mxu1 }
 0x6ef   : > { %3885 = vmatmul.mubr.msk.f32.gmra.mxu0 %vm667_vm3, %v1538_v22 }
 0x6f0   : > { %v3861_v23 = vpop.f32.mrf.mxu1  ;;  %3887 = vmatprep.mubr.msk.f32.mxu0 %vm4346_vm2, %v4344_v4 }
 0x6f6   : > { %v1543_v24 = vpop.f32.mrf.mxu1 }
 0x6f7   : > { %3888 = vmatmul.mubr.msk.f32.gmra.mxu0 %vm667_vm3, %v1543_v24 }
 0x6f8   : > { %v3864_v25 = vpop.f32.mrf.mxu1  ;;  %3939 = vmatprep.mubr.msk.f32.mxu0 %vm4346_vm2, %v4344_v4 }
 0x6f9   : > { %v1146_v25 = vadd.f32 %v3391_v9, %v4846_v10 }
 0x6fa   : > { %v1799_v27 = vpop.f32.mrf.mxu1 }
 0x6fb   : > { %v1833_v28 = vmul.f32 0.25, %v1799_v27 }
 0x6fc   : > { %v3906_v29 = vpop.f32.mrf.mxu1 }
 0x6fd   : > { %v1840_v31 = vsel %vm803_vm4, %v1833_v28, -inf }
 0x6fe   : > { %1841 = vmax.xlane.f32.xlu0 %v1840_v31  ;;  %v1804_v32 = vpop.f32.mrf.mxu1  ;;  %v1147_v31 = vadd.f32 %v3391_v9, %v4848_v12 }
 0x6ff   : > { %v1834_v26 = vmul.f32 0.25, %v1804_v32 }
 0x700   : > { %v3909_v33 = vpop.f32.mrf.mxu1 }
 0x701   : > { %v1843_v30 = vsel %vm803_vm4, %v1834_v26, -inf }
 0x702   : > { %1844 = vmax.xlane.f32.xlu1 %v1843_v30  ;;  %v1809_v34 = vpop.f32.mrf.mxu1 }
 0x703   : > { %v1835_v35 = vmul.f32 0.25, %v1809_v34 }
 0x704   : > { %v3912_v36 = vpop.f32.mrf.mxu1 }
 0x705   : > { %v1846_v37 = vsel %vm803_vm4, %v1835_v35, -inf }
 0x706   : > { %1847 = vmax.xlane.f32.xlu0 %v1846_v37  ;;  %v1814_v39 = vpop.f32.mrf.mxu1 }
 0x707   : > { %v5033_v40 = vmul.f32 0.25, %v1814_v39 }
 0x708   : > { %v3915_v41 = vpop.f32.mrf.mxu1 }
 0x709   : > { %v1849_v43 = vsel %vm803_vm4, %v5033_v40, -inf }
 0x70a   : > { %1850 = vmax.xlane.f32.xlu0 %v1849_v43  ;;  %v1819_v44 = vpop.f32.mrf.mxu1 }
 0x70b   : > { %v5037_v48 = vmul.f32 0.25, %v1819_v44 }
 0x70c   : > { %v3918_v59 = vpop.f32.mrf.mxu1 }
 0x70d   : > { %v1852_v61 = vsel %vm803_vm4, %v5037_v48, -inf }
 0x70e   : > { %1853 = vmax.xlane.f32.xlu1 %v1852_v61  ;;  %v1824_v62 = vpop.f32.mrf.mxu1 }
 0x70f   : > { %v5041_v63 = vmul.f32 0.25, %v1824_v62 }
 0x710   : > { %v3921_v1 = vpop.f32.mrf.mxu1 }
 0x711   : > { %v1855_v2 = vsel %vm803_vm4, %v5041_v63, -inf }
 0x712   : > { %1856 = vmax.xlane.f32.xlu0 %v1855_v2  ;;  %v1829_v5 = vpop.f32.mrf.mxu1  ;;  %v1148_v2 = vadd.f32 %v3391_v9, %v4850_v14 }
 0x713   : > { %v5051_v60 = vmul.f32 0.25, %v1829_v5 }
 0x714   : > { %v3924_v7 = vpop.f32.mrf.mxu1 }
 0x715   : > { %v1858_v0 = vsel %vm822_vm5, %v5051_v60, -inf }
 0x71f   : > { %2224 = vrot.lane.b32.xlu1 %v4530_v47, %s4351_s17 }
 0x723   : > { %2222 = vrot.lane.b32.xlu1 %v4538_v50, %s4351_s17 }
 0x728   : > { %1925 = vrot.lane.b32.xlu0 %v4569_v58, %s4350_s26  ;;  %s5655_s26 = scalar_lea.vmem %s5693_s13, %s4170_s21 }
 0x747   : > { %1859 = vmax.xlane.f32.xlu1 %v1858_v0 }
 0x758   : > { %2220 = vrot.lane.b32.xlu1 %v4520_v38, %s4351_s17 }
 0x772   : > { %v1636_v13 = vpop.f32.mrf.mxu0 }
 0x773   : > { %v5061_v15 = vadd.f32 %v1636_v13, %v1143_v11  ;;  %v1149_v11 = vadd.f32 %v3391_v9, %v4875_v45 }
 0x774   : > { %v3871_v16 = vpop.f32.mrf.mxu0 }
 0x776   : > { %v1641_v18 = vpop.f32.mrf.mxu0 }
 0x777   : > { %v5064_v19 = vadd.f32 %v1641_v18, %v1144_v17 }
 0x778   : > { %v3874_v20 = vpop.f32.mrf.mxu0 }
 0x77a   : > { %v1646_v22 = vpop.f32.mrf.mxu0 }
 0x77b   : > { %v5067_v23 = vadd.f32 %v1646_v22, %v1145_v21 }
 0x77c   : > { %v3877_v24 = vpop.f32.mrf.mxu0 }
 0x77e   : > { %v1651_v27 = vpop.f32.mrf.mxu0 }
 0x77f   : > { %v5070_v3 = vadd.f32 %v1651_v27, %v1146_v25 }
 0x780   : > { %v3880_v29 = vpop.f32.mrf.mxu0 }
 0x782   : > { %v1656_v32 = vpop.f32.mrf.mxu0 }
 0x783   : > { %v5073_v6 = vadd.f32 %v1656_v32, %v1147_v31 }
 0x784   : > { %v3883_v33 = vpop.f32.mrf.mxu0 }
 0x787   : > { %v1842_v30 = vpop.xlane.xlu0 %1841 }
 0x788   : > { %v1861_v34 = vsub.f32 %v1833_v28, %v1842_v30 }
 0x78a   : > { %v1868_v36 = vmul.f32 1.442695, %v1861_v34 }
 0x78b   : > { %v1845_v8 = vpop.xlane.xlu1 %1844 }
 0x78c   : > { %4245 = vpow2.f32 %v1868_v36  ;;  %v1862_v37 = vsub.f32 %v1834_v26, %v1845_v8 }
 0x78e   : > { %v1870_v39 = vmul.f32 1.442695, %v1862_v37 }
 0x78f   : > { %v1848_v41 = vpop.xlane.xlu0 %1847 }
 0x790   : > { %4247 = vpow2.f32 %v1870_v39  ;;  %v1863_v10 = vsub.f32 %v1835_v35, %v1848_v41 }
 0x792   : > { %v1872_v43 = vmul.f32 1.442695, %v1863_v10 }
 0x793   : > { %v1851_v44 = vpop.xlane.xlu0 %1850 }
 0x794   : > { %4249 = vpow2.f32 %v1872_v43  ;;  %v1864_v18 = vsub.f32 %v5033_v40, %v1851_v44 }
 0x796   : > { %v1874_v14 = vmul.f32 1.442695, %v1864_v18 }
 0x797   : > { %v1854_v20 = vpop.xlane.xlu1 %1853 }
 0x798   : > { %v1865_v21 = vsub.f32 %v5037_v48, %v1854_v20  ;;  %4251 = vpow2.f32 %v1874_v14 }
 0x799   : > { %v5075_v59 = vpop.eup %4245 }
 0x79a   : > { %v1882_v12 = vsel %vm803_vm4, %v5075_v59, 0.0  ;;  %v1876_v22 = vmul.f32 1.442695, %v1865_v21 }
 0x79b   : > { %1883 = vadd.xlane.f32.xlu0 %v1882_v12  ;;  %v1857_v61 = vpop.xlane.xlu0 %1856  ;;  %v2225_v25 = vpop.permute.xlu1 %2224 }
 0x79c   : > { %v1866_v24 = vsub.f32 %v5041_v63, %v1857_v61  ;;  %4253 = vpow2.f32 %v1876_v22 }
 0x79d   : > { %v5079_v62 = vpop.eup %4247 }
 0x79e   : > { %v1885_v28 = vsel %vm803_vm4, %v5079_v62, 0.0  ;;  %v1878_v45 = vmul.f32 1.442695, %v1866_v24 }
 0x79f   : > { %v1926_v26 = vpop.permute.xlu0 %1925  ;;  %1886 = vadd.xlane.f32.xlu1 %v1885_v28  ;;  %v2223_v9 = vpop.permute.xlu1 %2222 }
 0x7a0   : > { %3938 = vmatpush3.msra.mxu0 %v1926_v26  ;;  %4255 = vpow2.f32 %v1878_v45 }
 0x7a1   : > { %v5083_v1 = vpop.eup %4249  ;;  %3985 = vmatprep.subr.mxu0 %v4344_v4 }
 0x7a2   : > { %v1888_v35 = vsel %vm803_vm4, %v5083_v1, 0.0 }
 0x7a3   : > { %1889 = vadd.xlane.f32.xlu0 %v1888_v35 }
 0x7a5   : > { %v5101_v27 = vpop.eup %4251 }
 0x7a6   : > { %v1891_v40 = vsel %vm803_vm4, %v5101_v27, 0.0 }
 0x7a9   : > { %v5106_v33 = vpop.eup %4253 }
 0x7aa   : > { %v1894_v48 = vsel %vm803_vm4, %v5106_v33, 0.0 }
 0x7ad   : > { %v5110_v63 = vpop.eup %4255 }
 0x7ae   : > { %v1897_v30 = vsel %vm803_vm4, %v5110_v63, 0.0 }
 0x7af   : > { %v1661_v5 = vpop.f32.mrf.mxu0 }
 0x7b0   : > { %v5089_v7 = vadd.f32 %v1661_v5, %v1148_v2  ;;  %2216 = vrot.lane.b32.xlu1 %v4551_v53, %s4351_s17  ;;  %v2068_v5 = vld [vmem:[%s5683_s3 + $0x20] sm:$0xff] }
 0x7b1   : > { %v3886_v0 = vpop.f32.mrf.mxu0 }
 0x7b7   : > { %v1666_v13 = vpop.f32.mrf.mxu0 }
 0x7b8   : > { %v5094_v16 = vadd.f32 %v1666_v13, %v1149_v11 }
 0x7b9   : > { %v3889_v17 = vpop.f32.mrf.mxu0  ;;  %2218 = vrot.lane.b32.xlu0 %v4524_v42, %s4351_s17 }
 0x7d0   : > { %v1860_v29 = vpop.xlane.xlu1 %1859 }
 0x7d1   : > { %v1867_v31 = vsub.f32 %v5051_v60, %v1860_v29 }
 0x7d3   : > { %v1880_v32 = vmul.f32 1.442695, %v1867_v31 }
 0x7d4   : > { %1892 = vadd.xlane.f32.xlu1 %v1891_v40 }
 0x7d5   : > { %4257 = vpow2.f32 %v1880_v32 }
 0x7d8   : > { %1895 = vadd.xlane.f32.xlu1 %v1894_v48 }
 0x7dc   : > { %1898 = vadd.xlane.f32.xlu1 %v1897_v30 }
 0x7e2   : > { %v5114_v34 = vpop.eup %4257 }
 0x7e3   : > { %v1900_v60 = vsel %vm822_vm5, %v5114_v34, 0.0 }
 0x7e4   : > { %1901 = vadd.xlane.f32.xlu0 %v1900_v60 }
 0x7ed   : > { %2212 = vrot.lane.b32.xlu1 %v4563_v56, %s4351_s17 }
 0x7f1   : > { %2200 = vrot.lane.b32.xlu1 %v4528_v46, %s4352_s23 }
 0x7f5   : > { %2204 = vrot.lane.b32.xlu1 %v4524_v42, %s4352_s23  ;;  %v2069_v42 = vld [vmem:[%s5683_s3 + $0x28] sm:$0xff] }
 0x7f6   : > { %3961 = vmatpush3.msra.mxu1 %v2069_v42 }
 0x7f7   : > { %3962 = vmatprep.subr.mxu1 %v4344_v4 }
 0x7f8   : > { %3963 = vmatpush3.msra.mxu1 %v2068_v5 }
 0x7f9   : > { %2208 = vrot.lane.b32.xlu1 %v4538_v50, %s4352_s23  ;;  %4020 = vmatprep.subr.mxu1 %v4344_v4 }
 0x7fa   : > { %2214 = vrot.lane.b32.xlu0 %v4528_v46, %s4351_s17  ;;  %v2221_v46 = vpop.permute.xlu1 %2220 }
 0x7fe   : > { %2198 = vrot.lane.b32.xlu0 %v4563_v56, %s4352_s23 }
 0x802   : > { %2202 = vrot.lane.b32.xlu0 %v4551_v53, %s4352_s23 }
 0x806   : > { %2206 = vrot.lane.b32.xlu0 %v4520_v38, %s4352_s23 }
 0x80a   : > { %2210 = vrot.lane.b32.xlu0 %v4530_v47, %s4352_s23 }
 0x824   : > { %v1884_v50 = vpop.xlane.xlu0 %1883 }
 0x825   : > { %4259 = vrcp.f32 %v1884_v50 }
 0x828   : > { %v1887_v56 = vpop.xlane.xlu1 %1886 }
 0x829   : > { %4261 = vrcp.f32 %v1887_v56 }
 0x82c   : > { %v1890_v53 = vpop.xlane.xlu0 %1889  ;;  %v2217_v10 = vpop.permute.xlu1 %2216 }
 0x82d   : > { %4263 = vrcp.f32 %v1890_v53 }
 0x830   : > { %v2219_v41 = vpop.permute.xlu0 %2218 }
 0x832   : > { %v4260_v36 = vpop.eup %4259 }
 0x833   : > { %v1910_v38 = vmul.f32 %v4260_v36, %v5075_v59 }
 0x835   : > { %3442 = vst.msk [vmem:[%s4700_s19 + $0x70] sm:$0xff] %vm803_vm4, %v1910_v38  ;;  %3940 = vmatmul.mubr.msk.f32.vlgmr.msra.gmra.mxu0 %vm803_vm4, %v1910_v38 }
 0x836   : > { %v4262_v47 = vpop.eup %4261  ;;  %3986 = vmatpush3.xpose.msk.msra.mxu0 %vm667_vm3, %v2225_v25  ;;  %3942 = vmatprep.mubr.msk.f32.mxu0 %vm4346_vm2, %v4344_v4 }
 0x837   : > { %3987 = vmatprep.subr.mxu0 %v4344_v4  ;;  %v1911_v8 = vmul.f32 %v4262_v47, %v5079_v62 }
 0x839   : > { %3443 = vst.msk [vmem:[%s4700_s19 + $0x78] sm:$0xff] %vm803_vm4, %v1911_v8  ;;  %3943 = vmatmul.mubr.msk.f32.gmra.mxu0 %vm803_vm4, %v1911_v8 }
 0x83a   : > { %v4264_v37 = vpop.eup %4263  ;;  %3988 = vmatpush3.xpose.msk.msra.mxu0 %vm667_vm3, %v2223_v9  ;;  %3945 = vmatprep.mubr.msk.f32.mxu0 %vm4346_vm2, %v4344_v4 }
 0x83b   : > { %3989 = vmatprep.subr.mxu0 %v4344_v4  ;;  %v1912_v39 = vmul.f32 %v4264_v37, %v5083_v1 }
 0x83d   : > { %3444 = vst.msk [vmem:[%s4700_s19 + $0x80] sm:$0xff] %vm803_vm4, %v1912_v39  ;;  %3946 = vmatmul.mubr.msk.f32.gmra.mxu0 %vm803_vm4, %v1912_v39 }
 0x83e   : > { %3990 = vmatpush3.xpose.msk.msra.mxu0 %vm667_vm3, %v2221_v46  ;;  %3948 = vmatprep.mubr.msk.f32.mxu0 %vm4346_vm2, %v4344_v4 }
 0x83f   : > { %3991 = vmatprep.subr.mxu0 %v4344_v4 }
 0x842   : > { %3992 = vmatpush3.xpose.msk.msra.mxu0 %vm667_vm3, %v2219_v41 }
 0x843   : > { %3993 = vmatprep.subr.mxu0 %v4344_v4 }
 0x846   : > { %3994 = vmatpush3.xpose.msk.msra.mxu0 %vm667_vm3, %v2217_v10 }
 0x847   : > { %3995 = vmatprep.subr.mxu0 %v4344_v4 }
 0x85d   : > { %v1893_v43 = vpop.xlane.xlu1 %1892 }
 0x85e   : > { %4265 = vrcp.f32 %v1893_v43 }
 0x861   : > { %v1896_v44 = vpop.xlane.xlu1 %1895 }
 0x862   : > { %4267 = vrcp.f32 %v1896_v44 }
 0x865   : > { %v1899_v59 = vpop.xlane.xlu1 %1898 }
 0x866   : > { %4269 = vrcp.f32 %v1899_v59 }
 0x869   : > { %v2213_v0 = vpop.permute.xlu1 %2212 }
 0x86b   : > { %v4266_v12 = vpop.eup %4265 }
 0x86c   : > { %v1913_v61 = vmul.f32 %v4266_v12, %v5101_v27 }
 0x86d   : > { %v1902_v62 = vpop.xlane.xlu0 %1901  ;;  %v2201_v18 = vpop.permute.xlu1 %2200 }
 0x86e   : > { %4271 = vrcp.f32 %v1902_v62  ;;  %3445 = vst.msk [vmem:[%s4700_s19 + $0x88] sm:$0xff] %vm803_vm4, %v1913_v61  ;;  %3949 = vmatmul.mubr.msk.f32.gmra.mxu0 %vm803_vm4, %v1913_v61 }
 0x86f   : > { %v4268_v28 = vpop.eup %4267  ;;  %3951 = vmatprep.mubr.msk.f32.mxu0 %vm4346_vm2, %v4344_v4 }
 0x870   : > { %v1914_v26 = vmul.f32 %v4268_v28, %v5106_v33 }
 0x871   : > { %v2215_v1 = vpop.permute.xlu0 %2214  ;;  %v2205_v14 = vpop.permute.xlu1 %2204 }
 0x872   : > { %3446 = vst.msk [vmem:[%s4700_s19 + $0x90] sm:$0xff] %vm803_vm4, %v1914_v26  ;;  %3952 = vmatmul.mubr.msk.f32.gmra.mxu0 %vm803_vm4, %v1914_v26 }
 0x873   : > { %v4270_v35 = vpop.eup %4269  ;;  %3996 = vmatpush3.xpose.msk.msra.mxu0 %vm667_vm3, %v2215_v1  ;;  %3954 = vmatprep.mubr.msk.f32.mxu0 %vm4346_vm2, %v4344_v4 }
 0x874   : > { %3997 = vmatprep.subr.mxu0 %v4344_v4  ;;  %v1915_v2 = vmul.f32 %v4270_v35, %v5110_v63 }
 0x875   : > { %v2199_v17 = vpop.permute.xlu0 %2198  ;;  %v2209_v22 = vpop.permute.xlu1 %2208 }
 0x876   : > { %3447 = vst.msk [vmem:[%s4700_s19 + $0x98] sm:$0xff] %vm803_vm4, %v1915_v2  ;;  %3955 = vmatmul.mubr.msk.f32.gmra.mxu0 %vm803_vm4, %v1915_v2 }
 0x877   : > { %3998 = vmatpush3.xpose.msk.msra.mxu0 %vm667_vm3, %v2213_v0  ;;  %3957 = vmatprep.mubr.msk.f32.mxu0 %vm4346_vm2, %v4344_v4 }
 0x878   : > { %4055 = vmatprep.subr.mxu0 %v4344_v4 }
 0x879   : > { %v2203_v20 = vpop.permute.xlu0 %2202 }
 0x87b   : > { %v4272_v11 = vpop.eup %4271 }
 0x87c   : > { %v1916_v13 = vmul.f32 %v4272_v11, %v5114_v34 }
 0x87d   : > { %v2207_v21 = vpop.permute.xlu0 %2206 }
 0x87e   : > { %3448 = vst.msk [vmem:[%s4700_s19 + $0xa0] sm:$0x1] %vm822_vm5, %v1916_v13  ;;  %3958 = vmatmul.mubr.msk.f32.gmra.mxu0 %vm803_vm4, %v1916_v13 }
 0x87f   : > { %3999 = vmatprep.mubr.msk.f32.mxu0 %vm4346_vm2, %v4344_v4 }
 0x881   : > { %v2211_v24 = vpop.permute.xlu0 %2210 }
 0x882   : > { %4000 = vmatmul.mubr.msk.f32.vlgmr.msra.gmra.mxu0 %vm667_vm3, %v2199_v17 }
 0x883   : > { %4002 = vmatprep.mubr.msk.f32.mxu0 %vm4346_vm2, %v4344_v4 }
 0x886   : > { %4003 = vmatmul.mubr.msk.f32.gmra.mxu0 %vm667_vm3, %v2201_v18 }
 0x887   : > { %4005 = vmatprep.mubr.msk.f32.mxu0 %vm4346_vm2, %v4344_v4 }
 0x88a   : > { %4006 = vmatmul.mubr.msk.f32.gmra.mxu0 %vm667_vm3, %v2203_v20 }
 0x88b   : > { %4008 = vmatprep.mubr.msk.f32.mxu0 %vm4346_vm2, %v4344_v4 }
 0x88e   : > { %4009 = vmatmul.mubr.msk.f32.gmra.mxu0 %vm667_vm3, %v2205_v14 }
 0x88f   : > { %4011 = vmatprep.mubr.msk.f32.mxu0 %vm4346_vm2, %v4344_v4 }
 0x892   : > { %4012 = vmatmul.mubr.msk.f32.gmra.mxu0 %vm667_vm3, %v2207_v21 }
 0x893   : > { %4014 = vmatprep.mubr.msk.f32.mxu0 %vm4346_vm2, %v4344_v4 }
 0x896   : > { %4015 = vmatmul.mubr.msk.f32.gmra.mxu0 %vm667_vm3, %v2209_v22 }
 0x897   : > { %4017 = vmatprep.mubr.msk.f32.mxu0 %vm4346_vm2, %v4344_v4 }
 0x89a   : > { %4018 = vmatmul.mubr.msk.f32.gmra.mxu0 %vm667_vm3, %v2211_v24 }
 0x89b   : > { %4059 = vmatprep.mubr.msk.f32.mxu0 %vm4346_vm2, %v4344_v4 }
 0x8f5   : > { %v2034_v25 = vpop.f32.mrf.mxu0 }
 0x8f6   : > { %3965 = vmatmul.mubr.msk.f32.vlgmr.msra.gmra.mxu1 %vm667_vm3, %v2034_v25 }
 0x8f7   : > { %v3941_v45 = vpop.f32.mrf.mxu0  ;;  %3967 = vmatprep.mubr.msk.f32.mxu1 %vm4346_vm2, %v4344_v4 }
 0x8f9   : > { %v2039_v9 = vpop.f32.mrf.mxu0 }
 0x8fa   : > { %3968 = vmatmul.mubr.msk.f32.gmra.mxu1 %vm667_vm3, %v2039_v9 }
 0x8fb   : > { %v3944_v27 = vpop.f32.mrf.mxu0  ;;  %3970 = vmatprep.mubr.msk.f32.mxu1 %vm4346_vm2, %v4344_v4 }
 0x8fd   : > { %v2044_v29 = vpop.f32.mrf.mxu0 }
 0x8fe   : > { %3971 = vmatmul.mubr.msk.f32.gmra.mxu1 %vm667_vm3, %v2044_v29 }
 0x8ff   : > { %v3947_v31 = vpop.f32.mrf.mxu0  ;;  %3973 = vmatprep.mubr.msk.f32.mxu1 %vm4346_vm2, %v4344_v4 }
 0x92e   : > { %v2049_v32 = vpop.f32.mrf.mxu0 }
 0x92f   : > { %3974 = vmatmul.mubr.msk.f32.gmra.mxu1 %vm667_vm3, %v2049_v32 }
 0x930   : > { %v3950_v40 = vpop.f32.mrf.mxu0  ;;  %3976 = vmatprep.mubr.msk.f32.mxu1 %vm4346_vm2, %v4344_v4 }
 0x932   : > { %v2054_v33 = vpop.f32.mrf.mxu0 }
 0x933   : > { %3977 = vmatmul.mubr.msk.f32.gmra.mxu1 %vm667_vm3, %v2054_v33 }
 0x934   : > { %v3953_v48 = vpop.f32.mrf.mxu0  ;;  %3979 = vmatprep.mubr.msk.f32.mxu1 %vm4346_vm2, %v4344_v4 }
 0x936   : > { %v2059_v63 = vpop.f32.mrf.mxu0 }
 0x937   : > { %3980 = vmatmul.mubr.msk.f32.gmra.mxu1 %vm667_vm3, %v2059_v63 }
 0x938   : > { %v3956_v30 = vpop.f32.mrf.mxu0  ;;  %3982 = vmatprep.mubr.msk.f32.mxu1 %vm4346_vm2, %v4344_v4 }
 0x93e   : > { %v2064_v34 = vpop.f32.mrf.mxu0 }
 0x93f   : > { %3983 = vmatmul.mubr.msk.f32.gmra.mxu1 %vm667_vm3, %v2064_v34 }
 0x940   : > { %v3959_v60 = vpop.f32.mrf.mxu0  ;;  %4034 = vmatprep.mubr.msk.f32.mxu1 %vm4346_vm2, %v4344_v4 }
 0x942   : > { %v2320_v42 = vpop.f32.mrf.mxu0 }
 0x943   : > { %v2354_v46 = vmul.f32 0.25, %v2320_v42 }
 0x944   : > { %v4001_v50 = vpop.f32.mrf.mxu0 }
 0x945   : > { %v2361_v56 = vsel %vm803_vm4, %v2354_v46, -inf }
 0x946   : > { %2362 = vmax.xlane.f32.xlu1 %v2361_v56  ;;  %v2325_v53 = vpop.f32.mrf.mxu0 }
 0x947   : > { %v2355_v36 = vmul.f32 0.25, %v2325_v53 }
 0x948   : > { %v4004_v38 = vpop.f32.mrf.mxu0 }
 0x949   : > { %v2364_v47 = vsel %vm803_vm4, %v2355_v36, -inf }
 0x94a   : > { %2365 = vmax.xlane.f32.xlu0 %v2364_v47  ;;  %v2330_v8 = vpop.f32.mrf.mxu0 }
 0x94b   : > { %v2356_v37 = vmul.f32 0.25, %v2330_v8 }
 0x94c   : > { %v4007_v39 = vpop.f32.mrf.mxu0 }
 0x94d   : > { %v2367_v41 = vsel %vm803_vm4, %v2356_v37, -inf }
 0x94e   : > { %2368 = vmax.xlane.f32.xlu0 %v2367_v41  ;;  %v2335_v10 = vpop.f32.mrf.mxu0 }
 0x94f   : > { %v2357_v43 = vmul.f32 0.25, %v2335_v10 }
 0x950   : > { %v4010_v44 = vpop.f32.mrf.mxu0 }
 0x951   : > { %v2370_v59 = vsel %vm803_vm4, %v2357_v43, -inf }
 0x952   : > { %2371 = vmax.xlane.f32.xlu1 %v2370_v59  ;;  %v2340_v12 = vpop.f32.mrf.mxu0 }
 0x953   : > { %v5250_v35 = vmul.f32 0.25, %v2340_v12 }
 0x954   : > { %v4013_v61 = vpop.f32.mrf.mxu0 }
 0x955   : > { %v2373_v5 = vsel %vm803_vm4, %v5250_v35, -inf }
 0x956   : > { %v2345_v62 = vpop.f32.mrf.mxu0 }
 0x957   : > { %v5252_v2 = vmul.f32 0.25, %v2345_v62 }
 0x958   : > { %v4016_v28 = vpop.f32.mrf.mxu0 }
 0x959   : > { %v2376_v0 = vsel %vm803_vm4, %v5252_v2, -inf }
 0x95a   : > { %v2350_v26 = vpop.f32.mrf.mxu0 }
 0x95c   : > { %v4019_v1 = vpop.f32.mrf.mxu0 }
 0x963   : > { %2458 = vrot.lane.b32.xlu1 %v4532_v49, %s4352_s23  ;;  %v5262_v49 = vmul.f32 0.25, %v2350_v26 }
 0x964   : > { %2456 = vrot.lane.b32.xlu0 %v4540_v51, %s4352_s23 }
 0x965   : > { %v2379_v13 = vsel %vm822_vm5, %v5262_v49, -inf }
 0x983   : > { %2374 = vmax.xlane.f32.xlu0 %v2373_v5 }
 0x987   : > { %2377 = vmax.xlane.f32.xlu1 %v2376_v0 }
 0x998   : > { %2454 = vrot.lane.b32.xlu1 %v4545_v52, %s4352_s23 }
 0x999   : > { %2452 = vrot.lane.b32.xlu0 %v4553_v54, %s4352_s23 }
 0x9b6   : > { %v2157_v51 = vpop.f32.mrf.mxu1 }
 0x9b7   : > { %v5265_v11 = vadd.f32 %v2157_v51, %v5061_v15 }
 0x9b8   : > { %2380 = vmax.xlane.f32.xlu0 %v2379_v13  ;;  %v3966_v17 = vpop.f32.mrf.mxu1 }
 0x9ba   : > { %v2162_v18 = vpop.f32.mrf.mxu1 }
 0x9bb   : > { %v5270_v20 = vadd.f32 %v2162_v18, %v5064_v19 }
 0x9bc   : > { %v3969_v14 = vpop.f32.mrf.mxu1 }
 0x9be   : > { %v2167_v52 = vpop.f32.mrf.mxu1 }
 0x9bf   : > { %v5273_v21 = vadd.f32 %v2167_v52, %v5067_v23 }
 0x9c0   : > { %v3972_v54 = vpop.f32.mrf.mxu1 }
 0x9c1   : > { %v2590_v54 = vld [vmem:[%s5683_s3 + $0x38] sm:$0xff] }
 0x9c2   : > { %4056 = vmatpush3.msra.mxu0 %v2590_v54 }
 0x9c3   : > { %4057 = vmatprep.subr.mxu0 %v4344_v4 }
 0x9ce   : > { %2450 = vrot.lane.b32.xlu0 %v4557_v55, %s4352_s23 }
 0x9cf   : > { %v2363_v15 = vpop.xlane.xlu1 %2362 }
 0x9d0   : > { %v2382_v22 = vsub.f32 %v2354_v46, %v2363_v15 }
 0x9d2   : > { %v2389_v24 = vmul.f32 1.442695, %v2382_v22 }
 0x9d3   : > { %v2366_v25 = vpop.xlane.xlu0 %2365 }
 0x9d4   : > { %4273 = vpow2.f32 %v2389_v24  ;;  %v2383_v45 = vsub.f32 %v2355_v36, %v2366_v25 }
 0x9d6   : > { %v2391_v9 = vmul.f32 1.442695, %v2383_v45 }
 0x9d7   : > { %v2369_v27 = vpop.xlane.xlu0 %2368 }
 0x9d8   : > { %v2384_v29 = vsub.f32 %v2356_v37, %v2369_v27  ;;  %4275 = vpow2.f32 %v2391_v9 }
 0x9da   : > { %v2393_v19 = vmul.f32 1.442695, %v2384_v29 }
 0x9db   : > { %v2372_v31 = vpop.xlane.xlu1 %2371  ;;  %v2457_v33 = vpop.permute.xlu0 %2456 }
 0x9dc   : > { %4277 = vpow2.f32 %v2393_v19  ;;  %v2385_v32 = vsub.f32 %v2357_v43, %v2372_v31 }
 0x9de   : > { %v2395_v23 = vmul.f32 1.442695, %v2385_v32 }
 0x9df   : > { %v2459_v40 = vpop.permute.xlu1 %2458 }
 0x9e0   : > { %4279 = vpow2.f32 %v2395_v23  ;;  %4021 = vmatpush3.msk.msra.mxu1 %vm910_vm1, %v2459_v40 }
 0x9e1   : > { %v5278_v55 = vpop.eup %4273  ;;  %4022 = vmatprep.subr.mxu1 %v4344_v4 }
 0x9e2   : > { %4023 = vmatpush3.msra.mxu1 %v2457_v33  ;;  %v2403_v48 = vsel %vm803_vm4, %v5278_v55, 0.0 }
 0x9e3   : > { %2404 = vadd.xlane.f32.xlu1 %v2403_v48  ;;  %4024 = vmatprep.subr.mxu1 %v4344_v4 }
 0x9e5   : > { %v5284_v63 = vpop.eup %4275 }
 0x9e6   : > { %v2406_v60 = vsel %vm803_vm4, %v5284_v63, 0.0 }
 0x9e9   : > { %v5286_v30 = vpop.eup %4277 }
 0x9ea   : > { %v2409_v34 = vsel %vm803_vm4, %v5286_v30, 0.0 }
 0x9eb   : > { %2410 = vadd.xlane.f32.xlu1 %v2409_v34 }
 0x9ed   : > { %v5292_v42 = vpop.eup %4279  ;;  %2407 = vadd.xlane.f32.xlu0 %v2406_v60 }
 0x9ee   : > { %v2412_v56 = vsel %vm803_vm4, %v5292_v42, 0.0 }
 0x9ef   : > { %v2172_v46 = vpop.f32.mrf.mxu1 }
 0x9f0   : > { %v5295_v50 = vadd.f32 %v2172_v46, %v5070_v3 }
 0x9f1   : > { %2413 = vadd.xlane.f32.xlu0 %v2412_v56  ;;  %v3975_v53 = vpop.f32.mrf.mxu1 }
 0x9f3   : > { %v2177_v36 = vpop.f32.mrf.mxu1 }
 0x9f4   : > { %v5300_v38 = vadd.f32 %v2177_v36, %v5073_v6 }
 0x9f5   : > { %v3978_v47 = vpop.f32.mrf.mxu1 }
 0x9f7   : > { %v2182_v8 = vpop.f32.mrf.mxu1 }
 0x9f8   : > { %v5303_v37 = vadd.f32 %v2182_v8, %v5089_v7 }
 0x9f9   : > { %v3981_v39 = vpop.f32.mrf.mxu1 }
 0x9ff   : > { %v2187_v41 = vpop.f32.mrf.mxu1 }
 0xa00   : > { %v5306_v10 = vadd.f32 %v2187_v41, %v5094_v16 }
 0xa01   : > { %v3984_v3 = vpop.f32.mrf.mxu1 }
 0xa0c   : > { %v2375_v43 = vpop.xlane.xlu0 %2374 }
 0xa0d   : > { %v2386_v44 = vsub.f32 %v5250_v35, %v2375_v43 }
 0xa0f   : > { %v2397_v59 = vmul.f32 1.442695, %v2386_v44 }
 0xa10   : > { %v2378_v12 = vpop.xlane.xlu1 %2377  ;;  %v2453_v7 = vpop.permute.xlu0 %2452 }
 0xa11   : > { %4281 = vpow2.f32 %v2397_v59  ;;  %v2387_v6 = vsub.f32 %v5252_v2, %v2378_v12 }
 0xa13   : > { %v2399_v61 = vmul.f32 1.442695, %v2387_v6  ;;  %v4329_v6 = vld [vmem:[%s4488_s18] sm:$0xff] }
 0xa14   : > { %v2455_v62 = vpop.permute.xlu1 %2454 }
 0xa15   : > { %4283 = vpow2.f32 %v2399_v61  ;;  %4025 = vmatpush3.msra.mxu1 %v2455_v62 }
 0xa16   : > { %4026 = vmatprep.subr.mxu1 %v4344_v4 }
 0xa17   : > { %4027 = vmatpush3.msra.mxu1 %v2453_v7 }
 0xa18   : > { %4028 = vmatprep.subr.mxu1 %v4344_v4 }
 0xa1e   : > { %v4282_v16 = vpop.eup %4281 }
 0xa1f   : > { %v2415_v28 = vsel %vm803_vm4, %v4282_v16, 0.0 }
 0xa20   : > { %2416 = vadd.xlane.f32.xlu0 %v2415_v28 }
 0xa22   : > { %v4284_v26 = vpop.eup %4283 }
 0xa23   : > { %v2418_v1 = vsel %vm803_vm4, %v4284_v26, 0.0 }
 0xa24   : > { %2419 = vadd.xlane.f32.xlu1 %v2418_v1 }
 0xa35   : > { %2448 = vrot.lane.b32.xlu1 %v4565_v57, %s4352_s23 }
 0xa41   : > { %v2381_v35 = vpop.xlane.xlu0 %2380 }
 0xa42   : > { %v2388_v2 = vsub.f32 %v5262_v49, %v2381_v35 }
 0xa44   : > { %v2401_v5 = vmul.f32 1.442695, %v2388_v2 }
 0xa45   : > { %v2451_v0 = vpop.permute.xlu0 %2450 }
 0xa46   : > { %4285 = vpow2.f32 %v2401_v5  ;;  %4029 = vmatpush3.msra.mxu1 %v2451_v0  ;;  %v4331_v0 = vld [vmem:[%s4488_s18 + $0x10] sm:$0xff] }
 0xa47   : > { %4030 = vmatprep.subr.mxu1 %v4344_v4 }
 0xa53   : > { %v4286_v51 = vpop.eup %4285 }
 0xa54   : > { %v2421_v13 = vsel %vm822_vm5, %v4286_v51, 0.0 }
 0xa55   : > { %2422 = vadd.xlane.f32.xlu0 %v2421_v13 }
 0xa6b   : > { %2446 = vrot.lane.b32.xlu0 %v4569_v58, %s4352_s23  ;;  %v2589_v58 = vld [vmem:[%s5683_s3 + $0x30] sm:$0xff] }
 0xa6c   : > { %v2405_v17 = vpop.xlane.xlu1 %2404  ;;  %4058 = vmatpush3.msra.mxu0 %v2589_v58  ;;  %v4333_v58 = vld [vmem:[%s4488_s18 + $0x20] sm:$0xff] }
 0xa6d   : > { %4287 = vrcp.f32 %v2405_v17  ;;  %4117 = vmatprep.subr.mxu0 %v4344_v4 }
 0xa74   : > { %v2411_v57 = vpop.xlane.xlu1 %2410 }
 0xa75   : > { %4289 = vrcp.f32 %v2411_v57 }
 0xa76   : > { %v2408_v18 = vpop.xlane.xlu0 %2407 }
 0xa77   : > { %4291 = vrcp.f32 %v2408_v18  ;;  %v4332_v18 = vld [vmem:[%s4488_s18 + $0x18] sm:$0xff] }
 0xa7a   : > { %v4288_v49 = vpop.eup %4287  ;;  %v2414_v14 = vpop.xlane.xlu0 %2413 }
 0xa7b   : > { %v2431_v52 = vmul.f32 %v4288_v49, %v5278_v55  ;;  %4293 = vrcp.f32 %v2414_v14 }
 0xa7d   : > { %3478 = vst.msk [vmem:[%s4700_s19 + $0xa8] sm:$0xff] %vm803_vm4, %v2431_v52 }
 0xa82   : > { %v4290_v15 = vpop.eup %4289 }
 0xa83   : > { %v2433_v22 = vmul.f32 %v4290_v15, %v5286_v30 }
 0xa84   : > { %v4292_v24 = vpop.eup %4291 }
 0xa85   : > { %v2432_v25 = vmul.f32 %v4292_v24, %v5284_v63  ;;  %3480 = vst.msk [vmem:[%s4700_s19 + $0xb8] sm:$0xff] %vm803_vm4, %v2433_v22 }
 0xa87   : > { %3479 = vst.msk [vmem:[%s4700_s19 + $0xb0] sm:$0xff] %vm803_vm4, %v2432_v25 }
 0xa88   : > { %v4294_v45 = vpop.eup %4293 }
 0xa89   : > { %v2434_v9 = vmul.f32 %v4294_v45, %v5292_v42  ;;  %v4334_v45 = vld [vmem:[%s4488_s18 + $0x28] sm:$0xff] }
 0xa8b   : > { %3481 = vst.msk [vmem:[%s4700_s19 + $0xc0] sm:$0xff] %vm803_vm4, %v2434_v9 }
 0xaa9   : > { %v2417_v27 = vpop.xlane.xlu0 %2416 }
 0xaaa   : > { %4295 = vrcp.f32 %v2417_v27 }
 0xaad   : > { %v2420_v29 = vpop.xlane.xlu1 %2419 }
 0xaae   : > { %4297 = vrcp.f32 %v2420_v29 }
 0xab1   : > { %v2449_v19 = vpop.permute.xlu1 %2448 }
 0xab2   : > { %4031 = vmatpush3.msra.mxu1 %v2449_v19 }
 0xab3   : > { %4032 = vmatprep.subr.mxu1 %v4344_v4 }
 0xab7   : > { %v4296_v31 = vpop.eup %4295 }
 0xab8   : > { %v2435_v32 = vmul.f32 %v4296_v31, %v4282_v16  ;;  %v4335_v31 = vld [vmem:[%s4488_s18 + $0x30] sm:$0x1] }
 0xaba   : > { %3482 = vst.msk [vmem:[%s4700_s19 + $0xc8] sm:$0xff] %vm803_vm4, %v2435_v32 }
 0xabb   : > { %v4298_v23 = vpop.eup %4297 }
 0xabc   : > { %v2436_v40 = vmul.f32 %v4298_v23, %v4284_v26  ;;  %v4330_v26 = vld [vmem:[%s4488_s18 + $0x8] sm:$0xff] }
 0xabe   : > { %3483 = vst.msk [vmem:[%s4700_s19 + $0xd0] sm:$0xff] %vm803_vm4, %v2436_v40 }
 0xade   : > { %v2423_v55 = vpop.xlane.xlu0 %2422 }
 0xadf   : > { %4299 = vrcp.f32 %v2423_v55 }
 0xae2   : > { %v2447_v33 = vpop.permute.xlu0 %2446 }
 0xae3   : > { %4033 = vmatpush3.msra.mxu1 %v2447_v33 }
 0xae4   : > { %4035 = vmatmul.mubr.msk.f32.vlgmr.msra.gmra.mxu1 %vm803_vm4, %v2431_v52  ;;  %4080 = vmatprep.subr.mxu1 %v4344_v4 }
 0xae5   : > { %4037 = vmatprep.mubr.msk.f32.mxu1 %vm4346_vm2, %v4344_v4 }
 0xae8   : > { %4038 = vmatmul.mubr.msk.f32.gmra.mxu1 %vm803_vm4, %v2432_v25 }
 0xae9   : > { %4040 = vmatprep.mubr.msk.f32.mxu1 %vm4346_vm2, %v4344_v4 }
 0xaec   : > { %v4300_v48 = vpop.eup %4299  ;;  %4041 = vmatmul.mubr.msk.f32.gmra.mxu1 %vm803_vm4, %v2433_v22 }
 0xaed   : > { %4043 = vmatprep.mubr.msk.f32.mxu1 %vm4346_vm2, %v4344_v4  ;;  %v2437_v63 = vmul.f32 %v4300_v48, %v4286_v51 }
 0xaef   : > { %3484 = vst.msk [vmem:[%s4700_s19 + $0xd8] sm:$0x1] %vm822_vm5, %v2437_v63 }
 0xaf0   : > { %4044 = vmatmul.mubr.msk.f32.gmra.mxu1 %vm803_vm4, %v2434_v9 }
 0xaf1   : > { %4046 = vmatprep.mubr.msk.f32.mxu1 %vm4346_vm2, %v4344_v4 }
 0xaf4   : > { %4047 = vmatmul.mubr.msk.f32.gmra.mxu1 %vm803_vm4, %v2435_v32 }
 0xaf5   : > { %4049 = vmatprep.mubr.msk.f32.mxu1 %vm4346_vm2, %v4344_v4 }
 0xaf8   : > { %4050 = vmatmul.mubr.msk.f32.gmra.mxu1 %vm803_vm4, %v2436_v40 }
 0xaf9   : > { %4052 = vmatprep.mubr.msk.f32.mxu1 %vm4346_vm2, %v4344_v4 }
 0xafc   : > { %4053 = vmatmul.mubr.msk.f32.gmra.mxu1 %vm803_vm4, %v2437_v63 }
 0xafd   : > { %4096 = vmatprep.mubr.msk.f32.mxu1 %vm4346_vm2, %v4344_v4 }
 0xba4   : > { %v2555_v30 = vpop.f32.mrf.mxu1 }
 0xba5   : > { %4060 = vmatmul.mubr.msk.f32.vlgmr.msra.gmra.mxu0 %vm667_vm3, %v2555_v30 }
 0xba6   : > { %v4036_v34 = vpop.f32.mrf.mxu1  ;;  %4062 = vmatprep.mubr.msk.f32.mxu0 %vm4346_vm2, %v4344_v4 }
 0xba8   : > { %v2560_v60 = vpop.f32.mrf.mxu1 }
 0xba9   : > { %4063 = vmatmul.mubr.msk.f32.gmra.mxu0 %vm667_vm3, %v2560_v60 }
 0xbaa   : > { %v4039_v42 = vpop.f32.mrf.mxu1  ;;  %4065 = vmatprep.mubr.msk.f32.mxu0 %vm4346_vm2, %v4344_v4 }
 0xbac   : > { %v2565_v46 = vpop.f32.mrf.mxu1 }
 0xbad   : > { %4066 = vmatmul.mubr.msk.f32.gmra.mxu0 %vm667_vm3, %v2565_v46 }
 0xbae   : > { %v4042_v56 = vpop.f32.mrf.mxu1  ;;  %4068 = vmatprep.mubr.msk.f32.mxu0 %vm4346_vm2, %v4344_v4 }
 0xbb0   : > { %v2570_v53 = vpop.f32.mrf.mxu1 }
 0xbb1   : > { %4069 = vmatmul.mubr.msk.f32.gmra.mxu0 %vm667_vm3, %v2570_v53 }
 0xbb2   : > { %v4045_v36 = vpop.f32.mrf.mxu1  ;;  %4071 = vmatprep.mubr.msk.f32.mxu0 %vm4346_vm2, %v4344_v4 }
 0xbb4   : > { %v2575_v47 = vpop.f32.mrf.mxu1 }
 0xbb5   : > { %4072 = vmatmul.mubr.msk.f32.gmra.mxu0 %vm667_vm3, %v2575_v47 }
 0xbb6   : > { %v4048_v8 = vpop.f32.mrf.mxu1  ;;  %4074 = vmatprep.mubr.msk.f32.mxu0 %vm4346_vm2, %v4344_v4 }
 0xbb8   : > { %v2580_v39 = vpop.f32.mrf.mxu1 }
 0xbb9   : > { %4075 = vmatmul.mubr.msk.f32.gmra.mxu0 %vm667_vm3, %v2580_v39 }
 0xbba   : > { %v4051_v41 = vpop.f32.mrf.mxu1  ;;  %4077 = vmatprep.mubr.msk.f32.mxu0 %vm4346_vm2, %v4344_v4 }
 0xbbc   : > { %v2585_v3 = vpop.f32.mrf.mxu1 }
 0xbbd   : > { %4078 = vmatmul.mubr.msk.f32.gmra.mxu0 %vm667_vm3, %v2585_v3 }
 0xbbe   : > { %v4054_v43 = vpop.f32.mrf.mxu1  ;;  %4133 = vmatprep.mubr.msk.f32.mxu0 %vm4346_vm2, %v4344_v4 }
 0xc65   : > { %v2678_v44 = vpop.f32.mrf.mxu0 }
 0xc66   : > { %v2712_v59 = vadd.f32 %v2678_v44, %v5265_v11 }
 0xc67   : > { %v4061_v12 = vpop.f32.mrf.mxu0 }
 0xc68   : > { %v2719_v61 = vadd.f32 %v4329_v6, %v2712_v59 }
 0xc69   : > { %v2683_v62 = vpop.f32.mrf.mxu0 }
 0xc6a   : > { %v2713_v7 = vadd.f32 %v2683_v62, %v5270_v20  ;;  %v2726_v16 = vsel %vm516_vm0, %v2719_v61, 0.0 }
 0xc6b   : > { %2727 = vadd.xlane.f32.xlu1 %v2726_v16  ;;  %v4064_v28 = vpop.f32.mrf.mxu0 }
 0xc6c   : > { %v2720_v1 = vadd.f32 %v4330_v26, %v2713_v7 }
 0xc6d   : > { %v2688_v35 = vpop.f32.mrf.mxu0 }
 0xc6e   : > { %v2714_v2 = vadd.f32 %v2688_v35, %v5273_v21  ;;  %v2729_v5 = vsel %vm516_vm0, %v2720_v1, 0.0 }
 0xc6f   : > { %2730 = vadd.xlane.f32.xlu0 %v2729_v5  ;;  %v4067_v11 = vpop.f32.mrf.mxu0 }
 0xc70   : > { %v2721_v51 = vadd.f32 %v4331_v0, %v2714_v2  ;;  %v2853_v11 = vld [vmem:[%s5687_s7 + $0x30] sm:$0xff] }
 0xc71   : > { %v2693_v13 = vpop.f32.mrf.mxu0 }
 0xc72   : > { %v2715_v20 = vadd.f32 %v2693_v13, %v5295_v50  ;;  %v2732_v17 = vsel %vm516_vm0, %v2721_v51, 0.0  ;;  %v2851_v13 = vld [vmem:[%s5687_s7 + $0x20] sm:$0xff] }
 0xc73   : > { %2733 = vadd.xlane.f32.xlu1 %v2732_v17  ;;  %v4070_v57 = vpop.f32.mrf.mxu0  ;;  %v2849_v17 = vld [vmem:[%s5687_s7 + $0x10] sm:$0xff] }
 0xc74   : > { %v2722_v49 = vadd.f32 %v4332_v18, %v2715_v20  ;;  %v2850_v20 = vld [vmem:[%s5687_s7 + $0x18] sm:$0xff]  ;;  %v2848_v57 = vld [vmem:[%s5687_s7 + $0x8] sm:$0xff]  ;;  %v2847_v18 = vld [vmem:[%s5687_s7] sm:$0xff] }
 0xc75   : > { %v2698_v14 = vpop.f32.mrf.mxu0 }
 0xc76   : > { %v2716_v21 = vadd.f32 %v2698_v14, %v5300_v38  ;;  %v2735_v52 = vsel %vm516_vm0, %v2722_v49, 0.0  ;;  %v2996_v14 = vld [vmem:[%s5689_s9 + $0x30] sm:$0xff] }
 0xc77   : > { %2736 = vadd.xlane.f32.xlu1 %v2735_v52  ;;  %v4073_v54 = vpop.f32.mrf.mxu0  ;;  %v2994_v52 = vld [vmem:[%s5689_s9 + $0x20] sm:$0xff] }
 0xc78   : > { %v2723_v15 = vadd.f32 %v4333_v58, %v2716_v21  ;;  %v2995_v21 = vld [vmem:[%s5689_s9 + $0x28] sm:$0xff]  ;;  %v5497_v54 = vld [vmem:[%s5689_s9 + $0x18] sm:$0xff] }
 0xc79   : > { %v2703_v22 = vpop.f32.mrf.mxu0 }
 0xc7a   : > { %v2717_v50 = vadd.f32 %v2703_v22, %v5303_v37  ;;  %v2738_v24 = vsel %vm516_vm0, %v2723_v15, 0.0  ;;  %v2854_v37 = vld [vmem:[%s5687_s7 + $0x38] sm:$0xff] }
 0xc7b   : > { %2739 = vadd.xlane.f32.xlu1 %v2738_v24  ;;  %v4076_v25 = vpop.f32.mrf.mxu0  ;;  %4081 = vmatpush3.msra.mxu1 %v2854_v37  ;;  %v3500_v37 = vld [vmem:[%s5685_s5] ss:$0 sm:$0xff] }
 0xc7c   : > { %v2724_v9 = vadd.f32 %v4334_v45, %v2717_v50  ;;  %4082 = vmatprep.subr.mxu1 %v4344_v4 }
 0xc7d   : > { %v2708_v27 = vpop.f32.mrf.mxu0  ;;  %4083 = vmatpush3.msra.mxu1 %v2853_v11 }
 0xc7e   : > { %v2718_v29 = vadd.f32 %v2708_v27, %v5306_v10  ;;  %v2741_v38 = vsel %vm516_vm0, %v2724_v9, 0.0  ;;  %4084 = vmatprep.subr.mxu1 %v4344_v4 }
 0xc7f   : > { %2742 = vadd.xlane.f32.xlu0 %v2741_v38  ;;  %v4079_v19 = vpop.f32.mrf.mxu0 }
 0xc80   : > { %v2725_v32 = vadd.f32 %v4335_v31, %v2718_v29 }
 0xc82   : > { %v2745_v23 = vsel %vm2744_vm6, %v2725_v32, 0.0 }
 0xc83   : > { %2746 = vadd.xlane.f32.xlu1 %v2745_v23 }
 0xcf4   : > { %v2728_v40 = vpop.xlane.xlu1 %2727 }
 0xcf5   : > { %v2749_v55 = vmul.f32 0.015625, %v2728_v40 }
 0xcf7   : > { %v5416_v10 = vsub.f32 %v2719_v61, %v2749_v55 }
 0xcf8   : > { %v2731_v33 = vpop.xlane.xlu0 %2730 }
 0xcf9   : > { %v2750_v48 = vmul.f32 0.015625, %v2731_v33  ;;  %v2763_v63 = vmul.f32 %v5416_v10, %v5416_v10 }
 0xcfb   : > { %v5420_v30 = vsub.f32 %v2720_v1, %v2750_v48  ;;  %v2770_v34 = vsel %vm516_vm0, %v2763_v63, 0.0  ;;  %v3501_v48 = vld [vmem:[%s5686_s6] ss:$0 sm:$0xff] }
 0xcfc   : > { %v2734_v60 = vpop.xlane.xlu1 %2733  ;;  %2771 = vadd.xlane.f32.xlu0 %v2770_v34 }
 0xcfd   : > { %v2751_v42 = vmul.f32 0.015625, %v2734_v60  ;;  %v2764_v46 = vmul.f32 %v5420_v30, %v5420_v30 }
 0xcff   : > { %v5425_v56 = vsub.f32 %v2721_v51, %v2751_v42  ;;  %v2773_v53 = vsel %vm516_vm0, %v2764_v46, 0.0  ;;  %v2852_v51 = vld [vmem:[%s5687_s7 + $0x28] sm:$0xff] }
 0xd00   : > { %v2737_v36 = vpop.xlane.xlu1 %2736  ;;  %2774 = vadd.xlane.f32.xlu1 %v2773_v53  ;;  %4085 = vmatpush3.msra.mxu1 %v2852_v51  ;;  %v2992_v51 = vld [vmem:[%s5689_s9 + $0x10] sm:$0xff] }
 0xd01   : > { %v2752_v47 = vmul.f32 0.015625, %v2737_v36  ;;  %v2765_v8 = vmul.f32 %v5425_v56, %v5425_v56  ;;  %4086 = vmatprep.subr.mxu1 %v4344_v4 }
 0xd02   : > { %4087 = vmatpush3.msra.mxu1 %v2851_v13  ;;  %v2990_v13 = vld [vmem:[%s5689_s9] sm:$0xff] }
 0xd03   : > { %v5430_v39 = vsub.f32 %v2722_v49, %v2752_v47  ;;  %v2776_v41 = vsel %vm516_vm0, %v2765_v8, 0.0  ;;  %4088 = vmatprep.subr.mxu1 %v4344_v4  ;;  %v2997_v49 = vld [vmem:[%s5689_s9 + $0x38] sm:$0xff] }
 0xd04   : > { %v2740_v3 = vpop.xlane.xlu1 %2739  ;;  %2777 = vadd.xlane.f32.xlu0 %v2776_v41  ;;  %4089 = vmatpush3.msra.mxu1 %v2850_v20  ;;  %v3502_v20 = vld [vmem:[%s5688_s8] ss:$0 sm:$0xff] }
 0xd05   : > { %v2753_v43 = vmul.f32 0.015625, %v2740_v3  ;;  %v2766_v44 = vmul.f32 %v5430_v39, %v5430_v39  ;;  %4090 = vmatprep.subr.mxu1 %v4344_v4  ;;  %4118 = vmatpush3.msra.mxu0 %v2997_v49 }
 0xd06   : > { %4091 = vmatpush3.msra.mxu1 %v2849_v17  ;;  %4119 = vmatprep.subr.mxu0 %v4344_v4 }
 0xd07   : > { %v5435_v59 = vsub.f32 %v2723_v15, %v2753_v43  ;;  %v2779_v12 = vsel %vm516_vm0, %v2766_v44, 0.0  ;;  %4092 = vmatprep.subr.mxu1 %v4344_v4  ;;  %4120 = vmatpush3.msra.mxu0 %v2996_v14 }
 0xd08   : > { %v2743_v6 = vpop.xlane.xlu0 %2742  ;;  %2780 = vadd.xlane.f32.xlu1 %v2779_v12  ;;  %4093 = vmatpush3.msra.mxu1 %v2848_v57 }
 0xd09   : > { %v2754_v61 = vmul.f32 0.015625, %v2743_v6  ;;  %v2767_v62 = vmul.f32 %v5435_v59, %v5435_v59  ;;  %4094 = vmatprep.subr.mxu1 %v4344_v4  ;;  %4121 = vmatprep.subr.mxu0 %v4344_v4 }
 0xd0a   : > { %4095 = vmatpush3.msra.mxu1 %v2847_v18  ;;  %4122 = vmatpush3.msra.mxu0 %v2995_v21 }
 0xd0b   : > { %v5440_v7 = vsub.f32 %v2724_v9, %v2754_v61  ;;  %v2782_v16 = vsel %vm516_vm0, %v2767_v62, 0.0  ;;  %4154 = vmatprep.subr.mxu1 %v4344_v4  ;;  %4123 = vmatprep.subr.mxu0 %v4344_v4 }
 0xd0c   : > { %2783 = vadd.xlane.f32.xlu0 %v2782_v16  ;;  %v2747_v28 = vpop.xlane.xlu1 %2746  ;;  %4124 = vmatpush3.msra.mxu0 %v2994_v52 }
 0xd0d   : > { %v2755_v26 = vmul.f32 0.015625, %v2747_v28  ;;  %v2768_v1 = vmul.f32 %v5440_v7, %v5440_v7  ;;  %4125 = vmatprep.subr.mxu0 %v4344_v4 }
 0xd0e   : > { %4126 = vmatpush3.msra.mxu0 %v5497_v54 }
 0xd0f   : > { %v5445_v35 = vsub.f32 %v2725_v32, %v2755_v26  ;;  %v2785_v2 = vsel %vm516_vm0, %v2768_v1, 0.0  ;;  %4127 = vmatprep.subr.mxu0 %v4344_v4 }
 0xd10   : > { %2786 = vadd.xlane.f32.xlu1 %v2785_v2  ;;  %4128 = vmatpush3.msra.mxu0 %v2992_v51 }
 0xd11   : > { %v2769_v5 = vmul.f32 %v5445_v35, %v5445_v35  ;;  %4129 = vmatprep.subr.mxu0 %v4344_v4 }
 0xd13   : > { %v2788_v0 = vsel %vm2744_vm6, %v2769_v5, 0.0 }
 0xd14   : > { %2789 = vadd.xlane.f32.xlu0 %v2788_v0 }
 0xd85   : > { %v2772_v58 = vpop.xlane.xlu0 %2771 }
 0xd86   : > { %v2791_v15 = vmul.f32 0.015625, %v2772_v58 }
 0xd88   : > { %v2798_v22 = vadd.f32 1e-05, %v2791_v15 }
 0xd89   : > { %v2775_v50 = vpop.xlane.xlu1 %2774 }
 0xd8a   : > { %4301 = vrsqrt.f32 %v2798_v22  ;;  %v2792_v24 = vmul.f32 0.015625, %v2775_v50 }
 0xd8c   : > { %v2799_v25 = vadd.f32 1e-05, %v2792_v24 }
 0xd8d   : > { %v2778_v45 = vpop.xlane.xlu0 %2777 }
 0xd8e   : > { %4303 = vrsqrt.f32 %v2799_v25  ;;  %v2793_v9 = vmul.f32 0.015625, %v2778_v45 }
 0xd90   : > { %v2800_v27 = vadd.f32 1e-05, %v2793_v9 }
 0xd91   : > { %v2781_v29 = vpop.xlane.xlu1 %2780 }
 0xd92   : > { %4305 = vrsqrt.f32 %v2800_v27  ;;  %v2794_v38 = vmul.f32 0.015625, %v2781_v29 }
 0xd94   : > { %v2801_v19 = vadd.f32 1e-05, %v2794_v38 }
 0xd95   : > { %v2784_v31 = vpop.xlane.xlu0 %2783 }
 0xd96   : > { %4307 = vrsqrt.f32 %v2801_v19  ;;  %v2795_v32 = vmul.f32 0.015625, %v2784_v31 }
 0xd97   : > { %v4302_v23 = vpop.eup %4301 }
 0xd98   : > { %v2812_v40 = vmul.f32 %v4302_v23, %v5416_v10  ;;  %v2802_v55 = vadd.f32 1e-05, %v2795_v32 }
 0xd99   : > { %v2787_v33 = vpop.xlane.xlu1 %2786 }
 0xd9a   : > { %v2826_v63 = vmul.f32 %v3500_v37, %v2812_v40  ;;  %4309 = vrsqrt.f32 %v2802_v55  ;;  %v2796_v34 = vmul.f32 0.015625, %v2787_v33 }
 0xd9b   : > { %v4304_v60 = vpop.eup %4303 }
 0xd9c   : > { %v2803_v42 = vadd.f32 1e-05, %v2796_v34  ;;  %v5509_v46 = vadd.f32 %v3501_v48, %v2826_v63  ;;  %v2813_v53 = vmul.f32 %v4304_v60, %v5420_v30  ;;  %v3510_v63 = vld [vmem:[%s5690_s10] ss:$0 sm:$0xff] }
 0xd9d   : > { %v2790_v36 = vpop.xlane.xlu0 %2789 }
 0xd9e   : > { %4311 = vrsqrt.f32 %v2803_v42  ;;  %v2797_v47 = vmul.f32 0.015625, %v2790_v36  ;;  %4097 = vmatmul.mubr.msk.f32.vlgmr.msra.gmra.mxu1 %vm516_vm0, %v5509_v46  ;;  %v2827_v10 = vmul.f32 %v3500_v37, %v2813_v53 }
 0xd9f   : > { %v4306_v8 = vpop.eup %4305  ;;  %4099 = vmatprep.mubr.msk.f32.mxu1 %vm4346_vm2, %v4344_v4  ;;  %4162 = vmatpush3.msra.mxu1 %v2997_v49 }
 0xda0   : > { %v2804_v41 = vadd.f32 1e-05, %v2797_v47  ;;  %v5516_v3 = vadd.f32 %v3501_v48, %v2827_v10  ;;  %v2814_v43 = vmul.f32 %v4306_v8, %v5425_v56  ;;  %4155 = vmatprep.subr.mxu1 %v4344_v4 }
 0xda1   : > { %4163 = vmatpush3.msra.mxu1 %v2996_v14 }
 0xda2   : > { %4313 = vrsqrt.f32 %v2804_v41  ;;  %4100 = vmatmul.mubr.msk.f32.gmra.mxu1 %vm516_vm0, %v5516_v3  ;;  %v2828_v30 = vmul.f32 %v3500_v37, %v2814_v43  ;;  %4156 = vmatprep.subr.mxu1 %v4344_v4 }
 0xda3   : > { %v4308_v44 = vpop.eup %4307  ;;  %4102 = vmatprep.mubr.msk.f32.mxu1 %vm4346_vm2, %v4344_v4  ;;  %4164 = vmatpush3.msra.mxu1 %v2995_v21 }
 0xda4   : > { %v5525_v12 = vadd.f32 %v3501_v48, %v2828_v30  ;;  %v2815_v6 = vmul.f32 %v4308_v44, %v5430_v39  ;;  %4157 = vmatprep.subr.mxu1 %v4344_v4 }
 0xda5   : > { %4165 = vmatpush3.msra.mxu1 %v2994_v52 }
 0xda6   : > { %4103 = vmatmul.mubr.msk.f32.gmra.mxu1 %vm516_vm0, %v5525_v12  ;;  %v2829_v56 = vmul.f32 %v3500_v37, %v2815_v6  ;;  %4158 = vmatprep.subr.mxu1 %v4344_v4 }
 0xda7   : > { %v4310_v61 = vpop.eup %4309  ;;  %4105 = vmatprep.mubr.msk.f32.mxu1 %vm4346_vm2, %v4344_v4  ;;  %4166 = vmatpush3.msra.mxu1 %v5497_v54 }
 0xda8   : > { %v5535_v62 = vadd.f32 %v3501_v48, %v2829_v56  ;;  %v2816_v16 = vmul.f32 %v4310_v61, %v5435_v59  ;;  %4159 = vmatprep.subr.mxu1 %v4344_v4 }
 0xda9   : > { %4167 = vmatpush3.msra.mxu1 %v2992_v51 }
 0xdaa   : > { %4106 = vmatmul.mubr.msk.f32.gmra.mxu1 %vm516_vm0, %v5535_v62  ;;  %v2830_v39 = vmul.f32 %v3500_v37, %v2816_v16  ;;  %4160 = vmatprep.subr.mxu1 %v4344_v4 }
 0xdab   : > { %v4312_v28 = vpop.eup %4311  ;;  %4108 = vmatprep.mubr.msk.f32.mxu1 %vm4346_vm2, %v4344_v4 }
 0xdac   : > { %v5543_v26 = vadd.f32 %v3501_v48, %v2830_v39  ;;  %v2817_v1 = vmul.f32 %v4312_v28, %v5440_v7 }
 0xdae   : > { %4109 = vmatmul.mubr.msk.f32.gmra.mxu1 %vm516_vm0, %v5543_v26  ;;  %v2831_v2 = vmul.f32 %v3500_v37, %v2817_v1 }
 0xdaf   : > { %v4314_v5 = vpop.eup %4313  ;;  %4111 = vmatprep.mubr.msk.f32.mxu1 %vm4346_vm2, %v4344_v4 }
 0xdb0   : > { %v5550_v59 = vadd.f32 %v3501_v48, %v2831_v2  ;;  %v2818_v11 = vmul.f32 %v4314_v5, %v5445_v35  ;;  %v2991_v35 = vld [vmem:[%s5689_s9 + $0x8] sm:$0xff] }
 0xdb1   : > { %4130 = vmatpush3.msra.mxu0 %v2991_v35  ;;  %4168 = vmatpush3.msra.mxu1 %v2991_v35 }
 0xdb2   : > { %4112 = vmatmul.mubr.msk.f32.gmra.mxu1 %vm516_vm0, %v5550_v59  ;;  %v2832_v0 = vmul.f32 %v3500_v37, %v2818_v11  ;;  %4131 = vmatprep.subr.mxu0 %v4344_v4 }
 0xdb3   : > { %4114 = vmatprep.mubr.msk.f32.mxu1 %vm4346_vm2, %v4344_v4  ;;  %4161 = vmatprep.subr.mxu1 %v4344_v4 }
 0xdb4   : > { %v5557_v7 = vadd.f32 %v3501_v48, %v2832_v0  ;;  %4132 = vmatpush3.msra.mxu0 %v2990_v13  ;;  %4169 = vmatpush3.msra.mxu1 %v2990_v13 }
 0xdb6   : > { %4115 = vmatmul.mubr.msk.f32.gmra.mxu1 %vm516_vm0, %v5557_v7 }
 0xdb7   : > { %4148 = vmatprep.mubr.msk.f32.mxu1 %vm4346_vm2, %v4344_v4 }
 0xe5e   : > { %v2949_v17 = vpop.f32.mrf.mxu1 }
 0xe5f   : > { %v2950_v57 = vadd.f32 %v3502_v20, %v2949_v17 }
 0xe60   : > { %v4098_v18 = vpop.f32.mrf.mxu1 }
 0xe61   : > { %v2983_v49 = vmax.f32 %v2950_v57, 0.0 }
 0xe62   : > { %v2954_v14 = vpop.f32.mrf.mxu1 }
 0xe63   : > { %v2955_v21 = vadd.f32 %v3502_v20, %v2954_v14  ;;  %4134 = vmatmul.mubr.msk.f32.vlgmr.msra.gmra.mxu0 %vm516_vm0, %v2983_v49 }
 0xe64   : > { %v4101_v52 = vpop.f32.mrf.mxu1  ;;  %4136 = vmatprep.mubr.msk.f32.mxu0 %vm4346_vm2, %v4344_v4 }
 0xe65   : > { %v2984_v54 = vmax.f32 %v2955_v21, 0.0 }
 0xe66   : > { %v2959_v58 = vpop.f32.mrf.mxu1 }
 0xe67   : > { %v2960_v15 = vadd.f32 %v3502_v20, %v2959_v58  ;;  %4137 = vmatmul.mubr.msk.f32.gmra.mxu0 %vm516_vm0, %v2984_v54 }
 0xe68   : > { %v4104_v22 = vpop.f32.mrf.mxu1  ;;  %4139 = vmatprep.mubr.msk.f32.mxu0 %vm4346_vm2, %v4344_v4 }
 0xe69   : > { %v2985_v50 = vmax.f32 %v2960_v15, 0.0 }
 0xe6a   : > { %v2964_v24 = vpop.f32.mrf.mxu1 }
 0xe6b   : > { %v2965_v25 = vadd.f32 %v3502_v20, %v2964_v24  ;;  %4140 = vmatmul.mubr.msk.f32.gmra.mxu0 %vm516_vm0, %v2985_v50 }
 0xe6c   : > { %v4107_v45 = vpop.f32.mrf.mxu1  ;;  %4142 = vmatprep.mubr.msk.f32.mxu0 %vm4346_vm2, %v4344_v4 }
 0xe6d   : > { %v2986_v9 = vmax.f32 %v2965_v25, 0.0 }
 0xe6e   : > { %v2969_v27 = vpop.f32.mrf.mxu1 }
 0xe6f   : > { %v2970_v29 = vadd.f32 %v3502_v20, %v2969_v27  ;;  %4143 = vmatmul.mubr.msk.f32.gmra.mxu0 %vm516_vm0, %v2986_v9 }
 0xe70   : > { %v4110_v38 = vpop.f32.mrf.mxu1  ;;  %4145 = vmatprep.mubr.msk.f32.mxu0 %vm4346_vm2, %v4344_v4 }
 0xe71   : > { %v2987_v19 = vmax.f32 %v2970_v29, 0.0 }
 0xe72   : > { %v2974_v31 = vpop.f32.mrf.mxu1 }
 0xe73   : > { %v2975_v32 = vadd.f32 %v3502_v20, %v2974_v31  ;;  %4146 = vmatmul.mubr.msk.f32.gmra.mxu0 %vm516_vm0, %v2987_v19 }
 0xe74   : > { %v4113_v23 = vpop.f32.mrf.mxu1 }
 0xe75   : > { %v2988_v37 = vmax.f32 %v2975_v32, 0.0 }
 0xe76   : > { %v2979_v40 = vpop.f32.mrf.mxu1 }
 0xe77   : > { %v2980_v55 = vadd.f32 %v3502_v20, %v2979_v40  ;;  %4149 = vmatmul.mubr.msk.f32.vlgmr.msra.gmra.mxu1 %vm516_vm0, %v2988_v37 }
 0xe78   : > { %v4116_v33 = vpop.f32.mrf.mxu1  ;;  %4151 = vmatprep.mubr.msk.f32.mxu1 %vm4346_vm2, %v4344_v4 }
 0xe79   : > { %v2989_v48 = vmax.f32 %v2980_v55, 0.0 }
 0xe7b   : > { %4152 = vmatmul.mubr.msk.f32.gmra.mxu1 %vm516_vm0, %v2989_v48 }
 0xf23   : > { %v3092_v34 = vpop.f32.mrf.mxu0 }
 0xf24   : > { %v3093_v60 = vadd.f32 %v3510_v63, %v3092_v34 }
 0xf25   : > { %v4135_v42 = vpop.f32.mrf.mxu0 }
 0xf26   : > { %v3126_v53 = vadd.f32 %v3093_v60, %v5509_v46 }
 0xf27   : > { %v3097_v36 = vpop.f32.mrf.mxu0 }
 0xf28   : > { %v3098_v47 = vadd.f32 %v3510_v63, %v3097_v36  ;;  %v3133_v10 = vsel %vm516_vm0, %v3126_v53, 0.0 }
 0xf29   : > { %3134 = vadd.xlane.f32.xlu1 %v3133_v10  ;;  %v4138_v8 = vpop.f32.mrf.mxu0 }
 0xf2a   : > { %v3127_v4 = vadd.f32 %v3098_v47, %v5516_v3 }
 0xf2b   : > { %v3102_v41 = vpop.f32.mrf.mxu0 }
 0xf2c   : > { %v3103_v43 = vadd.f32 %v3510_v63, %v3102_v41  ;;  %v3136_v30 = vsel %vm516_vm0, %v3127_v4, 0.0 }
 0xf2d   : > { %3137 = vadd.xlane.f32.xlu0 %v3136_v30  ;;  %v4141_v44 = vpop.f32.mrf.mxu0 }
 0xf2e   : > { %v3128_v6 = vadd.f32 %v3103_v43, %v5525_v12 }
 0xf2f   : > { %v3107_v56 = vpop.f32.mrf.mxu0 }
 0xf30   : > { %v3108_v61 = vadd.f32 %v3510_v63, %v3107_v56  ;;  %v3139_v46 = vsel %vm516_vm0, %v3128_v6, 0.0 }
 0xf31   : > { %3140 = vadd.xlane.f32.xlu1 %v3139_v46  ;;  %v4144_v16 = vpop.f32.mrf.mxu0 }
 0xf32   : > { %v3129_v39 = vadd.f32 %v3108_v61, %v5535_v62 }
 0xf33   : > { %v3112_v28 = vpop.f32.mrf.mxu0 }
 0xf34   : > { %v3113_v1 = vadd.f32 %v3510_v63, %v3112_v28  ;;  %v3142_v3 = vsel %vm516_vm0, %v3129_v39, 0.0 }
 0xf35   : > { %3143 = vadd.xlane.f32.xlu0 %v3142_v3  ;;  %v4147_v2 = vpop.f32.mrf.mxu0  ;;  %v3518_v3 = vld [vmem:[%s5691_s11] ss:$0 sm:$0xff] }
 0xf36   : > { %v3130_v5 = vadd.f32 %v3113_v1, %v5543_v26 }
 0xf37   : > { %v3117_v11 = vpop.f32.mrf.mxu1 }
 0xf38   : > { %v3118_v0 = vadd.f32 %v3510_v63, %v3117_v11  ;;  %v3145_v12 = vsel %vm516_vm0, %v3130_v5, 0.0  ;;  %v3519_v11 = vld [vmem:[%s5692_s12] ss:$0 sm:$0xff] }
 0xf39   : > { %3146 = vadd.xlane.f32.xlu1 %v3145_v12  ;;  %v4150_v51 = vpop.f32.mrf.mxu1 }
 0xf3a   : > { %v3131_v35 = vadd.f32 %v3118_v0, %v5550_v59 }
 0xf3b   : > { %v3122_v13 = vpop.f32.mrf.mxu1 }
 0xf3c   : > { %v3123_v20 = vadd.f32 %v3510_v63, %v3122_v13  ;;  %v3148_v62 = vsel %vm516_vm0, %v3131_v35, 0.0 }
 0xf3d   : > { %3149 = vadd.xlane.f32.xlu0 %v3148_v62  ;;  %v4153_v17 = vpop.f32.mrf.mxu1 }
 0xf3e   : > { %v3132_v57 = vadd.f32 %v3123_v20, %v5557_v7 }
 0xf40   : > { %v3151_v18 = vsel %vm2744_vm6, %v3132_v57, 0.0 }
 0xf41   : > { %3152 = vadd.xlane.f32.xlu1 %v3151_v18 }
 0xfb2   : > { %v3135_v26 = vpop.xlane.xlu1 %3134 }
 0xfb3   : > { %v3154_v49 = vmul.f32 0.015625, %v3135_v26 }
 0xfb5   : > { %v3161_v14 = vsub.f32 %v3126_v53, %v3154_v49 }
 0xfb6   : > { %v3138_v21 = vpop.xlane.xlu0 %3137 }
 0xfb7   : > { %v3155_v52 = vmul.f32 0.015625, %v3138_v21  ;;  %v3168_v54 = vmul.f32 %v3161_v14, %v3161_v14 }
 0xfb9   : > { %v5613_v58 = vsub.f32 %v3127_v4, %v3155_v52  ;;  %v3175_v59 = vsel %vm516_vm0, %v3168_v54, 0.0 }
 0xfba   : > { %v3141_v15 = vpop.xlane.xlu1 %3140  ;;  %3176 = vadd.xlane.f32.xlu0 %v3175_v59 }
 0xfbb   : > { %v3156_v22 = vmul.f32 0.015625, %v3141_v15  ;;  %v3169_v50 = vmul.f32 %v5613_v58, %v5613_v58 }
 0xfbd   : > { %v5618_v7 = vsub.f32 %v3128_v6, %v3156_v22  ;;  %v3178_v24 = vsel %vm516_vm0, %v3169_v50, 0.0 }
 0xfbe   : > { %v3144_v25 = vpop.xlane.xlu0 %3143  ;;  %3179 = vadd.xlane.f32.xlu1 %v3178_v24 }
 0xfbf   : > { %v3157_v45 = vmul.f32 0.015625, %v3144_v25  ;;  %v3170_v9 = vmul.f32 %v5618_v7, %v5618_v7 }
 0xfc1   : > { %v5623_v27 = vsub.f32 %v3129_v39, %v3157_v45  ;;  %v3181_v29 = vsel %vm516_vm0, %v3170_v9, 0.0 }
 0xfc2   : > { %v3147_v38 = vpop.xlane.xlu1 %3146  ;;  %3182 = vadd.xlane.f32.xlu0 %v3181_v29 }
 0xfc3   : > { %v3158_v19 = vmul.f32 0.015625, %v3147_v38  ;;  %v3171_v31 = vmul.f32 %v5623_v27, %v5623_v27 }
 0xfc5   : > { %v5628_v32 = vsub.f32 %v3130_v5, %v3158_v19  ;;  %v3184_v23 = vsel %vm516_vm0, %v3171_v31, 0.0 }
 0xfc6   : > { %v3150_v37 = vpop.xlane.xlu0 %3149  ;;  %3185 = vadd.xlane.f32.xlu1 %v3184_v23 }
 0xfc7   : > { %v3159_v40 = vmul.f32 0.015625, %v3150_v37  ;;  %v3172_v55 = vmul.f32 %v5628_v32, %v5628_v32 }
 0xfc9   : > { %v5633_v33 = vsub.f32 %v3131_v35, %v3159_v40  ;;  %v3187_v48 = vsel %vm516_vm0, %v3172_v55, 0.0 }
 0xfca   : > { %3188 = vadd.xlane.f32.xlu0 %v3187_v48  ;;  %v3153_v63 = vpop.xlane.xlu1 %3152 }
 0xfcb   : > { %v3160_v34 = vmul.f32 0.015625, %v3153_v63  ;;  %v3173_v60 = vmul.f32 %v5633_v33, %v5633_v33 }
 0xfcd   : > { %v5638_v42 = vsub.f32 %v3132_v57, %v3160_v34  ;;  %v3190_v53 = vsel %vm516_vm0, %v3173_v60, 0.0 }
 0xfce   : > { %3191 = vadd.xlane.f32.xlu1 %v3190_v53 }
 0xfcf   : > { %v3174_v36 = vmul.f32 %v5638_v42, %v5638_v42 }
 0xfd1   : > { %v3193_v47 = vsel %vm2744_vm6, %v3174_v36, 0.0 }
 0xfd2   : > { %3194 = vadd.xlane.f32.xlu0 %v3193_v47 }
0x1043   : > { %v3177_v10 = vpop.xlane.xlu0 %3176 }
0x1044   : > { %v3196_v8 = vmul.f32 0.015625, %v3177_v10 }
0x1046   : > { %v3203_v4 = vadd.f32 1e-05, %v3196_v8 }
0x1047   : > { %v3180_v41 = vpop.xlane.xlu1 %3179 }
0x1048   : > { %4315 = vrsqrt.f32 %v3203_v4  ;;  %v3197_v43 = vmul.f32 0.015625, %v3180_v41 }
0x104a   : > { %v3204_v30 = vadd.f32 1e-05, %v3197_v43 }
0x104b   : > { %v3183_v44 = vpop.xlane.xlu0 %3182 }
0x104c   : > { %4317 = vrsqrt.f32 %v3204_v30  ;;  %v3198_v6 = vmul.f32 0.015625, %v3183_v44 }
0x104e   : > { %v3205_v56 = vadd.f32 1e-05, %v3198_v6 }
0x104f   : > { %v3186_v61 = vpop.xlane.xlu1 %3185 }
0x1050   : > { %4319 = vrsqrt.f32 %v3205_v56  ;;  %v3199_v46 = vmul.f32 0.015625, %v3186_v61 }
0x1052   : > { %v3206_v16 = vadd.f32 1e-05, %v3199_v46 }
0x1053   : > { %v3189_v39 = vpop.xlane.xlu0 %3188 }
0x1054   : > { %4321 = vrsqrt.f32 %v3206_v16  ;;  %v3200_v28 = vmul.f32 0.015625, %v3189_v39 }
0x1055   : > { %v4316_v1 = vpop.eup %4315 }
0x1056   : > { %v3217_v2 = vmul.f32 %v4316_v1, %v3161_v14  ;;  %v3207_v5 = vadd.f32 1e-05, %v3200_v28 }
0x1057   : > { %v3192_v0 = vpop.xlane.xlu1 %3191 }
0x1058   : > { %v3231_v12 = vmul.f32 %v3518_v3, %v3217_v2  ;;  %4323 = vrsqrt.f32 %v3207_v5  ;;  %v3201_v51 = vmul.f32 0.015625, %v3192_v0 }
0x1059   : > { %v4318_v35 = vpop.eup %4317 }
0x105a   : > { %v3245_v13 = vadd.f32 %v3519_v11, %v3231_v12  ;;  %v3218_v20 = vmul.f32 %v4318_v35, %v5613_v58  ;;  %v3208_v62 = vadd.f32 1e-05, %v3201_v51 }
0x105b   : > { %v3195_v17 = vpop.xlane.xlu0 %3194 }
0x105c   : > { %3252 = vst.msk [vmem:[%s5655_s26] sm:$0xff] %vm516_vm0, %v3245_v13  ;;  %v3232_v57 = vmul.f32 %v3518_v3, %v3218_v20  ;;  %4325 = vrsqrt.f32 %v3208_v62  ;;  %v3202_v18 = vmul.f32 0.015625, %v3195_v17 }
0x105d   : > { %v4320_v26 = vpop.eup %4319 }
0x105e   : > { %v3246_v49 = vadd.f32 %v3519_v11, %v3232_v57  ;;  %v3219_v14 = vmul.f32 %v4320_v26, %v5618_v7  ;;  %v3209_v21 = vadd.f32 1e-05, %v3202_v18 }
0x1060   : > { %3253 = vst.msk [vmem:[%s5655_s26 + $0x8] sm:$0xff] %vm516_vm0, %v3246_v49  ;;  %v3233_v52 = vmul.f32 %v3518_v3, %v3219_v14  ;;  %4327 = vrsqrt.f32 %v3209_v21 }
0x1061   : > { %v4322_v54 = vpop.eup %4321 }
0x1062   : > { %v3247_v58 = vadd.f32 %v3519_v11, %v3233_v52  ;;  %v3220_v59 = vmul.f32 %v4322_v54, %v5623_v27 }
0x1064   : > { %3254 = vst.msk [vmem:[%s5655_s26 + $0x10] sm:$0xff] %vm516_vm0, %v3247_v58  ;;  %v3234_v15 = vmul.f32 %v3518_v3, %v3220_v59 }
0x1065   : > { %v4324_v22 = vpop.eup %4323 }
0x1066   : > { %v3248_v50 = vadd.f32 %v3519_v11, %v3234_v15  ;;  %v3221_v24 = vmul.f32 %v4324_v22, %v5628_v32 }
0x1068   : > { %3255 = vst.msk [vmem:[%s5655_s26 + $0x18] sm:$0xff] %vm516_vm0, %v3248_v50  ;;  %v3235_v7 = vmul.f32 %v3518_v3, %v3221_v24 }
0x1069   : > { %v4326_v25 = vpop.eup %4325 }
0x106a   : > { %v3249_v45 = vadd.f32 %v3519_v11, %v3235_v7  ;;  %v3222_v9 = vmul.f32 %v4326_v25, %v5633_v33 }
0x106c   : > { %3256 = vst.msk [vmem:[%s5655_s26 + $0x20] sm:$0xff] %vm516_vm0, %v3249_v45  ;;  %v3236_v29 = vmul.f32 %v3518_v3, %v3222_v9 }
0x106d   : > { %v4328_v27 = vpop.eup %4327 }
0x106e   : > { %v3250_v38 = vadd.f32 %v3519_v11, %v3236_v29  ;;  %v3223_v19 = vmul.f32 %v4328_v27, %v5638_v42 }
0x1070   : > { %3257 = vst.msk [vmem:[%s5655_s26 + $0x28] sm:$0xff] %vm516_vm0, %v3250_v38  ;;  %v3237_v31 = vmul.f32 %v3518_v3, %v3223_v19 }
0x1072   : > { %v3251_v23 = vadd.f32 %v3519_v11, %v3237_v31 }
0x1074   : > { %3258 = vst.msk [vmem:[%s5655_s26 + $0x30] sm:$0x1] %vm2744_vm6, %v3251_v23 }
0x1075 PF: > { %s25_s29 = sadd.s32 1, %s4342_s29  }
0x1076   : > { %p22_p4 = scmp.ge.s32.totalorder %s25_s29, 4  }
0x1078   :  { %24 = sbr.rel (!%p22_p4) target bundleno = 1 (0x1), region = 117 }

</bundles_post_ra>
